<compile_context>
chip_gen: v7x
topology: tpu7x:2x2x1
jax: 0.10.0
libtpu: 0.0.40
codegen_flags: <defaults>
</compile_context>

<pallas_src>
import math

import jax
import jax.numpy as jnp
from jax import lax
from jax.experimental import pallas as pl
from jax.experimental.pallas import tpu as pltpu


# ----------------------------------------------------------------------------
# model config (tiny, deterministic 'b0'-style config)
# ----------------------------------------------------------------------------
IN_CHANNELS = [8, 16, 32, 64]   # c1..c4 channels
EMBED_DIM = 64                  # must equal c4 channels for the 7*E fuse concat
NUM_CLASSES = 21
NUM_HEADS = 2                   # localADeepMerge(embedding_dim, 2)
HEAD_DIM = EMBED_DIM // NUM_HEADS
STRIDES = [4, 8, 16, 32]

VMEM_LIMIT = 32 * 1024 * 1024   # explicit scoped-VMEM ceiling (safe on v5e/v6e/v7x)
MAX_ROW_TILE = 2048             # pixel-row tile cap (bf16 working set fits v7x 64 MiB)


def _bcast_spec(shape):
    """BlockSpec for a small weight that is fully resident every grid step."""
    nd = len(shape)
    return pl.BlockSpec(shape, lambda *_: (0,) * nd)


def _row_tile(n_rows, max_tile=MAX_ROW_TILE):
    """Largest divisor of n_rows that is <= max_tile and a multiple of 8, else full."""
    t = math.gcd(n_rows, max_tile)
    if t % 8 != 0:
        t = n_rows          # full extent always satisfies the (8, 128) rule
    return t


# ----------------------------------------------------------------------------
# Pallas kernel 0: fused [k|v] projection of c4 (ONCE per batch, shared by
# all three per-level kernels)
# ----------------------------------------------------------------------------
def kv_proj_call(c4_rows, wkv, bkv):
    """c4_rows: (B, Lk, C4) rows of the deepest feature map.
    Returns kv rows (B, Lk, 2E) f32 (k in lanes [:E], v in lanes [E:])."""
    B, Lk, C4 = c4_rows.shape
    E2 = wkv.shape[1]
    f32, bf16 = jnp.float32, jnp.bfloat16

    def kernel(c4_ref, w_ref, b_ref, o_ref):
        kv = jnp.dot(c4_ref[0].astype(bf16), w_ref[...],
                     preferred_element_type=f32) + b_ref[...]
        o_ref[0] = kv

    return pl.pallas_call(
        kernel,
        out_shape=jax.ShapeDtypeStruct((B, Lk, E2), f32),
        grid=(B,),
        in_specs=[
            pl.BlockSpec((1, Lk, C4), lambda b: (b, 0, 0)),
            _bcast_spec((C4, E2)),
            _bcast_spec((1, E2)),
        ],
        out_specs=pl.BlockSpec((1, Lk, E2), lambda b: (b, 0, 0)),
        compiler_params=pltpu.CompilerParams(
            dimension_semantics=("parallel",),
            vmem_limit_bytes=VMEM_LIMIT),
    )(c4_rows.astype(f32), wkv.astype(bf16), bkv.reshape(1, E2).astype(f32))


# ----------------------------------------------------------------------------
# Pallas kernel 1: fused per-level head path
#   backbone proj -> localConv2d -> MLP -> cross-attention -> [Fix | _localI]
# ----------------------------------------------------------------------------
def level_kernel_call(pooled_rows, khat, vhat, bb_w, local_w, mlp_w, mlp_b,
                      wq, bq, wo, bo):
    """pooled_rows: (B, P, 3) rows of the strided avg-pooled image (NHWC order).
    khat: (B, E, H*Lk) block-diagonal k (softmax scale folded in, bf16).
    vhat: (B, H*Lk, E) block-diagonal v (bf16).
    Returns FixLG rows (B, P, 2E) bf16: lanes [:E] = cross-attn Fix, [E:] = _localI.
    """
    B, P, _ = pooled_rows.shape
    C = bb_w.shape[1]
    E = EMBED_DIM
    HLk = khat.shape[2]
    Lk = HLk // NUM_HEADS
    f32, bf16 = jnp.float32, jnp.bfloat16

    TP = _row_tile(P)

    def kernel(x_ref, kh_ref, vh_ref, bbw_ref, lw_ref, mw_ref, mb_ref,
               wq_ref, bq_ref, wo_ref, bo_ref, o_ref):
        x3 = x_ref[0]                                   # (TP, 3) f32
        bbw = bbw_ref[...]                              # (3, C) f32
        # backbone stand-in: depth-3 1x1 proj as VPU broadcast FMAs (not MXU)
        c = (x3[:, 0:1] * bbw[0:1, :]
             + x3[:, 1:2] * bbw[1:2, :]
             + x3[:, 2:3] * bbw[2:3, :])
        c = jnp.maximum(c, 0.0)                         # (TP, C)

        # localConv2d (C -> 3C) + ReLU, then MLP (3C -> E) + bias (bf16 MXU, f32 acc)
        local = jnp.maximum(
            jnp.dot(c.astype(bf16), lw_ref[...], preferred_element_type=f32), 0.0)
        seq = jnp.dot(local.astype(bf16), mw_ref[...],
                      preferred_element_type=f32) + mb_ref[...]       # (TP, E)

        # q projection; BOTH heads' scores in a single MXU call via block-diag khat
        q = jnp.dot(seq.astype(bf16), wq_ref[...],
                    preferred_element_type=f32) + bq_ref[...]         # (TP, E)
        s = jnp.dot(q.astype(bf16), kh_ref[0],
                    preferred_element_type=f32)                       # (TP, H*Lk)

        # per-head softmax: head segments occupy disjoint lane ranges of s
        lane = lax.broadcasted_iota(jnp.int32, s.shape, 1)
        neg = jnp.float32(-1e30)
        m_lane = jnp.full_like(s, neg)
        for h in range(NUM_HEADS):
            msk = (lane >= h * Lk) & (lane < (h + 1) * Lk)
            mh = jnp.max(jnp.where(msk, s, neg), axis=-1, keepdims=True)
            m_lane = jnp.where(msk, mh, m_lane)
        p = jnp.exp(s - m_lane)
        inv = jnp.zeros_like(s)
        for h in range(NUM_HEADS):
            msk = (lane >= h * Lk) & (lane < (h + 1) * Lk)
            lh = jnp.sum(jnp.where(msk, p, 0.0), axis=-1, keepdims=True)
            # TODO(synk): use approx=False if bit-level parity with torch is required
            inv = jnp.where(msk, pl.reciprocal(lh, approx=True), inv)
        p = p * inv

        # block-diagonal vhat gives the head concat for free; out proj is one K=E dot
        attn = jnp.dot(p.astype(bf16), vh_ref[0],
                       preferred_element_type=f32)                    # (TP, E)
        fix = jnp.dot(attn.astype(bf16), wo_ref[...],
                      preferred_element_type=f32) + bo_ref[...]       # (TP, E)

        # FixLG = concat([Fix, _localI]) -> 2E = 128 lanes, one dense bf16 store
        o_ref[0] = jnp.concatenate([fix, seq], axis=-1).astype(o_ref.dtype)

    return pl.pallas_call(
        kernel,
        out_shape=jax.ShapeDtypeStruct((B, P, 2 * E), bf16),
        grid=(B, P // TP),
        in_specs=[
            pl.BlockSpec((1, TP, 3), lambda b, t: (b, t, 0)),
            pl.BlockSpec((1, E, HLk), lambda b, t: (b, 0, 0)),
            pl.BlockSpec((1, HLk, E), lambda b, t: (b, 0, 0)),
            _bcast_spec((3, C)),
            _bcast_spec((C, 3 * C)),
            _bcast_spec((3 * C, E)),
            _bcast_spec((1, E)),
            _bcast_spec((E, E)),
            _bcast_spec((1, E)),
            _bcast_spec((E, E)),
            _bcast_spec((1, E)),
        ],
        out_specs=pl.BlockSpec((1, TP, 2 * E), lambda b, t: (b, t, 0)),
        compiler_params=pltpu.CompilerParams(
            dimension_semantics=("parallel", "parallel"),
            vmem_limit_bytes=VMEM_LIMIT),
    )(pooled_rows.astype(f32), khat.astype(bf16), vhat.astype(bf16),
      bb_w.astype(f32), local_w.astype(bf16), mlp_w.astype(bf16),
      mlp_b.reshape(1, E).astype(f32),
      wq.astype(bf16), bq.reshape(1, E).astype(f32),
      wo.astype(bf16), bo.reshape(1, E).astype(f32))


# ----------------------------------------------------------------------------
# Pallas kernel 2: fused (implicit 7E concat) + linear_fuse(conv+BN+ReLU)
#                  + Dropout2d(eval)=identity + linear_pred
# ----------------------------------------------------------------------------
def fuse_pred_call(a, b, c, g, fuse_w, bn_scale, bn_shift, pred_w_pad, pred_b_pad):
    """a/b/c: (M, 2E) bf16 rows of FixLG8/16/32; g: (M, E) bf16 rows of GlobalM.
    Returns (M, Npad) f32 class-logit rows (lanes padded to 128; slice after)."""
    M = a.shape[0]
    E = EMBED_DIM
    Npad = pred_w_pad.shape[1]
    f32, bf16 = jnp.float32, jnp.bfloat16

    tm = _row_tile(M)        # big row tile that divides M -> no pad copies

    def kernel(a_ref, b_ref, c_ref, g_ref, fw_ref, bns_ref, bnb_ref,
               pw_ref, pb_ref, o_ref):
        # implicit 7E channel concat; streams merged at vreg (128-lane) boundaries
        # so the accumulating matmuls run at K=4E / K=3E (fills the 256-deep MXU
        # on v6e/v7x instead of four K=128/64 dots).
        ab = jnp.concatenate([a_ref[...], b_ref[...]], axis=-1)       # (tm, 4E) bf16
        cg = jnp.concatenate([c_ref[...], g_ref[...]], axis=-1)       # (tm, 3E) bf16
        acc = jnp.dot(ab, fw_ref[0:4 * E, :], preferred_element_type=f32)
        acc = acc + jnp.dot(cg, fw_ref[4 * E:7 * E, :], preferred_element_type=f32)
        y = jnp.maximum(acc * bns_ref[...] + bnb_ref[...], 0.0)       # BN(eval)+ReLU
        out = jnp.dot(y.astype(bf16), pw_ref[...],
                      preferred_element_type=f32) + pb_ref[...]       # linear_pred
        o_ref[...] = out.astype(o_ref.dtype)

    # TODO(synk): add pipeline_mode=pl.Buffered(3) on the a/b/c/g specs if DMA is
    # still exposed after the bf16 switch (conditional item from the perf review).
    return pl.pallas_call(
        kernel,
        out_shape=jax.ShapeDtypeStruct((M, Npad), f32),
        grid=(M // tm,),
        in_specs=[
            pl.BlockSpec((tm, 2 * E), lambda i: (i, 0)),
            pl.BlockSpec((tm, 2 * E), lambda i: (i, 0)),
            pl.BlockSpec((tm, 2 * E), lambda i: (i, 0)),
            pl.BlockSpec((tm, E), lambda i: (i, 0)),
            _bcast_spec((7 * E, E)),
            _bcast_spec((1, E)),
            _bcast_spec((1, E)),
            _bcast_spec((E, Npad)),
            _bcast_spec((1, Npad)),
        ],
        out_specs=pl.BlockSpec((tm, Npad), lambda i: (i, 0)),
        compiler_params=pltpu.CompilerParams(
            dimension_semantics=("parallel",),
            vmem_limit_bytes=VMEM_LIMIT),
    )(a.astype(bf16), b.astype(bf16), c.astype(bf16), g.astype(bf16),
      fuse_w.astype(bf16), bn_scale.reshape(1, E).astype(f32),
      bn_shift.reshape(1, E).astype(f32),
      pred_w_pad.astype(bf16), pred_b_pad.reshape(1, Npad).astype(f32))


# ----------------------------------------------------------------------------
# plain-JAX glue (all channels-last)
# ----------------------------------------------------------------------------
def avg_pool_nhwc(x, s):
    n, h, w, c = x.shape
    return x.reshape(n, h // s, s, w // s, s, c).mean(axis=(2, 4))


def backbone_proj_nhwc(pooled, w):
    """Depth-3 1x1 projection + ReLU as broadcast FMAs (kept off the MXU)."""
    y = pooled[..., 0:1] * w[0] + pooled[..., 1:2] * w[1] + pooled[..., 2:3] * w[2]
    return jnp.maximum(y, 0.0)


def bilinear_resize_nhwc(x, out_h, out_w, align_corners=False):
    """PyTorch-compatible F.interpolate(mode='bilinear') on NHWC.
    Lerp computed in f32, result cast back to x.dtype (bf16 on the FixLG path)."""
    n, h, w, c = x.shape
    xf = x.astype(jnp.float32)

    def src_idx(out_size, in_size):
        if align_corners:
            if out_size == 1:
                return jnp.zeros((out_size,), jnp.float32)
            return jnp.arange(out_size, dtype=jnp.float32) * (
                (in_size - 1) / (out_size - 1))
        s = (jnp.arange(out_size, dtype=jnp.float32) + 0.5) * (
            in_size / out_size) - 0.5
        return jnp.clip(s, 0.0, float(in_size - 1))

    ys = src_idx(out_h, h)
    xs = src_idx(out_w, w)
    y0 = jnp.floor(ys).astype(jnp.int32)
    y1 = jnp.minimum(y0 + 1, h - 1)
    wy = (ys - y0.astype(jnp.float32))[None, :, None, None]
    x0 = jnp.floor(xs).astype(jnp.int32)
    x1 = jnp.minimum(x0 + 1, w - 1)
    wx = (xs - x0.astype(jnp.float32))[None, None, :, None]

    top = xf[:, y0, :, :]
    bot = xf[:, y1, :, :]
    rows = top * (1.0 - wy) + bot * wy
    left = rows[:, :, x0, :]
    right = rows[:, :, x1, :]
    return (left * (1.0 - wx) + right * wx).astype(x.dtype)


# ----------------------------------------------------------------------------
# parameters
# ----------------------------------------------------------------------------
def init_params(key):
    p = {}
    ks = iter(jax.random.split(key, 64))

    def nrm(shape, std=0.05):
        return std * jax.random.normal(next(ks), shape, jnp.float32)

    E, C4 = EMBED_DIM, IN_CHANNELS[3]
    # backbone stub: 1x1 proj 3 -> C_i after strided avg pool
    for i, c in enumerate(IN_CHANNELS):
        p[f"bb_w{i}"] = nrm((3, c))
    # localConv2d stand-ins: C -> 3C pointwise + ReLU
    for i, c in enumerate(IN_CHANNELS[:3]):
        p[f"local_w{i}"] = nrm((c, 3 * c))
    # MLP heads (linear_c1/c2/c3).  linear_c4 exists in __init__ but is unused
    # in the PyTorch forward, so it is omitted here.
    for i, c in enumerate(IN_CHANNELS[:3]):
        p[f"mlp_w{i}"] = nrm((3 * c, E))
        p[f"mlp_b{i}"] = nrm((E,), 0.01)
    # cross (localADeepMerge stand-in): shared across the 3 calls
    p["cross_wq"], p["cross_bq"] = nrm((E, E)), nrm((E,), 0.01)
    p["cross_wk"], p["cross_bk"] = nrm((C4, E)), nrm((E,), 0.01)
    p["cross_wv"], p["cross_bv"] = nrm((C4, E)), nrm((E,), 0.01)
    p["cross_wo"], p["cross_bo"] = nrm((E, E)), nrm((E,), 0.01)
    # linear_fuse: ConvModule(7E -> E, k=1) = conv(no bias) + BN(eps=1e-3) + ReLU
    p["fuse_w"] = nrm((7 * E, E))
    p["bn_gamma"] = jnp.ones((E,), jnp.float32)
    p["bn_beta"] = jnp.zeros((E,), jnp.float32)
    p["bn_mean"] = nrm((E,), 0.01)
    p["bn_var"] = 1.0 + 0.1 * jax.random.uniform(next(ks), (E,), jnp.float32)
    # linear_pred: 1x1 conv E -> num_classes (with bias)
    p["pred_w"] = nrm((E, NUM_CLASSES))
    p["pred_b"] = nrm((NUM_CLASSES,), 0.01)
    return p


# ----------------------------------------------------------------------------
# forward pass
# ----------------------------------------------------------------------------
def fursformer_forward(p, x):
    n, _, H, W = x.shape
    E = EMBED_DIM
    d = HEAD_DIM
    f32, bf16 = jnp.float32, jnp.bfloat16

    # single relayout to channels-last; everything downstream stays NHWC/rows
    x_nhwc = jnp.transpose(x.astype(f32), (0, 2, 3, 1))

    # backbone stand-in front end: strided avg-pool pyramid
    pooled = [avg_pool_nhwc(x_nhwc, s) for s in STRIDES]
    h1, w1 = pooled[0].shape[1], pooled[0].shape[2]
    h4, w4 = pooled[3].shape[1], pooled[3].shape[2]
    Lk = h4 * w4

    # c4: depth-3 projection (VPU FMAs) -> k/v source + GlobalM
    c4_nhwc = backbone_proj_nhwc(pooled[3], p["bb_w3"])        # (B, h4, w4, E)
    c4_rows = c4_nhwc.reshape(n, Lk, E)

    # fused [k|v] projection of c4, ONCE per batch (hoisted out of the 3 levels)
    wkv = jnp.concatenate([p["cross_wk"], p["cross_wv"]], axis=1)   # (C4, 2E)
    bkv = jnp.concatenate([p["cross_bk"], p["cross_bv"]], axis=0)   # (2E,)
    kv = kv_proj_call(c4_rows, wkv, bkv)                            # (B, Lk, 2E) f32
    k_rows, v_rows = kv[..., :E], kv[..., E:]

    # block-diagonal khat/vhat: both heads' scores / values are single MXU calls
    # inside the level kernel and the head concat comes out for free; the softmax
    # scale is folded into khat (built once per forward, tiny).
    scale = 1.0 / math.sqrt(d)
    khat = jnp.zeros((n, E, NUM_HEADS * Lk), f32)
    vhat = jnp.zeros((n, NUM_HEADS * Lk, E), f32)
    for h in range(NUM_HEADS):
        kh = jnp.transpose(k_rows[..., h * d:(h + 1) * d], (0, 2, 1))   # (B, d, Lk)
        khat = khat.at[:, h * d:(h + 1) * d, h * Lk:(h + 1) * Lk].set(kh * scale)
        vhat = vhat.at[:, h * Lk:(h + 1) * Lk, h * d:(h + 1) * d].set(
            v_rows[..., h * d:(h + 1) * d])
    khat = khat.astype(bf16)
    vhat = vhat.astype(bf16)

    # per-level fused head kernels -> FixLG_i rows (B, P_i, 2E) in bf16
    fixlg = []
    for i in range(3):
        pi = pooled[i]
        Bi, Hi, Wi, _ = pi.shape
        out = level_kernel_call(
            pi.reshape(Bi, Hi * Wi, 3), khat, vhat,
            p[f"bb_w{i}"], p[f"local_w{i}"], p[f"mlp_w{i}"], p[f"mlp_b{i}"],
            p["cross_wq"], p["cross_bq"], p["cross_wo"], p["cross_bo"])
        fixlg.append(out.reshape(Bi, Hi, Wi, 2 * E))

    # bilinear resampling on bf16 NHWC (align_corners=False), channels on lanes
    FixLG8 = bilinear_resize_nhwc(fixlg[2], h1, w1, align_corners=False)
    FixLG16 = bilinear_resize_nhwc(fixlg[1], h1, w1, align_corners=False)
    FixLG32 = bilinear_resize_nhwc(fixlg[0], h1, w1, align_corners=False)
    GlobalM = bilinear_resize_nhwc(c4_nhwc.astype(bf16), h1, w1, align_corners=False)

    # fused: implicit 7E concat -> conv+BN+ReLU -> Dropout2d(eval)=id -> pred
    bn_scale = p["bn_gamma"] / jnp.sqrt(p["bn_var"] + 1e-3)
    bn_shift = p["bn_beta"] - p["bn_mean"] * bn_scale
    Npad = 128                                   # lane-dense prediction store
    pred_w_pad = jnp.pad(p["pred_w"], ((0, 0), (0, Npad - NUM_CLASSES)))
    pred_b_pad = jnp.pad(p["pred_b"], (0, Npad - NUM_CLASSES))

    M1 = n * h1 * w1
    rows = fuse_pred_call(
        FixLG8.reshape(M1, 2 * E), FixLG16.reshape(M1, 2 * E),
        FixLG32.reshape(M1, 2 * E), GlobalM.reshape(M1, E),
        p["fuse_w"], bn_scale, bn_shift, pred_w_pad, pred_b_pad)
    logits_nhwc = rows[:, :NUM_CLASSES].reshape(n, h1, w1, NUM_CLASSES)

    # final upsample to input resolution (align_corners=True), then to NCHW
    up = bilinear_resize_nhwc(logits_nhwc, H, W, align_corners=True)
    return jnp.transpose(up, (0, 3, 1, 2))


if __name__ == "__main__":
    key = jax.random.PRNGKey(0)
    k_param, k_x = jax.random.split(key)
    params = init_params(k_param)
    x = jax.random.normal(k_x, (2, 3, 64, 64), jnp.float32)

    fwd = jax.jit(fursformer_forward)
    out = fwd(params, x)
    jax.block_until_ready(out)

    assert out.shape == (2, NUM_CLASSES, 64, 64), out.shape
    assert jnp.isfinite(out).all()
    print("KERNEL_OK")
</pallas_src>

<mosaic_0001>
module attributes {stable_mosaic.version = 11 : i64} {
  func.func @kernel(%arg0: i32, %arg1: memref<1x4x64xf32, #tpu.memory_space<vmem>>, %arg2: memref<64x128xbf16, #tpu.memory_space<vmem>>, %arg3: memref<1x128xf32, #tpu.memory_space<vmem>>, %arg4: memref<1x4x128xf32, #tpu.memory_space<vmem>>) attributes {dimension_semantics = [#tpu.dimension_semantics<parallel>], iteration_bounds = array<i64: 2>, scalar_prefetch = 0 : i64, scratch_operands = 0 : i64, tpu.core_type = #tpu.core_type<tc>, window_params = [{transform_indices = @transform_0, window_bounds = array<i64: 1, 4, 64>}, {pipeline_mode = #tpu.pipeline_mode<synchronous>, transform_indices = @transform_1, window_bounds = array<i64: 64, 128>}, {pipeline_mode = #tpu.pipeline_mode<synchronous>, transform_indices = @transform_2, window_bounds = array<i64: 1, 128>}, {transform_indices = @transform_3, window_bounds = array<i64: 1, 4, 128>}]} {
    %c0 = arith.constant 0 : index
    %c0_0 = arith.constant 0 : index
    %c0_1 = arith.constant 0 : index
    %0 = vector.load %arg1[%c0, %c0_0, %c0_1] : memref<1x4x64xf32, #tpu.memory_space<vmem>>, vector<1x4x64xf32>
    %1 = vector.shape_cast %0 : vector<1x4x64xf32> to vector<4x64xf32>
    %2 = arith.truncf %1 : vector<4x64xf32> to vector<4x64xbf16>
    %c0_2 = arith.constant 0 : index
    %c0_3 = arith.constant 0 : index
    %3 = vector.load %arg2[%c0_2, %c0_3] : memref<64x128xbf16, #tpu.memory_space<vmem>>, vector<64x128xbf16>
    %cst = arith.constant dense<0.000000e+00> : vector<4x128xf32>
    %4 = tpu.matmul %2, %3, %cst {dimension_numbers = #tpu.dot_dimension_numbers<[1], [0], [0], [1], [0, 0, 1, 1], [], []>} : vector<4x64xbf16>, vector<64x128xbf16>, vector<4x128xf32> -> vector<4x128xf32>
    %c0_4 = arith.constant 0 : index
    %c0_5 = arith.constant 0 : index
    %5 = vector.load %arg3[%c0_4, %c0_5] : memref<1x128xf32, #tpu.memory_space<vmem>>, vector<1x128xf32>
    %6 = vector.broadcast %5 : vector<1x128xf32> to vector<4x128xf32>
    %7 = arith.addf %4, %6 : vector<4x128xf32>
    %c0_6 = arith.constant 0 : index
    %c0_7 = arith.constant 0 : index
    %c0_8 = arith.constant 0 : index
    %8 = vector.load %arg4[%c0_6, %c0_7, %c0_8] : memref<1x4x128xf32, #tpu.memory_space<vmem>>, vector<1x4x128xf32>
    %9 = vector.shape_cast %8 : vector<1x4x128xf32> to vector<4x128xf32>
    %10 = vector.shape_cast %7 : vector<4x128xf32> to vector<1x4x128xf32>
    tpu.vector_store %arg4[%c0_6, %c0_7, %c0_8], %10 {strides = array<i32>} : memref<1x4x128xf32, #tpu.memory_space<vmem>>, vector<1x4x128xf32>,
    return
  }
  func.func @transform_0(%arg0: i32) -> (i32, i32, i32) {
    %c0_i32 = arith.constant 0 : i32
    %c0_i32_0 = arith.constant 0 : i32
    %c0_i32_1 = arith.constant 0 : i32
    return %arg0, %c0_i32, %c0_i32_0 : i32, i32, i32
  }
  func.func @transform_1(%arg0: i32) -> (i32, i32) {
    %c0_i32 = arith.constant 0 : i32
    %c0_i32_0 = arith.constant 0 : i32
    %c0_i32_1 = arith.constant 0 : i32
    return %c0_i32, %c0_i32_0 : i32, i32
  }
  func.func @transform_2(%arg0: i32) -> (i32, i32) {
    %c0_i32 = arith.constant 0 : i32
    %c0_i32_0 = arith.constant 0 : i32
    %c0_i32_1 = arith.constant 0 : i32
    return %c0_i32, %c0_i32_0 : i32, i32
  }
  func.func @transform_3(%arg0: i32) -> (i32, i32, i32) {
    %c0_i32 = arith.constant 0 : i32
    %c0_i32_0 = arith.constant 0 : i32
    %c0_i32_1 = arith.constant 0 : i32
    return %arg0, %c0_i32, %c0_i32_0 : i32, i32, i32
  }
}

module attributes {stable_mosaic.version = 11 : i64} {
  func.func @kernel(%arg0: i32, %arg1: i32, %arg2: memref<1x256x3xf32, #tpu.memory_space<vmem>>, %arg3: memref<1x64x8xbf16, #tpu.memory_space<vmem>>, %arg4: memref<1x8x64xbf16, #tpu.memory_space<vmem>>, %arg5: memref<3x8xf32, #tpu.memory_space<vmem>>, %arg6: memref<8x24xbf16, #tpu.memory_space<vmem>>, %arg7: memref<24x64xbf16, #tpu.memory_space<vmem>>, %arg8: memref<1x64xf32, #tpu.memory_space<vmem>>, %arg9: memref<64x64xbf16, #tpu.memory_space<vmem>>, %arg10: memref<1x64xf32, #tpu.memory_space<vmem>>, %arg11: memref<64x64xbf16, #tpu.memory_space<vmem>>, %arg12: memref<1x64xf32, #tpu.memory_space<vmem>>, %arg13: memref<1x256x128xbf16, #tpu.memory_space<vmem>>) attributes {dimension_semantics = [#tpu.dimension_semantics<parallel>, #tpu.dimension_semantics<parallel>], iteration_bounds = array<i64: 2, 1>, scalar_prefetch = 0 : i64, scratch_operands = 0 : i64, tpu.core_type = #tpu.core_type<tc>, window_params = [{transform_indices = @transform_0, window_bounds = array<i64: 1, 256, 3>}, {transform_indices = @transform_1, window_bounds = array<i64: 1, 64, 8>}, {transform_indices = @transform_2, window_bounds = array<i64: 1, 8, 64>}, {pipeline_mode = #tpu.pipeline_mode<synchronous>, transform_indices = @transform_3, window_bounds = array<i64: 3, 8>}, {pipeline_mode = #tpu.pipeline_mode<synchronous>, transform_indices = @transform_4, window_bounds = array<i64: 8, 24>}, {pipeline_mode = #tpu.pipeline_mode<synchronous>, transform_indices = @transform_5, window_bounds = array<i64: 24, 64>}, {pipeline_mode = #tpu.pipeline_mode<synchronous>, transform_indices = @transform_6, window_bounds = array<i64: 1, 64>}, {pipeline_mode = #tpu.pipeline_mode<synchronous>, transform_indices = @transform_7, window_bounds = array<i64: 64, 64>}, {pipeline_mode = #tpu.pipeline_mode<synchronous>, transform_indices = @transform_8, window_bounds = array<i64: 1, 64>}, {pipeline_mode = #tpu.pipeline_mode<synchronous>, transform_indices = @transform_9, window_bounds = array<i64: 64, 64>}, {pipeline_mode = #tpu.pipeline_mode<synchronous>, transform_indices = @transform_10, window_bounds = array<i64: 1, 64>}, {transform_indices = @transform_11, window_bounds = array<i64: 1, 256, 128>}]} {
    %c0 = arith.constant 0 : index
    %c0_0 = arith.constant 0 : index
    %c0_1 = arith.constant 0 : index
    %0 = vector.load %arg2[%c0, %c0_0, %c0_1] : memref<1x256x3xf32, #tpu.memory_space<vmem>>, vector<1x256x3xf32>
    %1 = vector.shape_cast %0 : vector<1x256x3xf32> to vector<256x3xf32>
    %c0_2 = arith.constant 0 : index
    %c0_3 = arith.constant 0 : index
    %2 = vector.load %arg5[%c0_2, %c0_3] : memref<3x8xf32, #tpu.memory_space<vmem>>, vector<3x8xf32>
    %3 = vector.extract_strided_slice %1 {offsets = [0, 0], sizes = [256, 1], strides = [1, 1]} : vector<256x3xf32> to vector<256x1xf32>
    %4 = vector.extract_strided_slice %2 {offsets = [0, 0], sizes = [1, 8], strides = [1, 1]} : vector<3x8xf32> to vector<1x8xf32>
    %5 = vector.broadcast %3 : vector<256x1xf32> to vector<256x8xf32>
    %6 = vector.broadcast %4 : vector<1x8xf32> to vector<256x8xf32>
    %7 = arith.mulf %5, %6 : vector<256x8xf32>
    %8 = vector.extract_strided_slice %1 {offsets = [0, 1], sizes = [256, 1], strides = [1, 1]} : vector<256x3xf32> to vector<256x1xf32>
    %9 = vector.extract_strided_slice %2 {offsets = [1, 0], sizes = [1, 8], strides = [1, 1]} : vector<3x8xf32> to vector<1x8xf32>
    %10 = vector.broadcast %8 : vector<256x1xf32> to vector<256x8xf32>
    %11 = vector.broadcast %9 : vector<1x8xf32> to vector<256x8xf32>
    %12 = arith.mulf %10, %11 : vector<256x8xf32>
    %13 = arith.addf %7, %12 : vector<256x8xf32>
    %14 = vector.extract_strided_slice %1 {offsets = [0, 2], sizes = [256, 1], strides = [1, 1]} : vector<256x3xf32> to vector<256x1xf32>
    %15 = vector.extract_strided_slice %2 {offsets = [2, 0], sizes = [1, 8], strides = [1, 1]} : vector<3x8xf32> to vector<1x8xf32>
    %16 = vector.broadcast %14 : vector<256x1xf32> to vector<256x8xf32>
    %17 = vector.broadcast %15 : vector<1x8xf32> to vector<256x8xf32>
    %18 = arith.mulf %16, %17 : vector<256x8xf32>
    %19 = arith.addf %13, %18 : vector<256x8xf32>
    %cst = arith.constant 0.000000e+00 : f32
    %20 = vector.broadcast %cst : f32 to vector<256x8xf32>
    %21 = arith.maximumf %19, %20 : vector<256x8xf32>
    %22 = arith.truncf %21 : vector<256x8xf32> to vector<256x8xbf16>
    %c0_4 = arith.constant 0 : index
    %c0_5 = arith.constant 0 : index
    %23 = vector.load %arg6[%c0_4, %c0_5] : memref<8x24xbf16, #tpu.memory_space<vmem>>, vector<8x24xbf16>
    %cst_6 = arith.constant dense<0.000000e+00> : vector<256x24xf32>
    %24 = tpu.matmul %22, %23, %cst_6 {dimension_numbers = #tpu.dot_dimension_numbers<[1], [0], [0], [1], [0, 0, 1, 1], [], []>} : vector<256x8xbf16>, vector<8x24xbf16>, vector<256x24xf32> -> vector<256x24xf32>
    %cst_7 = arith.constant 0.000000e+00 : f32
    %25 = vector.broadcast %cst_7 : f32 to vector<256x24xf32>
    %26 = arith.maximumf %24, %25 : vector<256x24xf32>
    %27 = arith.truncf %26 : vector<256x24xf32> to vector<256x24xbf16>
    %c0_8 = arith.constant 0 : index
    %c0_9 = arith.constant 0 : index
    %28 = vector.load %arg7[%c0_8, %c0_9] : memref<24x64xbf16, #tpu.memory_space<vmem>>, vector<24x64xbf16>
    %cst_10 = arith.constant dense<0.000000e+00> : vector<256x64xf32>
    %29 = tpu.matmul %27, %28, %cst_10 {dimension_numbers = #tpu.dot_dimension_numbers<[1], [0], [0], [1], [0, 0, 1, 1], [], []>} : vector<256x24xbf16>, vector<24x64xbf16>, vector<256x64xf32> -> vector<256x64xf32>
    %c0_11 = arith.constant 0 : index
    %c0_12 = arith.constant 0 : index
    %30 = vector.load %arg8[%c0_11, %c0_12] : memref<1x64xf32, #tpu.memory_space<vmem>>, vector<1x64xf32>
    %31 = vector.broadcast %30 : vector<1x64xf32> to vector<256x64xf32>
    %32 = arith.addf %29, %31 : vector<256x64xf32>
    %33 = arith.truncf %32 : vector<256x64xf32> to vector<256x64xbf16>
    %c0_13 = arith.constant 0 : index
    %c0_14 = arith.constant 0 : index
    %34 = vector.load %arg9[%c0_13, %c0_14] : memref<64x64xbf16, #tpu.memory_space<vmem>>, vector<64x64xbf16>
    %cst_15 = arith.constant dense<0.000000e+00> : vector<256x64xf32>
    %35 = tpu.matmul %33, %34, %cst_15 {dimension_numbers = #tpu.dot_dimension_numbers<[1], [0], [0], [1], [0, 0, 1, 1], [], []>} : vector<256x64xbf16>, vector<64x64xbf16>, vector<256x64xf32> -> vector<256x64xf32>
    %c0_16 = arith.constant 0 : index
    %c0_17 = arith.constant 0 : index
    %36 = vector.load %arg10[%c0_16, %c0_17] : memref<1x64xf32, #tpu.memory_space<vmem>>, vector<1x64xf32>
    %37 = vector.broadcast %36 : vector<1x64xf32> to vector<256x64xf32>
    %38 = arith.addf %35, %37 : vector<256x64xf32>
    %39 = arith.truncf %38 : vector<256x64xf32> to vector<256x64xbf16>
    %c0_18 = arith.constant 0 : index
    %c0_19 = arith.constant 0 : index
    %c0_20 = arith.constant 0 : index
    %40 = vector.load %arg3[%c0_18, %c0_19, %c0_20] : memref<1x64x8xbf16, #tpu.memory_space<vmem>>, vector<1x64x8xbf16>
    %41 = vector.shape_cast %40 : vector<1x64x8xbf16> to vector<64x8xbf16>
    %cst_21 = arith.constant dense<0.000000e+00> : vector<256x8xf32>
    %42 = tpu.matmul %39, %41, %cst_21 {dimension_numbers = #tpu.dot_dimension_numbers<[1], [0], [0], [1], [0, 0, 1, 1], [], []>} : vector<256x64xbf16>, vector<64x8xbf16>, vector<256x8xf32> -> vector<256x8xf32>
    %43 = tpu.iota {dimensions = array<i32: 1>} : vector<256x8xi32>
    %cst_22 = arith.constant -1.000000e+30 : f32
    %44 = vector.broadcast %cst_22 : f32 to vector<256x8xf32>
    %c0_i32 = arith.constant 0 : i32
    %45 = vector.broadcast %c0_i32 : i32 to vector<256x8xi32>
    %46 = arith.cmpi sge, %43, %45 : vector<256x8xi32>
    %c4_i32 = arith.constant 4 : i32
    %47 = vector.broadcast %c4_i32 : i32 to vector<256x8xi32>
    %48 = arith.cmpi slt, %43, %47 : vector<256x8xi32>
    %49 = arith.andi %46, %48 : vector<256x8xi1>
    %cst_23 = arith.constant -1.000000e+30 : f32
    %50 = vector.broadcast %cst_23 : f32 to vector<256x8xf32>
    %51 = arith.select %49, %42, %50 : vector<256x8xi1>, vector<256x8xf32>
    %cst_24 = arith.constant dense<0xFF800000> : vector<256xf32>
    %52 = vector.multi_reduction <maximumf>, %51, %cst_24 [1] : vector<256x8xf32> to vector<256xf32>
    %53 = vector.shape_cast %52 : vector<256xf32> to vector<256x1xf32>
    %54 = vector.shape_cast %53 : vector<256x1xf32> to vector<256x1xf32>
    %55 = vector.broadcast %54 : vector<256x1xf32> to vector<256x8xf32>
    %56 = arith.select %49, %55, %44 : vector<256x8xi1>, vector<256x8xf32>
    %c4_i32_25 = arith.constant 4 : i32
    %57 = vector.broadcast %c4_i32_25 : i32 to vector<256x8xi32>
    %58 = arith.cmpi sge, %43, %57 : vector<256x8xi32>
    %c8_i32 = arith.constant 8 : i32
    %59 = vector.broadcast %c8_i32 : i32 to vector<256x8xi32>
    %60 = arith.cmpi slt, %43, %59 : vector<256x8xi32>
    %61 = arith.andi %58, %60 : vector<256x8xi1>
    %cst_26 = arith.constant -1.000000e+30 : f32
    %62 = vector.broadcast %cst_26 : f32 to vector<256x8xf32>
    %63 = arith.select %61, %42, %62 : vector<256x8xi1>, vector<256x8xf32>
    %cst_27 = arith.constant dense<0xFF800000> : vector<256xf32>
    %64 = vector.multi_reduction <maximumf>, %63, %cst_27 [1] : vector<256x8xf32> to vector<256xf32>
    %65 = vector.shape_cast %64 : vector<256xf32> to vector<256x1xf32>
    %66 = vector.shape_cast %65 : vector<256x1xf32> to vector<256x1xf32>
    %67 = vector.broadcast %66 : vector<256x1xf32> to vector<256x8xf32>
    %68 = arith.select %61, %67, %56 : vector<256x8xi1>, vector<256x8xf32>
    %69 = arith.subf %42, %68 : vector<256x8xf32>
    %70 = math.exp %69 : vector<256x8xf32>
    %cst_28 = arith.constant 0.000000e+00 : f32
    %71 = vector.broadcast %cst_28 : f32 to vector<256x8xf32>
    %c0_i32_29 = arith.constant 0 : i32
    %72 = vector.broadcast %c0_i32_29 : i32 to vector<256x8xi32>
    %73 = arith.cmpi sge, %43, %72 : vector<256x8xi32>
    %c4_i32_30 = arith.constant 4 : i32
    %74 = vector.broadcast %c4_i32_30 : i32 to vector<256x8xi32>
    %75 = arith.cmpi slt, %43, %74 : vector<256x8xi32>
    %76 = arith.andi %73, %75 : vector<256x8xi1>
    %cst_31 = arith.constant 0.000000e+00 : f32
    %77 = vector.broadcast %cst_31 : f32 to vector<256x8xf32>
    %78 = arith.select %76, %70, %77 : vector<256x8xi1>, vector<256x8xf32>
    %cst_32 = arith.constant dense<0.000000e+00> : vector<256xf32>
    %79 = vector.multi_reduction <add>, %78, %cst_32 [1] : vector<256x8xf32> to vector<256xf32>
    %80 = vector.shape_cast %79 : vector<256xf32> to vector<256x1xf32>
    %81 = tpu.reciprocal %80 {approx = true} : vector<256x1xf32> -> vector<256x1xf32>
    %82 = vector.shape_cast %81 : vector<256x1xf32> to vector<256x1xf32>
    %83 = vector.broadcast %82 : vector<256x1xf32> to vector<256x8xf32>
    %84 = arith.select %76, %83, %71 : vector<256x8xi1>, vector<256x8xf32>
    %c4_i32_33 = arith.constant 4 : i32
    %85 = vector.broadcast %c4_i32_33 : i32 to vector<256x8xi32>
    %86 = arith.cmpi sge, %43, %85 : vector<256x8xi32>
    %c8_i32_34 = arith.constant 8 : i32
    %87 = vector.broadcast %c8_i32_34 : i32 to vector<256x8xi32>
    %88 = arith.cmpi slt, %43, %87 : vector<256x8xi32>
    %89 = arith.andi %86, %88 : vector<256x8xi1>
    %cst_35 = arith.constant 0.000000e+00 : f32
    %90 = vector.broadcast %cst_35 : f32 to vector<256x8xf32>
    %91 = arith.select %89, %70, %90 : vector<256x8xi1>, vector<256x8xf32>
    %cst_36 = arith.constant dense<0.000000e+00> : vector<256xf32>
    %92 = vector.multi_reduction <add>, %91, %cst_36 [1] : vector<256x8xf32> to vector<256xf32>
    %93 = vector.shape_cast %92 : vector<256xf32> to vector<256x1xf32>
    %94 = tpu.reciprocal %93 {approx = true} : vector<256x1xf32> -> vector<256x1xf32>
    %95 = vector.shape_cast %94 : vector<256x1xf32> to vector<256x1xf32>
    %96 = vector.broadcast %95 : vector<256x1xf32> to vector<256x8xf32>
    %97 = arith.select %89, %96, %84 : vector<256x8xi1>, vector<256x8xf32>
    %98 = arith.mulf %70, %97 : vector<256x8xf32>
    %99 = arith.truncf %98 : vector<256x8xf32> to vector<256x8xbf16>
    %c0_37 = arith.constant 0 : index
    %c0_38 = arith.constant 0 : index
    %c0_39 = arith.constant 0 : index
    %100 = vector.load %arg4[%c0_37, %c0_38, %c0_39] : memref<1x8x64xbf16, #tpu.memory_space<vmem>>, vector<1x8x64xbf16>
    %101 = vector.shape_cast %100 : vector<1x8x64xbf16> to vector<8x64xbf16>
    %cst_40 = arith.constant dense<0.000000e+00> : vector<256x64xf32>
    %102 = tpu.matmul %99, %101, %cst_40 {dimension_numbers = #tpu.dot_dimension_numbers<[1], [0], [0], [1], [0, 0, 1, 1], [], []>} : vector<256x8xbf16>, vector<8x64xbf16>, vector<256x64xf32> -> vector<256x64xf32>
    %103 = arith.truncf %102 : vector<256x64xf32> to vector<256x64xbf16>
    %c0_41 = arith.constant 0 : index
    %c0_42 = arith.constant 0 : index
    %104 = vector.load %arg11[%c0_41, %c0_42] : memref<64x64xbf16, #tpu.memory_space<vmem>>, vector<64x64xbf16>
    %cst_43 = arith.constant dense<0.000000e+00> : vector<256x64xf32>
    %105 = tpu.matmul %103, %104, %cst_43 {dimension_numbers = #tpu.dot_dimension_numbers<[1], [0], [0], [1], [0, 0, 1, 1], [], []>} : vector<256x64xbf16>, vector<64x64xbf16>, vector<256x64xf32> -> vector<256x64xf32>
    %c0_44 = arith.constant 0 : index
    %c0_45 = arith.constant 0 : index
    %106 = vector.load %arg12[%c0_44, %c0_45] : memref<1x64xf32, #tpu.memory_space<vmem>>, vector<1x64xf32>
    %107 = vector.broadcast %106 : vector<1x64xf32> to vector<256x64xf32>
    %108 = arith.addf %105, %107 : vector<256x64xf32>
    %109 = tpu.concatenate %108, %32 in 1 : vector<256x64xf32>, vector<256x64xf32> -> vector<256x128xf32>
    %110 = arith.truncf %109 : vector<256x128xf32> to vector<256x128xbf16>
    %c0_46 = arith.constant 0 : index
    %c0_47 = arith.constant 0 : index
    %c0_48 = arith.constant 0 : index
    %111 = vector.load %arg13[%c0_46, %c0_47, %c0_48] : memref<1x256x128xbf16, #tpu.memory_space<vmem>>, vector<1x256x128xbf16>
    %112 = vector.shape_cast %111 : vector<1x256x128xbf16> to vector<256x128xbf16>
    %113 = vector.shape_cast %110 : vector<256x128xbf16> to vector<1x256x128xbf16>
    tpu.vector_store %arg13[%c0_46, %c0_47, %c0_48], %113 {strides = array<i32>} : memref<1x256x128xbf16, #tpu.memory_space<vmem>>, vector<1x256x128xbf16>,
    return
  }
  func.func @transform_0(%arg0: i32, %arg1: i32) -> (i32, i32, i32) {
    %c0_i32 = arith.constant 0 : i32
    %c0_i32_0 = arith.constant 0 : i32
    return %arg0, %arg1, %c0_i32 : i32, i32, i32
  }
  func.func @transform_1(%arg0: i32, %arg1: i32) -> (i32, i32, i32) {
    %c0_i32 = arith.constant 0 : i32
    %c0_i32_0 = arith.constant 0 : i32
    %c0_i32_1 = arith.constant 0 : i32
    return %arg0, %c0_i32, %c0_i32_0 : i32, i32, i32
  }
  func.func @transform_2(%arg0: i32, %arg1: i32) -> (i32, i32, i32) {
    %c0_i32 = arith.constant 0 : i32
    %c0_i32_0 = arith.constant 0 : i32
    %c0_i32_1 = arith.constant 0 : i32
    return %arg0, %c0_i32, %c0_i32_0 : i32, i32, i32
  }
  func.func @transform_3(%arg0: i32, %arg1: i32) -> (i32, i32) {
    %c0_i32 = arith.constant 0 : i32
    %c0_i32_0 = arith.constant 0 : i32
    %c0_i32_1 = arith.constant 0 : i32
    return %c0_i32, %c0_i32_0 : i32, i32
  }
  func.func @transform_4(%arg0: i32, %arg1: i32) -> (i32, i32) {
    %c0_i32 = arith.constant 0 : i32
    %c0_i32_0 = arith.constant 0 : i32
    %c0_i32_1 = arith.constant 0 : i32
    return %c0_i32, %c0_i32_0 : i32, i32
  }
  func.func @transform_5(%arg0: i32, %arg1: i32) -> (i32, i32) {
    %c0_i32 = arith.constant 0 : i32
    %c0_i32_0 = arith.constant 0 : i32
    %c0_i32_1 = arith.constant 0 : i32
    return %c0_i32, %c0_i32_0 : i32, i32
  }
  func.func @transform_6(%arg0: i32, %arg1: i32) -> (i32, i32) {
    %c0_i32 = arith.constant 0 : i32
    %c0_i32_0 = arith.constant 0 : i32
    %c0_i32_1 = arith.constant 0 : i32
    return %c0_i32, %c0_i32_0 : i32, i32
  }
  func.func @transform_7(%arg0: i32, %arg1: i32) -> (i32, i32) {
    %c0_i32 = arith.constant 0 : i32
    %c0_i32_0 = arith.constant 0 : i32
    %c0_i32_1 = arith.constant 0 : i32
    return %c0_i32, %c0_i32_0 : i32, i32
  }
  func.func @transform_8(%arg0: i32, %arg1: i32) -> (i32, i32) {
    %c0_i32 = arith.constant 0 : i32
    %c0_i32_0 = arith.constant 0 : i32
    %c0_i32_1 = arith.constant 0 : i32
    return %c0_i32, %c0_i32_0 : i32, i32
  }
  func.func @transform_9(%arg0: i32, %arg1: i32) -> (i32, i32) {
    %c0_i32 = arith.constant 0 : i32
    %c0_i32_0 = arith.constant 0 : i32
    %c0_i32_1 = arith.constant 0 : i32
    return %c0_i32, %c0_i32_0 : i32, i32
  }
  func.func @transform_10(%arg0: i32, %arg1: i32) -> (i32, i32) {
    %c0_i32 = arith.constant 0 : i32
    %c0_i32_0 = arith.constant 0 : i32
    %c0_i32_1 = arith.constant 0 : i32
    return %c0_i32, %c0_i32_0 : i32, i32
  }
  func.func @transform_11(%arg0: i32, %arg1: i32) -> (i32, i32, i32) {
    %c0_i32 = arith.constant 0 : i32
    %c0_i32_0 = arith.constant 0 : i32
    return %arg0, %arg1, %c0_i32 : i32, i32, i32
  }
}

module attributes {stable_mosaic.version = 11 : i64} {
  func.func @kernel(%arg0: i32, %arg1: i32, %arg2: memref<1x64x3xf32, #tpu.memory_space<vmem>>, %arg3: memref<1x64x8xbf16, #tpu.memory_space<vmem>>, %arg4: memref<1x8x64xbf16, #tpu.memory_space<vmem>>, %arg5: memref<3x16xf32, #tpu.memory_space<vmem>>, %arg6: memref<16x48xbf16, #tpu.memory_space<vmem>>, %arg7: memref<48x64xbf16, #tpu.memory_space<vmem>>, %arg8: memref<1x64xf32, #tpu.memory_space<vmem>>, %arg9: memref<64x64xbf16, #tpu.memory_space<vmem>>, %arg10: memref<1x64xf32, #tpu.memory_space<vmem>>, %arg11: memref<64x64xbf16, #tpu.memory_space<vmem>>, %arg12: memref<1x64xf32, #tpu.memory_space<vmem>>, %arg13: memref<1x64x128xbf16, #tpu.memory_space<vmem>>) attributes {dimension_semantics = [#tpu.dimension_semantics<parallel>, #tpu.dimension_semantics<parallel>], iteration_bounds = array<i64: 2, 1>, scalar_prefetch = 0 : i64, scratch_operands = 0 : i64, tpu.core_type = #tpu.core_type<tc>, window_params = [{transform_indices = @transform_0, window_bounds = array<i64: 1, 64, 3>}, {transform_indices = @transform_1, window_bounds = array<i64: 1, 64, 8>}, {transform_indices = @transform_2, window_bounds = array<i64: 1, 8, 64>}, {pipeline_mode = #tpu.pipeline_mode<synchronous>, transform_indices = @transform_3, window_bounds = array<i64: 3, 16>}, {pipeline_mode = #tpu.pipeline_mode<synchronous>, transform_indices = @transform_4, window_bounds = array<i64: 16, 48>}, {pipeline_mode = #tpu.pipeline_mode<synchronous>, transform_indices = @transform_5, window_bounds = array<i64: 48, 64>}, {pipeline_mode = #tpu.pipeline_mode<synchronous>, transform_indices = @transform_6, window_bounds = array<i64: 1, 64>}, {pipeline_mode = #tpu.pipeline_mode<synchronous>, transform_indices = @transform_7, window_bounds = array<i64: 64, 64>}, {pipeline_mode = #tpu.pipeline_mode<synchronous>, transform_indices = @transform_8, window_bounds = array<i64: 1, 64>}, {pipeline_mode = #tpu.pipeline_mode<synchronous>, transform_indices = @transform_9, window_bounds = array<i64: 64, 64>}, {pipeline_mode = #tpu.pipeline_mode<synchronous>, transform_indices = @transform_10, window_bounds = array<i64: 1, 64>}, {transform_indices = @transform_11, window_bounds = array<i64: 1, 64, 128>}]} {
    %c0 = arith.constant 0 : index
    %c0_0 = arith.constant 0 : index
    %c0_1 = arith.constant 0 : index
    %0 = vector.load %arg2[%c0, %c0_0, %c0_1] : memref<1x64x3xf32, #tpu.memory_space<vmem>>, vector<1x64x3xf32>
    %1 = vector.shape_cast %0 : vector<1x64x3xf32> to vector<64x3xf32>
    %c0_2 = arith.constant 0 : index
    %c0_3 = arith.constant 0 : index
    %2 = vector.load %arg5[%c0_2, %c0_3] : memref<3x16xf32, #tpu.memory_space<vmem>>, vector<3x16xf32>
    %3 = vector.extract_strided_slice %1 {offsets = [0, 0], sizes = [64, 1], strides = [1, 1]} : vector<64x3xf32> to vector<64x1xf32>
    %4 = vector.extract_strided_slice %2 {offsets = [0, 0], sizes = [1, 16], strides = [1, 1]} : vector<3x16xf32> to vector<1x16xf32>
    %5 = vector.broadcast %3 : vector<64x1xf32> to vector<64x16xf32>
    %6 = vector.broadcast %4 : vector<1x16xf32> to vector<64x16xf32>
    %7 = arith.mulf %5, %6 : vector<64x16xf32>
    %8 = vector.extract_strided_slice %1 {offsets = [0, 1], sizes = [64, 1], strides = [1, 1]} : vector<64x3xf32> to vector<64x1xf32>
    %9 = vector.extract_strided_slice %2 {offsets = [1, 0], sizes = [1, 16], strides = [1, 1]} : vector<3x16xf32> to vector<1x16xf32>
    %10 = vector.broadcast %8 : vector<64x1xf32> to vector<64x16xf32>
    %11 = vector.broadcast %9 : vector<1x16xf32> to vector<64x16xf32>
    %12 = arith.mulf %10, %11 : vector<64x16xf32>
    %13 = arith.addf %7, %12 : vector<64x16xf32>
    %14 = vector.extract_strided_slice %1 {offsets = [0, 2], sizes = [64, 1], strides = [1, 1]} : vector<64x3xf32> to vector<64x1xf32>
    %15 = vector.extract_strided_slice %2 {offsets = [2, 0], sizes = [1, 16], strides = [1, 1]} : vector<3x16xf32> to vector<1x16xf32>
    %16 = vector.broadcast %14 : vector<64x1xf32> to vector<64x16xf32>
    %17 = vector.broadcast %15 : vector<1x16xf32> to vector<64x16xf32>
    %18 = arith.mulf %16, %17 : vector<64x16xf32>
    %19 = arith.addf %13, %18 : vector<64x16xf32>
    %cst = arith.constant 0.000000e+00 : f32
    %20 = vector.broadcast %cst : f32 to vector<64x16xf32>
    %21 = arith.maximumf %19, %20 : vector<64x16xf32>
    %22 = arith.truncf %21 : vector<64x16xf32> to vector<64x16xbf16>
    %c0_4 = arith.constant 0 : index
    %c0_5 = arith.constant 0 : index
    %23 = vector.load %arg6[%c0_4, %c0_5] : memref<16x48xbf16, #tpu.memory_space<vmem>>, vector<16x48xbf16>
    %cst_6 = arith.constant dense<0.000000e+00> : vector<64x48xf32>
    %24 = tpu.matmul %22, %23, %cst_6 {dimension_numbers = #tpu.dot_dimension_numbers<[1], [0], [0], [1], [0, 0, 1, 1], [], []>} : vector<64x16xbf16>, vector<16x48xbf16>, vector<64x48xf32> -> vector<64x48xf32>
    %cst_7 = arith.constant 0.000000e+00 : f32
    %25 = vector.broadcast %cst_7 : f32 to vector<64x48xf32>
    %26 = arith.maximumf %24, %25 : vector<64x48xf32>
    %27 = arith.truncf %26 : vector<64x48xf32> to vector<64x48xbf16>
    %c0_8 = arith.constant 0 : index
    %c0_9 = arith.constant 0 : index
    %28 = vector.load %arg7[%c0_8, %c0_9] : memref<48x64xbf16, #tpu.memory_space<vmem>>, vector<48x64xbf16>
    %cst_10 = arith.constant dense<0.000000e+00> : vector<64x64xf32>
    %29 = tpu.matmul %27, %28, %cst_10 {dimension_numbers = #tpu.dot_dimension_numbers<[1], [0], [0], [1], [0, 0, 1, 1], [], []>} : vector<64x48xbf16>, vector<48x64xbf16>, vector<64x64xf32> -> vector<64x64xf32>
    %c0_11 = arith.constant 0 : index
    %c0_12 = arith.constant 0 : index
    %30 = vector.load %arg8[%c0_11, %c0_12] : memref<1x64xf32, #tpu.memory_space<vmem>>, vector<1x64xf32>
    %31 = vector.broadcast %30 : vector<1x64xf32> to vector<64x64xf32>
    %32 = arith.addf %29, %31 : vector<64x64xf32>
    %33 = arith.truncf %32 : vector<64x64xf32> to vector<64x64xbf16>
    %c0_13 = arith.constant 0 : index
    %c0_14 = arith.constant 0 : index
    %34 = vector.load %arg9[%c0_13, %c0_14] : memref<64x64xbf16, #tpu.memory_space<vmem>>, vector<64x64xbf16>
    %cst_15 = arith.constant dense<0.000000e+00> : vector<64x64xf32>
    %35 = tpu.matmul %33, %34, %cst_15 {dimension_numbers = #tpu.dot_dimension_numbers<[1], [0], [0], [1], [0, 0, 1, 1], [], []>} : vector<64x64xbf16>, vector<64x64xbf16>, vector<64x64xf32> -> vector<64x64xf32>
    %c0_16 = arith.constant 0 : index
    %c0_17 = arith.constant 0 : index
    %36 = vector.load %arg10[%c0_16, %c0_17] : memref<1x64xf32, #tpu.memory_space<vmem>>, vector<1x64xf32>
    %37 = vector.broadcast %36 : vector<1x64xf32> to vector<64x64xf32>
    %38 = arith.addf %35, %37 : vector<64x64xf32>
    %39 = arith.truncf %38 : vector<64x64xf32> to vector<64x64xbf16>
    %c0_18 = arith.constant 0 : index
    %c0_19 = arith.constant 0 : index
    %c0_20 = arith.constant 0 : index
    %40 = vector.load %arg3[%c0_18, %c0_19, %c0_20] : memref<1x64x8xbf16, #tpu.memory_space<vmem>>, vector<1x64x8xbf16>
    %41 = vector.shape_cast %40 : vector<1x64x8xbf16> to vector<64x8xbf16>
    %cst_21 = arith.constant dense<0.000000e+00> : vector<64x8xf32>
    %42 = tpu.matmul %39, %41, %cst_21 {dimension_numbers = #tpu.dot_dimension_numbers<[1], [0], [0], [1], [0, 0, 1, 1], [], []>} : vector<64x64xbf16>, vector<64x8xbf16>, vector<64x8xf32> -> vector<64x8xf32>
    %43 = tpu.iota {dimensions = array<i32: 1>} : vector<64x8xi32>
    %cst_22 = arith.constant -1.000000e+30 : f32
    %44 = vector.broadcast %cst_22 : f32 to vector<64x8xf32>
    %c0_i32 = arith.constant 0 : i32
    %45 = vector.broadcast %c0_i32 : i32 to vector<64x8xi32>
    %46 = arith.cmpi sge, %43, %45 : vector<64x8xi32>
    %c4_i32 = arith.constant 4 : i32
    %47 = vector.broadcast %c4_i32 : i32 to vector<64x8xi32>
    %48 = arith.cmpi slt, %43, %47 : vector<64x8xi32>
    %49 = arith.andi %46, %48 : vector<64x8xi1>
    %cst_23 = arith.constant -1.000000e+30 : f32
    %50 = vector.broadcast %cst_23 : f32 to vector<64x8xf32>
    %51 = arith.select %49, %42, %50 : vector<64x8xi1>, vector<64x8xf32>
    %cst_24 = arith.constant dense<0xFF800000> : vector<64xf32>
    %52 = vector.multi_reduction <maximumf>, %51, %cst_24 [1] : vector<64x8xf32> to vector<64xf32>
    %53 = vector.shape_cast %52 : vector<64xf32> to vector<64x1xf32>
    %54 = vector.shape_cast %53 : vector<64x1xf32> to vector<64x1xf32>
    %55 = vector.broadcast %54 : vector<64x1xf32> to vector<64x8xf32>
    %56 = arith.select %49, %55, %44 : vector<64x8xi1>, vector<64x8xf32>
    %c4_i32_25 = arith.constant 4 : i32
    %57 = vector.broadcast %c4_i32_25 : i32 to vector<64x8xi32>
    %58 = arith.cmpi sge, %43, %57 : vector<64x8xi32>
    %c8_i32 = arith.constant 8 : i32
    %59 = vector.broadcast %c8_i32 : i32 to vector<64x8xi32>
    %60 = arith.cmpi slt, %43, %59 : vector<64x8xi32>
    %61 = arith.andi %58, %60 : vector<64x8xi1>
    %cst_26 = arith.constant -1.000000e+30 : f32
    %62 = vector.broadcast %cst_26 : f32 to vector<64x8xf32>
    %63 = arith.select %61, %42, %62 : vector<64x8xi1>, vector<64x8xf32>
    %cst_27 = arith.constant dense<0xFF800000> : vector<64xf32>
    %64 = vector.multi_reduction <maximumf>, %63, %cst_27 [1] : vector<64x8xf32> to vector<64xf32>
    %65 = vector.shape_cast %64 : vector<64xf32> to vector<64x1xf32>
    %66 = vector.shape_cast %65 : vector<64x1xf32> to vector<64x1xf32>
    %67 = vector.broadcast %66 : vector<64x1xf32> to vector<64x8xf32>
    %68 = arith.select %61, %67, %56 : vector<64x8xi1>, vector<64x8xf32>
    %69 = arith.subf %42, %68 : vector<64x8xf32>
    %70 = math.exp %69 : vector<64x8xf32>
    %cst_28 = arith.constant 0.000000e+00 : f32
    %71 = vector.broadcast %cst_28 : f32 to vector<64x8xf32>
    %c0_i32_29 = arith.constant 0 : i32
    %72 = vector.broadcast %c0_i32_29 : i32 to vector<64x8xi32>
    %73 = arith.cmpi sge, %43, %72 : vector<64x8xi32>
    %c4_i32_30 = arith.constant 4 : i32
    %74 = vector.broadcast %c4_i32_30 : i32 to vector<64x8xi32>
    %75 = arith.cmpi slt, %43, %74 : vector<64x8xi32>
    %76 = arith.andi %73, %75 : vector<64x8xi1>
    %cst_31 = arith.constant 0.000000e+00 : f32
    %77 = vector.broadcast %cst_31 : f32 to vector<64x8xf32>
    %78 = arith.select %76, %70, %77 : vector<64x8xi1>, vector<64x8xf32>
    %cst_32 = arith.constant dense<0.000000e+00> : vector<64xf32>
    %79 = vector.multi_reduction <add>, %78, %cst_32 [1] : vector<64x8xf32> to vector<64xf32>
    %80 = vector.shape_cast %79 : vector<64xf32> to vector<64x1xf32>
    %81 = tpu.reciprocal %80 {approx = true} : vector<64x1xf32> -> vector<64x1xf32>
    %82 = vector.shape_cast %81 : vector<64x1xf32> to vector<64x1xf32>
    %83 = vector.broadcast %82 : vector<64x1xf32> to vector<64x8xf32>
    %84 = arith.select %76, %83, %71 : vector<64x8xi1>, vector<64x8xf32>
    %c4_i32_33 = arith.constant 4 : i32
    %85 = vector.broadcast %c4_i32_33 : i32 to vector<64x8xi32>
    %86 = arith.cmpi sge, %43, %85 : vector<64x8xi32>
    %c8_i32_34 = arith.constant 8 : i32
    %87 = vector.broadcast %c8_i32_34 : i32 to vector<64x8xi32>
    %88 = arith.cmpi slt, %43, %87 : vector<64x8xi32>
    %89 = arith.andi %86, %88 : vector<64x8xi1>
    %cst_35 = arith.constant 0.000000e+00 : f32
    %90 = vector.broadcast %cst_35 : f32 to vector<64x8xf32>
    %91 = arith.select %89, %70, %90 : vector<64x8xi1>, vector<64x8xf32>
    %cst_36 = arith.constant dense<0.000000e+00> : vector<64xf32>
    %92 = vector.multi_reduction <add>, %91, %cst_36 [1] : vector<64x8xf32> to vector<64xf32>
    %93 = vector.shape_cast %92 : vector<64xf32> to vector<64x1xf32>
    %94 = tpu.reciprocal %93 {approx = true} : vector<64x1xf32> -> vector<64x1xf32>
    %95 = vector.shape_cast %94 : vector<64x1xf32> to vector<64x1xf32>
    %96 = vector.broadcast %95 : vector<64x1xf32> to vector<64x8xf32>
    %97 = arith.select %89, %96, %84 : vector<64x8xi1>, vector<64x8xf32>
    %98 = arith.mulf %70, %97 : vector<64x8xf32>
    %99 = arith.truncf %98 : vector<64x8xf32> to vector<64x8xbf16>
    %c0_37 = arith.constant 0 : index
    %c0_38 = arith.constant 0 : index
    %c0_39 = arith.constant 0 : index
    %100 = vector.load %arg4[%c0_37, %c0_38, %c0_39] : memref<1x8x64xbf16, #tpu.memory_space<vmem>>, vector<1x8x64xbf16>
    %101 = vector.shape_cast %100 : vector<1x8x64xbf16> to vector<8x64xbf16>
    %cst_40 = arith.constant dense<0.000000e+00> : vector<64x64xf32>
    %102 = tpu.matmul %99, %101, %cst_40 {dimension_numbers = #tpu.dot_dimension_numbers<[1], [0], [0], [1], [0, 0, 1, 1], [], []>} : vector<64x8xbf16>, vector<8x64xbf16>, vector<64x64xf32> -> vector<64x64xf32>
    %103 = arith.truncf %102 : vector<64x64xf32> to vector<64x64xbf16>
    %c0_41 = arith.constant 0 : index
    %c0_42 = arith.constant 0 : index
    %104 = vector.load %arg11[%c0_41, %c0_42] : memref<64x64xbf16, #tpu.memory_space<vmem>>, vector<64x64xbf16>
    %cst_43 = arith.constant dense<0.000000e+00> : vector<64x64xf32>
    %105 = tpu.matmul %103, %104, %cst_43 {dimension_numbers = #tpu.dot_dimension_numbers<[1], [0], [0], [1], [0, 0, 1, 1], [], []>} : vector<64x64xbf16>, vector<64x64xbf16>, vector<64x64xf32> -> vector<64x64xf32>
    %c0_44 = arith.constant 0 : index
    %c0_45 = arith.constant 0 : index
    %106 = vector.load %arg12[%c0_44, %c0_45] : memref<1x64xf32, #tpu.memory_space<vmem>>, vector<1x64xf32>
    %107 = vector.broadcast %106 : vector<1x64xf32> to vector<64x64xf32>
    %108 = arith.addf %105, %107 : vector<64x64xf32>
    %109 = tpu.concatenate %108, %32 in 1 : vector<64x64xf32>, vector<64x64xf32> -> vector<64x128xf32>
    %110 = arith.truncf %109 : vector<64x128xf32> to vector<64x128xbf16>
    %c0_46 = arith.constant 0 : index
    %c0_47 = arith.constant 0 : index
    %c0_48 = arith.constant 0 : index
    %111 = vector.load %arg13[%c0_46, %c0_47, %c0_48] : memref<1x64x128xbf16, #tpu.memory_space<vmem>>, vector<1x64x128xbf16>
    %112 = vector.shape_cast %111 : vector<1x64x128xbf16> to vector<64x128xbf16>
    %113 = vector.shape_cast %110 : vector<64x128xbf16> to vector<1x64x128xbf16>
    tpu.vector_store %arg13[%c0_46, %c0_47, %c0_48], %113 {strides = array<i32>} : memref<1x64x128xbf16, #tpu.memory_space<vmem>>, vector<1x64x128xbf16>,
    return
  }
  func.func @transform_0(%arg0: i32, %arg1: i32) -> (i32, i32, i32) {
    %c0_i32 = arith.constant 0 : i32
    %c0_i32_0 = arith.constant 0 : i32
    return %arg0, %arg1, %c0_i32 : i32, i32, i32
  }
  func.func @transform_1(%arg0: i32, %arg1: i32) -> (i32, i32, i32) {
    %c0_i32 = arith.constant 0 : i32
    %c0_i32_0 = arith.constant 0 : i32
    %c0_i32_1 = arith.constant 0 : i32
    return %arg0, %c0_i32, %c0_i32_0 : i32, i32, i32
  }
  func.func @transform_2(%arg0: i32, %arg1: i32) -> (i32, i32, i32) {
    %c0_i32 = arith.constant 0 : i32
    %c0_i32_0 = arith.constant 0 : i32
    %c0_i32_1 = arith.constant 0 : i32
    return %arg0, %c0_i32, %c0_i32_0 : i32, i32, i32
  }
  func.func @transform_3(%arg0: i32, %arg1: i32) -> (i32, i32) {
    %c0_i32 = arith.constant 0 : i32
    %c0_i32_0 = arith.constant 0 : i32
    %c0_i32_1 = arith.constant 0 : i32
    return %c0_i32, %c0_i32_0 : i32, i32
  }
  func.func @transform_4(%arg0: i32, %arg1: i32) -> (i32, i32) {
    %c0_i32 = arith.constant 0 : i32
    %c0_i32_0 = arith.constant 0 : i32
    %c0_i32_1 = arith.constant 0 : i32
    return %c0_i32, %c0_i32_0 : i32, i32
  }
  func.func @transform_5(%arg0: i32, %arg1: i32) -> (i32, i32) {
    %c0_i32 = arith.constant 0 : i32
    %c0_i32_0 = arith.constant 0 : i32
    %c0_i32_1 = arith.constant 0 : i32
    return %c0_i32, %c0_i32_0 : i32, i32
  }
  func.func @transform_6(%arg0: i32, %arg1: i32) -> (i32, i32) {
    %c0_i32 = arith.constant 0 : i32
    %c0_i32_0 = arith.constant 0 : i32
    %c0_i32_1 = arith.constant 0 : i32
    return %c0_i32, %c0_i32_0 : i32, i32
  }
  func.func @transform_7(%arg0: i32, %arg1: i32) -> (i32, i32) {
    %c0_i32 = arith.constant 0 : i32
    %c0_i32_0 = arith.constant 0 : i32
    %c0_i32_1 = arith.constant 0 : i32
    return %c0_i32, %c0_i32_0 : i32, i32
  }
  func.func @transform_8(%arg0: i32, %arg1: i32) -> (i32, i32) {
    %c0_i32 = arith.constant 0 : i32
    %c0_i32_0 = arith.constant 0 : i32
    %c0_i32_1 = arith.constant 0 : i32
    return %c0_i32, %c0_i32_0 : i32, i32
  }
  func.func @transform_9(%arg0: i32, %arg1: i32) -> (i32, i32) {
    %c0_i32 = arith.constant 0 : i32
    %c0_i32_0 = arith.constant 0 : i32
    %c0_i32_1 = arith.constant 0 : i32
    return %c0_i32, %c0_i32_0 : i32, i32
  }
  func.func @transform_10(%arg0: i32, %arg1: i32) -> (i32, i32) {
    %c0_i32 = arith.constant 0 : i32
    %c0_i32_0 = arith.constant 0 : i32
    %c0_i32_1 = arith.constant 0 : i32
    return %c0_i32, %c0_i32_0 : i32, i32
  }
  func.func @transform_11(%arg0: i32, %arg1: i32) -> (i32, i32, i32) {
    %c0_i32 = arith.constant 0 : i32
    %c0_i32_0 = arith.constant 0 : i32
    return %arg0, %arg1, %c0_i32 : i32, i32, i32
  }
}

module attributes {stable_mosaic.version = 11 : i64} {
  func.func @kernel(%arg0: i32, %arg1: i32, %arg2: memref<1x16x3xf32, #tpu.memory_space<vmem>>, %arg3: memref<1x64x8xbf16, #tpu.memory_space<vmem>>, %arg4: memref<1x8x64xbf16, #tpu.memory_space<vmem>>, %arg5: memref<3x32xf32, #tpu.memory_space<vmem>>, %arg6: memref<32x96xbf16, #tpu.memory_space<vmem>>, %arg7: memref<96x64xbf16, #tpu.memory_space<vmem>>, %arg8: memref<1x64xf32, #tpu.memory_space<vmem>>, %arg9: memref<64x64xbf16, #tpu.memory_space<vmem>>, %arg10: memref<1x64xf32, #tpu.memory_space<vmem>>, %arg11: memref<64x64xbf16, #tpu.memory_space<vmem>>, %arg12: memref<1x64xf32, #tpu.memory_space<vmem>>, %arg13: memref<1x16x128xbf16, #tpu.memory_space<vmem>>) attributes {dimension_semantics = [#tpu.dimension_semantics<parallel>, #tpu.dimension_semantics<parallel>], iteration_bounds = array<i64: 2, 1>, scalar_prefetch = 0 : i64, scratch_operands = 0 : i64, tpu.core_type = #tpu.core_type<tc>, window_params = [{transform_indices = @transform_0, window_bounds = array<i64: 1, 16, 3>}, {transform_indices = @transform_1, window_bounds = array<i64: 1, 64, 8>}, {transform_indices = @transform_2, window_bounds = array<i64: 1, 8, 64>}, {pipeline_mode = #tpu.pipeline_mode<synchronous>, transform_indices = @transform_3, window_bounds = array<i64: 3, 32>}, {pipeline_mode = #tpu.pipeline_mode<synchronous>, transform_indices = @transform_4, window_bounds = array<i64: 32, 96>}, {pipeline_mode = #tpu.pipeline_mode<synchronous>, transform_indices = @transform_5, window_bounds = array<i64: 96, 64>}, {pipeline_mode = #tpu.pipeline_mode<synchronous>, transform_indices = @transform_6, window_bounds = array<i64: 1, 64>}, {pipeline_mode = #tpu.pipeline_mode<synchronous>, transform_indices = @transform_7, window_bounds = array<i64: 64, 64>}, {pipeline_mode = #tpu.pipeline_mode<synchronous>, transform_indices = @transform_8, window_bounds = array<i64: 1, 64>}, {pipeline_mode = #tpu.pipeline_mode<synchronous>, transform_indices = @transform_9, window_bounds = array<i64: 64, 64>}, {pipeline_mode = #tpu.pipeline_mode<synchronous>, transform_indices = @transform_10, window_bounds = array<i64: 1, 64>}, {transform_indices = @transform_11, window_bounds = array<i64: 1, 16, 128>}]} {
    %c0 = arith.constant 0 : index
    %c0_0 = arith.constant 0 : index
    %c0_1 = arith.constant 0 : index
    %0 = vector.load %arg2[%c0, %c0_0, %c0_1] : memref<1x16x3xf32, #tpu.memory_space<vmem>>, vector<1x16x3xf32>
    %1 = vector.shape_cast %0 : vector<1x16x3xf32> to vector<16x3xf32>
    %c0_2 = arith.constant 0 : index
    %c0_3 = arith.constant 0 : index
    %2 = vector.load %arg5[%c0_2, %c0_3] : memref<3x32xf32, #tpu.memory_space<vmem>>, vector<3x32xf32>
    %3 = vector.extract_strided_slice %1 {offsets = [0, 0], sizes = [16, 1], strides = [1, 1]} : vector<16x3xf32> to vector<16x1xf32>
    %4 = vector.extract_strided_slice %2 {offsets = [0, 0], sizes = [1, 32], strides = [1, 1]} : vector<3x32xf32> to vector<1x32xf32>
    %5 = vector.broadcast %3 : vector<16x1xf32> to vector<16x32xf32>
    %6 = vector.broadcast %4 : vector<1x32xf32> to vector<16x32xf32>
    %7 = arith.mulf %5, %6 : vector<16x32xf32>
    %8 = vector.extract_strided_slice %1 {offsets = [0, 1], sizes = [16, 1], strides = [1, 1]} : vector<16x3xf32> to vector<16x1xf32>
    %9 = vector.extract_strided_slice %2 {offsets = [1, 0], sizes = [1, 32], strides = [1, 1]} : vector<3x32xf32> to vector<1x32xf32>
    %10 = vector.broadcast %8 : vector<16x1xf32> to vector<16x32xf32>
    %11 = vector.broadcast %9 : vector<1x32xf32> to vector<16x32xf32>
    %12 = arith.mulf %10, %11 : vector<16x32xf32>
    %13 = arith.addf %7, %12 : vector<16x32xf32>
    %14 = vector.extract_strided_slice %1 {offsets = [0, 2], sizes = [16, 1], strides = [1, 1]} : vector<16x3xf32> to vector<16x1xf32>
    %15 = vector.extract_strided_slice %2 {offsets = [2, 0], sizes = [1, 32], strides = [1, 1]} : vector<3x32xf32> to vector<1x32xf32>
    %16 = vector.broadcast %14 : vector<16x1xf32> to vector<16x32xf32>
    %17 = vector.broadcast %15 : vector<1x32xf32> to vector<16x32xf32>
    %18 = arith.mulf %16, %17 : vector<16x32xf32>
    %19 = arith.addf %13, %18 : vector<16x32xf32>
    %cst = arith.constant 0.000000e+00 : f32
    %20 = vector.broadcast %cst : f32 to vector<16x32xf32>
    %21 = arith.maximumf %19, %20 : vector<16x32xf32>
    %22 = arith.truncf %21 : vector<16x32xf32> to vector<16x32xbf16>
    %c0_4 = arith.constant 0 : index
    %c0_5 = arith.constant 0 : index
    %23 = vector.load %arg6[%c0_4, %c0_5] : memref<32x96xbf16, #tpu.memory_space<vmem>>, vector<32x96xbf16>
    %cst_6 = arith.constant dense<0.000000e+00> : vector<16x96xf32>
    %24 = tpu.matmul %22, %23, %cst_6 {dimension_numbers = #tpu.dot_dimension_numbers<[1], [0], [0], [1], [0, 0, 1, 1], [], []>} : vector<16x32xbf16>, vector<32x96xbf16>, vector<16x96xf32> -> vector<16x96xf32>
    %cst_7 = arith.constant 0.000000e+00 : f32
    %25 = vector.broadcast %cst_7 : f32 to vector<16x96xf32>
    %26 = arith.maximumf %24, %25 : vector<16x96xf32>
    %27 = arith.truncf %26 : vector<16x96xf32> to vector<16x96xbf16>
    %c0_8 = arith.constant 0 : index
    %c0_9 = arith.constant 0 : index
    %28 = vector.load %arg7[%c0_8, %c0_9] : memref<96x64xbf16, #tpu.memory_space<vmem>>, vector<96x64xbf16>
    %cst_10 = arith.constant dense<0.000000e+00> : vector<16x64xf32>
    %29 = tpu.matmul %27, %28, %cst_10 {dimension_numbers = #tpu.dot_dimension_numbers<[1], [0], [0], [1], [0, 0, 1, 1], [], []>} : vector<16x96xbf16>, vector<96x64xbf16>, vector<16x64xf32> -> vector<16x64xf32>
    %c0_11 = arith.constant 0 : index
    %c0_12 = arith.constant 0 : index
    %30 = vector.load %arg8[%c0_11, %c0_12] : memref<1x64xf32, #tpu.memory_space<vmem>>, vector<1x64xf32>
    %31 = vector.broadcast %30 : vector<1x64xf32> to vector<16x64xf32>
    %32 = arith.addf %29, %31 : vector<16x64xf32>
    %33 = arith.truncf %32 : vector<16x64xf32> to vector<16x64xbf16>
    %c0_13 = arith.constant 0 : index
    %c0_14 = arith.constant 0 : index
    %34 = vector.load %arg9[%c0_13, %c0_14] : memref<64x64xbf16, #tpu.memory_space<vmem>>, vector<64x64xbf16>
    %cst_15 = arith.constant dense<0.000000e+00> : vector<16x64xf32>
    %35 = tpu.matmul %33, %34, %cst_15 {dimension_numbers = #tpu.dot_dimension_numbers<[1], [0], [0], [1], [0, 0, 1, 1], [], []>} : vector<16x64xbf16>, vector<64x64xbf16>, vector<16x64xf32> -> vector<16x64xf32>
    %c0_16 = arith.constant 0 : index
    %c0_17 = arith.constant 0 : index
    %36 = vector.load %arg10[%c0_16, %c0_17] : memref<1x64xf32, #tpu.memory_space<vmem>>, vector<1x64xf32>
    %37 = vector.broadcast %36 : vector<1x64xf32> to vector<16x64xf32>
    %38 = arith.addf %35, %37 : vector<16x64xf32>
    %39 = arith.truncf %38 : vector<16x64xf32> to vector<16x64xbf16>
    %c0_18 = arith.constant 0 : index
    %c0_19 = arith.constant 0 : index
    %c0_20 = arith.constant 0 : index
    %40 = vector.load %arg3[%c0_18, %c0_19, %c0_20] : memref<1x64x8xbf16, #tpu.memory_space<vmem>>, vector<1x64x8xbf16>
    %41 = vector.shape_cast %40 : vector<1x64x8xbf16> to vector<64x8xbf16>
    %cst_21 = arith.constant dense<0.000000e+00> : vector<16x8xf32>
    %42 = tpu.matmul %39, %41, %cst_21 {dimension_numbers = #tpu.dot_dimension_numbers<[1], [0], [0], [1], [0, 0, 1, 1], [], []>} : vector<16x64xbf16>, vector<64x8xbf16>, vector<16x8xf32> -> vector<16x8xf32>
    %43 = tpu.iota {dimensions = array<i32: 1>} : vector<16x8xi32>
    %cst_22 = arith.constant -1.000000e+30 : f32
    %44 = vector.broadcast %cst_22 : f32 to vector<16x8xf32>
    %c0_i32 = arith.constant 0 : i32
    %45 = vector.broadcast %c0_i32 : i32 to vector<16x8xi32>
    %46 = arith.cmpi sge, %43, %45 : vector<16x8xi32>
    %c4_i32 = arith.constant 4 : i32
    %47 = vector.broadcast %c4_i32 : i32 to vector<16x8xi32>
    %48 = arith.cmpi slt, %43, %47 : vector<16x8xi32>
    %49 = arith.andi %46, %48 : vector<16x8xi1>
    %cst_23 = arith.constant -1.000000e+30 : f32
    %50 = vector.broadcast %cst_23 : f32 to vector<16x8xf32>
    %51 = arith.select %49, %42, %50 : vector<16x8xi1>, vector<16x8xf32>
    %cst_24 = arith.constant dense<0xFF800000> : vector<16xf32>
    %52 = vector.multi_reduction <maximumf>, %51, %cst_24 [1] : vector<16x8xf32> to vector<16xf32>
    %53 = vector.shape_cast %52 : vector<16xf32> to vector<16x1xf32>
    %54 = vector.shape_cast %53 : vector<16x1xf32> to vector<16x1xf32>
    %55 = vector.broadcast %54 : vector<16x1xf32> to vector<16x8xf32>
    %56 = arith.select %49, %55, %44 : vector<16x8xi1>, vector<16x8xf32>
    %c4_i32_25 = arith.constant 4 : i32
    %57 = vector.broadcast %c4_i32_25 : i32 to vector<16x8xi32>
    %58 = arith.cmpi sge, %43, %57 : vector<16x8xi32>
    %c8_i32 = arith.constant 8 : i32
    %59 = vector.broadcast %c8_i32 : i32 to vector<16x8xi32>
    %60 = arith.cmpi slt, %43, %59 : vector<16x8xi32>
    %61 = arith.andi %58, %60 : vector<16x8xi1>
    %cst_26 = arith.constant -1.000000e+30 : f32
    %62 = vector.broadcast %cst_26 : f32 to vector<16x8xf32>
    %63 = arith.select %61, %42, %62 : vector<16x8xi1>, vector<16x8xf32>
    %cst_27 = arith.constant dense<0xFF800000> : vector<16xf32>
    %64 = vector.multi_reduction <maximumf>, %63, %cst_27 [1] : vector<16x8xf32> to vector<16xf32>
    %65 = vector.shape_cast %64 : vector<16xf32> to vector<16x1xf32>
    %66 = vector.shape_cast %65 : vector<16x1xf32> to vector<16x1xf32>
    %67 = vector.broadcast %66 : vector<16x1xf32> to vector<16x8xf32>
    %68 = arith.select %61, %67, %56 : vector<16x8xi1>, vector<16x8xf32>
    %69 = arith.subf %42, %68 : vector<16x8xf32>
    %70 = math.exp %69 : vector<16x8xf32>
    %cst_28 = arith.constant 0.000000e+00 : f32
    %71 = vector.broadcast %cst_28 : f32 to vector<16x8xf32>
    %c0_i32_29 = arith.constant 0 : i32
    %72 = vector.broadcast %c0_i32_29 : i32 to vector<16x8xi32>
    %73 = arith.cmpi sge, %43, %72 : vector<16x8xi32>
    %c4_i32_30 = arith.constant 4 : i32
    %74 = vector.broadcast %c4_i32_30 : i32 to vector<16x8xi32>
    %75 = arith.cmpi slt, %43, %74 : vector<16x8xi32>
    %76 = arith.andi %73, %75 : vector<16x8xi1>
    %cst_31 = arith.constant 0.000000e+00 : f32
    %77 = vector.broadcast %cst_31 : f32 to vector<16x8xf32>
    %78 = arith.select %76, %70, %77 : vector<16x8xi1>, vector<16x8xf32>
    %cst_32 = arith.constant dense<0.000000e+00> : vector<16xf32>
    %79 = vector.multi_reduction <add>, %78, %cst_32 [1] : vector<16x8xf32> to vector<16xf32>
    %80 = vector.shape_cast %79 : vector<16xf32> to vector<16x1xf32>
    %81 = tpu.reciprocal %80 {approx = true} : vector<16x1xf32> -> vector<16x1xf32>
    %82 = vector.shape_cast %81 : vector<16x1xf32> to vector<16x1xf32>
    %83 = vector.broadcast %82 : vector<16x1xf32> to vector<16x8xf32>
    %84 = arith.select %76, %83, %71 : vector<16x8xi1>, vector<16x8xf32>
    %c4_i32_33 = arith.constant 4 : i32
    %85 = vector.broadcast %c4_i32_33 : i32 to vector<16x8xi32>
    %86 = arith.cmpi sge, %43, %85 : vector<16x8xi32>
    %c8_i32_34 = arith.constant 8 : i32
    %87 = vector.broadcast %c8_i32_34 : i32 to vector<16x8xi32>
    %88 = arith.cmpi slt, %43, %87 : vector<16x8xi32>
    %89 = arith.andi %86, %88 : vector<16x8xi1>
    %cst_35 = arith.constant 0.000000e+00 : f32
    %90 = vector.broadcast %cst_35 : f32 to vector<16x8xf32>
    %91 = arith.select %89, %70, %90 : vector<16x8xi1>, vector<16x8xf32>
    %cst_36 = arith.constant dense<0.000000e+00> : vector<16xf32>
    %92 = vector.multi_reduction <add>, %91, %cst_36 [1] : vector<16x8xf32> to vector<16xf32>
    %93 = vector.shape_cast %92 : vector<16xf32> to vector<16x1xf32>
    %94 = tpu.reciprocal %93 {approx = true} : vector<16x1xf32> -> vector<16x1xf32>
    %95 = vector.shape_cast %94 : vector<16x1xf32> to vector<16x1xf32>
    %96 = vector.broadcast %95 : vector<16x1xf32> to vector<16x8xf32>
    %97 = arith.select %89, %96, %84 : vector<16x8xi1>, vector<16x8xf32>
    %98 = arith.mulf %70, %97 : vector<16x8xf32>
    %99 = arith.truncf %98 : vector<16x8xf32> to vector<16x8xbf16>
    %c0_37 = arith.constant 0 : index
    %c0_38 = arith.constant 0 : index
    %c0_39 = arith.constant 0 : index
    %100 = vector.load %arg4[%c0_37, %c0_38, %c0_39] : memref<1x8x64xbf16, #tpu.memory_space<vmem>>, vector<1x8x64xbf16>
    %101 = vector.shape_cast %100 : vector<1x8x64xbf16> to vector<8x64xbf16>
    %cst_40 = arith.constant dense<0.000000e+00> : vector<16x64xf32>
    %102 = tpu.matmul %99, %101, %cst_40 {dimension_numbers = #tpu.dot_dimension_numbers<[1], [0], [0], [1], [0, 0, 1, 1], [], []>} : vector<16x8xbf16>, vector<8x64xbf16>, vector<16x64xf32> -> vector<16x64xf32>
    %103 = arith.truncf %102 : vector<16x64xf32> to vector<16x64xbf16>
    %c0_41 = arith.constant 0 : index
    %c0_42 = arith.constant 0 : index
    %104 = vector.load %arg11[%c0_41, %c0_42] : memref<64x64xbf16, #tpu.memory_space<vmem>>, vector<64x64xbf16>
    %cst_43 = arith.constant dense<0.000000e+00> : vector<16x64xf32>
    %105 = tpu.matmul %103, %104, %cst_43 {dimension_numbers = #tpu.dot_dimension_numbers<[1], [0], [0], [1], [0, 0, 1, 1], [], []>} : vector<16x64xbf16>, vector<64x64xbf16>, vector<16x64xf32> -> vector<16x64xf32>
    %c0_44 = arith.constant 0 : index
    %c0_45 = arith.constant 0 : index
    %106 = vector.load %arg12[%c0_44, %c0_45] : memref<1x64xf32, #tpu.memory_space<vmem>>, vector<1x64xf32>
    %107 = vector.broadcast %106 : vector<1x64xf32> to vector<16x64xf32>
    %108 = arith.addf %105, %107 : vector<16x64xf32>
    %109 = tpu.concatenate %108, %32 in 1 : vector<16x64xf32>, vector<16x64xf32> -> vector<16x128xf32>
    %110 = arith.truncf %109 : vector<16x128xf32> to vector<16x128xbf16>
    %c0_46 = arith.constant 0 : index
    %c0_47 = arith.constant 0 : index
    %c0_48 = arith.constant 0 : index
    %111 = vector.load %arg13[%c0_46, %c0_47, %c0_48] : memref<1x16x128xbf16, #tpu.memory_space<vmem>>, vector<1x16x128xbf16>
    %112 = vector.shape_cast %111 : vector<1x16x128xbf16> to vector<16x128xbf16>
    %113 = vector.shape_cast %110 : vector<16x128xbf16> to vector<1x16x128xbf16>
    tpu.vector_store %arg13[%c0_46, %c0_47, %c0_48], %113 {strides = array<i32>} : memref<1x16x128xbf16, #tpu.memory_space<vmem>>, vector<1x16x128xbf16>,
    return
  }
  func.func @transform_0(%arg0: i32, %arg1: i32) -> (i32, i32, i32) {
    %c0_i32 = arith.constant 0 : i32
    %c0_i32_0 = arith.constant 0 : i32
    return %arg0, %arg1, %c0_i32 : i32, i32, i32
  }
  func.func @transform_1(%arg0: i32, %arg1: i32) -> (i32, i32, i32) {
    %c0_i32 = arith.constant 0 : i32
    %c0_i32_0 = arith.constant 0 : i32
    %c0_i32_1 = arith.constant 0 : i32
    return %arg0, %c0_i32, %c0_i32_0 : i32, i32, i32
  }
  func.func @transform_2(%arg0: i32, %arg1: i32) -> (i32, i32, i32) {
    %c0_i32 = arith.constant 0 : i32
    %c0_i32_0 = arith.constant 0 : i32
    %c0_i32_1 = arith.constant 0 : i32
    return %arg0, %c0_i32, %c0_i32_0 : i32, i32, i32
  }
  func.func @transform_3(%arg0: i32, %arg1: i32) -> (i32, i32) {
    %c0_i32 = arith.constant 0 : i32
    %c0_i32_0 = arith.constant 0 : i32
    %c0_i32_1 = arith.constant 0 : i32
    return %c0_i32, %c0_i32_0 : i32, i32
  }
  func.func @transform_4(%arg0: i32, %arg1: i32) -> (i32, i32) {
    %c0_i32 = arith.constant 0 : i32
    %c0_i32_0 = arith.constant 0 : i32
    %c0_i32_1 = arith.constant 0 : i32
    return %c0_i32, %c0_i32_0 : i32, i32
  }
  func.func @transform_5(%arg0: i32, %arg1: i32) -> (i32, i32) {
    %c0_i32 = arith.constant 0 : i32
    %c0_i32_0 = arith.constant 0 : i32
    %c0_i32_1 = arith.constant 0 : i32
    return %c0_i32, %c0_i32_0 : i32, i32
  }
  func.func @transform_6(%arg0: i32, %arg1: i32) -> (i32, i32) {
    %c0_i32 = arith.constant 0 : i32
    %c0_i32_0 = arith.constant 0 : i32
    %c0_i32_1 = arith.constant 0 : i32
    return %c0_i32, %c0_i32_0 : i32, i32
  }
  func.func @transform_7(%arg0: i32, %arg1: i32) -> (i32, i32) {
    %c0_i32 = arith.constant 0 : i32
    %c0_i32_0 = arith.constant 0 : i32
    %c0_i32_1 = arith.constant 0 : i32
    return %c0_i32, %c0_i32_0 : i32, i32
  }
  func.func @transform_8(%arg0: i32, %arg1: i32) -> (i32, i32) {
    %c0_i32 = arith.constant 0 : i32
    %c0_i32_0 = arith.constant 0 : i32
    %c0_i32_1 = arith.constant 0 : i32
    return %c0_i32, %c0_i32_0 : i32, i32
  }
  func.func @transform_9(%arg0: i32, %arg1: i32) -> (i32, i32) {
    %c0_i32 = arith.constant 0 : i32
    %c0_i32_0 = arith.constant 0 : i32
    %c0_i32_1 = arith.constant 0 : i32
    return %c0_i32, %c0_i32_0 : i32, i32
  }
  func.func @transform_10(%arg0: i32, %arg1: i32) -> (i32, i32) {
    %c0_i32 = arith.constant 0 : i32
    %c0_i32_0 = arith.constant 0 : i32
    %c0_i32_1 = arith.constant 0 : i32
    return %c0_i32, %c0_i32_0 : i32, i32
  }
  func.func @transform_11(%arg0: i32, %arg1: i32) -> (i32, i32, i32) {
    %c0_i32 = arith.constant 0 : i32
    %c0_i32_0 = arith.constant 0 : i32
    return %arg0, %arg1, %c0_i32 : i32, i32, i32
  }
}

module attributes {stable_mosaic.version = 11 : i64} {
  func.func @kernel(%arg0: i32, %arg1: memref<512x128xbf16, #tpu.memory_space<vmem>>, %arg2: memref<512x128xbf16, #tpu.memory_space<vmem>>, %arg3: memref<512x128xbf16, #tpu.memory_space<vmem>>, %arg4: memref<512x64xbf16, #tpu.memory_space<vmem>>, %arg5: memref<448x64xbf16, #tpu.memory_space<vmem>>, %arg6: memref<1x64xf32, #tpu.memory_space<vmem>>, %arg7: memref<1x64xf32, #tpu.memory_space<vmem>>, %arg8: memref<64x128xbf16, #tpu.memory_space<vmem>>, %arg9: memref<1x128xf32, #tpu.memory_space<vmem>>, %arg10: memref<512x128xf32, #tpu.memory_space<vmem>>) attributes {dimension_semantics = [#tpu.dimension_semantics<parallel>], iteration_bounds = array<i64: 1>, scalar_prefetch = 0 : i64, scratch_operands = 0 : i64, tpu.core_type = #tpu.core_type<tc>, window_params = [{transform_indices = @transform_0, window_bounds = array<i64: 512, 128>}, {transform_indices = @transform_1, window_bounds = array<i64: 512, 128>}, {transform_indices = @transform_2, window_bounds = array<i64: 512, 128>}, {transform_indices = @transform_3, window_bounds = array<i64: 512, 64>}, {pipeline_mode = #tpu.pipeline_mode<synchronous>, transform_indices = @transform_4, window_bounds = array<i64: 448, 64>}, {pipeline_mode = #tpu.pipeline_mode<synchronous>, transform_indices = @transform_5, window_bounds = array<i64: 1, 64>}, {pipeline_mode = #tpu.pipeline_mode<synchronous>, transform_indices = @transform_6, window_bounds = array<i64: 1, 64>}, {pipeline_mode = #tpu.pipeline_mode<synchronous>, transform_indices = @transform_7, window_bounds = array<i64: 64, 128>}, {pipeline_mode = #tpu.pipeline_mode<synchronous>, transform_indices = @transform_8, window_bounds = array<i64: 1, 128>}, {transform_indices = @transform_9, window_bounds = array<i64: 512, 128>}]} {
    %c0 = arith.constant 0 : index
    %c0_0 = arith.constant 0 : index
    %0 = vector.load %arg1[%c0, %c0_0] : memref<512x128xbf16, #tpu.memory_space<vmem>>, vector<512x128xbf16>
    %c0_1 = arith.constant 0 : index
    %c0_2 = arith.constant 0 : index
    %1 = vector.load %arg2[%c0_1, %c0_2] : memref<512x128xbf16, #tpu.memory_space<vmem>>, vector<512x128xbf16>
    %2 = tpu.concatenate %0, %1 in 1 : vector<512x128xbf16>, vector<512x128xbf16> -> vector<512x256xbf16>
    %c0_3 = arith.constant 0 : index
    %c0_4 = arith.constant 0 : index
    %3 = vector.load %arg3[%c0_3, %c0_4] : memref<512x128xbf16, #tpu.memory_space<vmem>>, vector<512x128xbf16>
    %c0_5 = arith.constant 0 : index
    %c0_6 = arith.constant 0 : index
    %4 = vector.load %arg4[%c0_5, %c0_6] : memref<512x64xbf16, #tpu.memory_space<vmem>>, vector<512x64xbf16>
    %5 = tpu.concatenate %3, %4 in 1 : vector<512x128xbf16>, vector<512x64xbf16> -> vector<512x192xbf16>
    %c0_7 = arith.constant 0 : index
    %c0_8 = arith.constant 0 : index
    %6 = vector.load %arg5[%c0_7, %c0_8] : memref<448x64xbf16, #tpu.memory_space<vmem>>, vector<256x64xbf16>
    %cst = arith.constant dense<0.000000e+00> : vector<512x64xf32>
    %7 = tpu.matmul %2, %6, %cst {dimension_numbers = #tpu.dot_dimension_numbers<[1], [0], [0], [1], [0, 0, 1, 1], [], []>} : vector<512x256xbf16>, vector<256x64xbf16>, vector<512x64xf32> -> vector<512x64xf32>
    %c256 = arith.constant 256 : index
    %c0_9 = arith.constant 0 : index
    %8 = vector.load %arg5[%c256, %c0_9] : memref<448x64xbf16, #tpu.memory_space<vmem>>, vector<192x64xbf16>
    %cst_10 = arith.constant dense<0.000000e+00> : vector<512x64xf32>
    %9 = tpu.matmul %5, %8, %cst_10 {dimension_numbers = #tpu.dot_dimension_numbers<[1], [0], [0], [1], [0, 0, 1, 1], [], []>} : vector<512x192xbf16>, vector<192x64xbf16>, vector<512x64xf32> -> vector<512x64xf32>
    %10 = arith.addf %7, %9 : vector<512x64xf32>
    %c0_11 = arith.constant 0 : index
    %c0_12 = arith.constant 0 : index
    %11 = vector.load %arg6[%c0_11, %c0_12] : memref<1x64xf32, #tpu.memory_space<vmem>>, vector<1x64xf32>
    %12 = vector.broadcast %11 : vector<1x64xf32> to vector<512x64xf32>
    %13 = arith.mulf %10, %12 : vector<512x64xf32>
    %c0_13 = arith.constant 0 : index
    %c0_14 = arith.constant 0 : index
    %14 = vector.load %arg7[%c0_13, %c0_14] : memref<1x64xf32, #tpu.memory_space<vmem>>, vector<1x64xf32>
    %15 = vector.broadcast %14 : vector<1x64xf32> to vector<512x64xf32>
    %16 = arith.addf %13, %15 : vector<512x64xf32>
    %cst_15 = arith.constant 0.000000e+00 : f32
    %17 = vector.broadcast %cst_15 : f32 to vector<512x64xf32>
    %18 = arith.maximumf %16, %17 : vector<512x64xf32>
    %19 = arith.truncf %18 : vector<512x64xf32> to vector<512x64xbf16>
    %c0_16 = arith.constant 0 : index
    %c0_17 = arith.constant 0 : index
    %20 = vector.load %arg8[%c0_16, %c0_17] : memref<64x128xbf16, #tpu.memory_space<vmem>>, vector<64x128xbf16>
    %cst_18 = arith.constant dense<0.000000e+00> : vector<512x128xf32>
    %21 = tpu.matmul %19, %20, %cst_18 {dimension_numbers = #tpu.dot_dimension_numbers<[1], [0], [0], [1], [0, 0, 1, 1], [], []>} : vector<512x64xbf16>, vector<64x128xbf16>, vector<512x128xf32> -> vector<512x128xf32>
    %c0_19 = arith.constant 0 : index
    %c0_20 = arith.constant 0 : index
    %22 = vector.load %arg9[%c0_19, %c0_20] : memref<1x128xf32, #tpu.memory_space<vmem>>, vector<1x128xf32>
    %23 = vector.broadcast %22 : vector<1x128xf32> to vector<512x128xf32>
    %24 = arith.addf %21, %23 : vector<512x128xf32>
    %c0_21 = arith.constant 0 : index
    %c0_22 = arith.constant 0 : index
    %25 = vector.load %arg10[%c0_21, %c0_22] : memref<512x128xf32, #tpu.memory_space<vmem>>, vector<512x128xf32>
    tpu.vector_store %arg10[%c0_21, %c0_22], %24 {strides = array<i32>} : memref<512x128xf32, #tpu.memory_space<vmem>>, vector<512x128xf32>,
    return
  }
  func.func @transform_0(%arg0: i32) -> (i32, i32) {
    %c0_i32 = arith.constant 0 : i32
    %c0_i32_0 = arith.constant 0 : i32
    return %arg0, %c0_i32 : i32, i32
  }
  func.func @transform_1(%arg0: i32) -> (i32, i32) {
    %c0_i32 = arith.constant 0 : i32
    %c0_i32_0 = arith.constant 0 : i32
    return %arg0, %c0_i32 : i32, i32
  }
  func.func @transform_2(%arg0: i32) -> (i32, i32) {
    %c0_i32 = arith.constant 0 : i32
    %c0_i32_0 = arith.constant 0 : i32
    return %arg0, %c0_i32 : i32, i32
  }
  func.func @transform_3(%arg0: i32) -> (i32, i32) {
    %c0_i32 = arith.constant 0 : i32
    %c0_i32_0 = arith.constant 0 : i32
    return %arg0, %c0_i32 : i32, i32
  }
  func.func @transform_4(%arg0: i32) -> (i32, i32) {
    %c0_i32 = arith.constant 0 : i32
    %c0_i32_0 = arith.constant 0 : i32
    %c0_i32_1 = arith.constant 0 : i32
    return %c0_i32, %c0_i32_0 : i32, i32
  }
  func.func @transform_5(%arg0: i32) -> (i32, i32) {
    %c0_i32 = arith.constant 0 : i32
    %c0_i32_0 = arith.constant 0 : i32
    %c0_i32_1 = arith.constant 0 : i32
    return %c0_i32, %c0_i32_0 : i32, i32
  }
  func.func @transform_6(%arg0: i32) -> (i32, i32) {
    %c0_i32 = arith.constant 0 : i32
    %c0_i32_0 = arith.constant 0 : i32
    %c0_i32_1 = arith.constant 0 : i32
    return %c0_i32, %c0_i32_0 : i32, i32
  }
  func.func @transform_7(%arg0: i32) -> (i32, i32) {
    %c0_i32 = arith.constant 0 : i32
    %c0_i32_0 = arith.constant 0 : i32
    %c0_i32_1 = arith.constant 0 : i32
    return %c0_i32, %c0_i32_0 : i32, i32
  }
  func.func @transform_8(%arg0: i32) -> (i32, i32) {
    %c0_i32 = arith.constant 0 : i32
    %c0_i32_0 = arith.constant 0 : i32
    %c0_i32_1 = arith.constant 0 : i32
    return %c0_i32, %c0_i32_0 : i32, i32
  }
  func.func @transform_9(%arg0: i32) -> (i32, i32) {
    %c0_i32 = arith.constant 0 : i32
    %c0_i32_0 = arith.constant 0 : i32
    return %arg0, %c0_i32 : i32, i32
  }
}

</mosaic_0001>

<bundles_post_ra>
// kernel: fursformer_forward.5
= control target key start
LH: loop header
LB: loop body
LE: loop exit
PB: predicated region body
PF: predicated region fallthrough
CT: control target
= control target key end

     0   :  { %s382_s12 = smov 0   ;;  %s414_s0 = inlined_call_operand.vmem [shape: f32[2,4,64], index: 0, kind: input, shape index: {}]   ;;  %s415_s1 = inlined_call_operand.vmem [shape: bf16[64,128], index: 1, kind: input, shape index: {}]   ;;  %s416_s2 = inlined_call_operand.vmem [shape: f32[1,128], index: 2, kind: input, shape index: {}]   ;;  %s417_s3 = inlined_call_operand.vmem [shape: f32[2,4,128], index: 3, kind: output, shape index: {}]  }
   0x1 LB: > { %s306_s13 = sadd.s32 4294967295, %s358_s12   ;;  %p310_p0 = scmp.ge.s32.totalorder %s358_s12, 1  ;;  %s358_s12 = sphi %s382_s12, %s13_s12  }
   0x2   : > { %p136_p1 = scmp.lt.s32.totalorder %s358_s12, 3 }
   0x4   : > { %p137_p2 = pnand %p310_p0, %p136_p1 }
   0x5   : > { %v348_v0 = vld [vmem:[%s415_s1] sm:$0xff] (!%p137_p2)   ;;  %v360_v1 = vmov (!%p137_p2), 0.0   ;;  %v349_v2 = vld [vmem:[%s415_s1 + $0x8] sm:$0xff] (!%p137_p2)   ;;  %vm361_vm0 = vmmov (!%p137_p2), 0   ;;  %p158_p3 = scmp.lt.s32.totalorder (!%p137_p2), %s306_s13, 1  ;;  %v350_v3 = vld [vmem:[%s415_s1 + $0x10] sm:$0xff] (!%p137_p2)  }
   0x6   : > { %140 = sbr.rel (%p137_p2) target bundleno = 237 (0xed), region = 32  ;;  %326 = vmatprep.subr.bf16.mxu0 (!%p137_p2), %v360_v1  ;;  %334 = vmatprep.mubr.msk.bf16.mxu0 (!%p137_p2), %vm361_vm0, %v360_v1  ;;  %v351_v4 = vld [vmem:[%s415_s1 + $0x18] sm:$0xff] (!%p137_p2)   ;;  %vm208_vm1 = vcmask (!%p137_p2), 523264   ;;  %v313_v7 = vld [vmem:[%s416_s2] ss:$0 sm:$0xff] (!%p137_p2) }
   0x7   : > { %327 = vmatpush3.bf16.msra.mxu0 (!%p137_p2), %v348_v0 }
   0x8   : > { %328 = vmatprep.subr.bf16.mxu0 (!%p137_p2), %v360_v1 }
   0xb   : > { %329 = vmatpush3.bf16.msra.mxu0 (!%p137_p2), %v349_v2 }
   0xc   : > { %330 = vmatprep.subr.bf16.mxu0 (!%p137_p2), %v360_v1 }
   0xd   : > { %s419_s13 = smov (!%p158_p3, %s306_s13), 1 }
   0xe   : > { %s311_s20 = sshll.u32 %s419_s13, 2 }
   0xf   : > { %s161_s23 = scalar_lea.vmem %s414_s0, %s311_s20  ;;  %331 = vmatpush3.bf16.msra.mxu0 %v350_v3  ;;  %s165_s30 = scalar_lea.vmem %s417_s3, %s311_s20 }
  0x10   : > { %v167_v5 = vld [vmem:[%s161_s23] sm:$0xf]  ;;  %332 = vmatprep.subr.bf16.mxu0 %v360_v1 }
  0x11   : > { %v168_v6 = vpack.c.bf16 %v167_v5, %v167_v5 }
  0x13   : > { %333 = vmatpush3.bf16.msra.mxu0 %v351_v4 }
  0x16   : > { %335 = vmatmul.mubr.msk.bf16.vlgmr.msra.gmra.mrb[0].mxu0 %vm208_vm1, %v168_v6 }
  0xe9   : > { %v246_v8 = vpop.f32.mrb[0].mxu0 }
  0xea   : > { %v247_v9 = vadd.f32 %v313_v7, %v246_v8  ;;  %v336_v10 = vpop.f32.mrb[1].mxu0 }
  0xeb   : > { %v249_v11 = vpop.f32.mrb[2].mxu0 }
  0xec   : > { %252 = vst [vmem:[%s165_s30] sm:$0xf] %v247_v9  ;;  %v337_v12 = vpop.f32.mrb[3].mxu0 }
  0xed PF: > { %s13_s12 = sadd.s32 1, %s358_s12  }
  0xee   : > { %p10_p4 = scmp.ge.s32.totalorder %s13_s12, 4  }
  0xf0   :  { %12 = sbr.rel (!%p10_p4) target bundleno = 1 (0x1), region = 62 }

// kernel: fursformer_forward.6
= control target key start
LH: loop header
LB: loop body
LE: loop exit
PB: predicated region body
PF: predicated region fallthrough
CT: control target
= control target key end

     0   :  { %s4988_s17 = smov 0   ;;  %s4990_s18 = smov 0   ;;  %s6841_s0 = inlined_call_operand.vmem [shape: f32[2,256,3], index: 0, kind: input, shape index: {}]   ;;  %s6842_s1 = inlined_call_operand.vmem [shape: bf16[2,64,8], index: 1, kind: input, shape index: {}]   ;;  %s6843_s2 = inlined_call_operand.vmem [shape: bf16[2,8,64], index: 2, kind: input, shape index: {}]   ;;  %s6844_s3 = inlined_call_operand.vmem [shape: f32[3,8], index: 3, kind: input, shape index: {}]   ;;  %s6845_s4 = inlined_call_operand.vmem [shape: bf16[8,24], index: 4, kind: input, shape index: {}]   ;;  %s6846_s5 = inlined_call_operand.vmem [shape: bf16[24,64], index: 5, kind: input, shape index: {}]   ;;  %s6847_s6 = inlined_call_operand.vmem [shape: f32[1,64], index: 6, kind: input, shape index: {}]   ;;  %s6848_s7 = inlined_call_operand.vmem [shape: bf16[64,64], index: 7, kind: input, shape index: {}]   ;;  %s6849_s8 = inlined_call_operand.vmem [shape: f32[1,64], index: 8, kind: input, shape index: {}]   ;;  %s6850_s9 = inlined_call_operand.vmem [shape: bf16[64,64], index: 9, kind: input, shape index: {}]   ;;  %s6851_s10 = inlined_call_operand.vmem [shape: f32[1,64], index: 10, kind: input, shape index: {}]   ;;  %s6852_s11 = inlined_call_operand.vmem [shape: bf16[2,256,128], index: 11, kind: output, shape index: {}]  }
   0x1   :  { %s4992_s19 = smov 0  }
   0x2 LB: > { %s33_s20 = sadd.s32 1, %s4918_s18  ;;  %p3918_p0 = scmp.ge.s32.totalorder %s4922_s19, 1  ;;  %s4922_s19 = sphi %s4992_s19, %s21_s19   ;;  %s4918_s18 = sphi %s4990_s18, %s6941_s18   ;;  %s4914_s17 = sphi %s4988_s17, %s6940_s17  }
   0x3   : > { %p35_p1 = scmp.ge.s32.totalorder %s33_s20, 2  ;;  %p377_p2 = scmp.lt.s32.totalorder %s4922_s19, 3 }
   0x5   : > { %s6943_s20 = smov (%p35_p1, %s33_s20), 0  ;;  %p378_p3 = pnand %p3918_p0, %p377_p2 }
   0x7   : > { %381 = sbr.rel (%p378_p3) target bundleno = 2079 (0x81f), region = 64 }
   0xe   : > { %p435_p4 = scmp.lt.s32.totalorder %s4914_s17, 1  ;;  %v4924_v0 = vmov 1   ;;  %v4925_v7 = vmov 0   ;;  %v4926_v8 = vmov 2   ;;  %v1133_v19 = vld [vmem:[%s6845_s4] sm:$0xf]  ;;  %v657_v54 = vlaneseq }
   0xf   : > { %4572 = vset.pattern.permute.xlu0 %v4924_v0  ;;  %4570 = vset.pattern.permute.xlu1 %v4924_v0  ;;  %vm1183_vm0 = vcmask 1043456   ;;  %v496_v61 = vld [vmem:[%s6844_s3] sm:$0x7]  ;;  %vm1134_vm1 = vcmask 64512   ;;  %vm1415_vm2 = vcmask 195584   ;;  %vm1683_vm3 = vcmask 523264  }
  0x10   : > { %s6945_s17 = smov (!%p435_p4, %s4914_s17), 1  ;;  %4539 = vmatprep.subr.msk.bf16.mxu0 %vm1183_vm0, %v1133_v19  ;;  %v1185_v20 = vsel %vm1183_vm0, %v1133_v19, 0  ;;  %v658_v57 = vshrl.u32 %v657_v54, 7  ;;  %s4927_s23 = smov 64  }
  0x11   : > { %s4073_s21 = sshll.u32 %s6945_s17, 8  ;;  %4316 = vmatpush3.bf16.msra.mxu0 %v1185_v20  ;;  %s4074_s28 = sshll.u32 %s6945_s17, 5 }
  0x12   : > { %s5014_s24 = scalar_lea.vmem %s6841_s0, %s4073_s21  ;;  %v823_v60 = vsub.s32 1, %v658_v57  ;;  %v659_v62 = vsub.s32 0, %v658_v57  ;;  %s448_s12 = scalar_lea.vmem %s6842_s1, %s4074_s28 }
  0x13   : > { %v466_v1 = vld [vmem:[%s5014_s24 + $0x10] sm:$0xff]  ;;  %v464_v2 = vld [vmem:[%s5014_s24] sm:$0xff]  ;;  %v469_v3 = vld [vmem:[%s5014_s24 + $0x28] sm:$0xff]  ;;  %s3923_s15 = sshll.u32 %s6945_s17, 2 }
  0x14   : > { %702 = vperm.xlu0 %4572, %v466_v1   ;;  %694 = vperm.xlu1 %4570, %v464_v2   ;;  %v465_v4 = vld [vmem:[%s5014_s24 + $0x8] sm:$0xff]  ;;  %v470_v5 = vld [vmem:[%s5014_s24 + $0x30] sm:$0xff]  ;;  %v467_v6 = vld [vmem:[%s5014_s24 + $0x18] sm:$0xff]  ;;  %s452_s22 = scalar_lea.vmem %s6843_s2, %s3923_s15  ;;  %s4075_s15 = sshll.u32 %s6945_s17, 7 }
  0x15   : > { %v468_v9 = vld [vmem:[%s5014_s24 + $0x20] sm:$0xff]  ;;  %v471_v10 = vld [vmem:[%s5014_s24 + $0x38] sm:$0xff]  ;;  %v473_v11 = vld [vmem:[%s5014_s24 + $0x48] sm:$0xff] }
  0x16   : > { %v5030_v12 = vld [vmem:[%s5014_s24 + $0x60] sm:$0xff]  ;;  %v5034_v13 = vld [vmem:[%s5014_s24 + $0x78] sm:$0xff]  ;;  %v5039_v14 = vld [vmem:[%s5014_s24 + $0x88] sm:$0xff] }
  0x17   : > { %v5044_v15 = vld [vmem:[%s5014_s24 + $0xa0] sm:$0xff]  ;;  %v5049_v16 = vld [vmem:[%s5014_s24 + $0xb8] sm:$0xff]  ;;  %v5053_v17 = vld [vmem:[%s5014_s24 + $0xc8] sm:$0xff] }
  0x18   : > { %714 = vperm.xlu0 %4572, %v469_v3   ;;  %698 = vperm.xlu1 %4570, %v465_v4   ;;  %v472_v18 = vld [vmem:[%s5014_s24 + $0x40] sm:$0xff]  ;;  %v474_v21 = vld [vmem:[%s5014_s24 + $0x50] sm:$0xff]  ;;  %v475_v22 = vld [vmem:[%s5014_s24 + $0x58] sm:$0xff] }
  0x19   : > { %v5074_v23 = vld [vmem:[%s5014_s24 + $0x90] sm:$0xff]  ;;  %v5085_v25 = vld [vmem:[%s5014_s24 + $0xe0] sm:$0xff]  ;;  %v477_v26 = vld [vmem:[%s5014_s24 + $0x68] sm:$0xff] }
  0x1a   : > { %v5081_v24 = vld [vmem:[%s5014_s24 + $0xd0] sm:$0xff]  ;;  %v5099_v28 = vld [vmem:[%s5014_s24 + $0xa8] sm:$0xff]  ;;  %v480_v34 = vld [vmem:[%s5014_s24 + $0x80] sm:$0xff] }
  0x1b   : > { %v478_v27 = vld [vmem:[%s5014_s24 + $0x70] sm:$0xff]  ;;  %v5119_v35 = vld [vmem:[%s5014_s24 + $0xe8] sm:$0xff]  ;;  %v483_v43 = vld [vmem:[%s5014_s24 + $0x98] sm:$0xff] }
  0x1c   : > { %718 = vperm.xlu0 %4572, %v470_v5   ;;  %4571 = vset.pattern.permute.xlu1 %v4925_v7  ;;  %v5104_v29 = vld [vmem:[%s5014_s24 + $0xb0] sm:$0xff]  ;;  %v5139_v44 = vld [vmem:[%s5014_s24 + $0xf8] sm:$0xff] }
  0x1d   : > { %514 = vperm.xlu1 %4571, %v467_v6   ;;  %v5128_v38 = vld [vmem:[%s5014_s24 + $0xf0] sm:$0xff] }
  0x20   : > { %4578 = vset.pattern.permute.xlu0 %v4926_v8 }
  0x21   : > { %894 = vperm.xlu0 %4578, %v465_v4   ;;  %4573 = vset.pattern.permute.xlu1 %v4924_v0 }
  0x22   : > { %706 = vperm.xlu1 %4573, %v467_v6  }
  0x25   : > { %906 = vperm.xlu0 %4578, %v468_v9  }
  0x26   : > { %4574 = vset.pattern.permute.xlu1 %v4926_v8 }
  0x27   : > { %890 = vperm.xlu1 %4574, %v464_v2  }
  0x29   : > { %918 = vperm.xlu0 %4578, %v471_v10  }
  0x2b   : > { %898 = vperm.xlu1 %4574, %v466_v1  }
  0x2d   : > { %926 = vperm.xlu0 %4578, %v473_v11  }
  0x2f   : > { %902 = vperm.xlu1 %4574, %v467_v6  }
  0x31   : > { %938 = vperm.xlu0 %4578, %v5030_v12  }
  0x33   : > { %4575 = vset.pattern.permute.xlu1 %v4925_v7 }
  0x34   : > { %524 = vperm.xlu1 %4575, %v469_v3  }
  0x35   : > { %950 = vperm.xlu0 %4578, %v5034_v13  }
  0x38   : > { %4576 = vset.pattern.permute.xlu1 %v4924_v0 }
  0x39   : > { %958 = vperm.xlu0 %4578, %v5039_v14   ;;  %710 = vperm.xlu1 %4576, %v468_v9  }
  0x3d   : > { %970 = vperm.xlu0 %4578, %v5044_v15   ;;  %4577 = vset.pattern.permute.xlu1 %v4925_v7 }
  0x3e   : > { %529 = vperm.xlu1 %4577, %v470_v5  }
  0x41   : > { %982 = vperm.xlu0 %4578, %v5049_v16  }
  0x42   : > { %534 = vperm.xlu1 %4577, %v471_v10  }
  0x45   : > { %990 = vperm.xlu0 %4578, %v5053_v17  }
  0x46   : > { %4579 = vset.pattern.permute.xlu1 %v4924_v0 }
  0x47   : > { %722 = vperm.xlu1 %4579, %v471_v10  }
  0x49   : > { %4606 = vset.pattern.permute.xlu0 %v4925_v7 }
  0x4a   : > { %499 = vperm.xlu0 %4606, %v464_v2   ;;  %v1019_v2 = vsub.s32 2, %v658_v57 }
  0x4b   : > { %4580 = vset.pattern.permute.xlu1 %v4926_v8 }
  0x4c   : > { %910 = vperm.xlu1 %4580, %v469_v3  }
  0x4e   : > { %504 = vperm.xlu0 %4606, %v465_v4   ;;  %v5174_v4 = vrot.slane %v496_v61, %v659_v62 }
  0x50   : > { %914 = vperm.xlu1 %4580, %v470_v5  }
  0x52   : > { %509 = vperm.xlu0 %4606, %v466_v1   ;;  %v5172_v1 = vrot.slane %v496_v61, %v823_v60 }
  0x54   : > { %4581 = vset.pattern.permute.xlu1 %v4925_v7 }
  0x55   : > { %539 = vperm.xlu1 %4581, %v472_v18  }
  0x56   : > { %519 = vperm.xlu0 %4606, %v468_v9   ;;  %v5179_v9 = vrot.slane %v496_v61, %v1019_v2 }
  0x59   : > { %4582 = vset.pattern.permute.xlu1 %v4924_v0 }
  0x5a   : > { %544 = vperm.xlu0 %4606, %v473_v11   ;;  %726 = vperm.xlu1 %4582, %v472_v18  }
  0x5e   : > { %549 = vperm.xlu0 %4606, %v474_v21   ;;  %730 = vperm.xlu1 %4582, %v473_v11  }
  0x62   : > { %559 = vperm.xlu0 %4606, %v5030_v12   ;;  %4583 = vset.pattern.permute.xlu1 %v4925_v7 }
  0x63   : > { %554 = vperm.xlu1 %4583, %v475_v22  }
  0x66   : > { %584 = vperm.xlu0 %4606, %v5039_v14  }
  0x67   : > { %4584 = vset.pattern.permute.xlu1 %v4924_v0 }
  0x68   : > { %738 = vperm.xlu1 %4584, %v475_v22  }
  0x6a   : > { %589 = vperm.xlu0 %4606, %v5074_v23  }
  0x6c   : > { %4585 = vset.pattern.permute.xlu1 %v4926_v8 }
  0x6d   : > { %922 = vperm.xlu1 %4585, %v472_v18  }
  0x6e   : > { %599 = vperm.xlu0 %4606, %v5044_v15  }
  0x71   : > { %930 = vperm.xlu1 %4585, %v474_v21  }
  0x72   : > { %624 = vperm.xlu0 %4606, %v5053_v17  }
  0x75   : > { %934 = vperm.xlu1 %4585, %v475_v22  }
  0x76   : > { %629 = vperm.xlu0 %4606, %v5081_v24  }
  0x79   : > { %4586 = vset.pattern.permute.xlu1 %v4925_v7 }
  0x7a   : > { %639 = vperm.xlu0 %4606, %v5085_v25   ;;  %564 = vperm.xlu1 %4586, %v477_v26  }
  0x7e   : > { %4607 = vset.pattern.permute.xlu0 %v4924_v0  ;;  %4587 = vset.pattern.permute.xlu1 %v4924_v0 }
  0x7f   : > { %734 = vperm.xlu0 %4607, %v474_v21   ;;  %742 = vperm.xlu1 %4587, %v5030_v12  }
  0x83   : > { %746 = vperm.xlu0 %4607, %v477_v26   ;;  %4588 = vset.pattern.permute.xlu1 %v4925_v7 }
  0x84   : > { %569 = vperm.xlu1 %4588, %v478_v27  }
  0x87   : > { %750 = vperm.xlu0 %4607, %v478_v27  }
  0x88   : > { %574 = vperm.xlu1 %4588, %v5034_v13  }
  0x8b   : > { %766 = vperm.xlu0 %4607, %v5074_v23  }
  0x8c   : > { %4589 = vset.pattern.permute.xlu1 %v4924_v0 }
  0x8d   : > { %754 = vperm.xlu1 %4589, %v5034_v13  }
  0x8f   : > { %778 = vperm.xlu0 %4607, %v5099_v28  }
  0x91   : > { %4590 = vset.pattern.permute.xlu1 %v4926_v8 }
  0x92   : > { %942 = vperm.xlu1 %4590, %v477_v26  }
  0x93   : > { %v5107_v30 = vpop.permute.xlu1 %694  ;;  %v5109_v31 = vpop.permute.xlu0 %702  ;;  %782 = vperm.xlu0 %4607, %v5104_v29  }
  0x94   : > { %v825_v6 = vmul.f32 %v5172_v1, %v5107_v30  ;;  %v827_v26 = vmul.f32 %v5172_v1, %v5109_v31 }
  0x96   : > { %946 = vperm.xlu1 %4590, %v478_v27  }
  0x97   : > { %v5112_v32 = vpop.permute.xlu1 %698  ;;  %v5114_v33 = vpop.permute.xlu0 %714  ;;  %798 = vperm.xlu0 %4607, %v5081_v24  }
  0x9a   : > { %4591 = vset.pattern.permute.xlu1 %v4925_v7 }
  0x9b   : > { %579 = vperm.xlu1 %4591, %v480_v34   ;;  %v5122_v36 = vpop.permute.xlu0 %718  ;;  %810 = vperm.xlu0 %4607, %v5119_v35  }
  0x9c   : > { %v5125_v37 = vpop.permute.xlu1 %514 }
  0x9d   : > { %v664_v21 = vmul.f32 %v5174_v4, %v5125_v37 }
  0x9f   : > { %4592 = vset.pattern.permute.xlu1 %v4924_v0  ;;  %814 = vperm.xlu0 %4607, %v5128_v38  }
  0xa0   : > { %758 = vperm.xlu1 %4592, %v480_v34   ;;  %v895_v39 = vpop.permute.xlu0 %894 }
  0xa1   : > { %v707_v40 = vpop.permute.xlu1 %706  ;;  %v1022_v18 = vmul.f32 %v5179_v9, %v895_v39 }
  0xa2   : > { %v828_v13 = vmul.f32 %v5172_v1, %v707_v40 }
  0xa3   : > { %4612 = vset.pattern.permute.xlu0 %v4926_v8 }
  0xa4   : > { %762 = vperm.xlu1 %4592, %v5039_v14   ;;  %v5134_v41 = vpop.permute.xlu0 %906  ;;  %1002 = vperm.xlu0 %4612, %v5085_v25  }
  0xa5   : > { %v1025_v2 = vmul.f32 %v5179_v9, %v5134_v41 }
  0xa6   : > { %v891_v42 = vpop.permute.xlu1 %890 }
  0xa7   : > { %v1021_v19 = vmul.f32 %v5179_v9, %v891_v42  ;;  %v831_v42 = vmul.f32 %v5172_v1, %v5122_v36 }
  0xa8   : > { %4593 = vset.pattern.permute.xlu1 %v4925_v7  ;;  %v5142_v45 = vpop.permute.xlu0 %918  ;;  %1014 = vperm.xlu0 %4612, %v5139_v44  }
  0xa9   : > { %594 = vperm.xlu1 %4593, %v483_v43  }
  0xaa   : > { %v899_v46 = vpop.permute.xlu1 %898 }
  0xab   : > { %v1023_v31 = vmul.f32 %v5179_v9, %v899_v46 }
  0xac   : > { %v5145_v47 = vpop.permute.xlu0 %926 }
  0xad   : > { %4594 = vset.pattern.permute.xlu1 %v4924_v0 }
  0xae   : > { %770 = vperm.xlu1 %4594, %v483_v43   ;;  %v903_v48 = vpop.permute.xlu1 %902 }
  0xaf   : > { %v1024_v22 = vmul.f32 %v5179_v9, %v903_v48 }
  0xb0   : > { %v5148_v49 = vpop.permute.xlu0 %938 }
  0xb2   : > { %4595 = vset.pattern.permute.xlu1 %v4926_v8 }
  0xb3   : > { %954 = vperm.xlu1 %4595, %v480_v34   ;;  %v525_v50 = vpop.permute.xlu1 %524  ;;  %v860_v34 = vadd.f32 %v828_v13, %v664_v21 }
  0xb4   : > { %v5151_v51 = vpop.permute.xlu0 %950  ;;  %v666_v39 = vmul.f32 %v5174_v4, %v525_v50 }
  0xb5   : > { %v1056_v48 = vadd.f32 %v1024_v22, %v860_v34 }
  0xb7   : > { %962 = vperm.xlu1 %4595, %v5074_v23   ;;  %v1088_v13 = vmax.f32 %v1056_v48, 0.0 }
  0xb8   : > { %v5154_v52 = vpop.permute.xlu1 %710  ;;  %v5156_v53 = vpop.permute.xlu0 %958 }
  0xb9   : > { %v829_v46 = vmul.f32 %v5172_v1, %v5154_v52 }
  0xbb   : > { %966 = vperm.xlu1 %4595, %v483_v43  }
  0xbc   : > { %v5158_v55 = vpop.permute.xlu0 %970 }
  0xbd   : > { %v530_v56 = vpop.permute.xlu1 %529 }
  0xbe   : > { %v667_v57 = vmul.f32 %v5174_v4, %v530_v56 }
  0xbf   : > { %4596 = vset.pattern.permute.xlu1 %v4925_v7 }
  0xc0   : > { %604 = vperm.xlu1 %4596, %v5099_v28   ;;  %v5163_v58 = vpop.permute.xlu0 %982 }
  0xc1   : > { %v535_v59 = vpop.permute.xlu1 %534 }
  0xc4   : > { %4597 = vset.pattern.permute.xlu1 %v4924_v0  ;;  %v5169_v63 = vpop.permute.xlu0 %990 }
  0xc5   : > { %774 = vperm.xlu1 %4597, %v5044_v15   ;;  %v826_v15 = vmul.f32 %v5172_v1, %v5112_v32  ;;  %v830_v32 = vmul.f32 %v5172_v1, %v5114_v33 }
  0xc6   : > { %v723_v3 = vpop.permute.xlu1 %722 }
  0xc7   : > { %v832_v33 = vmul.f32 %v5172_v1, %v723_v3 }
  0xc9   : > { %v500_v5 = vpop.permute.xlu0 %499  ;;  %4598 = vset.pattern.permute.xlu1 %v4925_v7 }
  0xca   : > { %v661_v10 = vmul.f32 %v5174_v4, %v500_v5  ;;  %609 = vperm.xlu1 %4598, %v5104_v29   ;;  %v862_v5 = vadd.f32 %v830_v32, %v666_v39 }
  0xcb   : > { %v911_v11 = vpop.permute.xlu1 %910 }
  0xcc   : > { %v857_v12 = vadd.f32 %v825_v6, %v661_v10  ;;  %v1026_v50 = vmul.f32 %v5179_v9, %v911_v11  ;;  %v668_v6 = vmul.f32 %v5174_v4, %v535_v59 }
  0xcd   : > { %v505_v14 = vpop.permute.xlu0 %504 }
  0xce   : > { %v662_v20 = vmul.f32 %v5174_v4, %v505_v14  ;;  %614 = vperm.xlu1 %4598, %v5049_v16   ;;  %v1053_v30 = vadd.f32 %v1021_v19, %v857_v12  ;;  %v1028_v12 = vmul.f32 %v5179_v9, %v5142_v45  ;;  %v863_v14 = vadd.f32 %v831_v42, %v667_v57 }
  0xcf   : > { %v915_v23 = vpop.permute.xlu1 %914  ;;  %v864_v41 = vadd.f32 %v832_v33, %v668_v6  ;;  %v1030_v57 = vmul.f32 %v5179_v9, %v5145_v47 }
  0xd0   : > { %v858_v27 = vadd.f32 %v826_v15, %v662_v20  ;;  %v1085_v36 = vmax.f32 %v1053_v30, 0.0  ;;  %v1027_v3 = vmul.f32 %v5179_v9, %v915_v23  ;;  %v1058_v15 = vadd.f32 %v1026_v50, %v862_v5 }
  0xd1   : > { %v510_v40 = vpop.permute.xlu0 %509  ;;  %v1060_v23 = vadd.f32 %v1028_v12, %v864_v41 }
  0xd2   : > { %v663_v37 = vmul.f32 %v5174_v4, %v510_v40  ;;  %4599 = vset.pattern.permute.xlu1 %v4924_v0  ;;  %v1054_v43 = vadd.f32 %v1022_v18, %v858_v27  ;;  %v1059_v20 = vadd.f32 %v1027_v3, %v863_v14  ;;  %v1090_v45 = vmax.f32 %v1058_v15, 0.0 }
  0xd3   : > { %786 = vperm.xlu1 %4599, %v5049_v16   ;;  %v1092_v39 = vmax.f32 %v1060_v23, 0.0 }
  0xd4   : > { %v859_v60 = vadd.f32 %v827_v26, %v663_v37  ;;  %v540_v61 = vpop.permute.xlu1 %539  ;;  %v1086_v62 = vmax.f32 %v1054_v43, 0.0  ;;  %v1091_v32 = vmax.f32 %v1059_v20, 0.0 }
  0xd5   : > { %v520_v56 = vpop.permute.xlu0 %519 }
  0xd6   : > { %v1055_v10 = vadd.f32 %v1023_v31, %v859_v60  ;;  %v665_v16 = vmul.f32 %v5174_v4, %v520_v56  ;;  %v1117_v11 = vpack.c.bf16 %v1086_v62, %v1085_v36  ;;  %v1120_v42 = vpack.c.bf16 %v1092_v39, %v1091_v32 }
  0xd7   : > { %4600 = vset.pattern.permute.xlu1 %v4926_v8  ;;  %v669_v36 = vmul.f32 %v5174_v4, %v540_v61 }
  0xd8   : > { %v1087_v18 = vmax.f32 %v1055_v10, 0.0  ;;  %v861_v52 = vadd.f32 %v829_v46, %v665_v16  ;;  %974 = vperm.xlu1 %4600, %v5099_v28   ;;  %4317 = vmatprep.mubr.msk.bf16.mxu0 %vm1134_vm1, %v1117_v11  ;;  %v488_v28 = vld [vmem:[%s5014_s24 + $0xc0] sm:$0xff] }
  0xd9   : > { %v727_v59 = vpop.permute.xlu1 %726  ;;  %v545_v19 = vpop.permute.xlu0 %544 }
  0xda   : > { %v1057_v21 = vadd.f32 %v1025_v2, %v861_v52  ;;  %v1118_v22 = vpack.c.bf16 %v1088_v13, %v1087_v18  ;;  %v833_v33 = vmul.f32 %v5172_v1, %v727_v59  ;;  %v491_v2 = vld [vmem:[%s5014_s24 + $0xd8] sm:$0xff] }
  0xdc   : > { %v1089_v26 = vmax.f32 %v1057_v21, 0.0  ;;  %978 = vperm.xlu1 %4600, %v5104_v29   ;;  %4318 = vmatmul.mubr.msk.bf16.vlgmr.msra.gmra.mrb[0].mxu0 %vm1134_vm1, %v1118_v22  ;;  %v670_v29 = vmul.f32 %v5174_v4, %v545_v19  ;;  %v865_v5 = vadd.f32 %v833_v33, %v669_v36 }
  0xdd   : > { %v731_v27 = vpop.permute.xlu1 %730  ;;  %v550_v30 = vpop.permute.xlu0 %549 }
  0xde   : > { %v1119_v34 = vpack.c.bf16 %v1090_v45, %v1089_v26  ;;  %v834_v43 = vmul.f32 %v5172_v1, %v731_v27  ;;  %v671_v15 = vmul.f32 %v5174_v4, %v550_v30 }
  0xe0   : > { %4601 = vset.pattern.permute.xlu1 %v4925_v7  ;;  %4321 = vmatprep.mubr.msk.bf16.mxu0 %vm1134_vm1, %v1119_v34  ;;  %v866_v50 = vadd.f32 %v834_v43, %v670_v29 }
  0xe1   : > { %619 = vperm.xlu1 %4601, %v488_v28   ;;  %v560_v40 = vpop.permute.xlu0 %559 }
  0xe2   : > { %v555_v37 = vpop.permute.xlu1 %554  ;;  %v1062_v46 = vadd.f32 %v1030_v57, %v866_v50  ;;  %v1033_v57 = vmul.f32 %v5179_v9, %v5148_v49  ;;  %v1036_v49 = vmul.f32 %v5179_v9, %v5151_v51 }
  0xe3   : > { %v672_v18 = vmul.f32 %v5174_v4, %v555_v37 }
  0xe4   : > { %4322 = vmatmul.mubr.msk.bf16.gmra.mrb[4].mxu0 %vm1134_vm1, %v1120_v42  ;;  %v1094_v10 = vmax.f32 %v1062_v46, 0.0 }
  0xe5   : > { %4602 = vset.pattern.permute.xlu1 %v4924_v0  ;;  %v5228_v31 = vpop.permute.xlu0 %584 }
  0xe6   : > { %790 = vperm.xlu1 %4602, %v488_v28  }
  0xe7   : > { %v739_v48 = vpop.permute.xlu1 %738 }
  0xe8   : > { %v836_v41 = vmul.f32 %v5172_v1, %v739_v48 }
  0xe9   : > { %v5233_v60 = vpop.permute.xlu0 %589 }
  0xea   : > { %794 = vperm.xlu1 %4602, %v5053_v17   ;;  %v868_v20 = vadd.f32 %v836_v41, %v672_v18 }
  0xec   : > { %v923_v62 = vpop.permute.xlu1 %922 }
  0xed   : > { %v1029_v6 = vmul.f32 %v5179_v9, %v923_v62  ;;  %v5239_v56 = vpop.permute.xlu0 %599 }
  0xee   : > { %4603 = vset.pattern.permute.xlu1 %v4925_v7 }
  0xef   : > { %v1061_v47 = vadd.f32 %v1029_v6, %v865_v5  ;;  %634 = vperm.xlu1 %4603, %v491_v2  }
  0xf0   : > { %v931_v3 = vpop.permute.xlu1 %930 }
  0xf1   : > { %v1093_v16 = vmax.f32 %v1061_v47, 0.0  ;;  %v5242_v11 = vpop.permute.xlu0 %624  ;;  %v1031_v22 = vmul.f32 %v5179_v9, %v931_v3 }
  0xf3   : > { %v1121_v17 = vpack.c.bf16 %v1094_v10, %v1093_v16  ;;  %4604 = vset.pattern.permute.xlu1 %v4924_v0 }
  0xf4   : > { %802 = vperm.xlu1 %4604, %v491_v2   ;;  %v935_v61 = vpop.permute.xlu1 %934 }
  0xf5   : > { %4325 = vmatprep.mubr.msk.bf16.mxu0 %vm1134_vm1, %v1121_v17  ;;  %v5246_v12 = vpop.permute.xlu0 %629  ;;  %v1032_v52 = vmul.f32 %v5179_v9, %v935_v61 }
  0xf7   : > { %v1064_v23 = vadd.f32 %v1032_v52, %v868_v20 }
  0xf8   : > { %4605 = vset.pattern.permute.xlu1 %v4926_v8 }
  0xf9   : > { %986 = vperm.xlu1 %4605, %v488_v28   ;;  %v565_v13 = vpop.permute.xlu1 %564  ;;  %v5249_v14 = vpop.permute.xlu0 %639  ;;  %v1096_v32 = vmax.f32 %v1064_v23, 0.0  ;;  %v673_v28 = vmul.f32 %v5174_v4, %v560_v40  ;;  %v1038_v23 = vmul.f32 %v5179_v9, %v5156_v53  ;;  %v679_v53 = vmul.f32 %v5174_v4, %v5233_v60 }
  0xfa   : > { %v674_v40 = vmul.f32 %v5174_v4, %v565_v13 }
  0xfd   : > { %994 = vperm.xlu1 %4605, %v5081_v24  }
  0xfe   : > { %v735_v59 = vpop.permute.xlu0 %734  ;;  %v743_v19 = vpop.permute.xlu1 %742 }
  0xff   : > { %v835_v21 = vmul.f32 %v5172_v1, %v735_v59  ;;  %v837_v39 = vmul.f32 %v5172_v1, %v743_v19 }
 0x101   : > { %v867_v45 = vadd.f32 %v835_v21, %v671_v15  ;;  %998 = vperm.xlu1 %4605, %v491_v2   ;;  %v869_v29 = vadd.f32 %v837_v39, %v673_v28 }
 0x102   : > { %v747_v42 = vpop.permute.xlu0 %746 }
 0x103   : > { %v1063_v26 = vadd.f32 %v1031_v22, %v867_v45  ;;  %v570_v27 = vpop.permute.xlu1 %569  ;;  %v838_v43 = vmul.f32 %v5172_v1, %v747_v42  ;;  %v1065_v36 = vadd.f32 %v1033_v57, %v869_v29  ;;  %v4694_v22 = vld [vmem:[%s6846_s5] sm:$0xff]  }
 0x104   : > { %v675_v6 = vmul.f32 %v5174_v4, %v570_v27  ;;  %4349 = vmatprep.subr.bf16.mxu1 %v4694_v22 }
 0x105   : > { %v1095_v30 = vmax.f32 %v1063_v26, 0.0  ;;  %4608 = vset.pattern.permute.xlu1 %v4925_v7  ;;  %v870_v62 = vadd.f32 %v838_v43, %v674_v40  ;;  %v1097_v47 = vmax.f32 %v1065_v36, 0.0  ;;  %4350 = vmatpush3.bf16.msra.mxu1 %v4694_v22 }
 0x106   : > { %644 = vperm.xlu1 %4608, %v5119_v35   ;;  %v751_v33 = vpop.permute.xlu0 %750 }
 0x107   : > { %v575_v34 = vpop.permute.xlu1 %574  ;;  %v1122_v24 = vpack.c.bf16 %v1096_v32, %v1095_v30  ;;  %v839_v2 = vmul.f32 %v5172_v1, %v751_v33 }
 0x108   : > { %v676_v50 = vmul.f32 %v5174_v4, %v575_v34 }
 0x109   : > { %4326 = vmatmul.mubr.msk.bf16.gmra.mrb[8].mxu0 %vm1134_vm1, %v1122_v24  ;;  %v871_v10 = vadd.f32 %v839_v2, %v675_v6 }
 0x10a   : > { %4609 = vset.pattern.permute.xlu1 %v4924_v0  ;;  %v767_v30 = vpop.permute.xlu0 %766 }
 0x10b   : > { %806 = vperm.xlu1 %4609, %v5085_v25   ;;  %v843_v24 = vmul.f32 %v5172_v1, %v767_v30 }
 0x10c   : > { %v755_v37 = vpop.permute.xlu1 %754 }
 0x10d   : > { %v840_v48 = vmul.f32 %v5172_v1, %v755_v37 }
 0x10f   : > { %4610 = vset.pattern.permute.xlu1 %v4925_v7  ;;  %v872_v5 = vadd.f32 %v840_v48, %v676_v50  ;;  %v875_v48 = vadd.f32 %v843_v24, %v679_v53 }
 0x110   : > { %649 = vperm.xlu1 %4610, %v5128_v38  }
 0x111   : > { %v943_v25 = vpop.permute.xlu1 %942  ;;  %v1068_v16 = vadd.f32 %v1036_v49, %v872_v5 }
 0x112   : > { %v1034_v46 = vmul.f32 %v5179_v9, %v943_v25 }
 0x113   : > { %v1100_v15 = vmax.f32 %v1068_v16, 0.0 }
 0x114   : > { %v1066_v7 = vadd.f32 %v1034_v46, %v870_v62  ;;  %654 = vperm.xlu1 %4610, %v5139_v44  }
 0x115   : > { %v947_v3 = vpop.permute.xlu1 %946 }
 0x116   : > { %v1098_v17 = vmax.f32 %v1066_v7, 0.0  ;;  %v1035_v61 = vmul.f32 %v5179_v9, %v947_v3  ;;  %v779_v3 = vpop.permute.xlu0 %778 }
 0x118   : > { %v1123_v13 = vpack.c.bf16 %v1098_v17, %v1097_v47  ;;  %v1067_v41 = vadd.f32 %v1035_v61, %v871_v10  ;;  %4611 = vset.pattern.permute.xlu1 %v4924_v0  ;;  %v681_v10 = vmul.f32 %v5174_v4, %v5239_v56  ;;  %v846_v61 = vmul.f32 %v5172_v1, %v779_v3 }
 0x119   : > { %818 = vperm.xlu1 %4611, %v5139_v44   ;;  %v678_v44 = vmul.f32 %v5174_v4, %v5228_v31  ;;  %v4695_v31 = vld [vmem:[%s6846_s5 + $0x8] ss:$0 sps:$4 sm:$0xff]  }
 0x11a   : > { %v1099_v51 = vmax.f32 %v1067_v41, 0.0  ;;  %4329 = vmatprep.mubr.msk.bf16.mxu0 %vm1134_vm1, %v1123_v13  ;;  %v580_v18 = vpop.permute.xlu1 %579  ;;  %4540 = vmatprep.subr.msk.bf16.mxu1 %vm1183_vm0, %v4695_v31  ;;  %v1465_v34 = vsel %vm1183_vm0, %v4695_v31, 0 }
 0x11b   : > { %4352 = vmatpush3.bf16.msra.mxu1 %v1465_v34 }
 0x11c   : > { %v1124_v52 = vpack.c.bf16 %v1100_v15, %v1099_v51  ;;  %v1041_v15 = vmul.f32 %v5179_v9, %v5158_v55  ;;  %v783_v51 = vpop.permute.xlu0 %782 }
 0x11d   : > { %4613 = vset.pattern.permute.xlu1 %v4926_v8 }
 0x11e   : > { %1006 = vperm.xlu1 %4613, %v5119_v35   ;;  %4330 = vmatmul.mubr.msk.bf16.gmra.mrb[12].mxu0 %vm1134_vm1, %v1124_v52  ;;  %v847_v52 = vmul.f32 %v5172_v1, %v783_v51 }
 0x11f   : > { %v759_v59 = vpop.permute.xlu1 %758 }
 0x120   : > { %v841_v8 = vmul.f32 %v5172_v1, %v759_v59 }
 0x122   : > { %1010 = vperm.xlu1 %4613, %v5128_v38   ;;  %v677_v38 = vmul.f32 %v5174_v4, %v580_v18 }
 0x123   : > { %v763_v19 = vpop.permute.xlu1 %762 }
 0x124   : > { %v842_v0 = vmul.f32 %v5172_v1, %v763_v19  ;;  %v873_v26 = vadd.f32 %v841_v8, %v677_v38 }
 0x126   : > { %v874_v35 = vadd.f32 %v842_v0, %v678_v44 }
 0x128   : > { %v595_v20 = vpop.permute.xlu1 %594  ;;  %v1070_v27 = vadd.f32 %v1038_v23, %v874_v35 }
 0x129   : > { %v680_v57 = vmul.f32 %v5174_v4, %v595_v20 }
 0x12a   : > { %v1102_v42 = vmax.f32 %v1070_v27, 0.0 }
 0x12d   : > { %v771_v21 = vpop.permute.xlu1 %770 }
 0x12e   : > { %v844_v37 = vmul.f32 %v5172_v1, %v771_v21  ;;  %v1044_v21 = vmul.f32 %v5179_v9, %v5163_v58 }
 0x130   : > { %v876_v50 = vadd.f32 %v844_v37, %v680_v57  ;;  %v799_v57 = vpop.permute.xlu0 %798 }
 0x132   : > { %v955_v45 = vpop.permute.xlu1 %954 }
 0x133   : > { %v1037_v32 = vmul.f32 %v5179_v9, %v955_v45 }
 0x134   : > { %v811_v51 = vpop.permute.xlu0 %810 }
 0x135   : > { %v1069_v28 = vadd.f32 %v1037_v32, %v873_v26 }
 0x136   : > { %v963_v39 = vpop.permute.xlu1 %962 }
 0x137   : > { %v1101_v29 = vmax.f32 %v1069_v28, 0.0  ;;  %v1039_v43 = vmul.f32 %v5179_v9, %v963_v39  ;;  %v686_v39 = vmul.f32 %v5174_v4, %v5242_v11  ;;  %v851_v11 = vmul.f32 %v5172_v1, %v799_v57 }
 0x139   : > { %v1125_v33 = vpack.c.bf16 %v1102_v42, %v1101_v29  ;;  %v1071_v36 = vadd.f32 %v1039_v43, %v875_v48  ;;  %v1046_v43 = vmul.f32 %v5179_v9, %v5169_v63 }
 0x13a   : > { %v967_v40 = vpop.permute.xlu1 %966 }
 0x13b   : > { %v1040_v60 = vmul.f32 %v5179_v9, %v967_v40  ;;  %4333 = vmatprep.mubr.msk.bf16.mxu0 %vm1134_vm1, %v1125_v33  ;;  %v1103_v62 = vmax.f32 %v1071_v36, 0.0 }
 0x13d   : > { %v1072_v25 = vadd.f32 %v1040_v60, %v876_v50  ;;  %v687_v60 = vmul.f32 %v5174_v4, %v5246_v12 }
 0x13f   : > { %v1104_v2 = vmax.f32 %v1072_v25, 0.0  ;;  %v605_v5 = vpop.permute.xlu1 %604 }
 0x140   : > { %v682_v13 = vmul.f32 %v5174_v4, %v605_v5 }
 0x141   : > { %v1126_v46 = vpack.c.bf16 %v1104_v2, %v1103_v62 }
 0x142   : > { %v878_v20 = vadd.f32 %v846_v61, %v682_v13 }
 0x143   : > { %4334 = vmatmul.mubr.msk.bf16.gmra.mrb[16].mxu0 %vm1134_vm1, %v1126_v46 }
 0x144   : > { %v775_v49 = vpop.permute.xlu1 %774 }
 0x145   : > { %v845_v47 = vmul.f32 %v5172_v1, %v775_v49  ;;  %v883_v49 = vadd.f32 %v851_v11, %v687_v60 }
 0x147   : > { %v877_v17 = vadd.f32 %v845_v47, %v681_v10 }
 0x149   : > { %v610_v6 = vpop.permute.xlu1 %609  ;;  %v1073_v59 = vadd.f32 %v1041_v15, %v877_v17 }
 0x14a   : > { %v683_v56 = vmul.f32 %v5174_v4, %v610_v6 }
 0x14b   : > { %v1105_v8 = vmax.f32 %v1073_v59, 0.0 }
 0x14c   : > { %v879_v55 = vadd.f32 %v847_v52, %v683_v56  ;;  %v815_v52 = vpop.permute.xlu0 %814  ;;  %v689_v56 = vmul.f32 %v5174_v4, %v5249_v14 }
 0x14d   : > { %v615_v7 = vpop.permute.xlu1 %614 }
 0x14e   : > { %v684_v18 = vmul.f32 %v5174_v4, %v615_v7 }
 0x152   : > { %v787_v16 = vpop.permute.xlu1 %786 }
 0x153   : > { %v848_v41 = vmul.f32 %v5172_v1, %v787_v16 }
 0x155   : > { %v880_v0 = vadd.f32 %v848_v41, %v684_v18 }
 0x157   : > { %v975_v19 = vpop.permute.xlu1 %974  ;;  %v1076_v23 = vadd.f32 %v1044_v21, %v880_v0 }
 0x158   : > { %v1042_v44 = vmul.f32 %v5179_v9, %v975_v19 }
 0x159   : > { %v1108_v27 = vmax.f32 %v1076_v23, 0.0 }
 0x15a   : > { %v1074_v22 = vadd.f32 %v1042_v44, %v878_v20  ;;  %v1003_v20 = vpop.permute.xlu0 %1002 }
 0x15b   : > { %v979_v35 = vpop.permute.xlu1 %978  ;;  %v1049_v21 = vmul.f32 %v5179_v9, %v1003_v20 }
 0x15c   : > { %v1106_v38 = vmax.f32 %v1074_v22, 0.0  ;;  %v1043_v45 = vmul.f32 %v5179_v9, %v979_v35 }
 0x15e   : > { %v1127_v31 = vpack.c.bf16 %v1106_v38, %v1105_v8  ;;  %v1075_v26 = vadd.f32 %v1043_v45, %v879_v55  ;;  %v1015_v35 = vpop.permute.xlu0 %1014  ;;  %v854_v55 = vmul.f32 %v5172_v1, %v811_v51 }
 0x15f   : > { %v1052_v45 = vmul.f32 %v5179_v9, %v1015_v35  ;;  %v4696_v35 = vld [vmem:[%s6848_s7] sm:$0xff]  }
 0x160   : > { %v1107_v32 = vmax.f32 %v1075_v26, 0.0  ;;  %4337 = vmatprep.mubr.msk.bf16.mxu0 %vm1134_vm1, %v1127_v31  ;;  %v620_v30 = vpop.permute.xlu1 %619  ;;  %4385 = vmatprep.subr.bf16.mxu0 %v4696_v35 }
 0x161   : > { %v685_v48 = vmul.f32 %v5174_v4, %v620_v30  ;;  %v855_v30 = vmul.f32 %v5172_v1, %v815_v52  ;;  %4386 = vmatpush3.bf16.msra.mxu0 %v4696_v35 }
 0x162   : > { %v1128_v34 = vpack.c.bf16 %v1108_v27, %v1107_v32 }
 0x164   : > { %4338 = vmatmul.mubr.msk.bf16.gmra.mrb[20].mxu0 %vm1134_vm1, %v1128_v34 }
 0x165   : > { %v791_v53 = vpop.permute.xlu1 %790 }
 0x166   : > { %v849_v37 = vmul.f32 %v5172_v1, %v791_v53 }
 0x168   : > { %v881_v40 = vadd.f32 %v849_v37, %v685_v48 }
 0x169   : > { %v795_v58 = vpop.permute.xlu1 %794 }
 0x16a   : > { %v850_v28 = vmul.f32 %v5172_v1, %v795_v58 }
 0x16c   : > { %v882_v29 = vadd.f32 %v850_v28, %v686_v39 }
 0x16e   : > { %v635_v24 = vpop.permute.xlu1 %634  ;;  %v1078_v50 = vadd.f32 %v1046_v43, %v882_v29 }
 0x16f   : > { %v688_v6 = vmul.f32 %v5174_v4, %v635_v24 }
 0x170   : > { %v1110_v2 = vmax.f32 %v1078_v50, 0.0 }
 0x173   : > { %v803_v42 = vpop.permute.xlu1 %802 }
 0x174   : > { %v852_v5 = vmul.f32 %v5172_v1, %v803_v42 }
 0x176   : > { %v884_v3 = vadd.f32 %v852_v5, %v688_v6 }
 0x178   : > { %v987_v33 = vpop.permute.xlu1 %986 }
 0x179   : > { %v1045_v36 = vmul.f32 %v5179_v9, %v987_v33 }
 0x17b   : > { %v1077_v25 = vadd.f32 %v1045_v36, %v881_v40 }
 0x17c   : > { %v995_v62 = vpop.permute.xlu1 %994 }
 0x17d   : > { %v1109_v46 = vmax.f32 %v1077_v25, 0.0  ;;  %v1047_v63 = vmul.f32 %v5179_v9, %v995_v62 }
 0x17f   : > { %v1129_v7 = vpack.c.bf16 %v1110_v2, %v1109_v46  ;;  %v1079_v10 = vadd.f32 %v1047_v63, %v883_v49 }
 0x180   : > { %v999_v47 = vpop.permute.xlu1 %998 }
 0x181   : > { %v1048_v16 = vmul.f32 %v5179_v9, %v999_v47  ;;  %4341 = vmatprep.mubr.msk.bf16.mxu0 %vm1134_vm1, %v1129_v7  ;;  %v1111_v17 = vmax.f32 %v1079_v10, 0.0 }
 0x183   : > { %v1080_v12 = vadd.f32 %v1048_v16, %v884_v3 }
 0x185   : > { %v1112_v61 = vmax.f32 %v1080_v12, 0.0  ;;  %v645_v13 = vpop.permute.xlu1 %644 }
 0x186   : > { %v690_v22 = vmul.f32 %v5174_v4, %v645_v13 }
 0x187   : > { %v1130_v41 = vpack.c.bf16 %v1112_v61, %v1111_v17 }
 0x188   : > { %v886_v26 = vadd.f32 %v854_v55, %v690_v22  ;;  %v4697_v55 = vld [vmem:[%s6848_s7 + $0x8] sm:$0xff]  }
 0x189   : > { %4342 = vmatmul.mubr.msk.bf16.gmra.mrb[24].mxu0 %vm1134_vm1, %v1130_v41  ;;  %4387 = vmatprep.subr.bf16.mxu0 %v4697_v55 }
 0x18a   : > { %v807_v15 = vpop.permute.xlu1 %806  ;;  %4388 = vmatpush3.bf16.msra.mxu0 %v4697_v55 }
 0x18b   : > { %v853_v19 = vmul.f32 %v5172_v1, %v807_v15 }
 0x18d   : > { %v885_v44 = vadd.f32 %v853_v19, %v689_v56 }
 0x18f   : > { %v650_v18 = vpop.permute.xlu1 %649  ;;  %v1081_v38 = vadd.f32 %v1049_v21, %v885_v44 }
 0x190   : > { %v691_v14 = vmul.f32 %v5174_v4, %v650_v18 }
 0x191   : > { %v1113_v53 = vmax.f32 %v1081_v38, 0.0  ;;  %v4699_v38 = vld [vmem:[%s6848_s7 + $0x18] sm:$0xff]  }
 0x192   : > { %v887_v24 = vadd.f32 %v855_v30, %v691_v14 }
 0x193   : > { %v655_v59 = vpop.permute.xlu1 %654 }
 0x194   : > { %v692_v23 = vmul.f32 %v5174_v4, %v655_v59 }
 0x198   : > { %v819_v0 = vpop.permute.xlu1 %818 }
 0x199   : > { %v856_v8 = vmul.f32 %v5172_v1, %v819_v0 }
 0x19b   : > { %v888_v27 = vadd.f32 %v856_v8, %v692_v23  ;;  %v4698_v23 = vld [vmem:[%s6848_s7 + $0x10] sm:$0xff]  }
 0x19c   : > { %4389 = vmatprep.subr.bf16.mxu0 %v4698_v23 }
 0x19d   : > { %v1007_v31 = vpop.permute.xlu1 %1006  ;;  %v1084_v28 = vadd.f32 %v1052_v45, %v888_v27  ;;  %4390 = vmatpush3.bf16.msra.mxu0 %v4698_v23 }
 0x19e   : > { %v1050_v32 = vmul.f32 %v5179_v9, %v1007_v31  ;;  %4391 = vmatprep.subr.bf16.mxu0 %v4699_v38 }
 0x19f   : > { %v1116_v43 = vmax.f32 %v1084_v28, 0.0 }
 0x1a0   : > { %v1082_v34 = vadd.f32 %v1050_v32, %v886_v26 }
 0x1a1   : > { %v1011_v58 = vpop.permute.xlu1 %1010  ;;  %4392 = vmatpush3.bf16.msra.mxu0 %v4699_v38 }
 0x1a2   : > { %v1114_v39 = vmax.f32 %v1082_v34, 0.0  ;;  %v1051_v42 = vmul.f32 %v5179_v9, %v1011_v58 }
 0x1a4   : > { %v1131_v37 = vpack.c.bf16 %v1114_v39, %v1113_v53  ;;  %v1083_v29 = vadd.f32 %v1051_v42, %v887_v24 }
 0x1a6   : > { %v1115_v48 = vmax.f32 %v1083_v29, 0.0  ;;  %4345 = vmatprep.mubr.msk.bf16.mxu0 %vm1134_vm1, %v1131_v37 }
 0x1a8   : > { %v1132_v4 = vpack.c.bf16 %v1116_v43, %v1115_v48 }
 0x1aa   : > { %4346 = vmatmul.mubr.msk.bf16.gmra.mrb[28].mxu0 %vm1134_vm1, %v1132_v4 }
 0x1af   : > { %v4319_v57 = vpop.f32.mrb[0].mxu0 }
 0x1b0   : > { %v1221_v33 = vpop.f32.mrb[1].mxu0  ;;  %v1350_v40 = vmax.f32 %v4319_v57, 0.0 }
 0x1b1   : > { %v4320_v1 = vpop.f32.mrb[2].mxu0  ;;  %v1348_v60 = vmax.f32 %v1221_v33, 0.0 }
 0x1b2   : > { %v1351_v50 = vmax.f32 %v4320_v1, 0.0  ;;  %v1224_v36 = vpop.f32.mrb[3].mxu0 }
 0x1b3   : > { %v1349_v11 = vmax.f32 %v1224_v36, 0.0 }
 0x1b4   : > { %v1381_v25 = vpack.c.bf16 %v1351_v50, %v1350_v40 }
 0x1b5   : > { %v1380_v9 = vpack.c.bf16 %v1349_v11, %v1348_v60 }
 0x1b7   : > { %v4323_v62 = vpop.f32.mrb[4].mxu0  ;;  %4353 = vmatprep.mubr.msk.bf16.mxu1 %vm1415_vm2, %v1380_v9 }
 0x1b8   : > { %v1237_v2 = vpop.f32.mrb[5].mxu0  ;;  %4354 = vmatmul.mubr.msk.bf16.vlgmr.msra.gmra.mrb[0].mxu1 %vm1415_vm2, %v1381_v25  ;;  %v1354_v46 = vmax.f32 %v4323_v62, 0.0 }
 0x1b9   : > { %v4324_v5 = vpop.f32.mrb[6].mxu0  ;;  %v1352_v6 = vmax.f32 %v1237_v2, 0.0 }
 0x1ba   : > { %v1355_v63 = vmax.f32 %v4324_v5, 0.0  ;;  %v1240_v49 = vpop.f32.mrb[7].mxu0 }
 0x1bb   : > { %v1353_v7 = vmax.f32 %v1240_v49, 0.0 }
 0x1bc   : > { %v1383_v47 = vpack.c.bf16 %v1355_v63, %v1354_v46 }
 0x1bd   : > { %v1382_v3 = vpack.c.bf16 %v1353_v7, %v1352_v6 }
 0x1bf   : > { %4357 = vmatprep.mubr.msk.bf16.mxu1 %vm1415_vm2, %v1382_v3 }
 0x1c0   : > { %4358 = vmatmul.mubr.msk.bf16.gmra.mrb[4].mxu1 %vm1415_vm2, %v1383_v47 }
 0x1dc   : > { %v4327_v10 = vpop.f32.mrb[8].mxu0 }
 0x1dd   : > { %v1253_v16 = vpop.f32.mrb[9].mxu0  ;;  %v1358_v17 = vmax.f32 %v4327_v10, 0.0 }
 0x1de   : > { %v4328_v12 = vpop.f32.mrb[10].mxu0  ;;  %v1356_v41 = vmax.f32 %v1253_v16, 0.0 }
 0x1df   : > { %v1359_v61 = vmax.f32 %v4328_v12, 0.0  ;;  %v1256_v13 = vpop.f32.mrb[11].mxu0  ;;  %v5392_v12 = vld [vmem:[%s6847_s6] ss:$0 sm:$0xff] }
 0x1e0   : > { %v1357_v15 = vmax.f32 %v1256_v13, 0.0 }
 0x1e1   : > { %v1385_v51 = vpack.c.bf16 %v1359_v61, %v1358_v17 }
 0x1e2   : > { %v1384_v18 = vpack.c.bf16 %v1357_v15, %v1356_v41 }
 0x1e4   : > { %4361 = vmatprep.mubr.msk.bf16.mxu1 %vm1415_vm2, %v1384_v18 }
 0x1e5   : > { %4362 = vmatmul.mubr.msk.bf16.gmra.mrb[8].mxu1 %vm1415_vm2, %v1385_v51 }
 0x1f1   : > { %v4331_v52 = vpop.f32.mrb[12].mxu0 }
 0x1f2   : > { %v1269_v59 = vpop.f32.mrb[13].mxu0  ;;  %v1362_v20 = vmax.f32 %v4331_v52, 0.0 }
 0x1f3   : > { %v4332_v19 = vpop.f32.mrb[14].mxu0  ;;  %v1360_v44 = vmax.f32 %v1269_v59, 0.0 }
 0x1f4   : > { %v1363_v56 = vmax.f32 %v4332_v19, 0.0  ;;  %v1272_v0 = vpop.f32.mrb[15].mxu0 }
 0x1f5   : > { %v1361_v21 = vmax.f32 %v1272_v0, 0.0 }
 0x1f6   : > { %v1387_v22 = vpack.c.bf16 %v1363_v56, %v1362_v20 }
 0x1f7   : > { %v1386_v8 = vpack.c.bf16 %v1361_v21, %v1360_v44 }
 0x1f9   : > { %4365 = vmatprep.mubr.msk.bf16.mxu1 %vm1415_vm2, %v1386_v8 }
 0x1fa   : > { %4366 = vmatmul.mubr.msk.bf16.gmra.mrb[12].mxu1 %vm1415_vm2, %v1387_v22 }
 0x216   : > { %v4335_v45 = vpop.f32.mrb[16].mxu0 }
 0x217   : > { %v1285_v31 = vpop.f32.mrb[17].mxu0  ;;  %v1366_v14 = vmax.f32 %v4335_v45, 0.0 }
 0x218   : > { %v4336_v26 = vpop.f32.mrb[18].mxu0  ;;  %v1364_v30 = vmax.f32 %v1285_v31, 0.0 }
 0x219   : > { %v1367_v27 = vmax.f32 %v4336_v26, 0.0  ;;  %v1288_v32 = vpop.f32.mrb[19].mxu0 }
 0x21a   : > { %v1365_v34 = vmax.f32 %v1288_v32, 0.0 }
 0x21b   : > { %v1389_v53 = vpack.c.bf16 %v1367_v27, %v1366_v14 }
 0x21c   : > { %v1388_v58 = vpack.c.bf16 %v1365_v34, %v1364_v30 }
 0x21e   : > { %4369 = vmatprep.mubr.msk.bf16.mxu1 %vm1415_vm2, %v1388_v58 }
 0x21f   : > { %4370 = vmatmul.mubr.msk.bf16.gmra.mrb[16].mxu1 %vm1415_vm2, %v1389_v53 }
 0x237   : > { %v4339_v24 = vpop.f32.mrb[20].mxu0 }
 0x238   : > { %v1301_v28 = vpop.f32.mrb[21].mxu0  ;;  %v1370_v42 = vmax.f32 %v4339_v24, 0.0 }
 0x239   : > { %v4340_v39 = vpop.f32.mrb[22].mxu0  ;;  %v1368_v43 = vmax.f32 %v1301_v28, 0.0 }
 0x23a   : > { %v1371_v37 = vmax.f32 %v4340_v39, 0.0  ;;  %v1304_v29 = vpop.f32.mrb[23].mxu0 }
 0x23b   : > { %v1369_v48 = vmax.f32 %v1304_v29, 0.0 }
 0x23c   : > { %v1391_v4 = vpack.c.bf16 %v1371_v37, %v1370_v42 }
 0x23d   : > { %v1390_v57 = vpack.c.bf16 %v1369_v48, %v1368_v43 }
 0x23f   : > { %4373 = vmatprep.mubr.msk.bf16.mxu1 %vm1415_vm2, %v1390_v57 }
 0x240   : > { %4374 = vmatmul.mubr.msk.bf16.gmra.mrb[20].mxu1 %vm1415_vm2, %v1391_v4 }
 0x25c   : > { %v4343_v33 = vpop.f32.mrb[24].mxu0 }
 0x25d   : > { %v1317_v1 = vpop.f32.mrb[25].mxu0  ;;  %v1374_v50 = vmax.f32 %v4343_v33, 0.0 }
 0x25e   : > { %v4344_v40 = vpop.f32.mrb[26].mxu0  ;;  %v1372_v11 = vmax.f32 %v1317_v1, 0.0 }
 0x25f   : > { %v1375_v36 = vmax.f32 %v4344_v40, 0.0  ;;  %v1320_v60 = vpop.f32.mrb[27].mxu0 }
 0x260   : > { %v1373_v25 = vmax.f32 %v1320_v60, 0.0 }
 0x261   : > { %v1393_v9 = vpack.c.bf16 %v1375_v36, %v1374_v50 }
 0x262   : > { %v1392_v62 = vpack.c.bf16 %v1373_v25, %v1372_v11  ;;  %v4700_v11 = vld [vmem:[%s448_s12] sm:$0xff]   ;;  %v4701_v25 = vld [vmem:[%s448_s12 + $0x8] sm:$0xff]  }
 0x263   : > { %4425 = vmatprep.subr.bf16.mxu1 %v4700_v11 }
 0x264   : > { %4377 = vmatprep.mubr.msk.bf16.mxu1 %vm1415_vm2, %v1392_v62  ;;  %4426 = vmatpush3.bf16.msra.mxu1 %v4700_v11  ;;  %v4703_v62 = vld [vmem:[%s448_s12 + $0x18] sm:$0xff]  }
 0x265   : > { %4378 = vmatmul.mubr.msk.bf16.gmra.mrb[24].mxu1 %vm1415_vm2, %v1393_v9  ;;  %4427 = vmatprep.subr.bf16.mxu1 %v4701_v25  ;;  %v4702_v9 = vld [vmem:[%s448_s12 + $0x10] sm:$0xff]  }
 0x268   : > { %4428 = vmatpush3.bf16.msra.mxu1 %v4701_v25 }
 0x269   : > { %4429 = vmatprep.subr.bf16.mxu1 %v4702_v9 }
 0x26c   : > { %4430 = vmatpush3.bf16.msra.mxu1 %v4702_v9 }
 0x26d   : > { %4431 = vmatprep.subr.bf16.mxu1 %v4703_v62 }
 0x270   : > { %4432 = vmatpush3.bf16.msra.mxu1 %v4703_v62 }
 0x27d   : > { %v4347_v2 = vpop.f32.mrb[28].mxu0 }
 0x27e   : > { %v1333_v5 = vpop.f32.mrb[29].mxu0  ;;  %v1378_v63 = vmax.f32 %v4347_v2, 0.0 }
 0x27f   : > { %v4348_v46 = vpop.f32.mrb[30].mxu0  ;;  %v1376_v7 = vmax.f32 %v1333_v5, 0.0 }
 0x280   : > { %v1379_v49 = vmax.f32 %v4348_v46, 0.0  ;;  %v1336_v6 = vpop.f32.mrb[31].mxu0 }
 0x281   : > { %v1377_v47 = vmax.f32 %v1336_v6, 0.0 }
 0x282   : > { %v1395_v3 = vpack.c.bf16 %v1379_v49, %v1378_v63 }
 0x283   : > { %v1394_v10 = vpack.c.bf16 %v1377_v47, %v1376_v7 }
 0x285   : > { %4381 = vmatprep.mubr.msk.bf16.mxu1 %vm1415_vm2, %v1394_v10 }
 0x286   : > { %4382 = vmatmul.mubr.msk.bf16.gmra.mrb[28].mxu1 %vm1415_vm2, %v1395_v3 }
 0x28b   : > { %v4355_v16 = vpop.f32.mrb[0].mxu1 }
 0x28c   : > { %v1501_v17 = vpop.f32.mrb[1].mxu1  ;;  %v5395_v13 = vadd.f32 %v4355_v16, %v5392_v12 }
 0x28d   : > { %v4356_v61 = vpop.f32.mrb[2].mxu1  ;;  %v5401_v51 = vadd.f32 %v5392_v12, %v1501_v17 }
 0x28e   : > { %v5398_v41 = vadd.f32 %v4356_v61, %v5392_v12  ;;  %v1504_v15 = vpop.f32.mrb[3].mxu1 }
 0x28f   : > { %v5404_v18 = vadd.f32 %v5392_v12, %v1504_v15 }
 0x290   : > { %v1629_v59 = vpack.c.bf16 %v5398_v41, %v5395_v13 }
 0x291   : > { %v1628_v20 = vpack.c.bf16 %v5404_v18, %v5401_v51 }
 0x293   : > { %v4359_v56 = vpop.f32.mrb[4].mxu1  ;;  %4393 = vmatprep.mubr.msk.bf16.mxu0 %vm1683_vm3, %v1628_v20 }
 0x294   : > { %v1517_v0 = vpop.f32.mrb[5].mxu1  ;;  %4394 = vmatmul.mubr.msk.bf16.vlgmr.msra.gmra.mrb[32].mxu0 %vm1683_vm3, %v1629_v59  ;;  %v5417_v21 = vadd.f32 %v4359_v56, %v5392_v12 }
 0x295   : > { %v4360_v44 = vpop.f32.mrb[6].mxu1  ;;  %v5423_v35 = vadd.f32 %v5392_v12, %v1517_v0 }
 0x296   : > { %v5420_v22 = vadd.f32 %v4360_v44, %v5392_v12  ;;  %v1520_v8 = vpop.f32.mrb[7].mxu1 }
 0x297   : > { %v5426_v55 = vadd.f32 %v5392_v12, %v1520_v8 }
 0x298   : > { %v1631_v38 = vpack.c.bf16 %v5420_v22, %v5417_v21 }
 0x299   : > { %v1630_v31 = vpack.c.bf16 %v5426_v55, %v5423_v35 }
 0x29b   : > { %4397 = vmatprep.mubr.msk.bf16.mxu0 %vm1683_vm3, %v1630_v31 }
 0x29c   : > { %4398 = vmatmul.mubr.msk.bf16.gmra.mrb[36].mxu0 %vm1683_vm3, %v1631_v38 }
 0x2b8   : > { %v4363_v26 = vpop.f32.mrb[8].mxu1 }
 0x2b9   : > { %v1533_v14 = vpop.f32.mrb[9].mxu1  ;;  %v5439_v32 = vadd.f32 %v4363_v26, %v5392_v12 }
 0x2ba   : > { %v4364_v27 = vpop.f32.mrb[10].mxu1  ;;  %v5445_v53 = vadd.f32 %v5392_v12, %v1533_v14 }
 0x2bb   : > { %6876 = vst [vmem:[#allocation2_spill] sm:$0xff] %v5439_v32  ;;  %v5442_v30 = vadd.f32 %v4364_v27, %v5392_v12  ;;  %v1536_v34 = vpop.f32.mrb[11].mxu1 }
 0x2bc   : > { %v5448_v58 = vadd.f32 %v5392_v12, %v1536_v34 }
 0x2bd   : > { %6877 = vst [vmem:[#allocation3_spill] sm:$0xff] %v5442_v30  ;;  %v1633_v28 = vpack.c.bf16 %v5442_v30, %v5439_v32 }
 0x2be   : > { %v1632_v42 = vpack.c.bf16 %v5448_v58, %v5445_v53 }
 0x2c0   : > { %4401 = vmatprep.mubr.msk.bf16.mxu0 %vm1683_vm3, %v1632_v42 }
 0x2c1   : > { %4402 = vmatmul.mubr.msk.bf16.gmra.mrb[40].mxu0 %vm1683_vm3, %v1633_v28 }
 0x2cd   : > { %v4367_v37 = vpop.f32.mrb[12].mxu1 }
 0x2ce   : > { %v1549_v29 = vpop.f32.mrb[13].mxu1  ;;  %v5461_v48 = vadd.f32 %v4367_v37, %v5392_v12 }
 0x2cf   : > { %v4368_v43 = vpop.f32.mrb[14].mxu1  ;;  %v5467_v33 = vadd.f32 %v5392_v12, %v1549_v29 }
 0x2d0   : > { %6878 = vst [vmem:[#allocation4_spill] sm:$0xff] %v5461_v48  ;;  %v5464_v4 = vadd.f32 %v4368_v43, %v5392_v12  ;;  %v1552_v57 = vpop.f32.mrb[15].mxu1 }
 0x2d1   : > { %6880 = vst [vmem:[#allocation6_spill] sm:$0xff] %v5467_v33  ;;  %v5470_v1 = vadd.f32 %v5392_v12, %v1552_v57 }
 0x2d2   : > { %6879 = vst [vmem:[#allocation5_spill] sm:$0xff] %v5464_v4  ;;  %v1635_v50 = vpack.c.bf16 %v5464_v4, %v5461_v48 }
 0x2d3   : > { %6881 = vst [vmem:[#allocation7_spill] sm:$0xff] %v5470_v1  ;;  %v1634_v60 = vpack.c.bf16 %v5470_v1, %v5467_v33 }
 0x2d5   : > { %4405 = vmatprep.mubr.msk.bf16.mxu0 %vm1683_vm3, %v1634_v60 }
 0x2d6   : > { %4406 = vmatmul.mubr.msk.bf16.gmra.mrb[44].mxu0 %vm1683_vm3, %v1635_v50 }
 0x2f2   : > { %v4371_v2 = vpop.f32.mrb[16].mxu1 }
 0x2f3   : > { %v1565_v5 = vpop.f32.mrb[17].mxu1  ;;  %v5487_v63 = vadd.f32 %v4371_v2, %v5392_v12 }
 0x2f4   : > { %v4372_v46 = vpop.f32.mrb[18].mxu1  ;;  %v5493_v7 = vadd.f32 %v5392_v12, %v1565_v5 }
 0x2f5   : > { %6882 = vst [vmem:[#allocation8_spill] sm:$0xff] %v5487_v63  ;;  %v5490_v49 = vadd.f32 %v4372_v46, %v5392_v12  ;;  %v1568_v6 = vpop.f32.mrb[19].mxu1 }
 0x2f6   : > { %6884 = vst [vmem:[#allocation10_spill] sm:$0xff] %v5493_v7  ;;  %v5496_v47 = vadd.f32 %v5392_v12, %v1568_v6 }
 0x2f7   : > { %6883 = vst [vmem:[#allocation9_spill] sm:$0xff] %v5490_v49  ;;  %v1637_v10 = vpack.c.bf16 %v5490_v49, %v5487_v63 }
 0x2f8   : > { %6885 = vst [vmem:[#allocation11_spill] sm:$0xff] %v5496_v47  ;;  %v1636_v17 = vpack.c.bf16 %v5496_v47, %v5493_v7 }
 0x2fa   : > { %4409 = vmatprep.mubr.msk.bf16.mxu0 %vm1683_vm3, %v1636_v17 }
 0x2fb   : > { %4410 = vmatmul.mubr.msk.bf16.gmra.mrb[48].mxu0 %vm1683_vm3, %v1637_v10 }
 0x313   : > { %v4375_v61 = vpop.f32.mrb[20].mxu1 }
 0x314   : > { %v1581_v15 = vpop.f32.mrb[21].mxu1  ;;  %v5509_v20 = vadd.f32 %v4375_v61, %v5392_v12 }
 0x315   : > { %v4376_v59 = vpop.f32.mrb[22].mxu1  ;;  %v5515_v44 = vadd.f32 %v5392_v12, %v1581_v15 }
 0x316   : > { %6886 = vst [vmem:[#allocation12_spill] sm:$0xff] %v5509_v20  ;;  %v5512_v56 = vadd.f32 %v4376_v59, %v5392_v12  ;;  %v1584_v0 = vpop.f32.mrb[23].mxu1 }
 0x317   : > { %6888 = vst [vmem:[#allocation14_spill] sm:$0xff] %v5515_v44  ;;  %v5518_v8 = vadd.f32 %v5392_v12, %v1584_v0 }
 0x318   : > { %6887 = vst [vmem:[#allocation13_spill] sm:$0xff] %v5512_v56  ;;  %v1639_v31 = vpack.c.bf16 %v5512_v56, %v5509_v20 }
 0x319   : > { %6889 = vst [vmem:[#allocation15_spill] sm:$0xff] %v5518_v8  ;;  %v1638_v14 = vpack.c.bf16 %v5518_v8, %v5515_v44 }
 0x31b   : > { %4413 = vmatprep.mubr.msk.bf16.mxu0 %vm1683_vm3, %v1638_v14 }
 0x31c   : > { %4414 = vmatmul.mubr.msk.bf16.gmra.mrb[52].mxu0 %vm1683_vm3, %v1639_v31 }
 0x338   : > { %v4379_v27 = vpop.f32.mrb[24].mxu1 }
 0x339   : > { %v1597_v34 = vpop.f32.mrb[25].mxu1  ;;  %v5531_v42 = vadd.f32 %v4379_v27, %v5392_v12 }
 0x33a   : > { %v4380_v28 = vpop.f32.mrb[26].mxu1  ;;  %v5537_v43 = vadd.f32 %v5392_v12, %v1597_v34 }
 0x33b   : > { %6890 = vst [vmem:[#allocation16_spill] sm:$0xff] %v5531_v42  ;;  %v5534_v37 = vadd.f32 %v4380_v28, %v5392_v12  ;;  %v1600_v29 = vpop.f32.mrb[27].mxu1 }
 0x33c   : > { %6892 = vst [vmem:[#allocation18_spill] sm:$0xff] %v5537_v43  ;;  %v5540_v57 = vadd.f32 %v5392_v12, %v1600_v29 }
 0x33d   : > { %6891 = vst [vmem:[#allocation17_spill] sm:$0xff] %v5534_v37  ;;  %v1641_v60 = vpack.c.bf16 %v5534_v37, %v5531_v42 }
 0x33e   : > { %6893 = vst [vmem:[#allocation19_spill] sm:$0xff] %v5540_v57  ;;  %v1640_v25 = vpack.c.bf16 %v5540_v57, %v5537_v43 }
 0x340   : > { %4417 = vmatprep.mubr.msk.bf16.mxu0 %vm1683_vm3, %v1640_v25 }
 0x341   : > { %4418 = vmatmul.mubr.msk.bf16.gmra.mrb[56].mxu0 %vm1683_vm3, %v1641_v60 }
 0x359   : > { %v4383_v9 = vpop.f32.mrb[28].mxu1 }
 0x35a   : > { %v1613_v62 = vpop.f32.mrb[29].mxu1  ;;  %v5553_v5 = vadd.f32 %v4383_v9, %v5392_v12 }
 0x35b   : > { %v4384_v2 = vpop.f32.mrb[30].mxu1  ;;  %v5559_v10 = vadd.f32 %v5392_v12, %v1613_v62 }
 0x35c   : > { %6894 = vst [vmem:[#allocation20_spill] sm:$0xff] %v5553_v5  ;;  %v5556_v46 = vadd.f32 %v4384_v2, %v5392_v12  ;;  %v1616_v6 = vpop.f32.mrb[31].mxu1 }
 0x35d   : > { %6896 = vst [vmem:[#allocation22_spill] sm:$0xff] %v5559_v10  ;;  %v5562_v17 = vadd.f32 %v5392_v12, %v1616_v6  ;;  %v5577_v12 = vld [vmem:[%s6849_s8] ss:$0 sm:$0xff] }
 0x35e   : > { %6895 = vst [vmem:[#allocation21_spill] sm:$0xff] %v5556_v46  ;;  %v1643_v15 = vpack.c.bf16 %v5556_v46, %v5553_v5 }
 0x35f   : > { %6897 = vst [vmem:[#allocation23_spill] sm:$0xff] %v5562_v17  ;;  %v1642_v0 = vpack.c.bf16 %v5562_v17, %v5559_v10 }
 0x361   : > { %4421 = vmatprep.mubr.msk.bf16.mxu0 %vm1683_vm3, %v1642_v0 }
 0x362   : > { %4422 = vmatmul.mubr.msk.bf16.gmra.mrb[60].mxu0 %vm1683_vm3, %v1643_v15 }
 0x367   : > { %v4395_v31 = vpop.f32.mrb[32].mxu0 }
 0x368   : > { %v1766_v14 = vpop.f32.mrb[33].mxu0  ;;  %v1775_v34 = vadd.f32 %v4395_v31, %v5577_v12 }
 0x369   : > { %v4396_v27 = vpop.f32.mrb[34].mxu0  ;;  %v1767_v60 = vadd.f32 %v5577_v12, %v1766_v14 }
 0x36a   : > { %v1778_v28 = vadd.f32 %v4396_v27, %v5577_v12  ;;  %v1769_v29 = vpop.f32.mrb[35].mxu0 }
 0x36b   : > { %v1770_v25 = vadd.f32 %v5577_v12, %v1769_v29 }
 0x36c   : > { %v1894_v9 = vpack.c.bf16 %v1778_v28, %v1775_v34 }
 0x36d   : > { %v1893_v62 = vpack.c.bf16 %v1770_v25, %v1767_v60 }
 0x36f   : > { %v4399_v2 = vpop.f32.mrb[36].mxu0  ;;  %4433 = vmatprep.mubr.msk.bf16.mxu1 %vm1683_vm3, %v1893_v62 }
 0x370   : > { %v1782_v6 = vpop.f32.mrb[37].mxu0  ;;  %4434 = vmatmul.mubr.msk.bf16.vlgmr.msra.gmra.mrb[32].mxu1 %vm1683_vm3, %v1894_v9  ;;  %v1791_v0 = vadd.f32 %v4399_v2, %v5577_v12 }
 0x371   : > { %v4400_v15 = vpop.f32.mrb[38].mxu0  ;;  %v1783_v27 = vadd.f32 %v5577_v12, %v1782_v6 }
 0x372   : > { %v1794_v31 = vadd.f32 %v4400_v15, %v5577_v12  ;;  %v1785_v61 = vpop.f32.mrb[39].mxu0 }
 0x373   : > { %v1786_v14 = vadd.f32 %v5577_v12, %v1785_v61 }
 0x374   : > { %v1896_v59 = vpack.c.bf16 %v1794_v31, %v1791_v0 }
 0x375   : > { %v1895_v29 = vpack.c.bf16 %v1786_v14, %v1783_v27 }
 0x377   : > { %4437 = vmatprep.mubr.msk.bf16.mxu1 %vm1683_vm3, %v1895_v29 }
 0x378   : > { %4438 = vmatmul.mubr.msk.bf16.gmra.mrb[36].mxu1 %vm1683_vm3, %v1896_v59 }
 0x394   : > { %v4403_v34 = vpop.f32.mrb[40].mxu0 }
 0x395   : > { %v1798_v28 = vpop.f32.mrb[41].mxu0  ;;  %v1807_v25 = vadd.f32 %v4403_v34, %v5577_v12 }
 0x396   : > { %v4404_v60 = vpop.f32.mrb[42].mxu0  ;;  %v1799_v2 = vadd.f32 %v5577_v12, %v1798_v28 }
 0x397   : > { %v1810_v9 = vadd.f32 %v4404_v60, %v5577_v12  ;;  %v1801_v62 = vpop.f32.mrb[43].mxu0 }
 0x398   : > { %v1802_v6 = vadd.f32 %v5577_v12, %v1801_v62 }
 0x399   : > { %v1898_v15 = vpack.c.bf16 %v1810_v9, %v1807_v25 }
 0x39a   : > { %v1897_v61 = vpack.c.bf16 %v1802_v6, %v1799_v2 }
 0x39c   : > { %4441 = vmatprep.mubr.msk.bf16.mxu1 %vm1683_vm3, %v1897_v61 }
 0x39d   : > { %4442 = vmatmul.mubr.msk.bf16.gmra.mrb[40].mxu1 %vm1683_vm3, %v1898_v15 }
 0x3a9   : > { %v4407_v0 = vpop.f32.mrb[44].mxu0 }
 0x3aa   : > { %v1814_v59 = vpop.f32.mrb[45].mxu0  ;;  %v1823_v27 = vadd.f32 %v4407_v0, %v5577_v12 }
 0x3ab   : > { %v4408_v31 = vpop.f32.mrb[46].mxu0  ;;  %v1815_v34 = vadd.f32 %v5577_v12, %v1814_v59 }
 0x3ac   : > { %v1826_v14 = vadd.f32 %v4408_v31, %v5577_v12  ;;  %v1817_v29 = vpop.f32.mrb[47].mxu0 }
 0x3ad   : > { %v1818_v28 = vadd.f32 %v5577_v12, %v1817_v29 }
 0x3ae   : > { %v1900_v60 = vpack.c.bf16 %v1826_v14, %v1823_v27 }
 0x3af   : > { %v1899_v62 = vpack.c.bf16 %v1818_v28, %v1815_v34 }
 0x3b1   : > { %4445 = vmatprep.mubr.msk.bf16.mxu1 %vm1683_vm3, %v1899_v62 }
 0x3b2   : > { %4446 = vmatmul.mubr.msk.bf16.gmra.mrb[44].mxu1 %vm1683_vm3, %v1900_v60 }
 0x3ce   : > { %v4411_v25 = vpop.f32.mrb[48].mxu0 }
 0x3cf   : > { %v1830_v9 = vpop.f32.mrb[49].mxu0  ;;  %v1839_v6 = vadd.f32 %v4411_v25, %v5577_v12 }
 0x3d0   : > { %v4412_v2 = vpop.f32.mrb[50].mxu0  ;;  %v1831_v0 = vadd.f32 %v5577_v12, %v1830_v9 }
 0x3d1   : > { %v1842_v15 = vadd.f32 %v4412_v2, %v5577_v12  ;;  %v1833_v61 = vpop.f32.mrb[51].mxu0 }
 0x3d2   : > { %v1834_v59 = vadd.f32 %v5577_v12, %v1833_v61 }
 0x3d3   : > { %v1902_v31 = vpack.c.bf16 %v1842_v15, %v1839_v6 }
 0x3d4   : > { %v1901_v29 = vpack.c.bf16 %v1834_v59, %v1831_v0 }
 0x3d6   : > { %4449 = vmatprep.mubr.msk.bf16.mxu1 %vm1683_vm3, %v1901_v29 }
 0x3d7   : > { %4450 = vmatmul.mubr.msk.bf16.gmra.mrb[48].mxu1 %vm1683_vm3, %v1902_v31 }
 0x3ef   : > { %v4415_v27 = vpop.f32.mrb[52].mxu0 }
 0x3f0   : > { %v1846_v14 = vpop.f32.mrb[53].mxu0  ;;  %v1855_v28 = vadd.f32 %v4415_v27, %v5577_v12 }
 0x3f1   : > { %v4416_v34 = vpop.f32.mrb[54].mxu0  ;;  %v1847_v25 = vadd.f32 %v5577_v12, %v1846_v14 }
 0x3f2   : > { %v1858_v60 = vadd.f32 %v4416_v34, %v5577_v12  ;;  %v1849_v62 = vpop.f32.mrb[55].mxu0 }
 0x3f3   : > { %v1850_v9 = vadd.f32 %v5577_v12, %v1849_v62 }
 0x3f4   : > { %v1904_v2 = vpack.c.bf16 %v1858_v60, %v1855_v28 }
 0x3f5   : > { %v1903_v61 = vpack.c.bf16 %v1850_v9, %v1847_v25 }
 0x3f7   : > { %4453 = vmatprep.mubr.msk.bf16.mxu1 %vm1683_vm3, %v1903_v61 }
 0x3f8   : > { %4454 = vmatmul.mubr.msk.bf16.gmra.mrb[52].mxu1 %vm1683_vm3, %v1904_v2 }
 0x414   : > { %v4419_v6 = vpop.f32.mrb[56].mxu0 }
 0x415   : > { %v1862_v15 = vpop.f32.mrb[57].mxu0  ;;  %v1871_v59 = vadd.f32 %v4419_v6, %v5577_v12 }
 0x416   : > { %v4420_v0 = vpop.f32.mrb[58].mxu0  ;;  %v1863_v27 = vadd.f32 %v5577_v12, %v1862_v15 }
 0x417   : > { %v1874_v31 = vadd.f32 %v4420_v0, %v5577_v12  ;;  %v1865_v29 = vpop.f32.mrb[59].mxu0 }
 0x418   : > { %v1866_v14 = vadd.f32 %v5577_v12, %v1865_v29 }
 0x419   : > { %v1906_v34 = vpack.c.bf16 %v1874_v31, %v1871_v59  ;;  %v5626_v59 = vand.u32 127, %v657_v54 }
 0x41a   : > { %v1905_v62 = vpack.c.bf16 %v1866_v14, %v1863_v27 }
 0x41b   : > { %vm2315_vm4 = vcmp.ge.s32.totalorder %v5626_v59, 4  ;;  %vm2316_vm5 = vcmp.lt.s32.totalorder %v5626_v59, 8  ;;  %vm2153_vm6 = vcmp.lt.s32.totalorder %v5626_v59, 4 }
 0x41c   : > { %4457 = vmatprep.mubr.msk.bf16.mxu1 %vm1683_vm3, %v1905_v62  ;;  %vm5633_vm7 = vmand %vm2315_vm4, %vm2316_vm5 }
 0x41d   : > { %4458 = vmatmul.mubr.msk.bf16.gmra.mrb[56].mxu1 %vm1683_vm3, %v1906_v34 }
 0x435   : > { %v4423_v28 = vpop.f32.mrb[60].mxu0 }
 0x436   : > { %v1878_v60 = vpop.f32.mrb[61].mxu0  ;;  %v1887_v9 = vadd.f32 %v4423_v28, %v5577_v12 }
 0x437   : > { %v4424_v25 = vpop.f32.mrb[62].mxu0  ;;  %v1879_v6 = vadd.f32 %v5577_v12, %v1878_v60 }
 0x438   : > { %v1890_v2 = vadd.f32 %v4424_v25, %v5577_v12  ;;  %v1881_v61 = vpop.f32.mrb[63].mxu0 }
 0x439   : > { %v1882_v15 = vadd.f32 %v5577_v12, %v1881_v61 }
 0x43a   : > { %v1908_v0 = vpack.c.bf16 %v1890_v2, %v1887_v9 }
 0x43b   : > { %v1907_v29 = vpack.c.bf16 %v1882_v15, %v1879_v6 }
 0x43d   : > { %4461 = vmatprep.mubr.msk.bf16.mxu1 %vm1683_vm3, %v1907_v29 }
 0x43e   : > { %4462 = vmatmul.mubr.msk.bf16.gmra.mrb[60].mxu1 %vm1683_vm3, %v1908_v0 }
 0x443   : > { %v5637_v12 = vpop.f32.mrb[32].mxu1 }
 0x444   : > { %v5639_v27 = vpop.f32.mrb[33].mxu1  ;;  %v2157_v54 = vsel %vm2153_vm6, %v5637_v12, -1e+30  ;;  %v2320_v25 = vsel %vm5633_vm7, %v5637_v12, -1e+30 }
 0x445   : > { %v5644_v14 = vpop.f32.mrb[34].mxu1  ;;  %v2193_v34 = vsel %vm1134_vm1, %v2157_v54, -inf  ;;  %v2155_v62 = vsel %vm2153_vm6, %v5639_v27, -1e+30  ;;  %v2356_v2 = vsel %vm1134_vm1, %v2320_v25, -inf }
 0x446   : > { %2194 = vmax.xlane.f32.xlu0 %v2193_v34  ;;  %v5650_v28 = vpop.f32.mrb[35].mxu1  ;;  %v2187_v60 = vsel %vm1134_vm1, %v2155_v62, -inf  ;;  %v2158_v9 = vsel %vm2153_vm6, %v5644_v14, -1e+30  ;;  %v2318_v6 = vsel %vm5633_vm7, %v5639_v27, -1e+30 }
 0x447   : > { %2188 = vmax.xlane.f32.xlu1 %v2187_v60  ;;  %v2196_v61 = vsel %vm1134_vm1, %v2158_v9, -inf  ;;  %v2321_v0 = vsel %vm5633_vm7, %v5644_v14, -1e+30  ;;  %v2350_v34 = vsel %vm1134_vm1, %v2318_v6, -inf  ;;  %v2156_v25 = vsel %vm2153_vm6, %v5650_v28, -1e+30 }
 0x448   : > { %v2359_v60 = vsel %vm1134_vm1, %v2321_v0, -inf  ;;  %v2319_v9 = vsel %vm5633_vm7, %v5650_v28, -1e+30 }
 0x44a   : > { %2357 = vmax.xlane.f32.xlu0 %v2356_v2  ;;  %v2190_v2 = vsel %vm1134_vm1, %v2156_v25, -inf }
 0x44b   : > { %2197 = vmax.xlane.f32.xlu1 %v2196_v61  ;;  %v5664_v15 = vpop.f32.mrb[36].mxu1  ;;  %v2353_v61 = vsel %vm1134_vm1, %v2319_v9, -inf }
 0x44c   : > { %v5669_v29 = vpop.f32.mrb[37].mxu1  ;;  %v2161_v6 = vsel %vm2153_vm6, %v5664_v15, -1e+30  ;;  %v2324_v25 = vsel %vm5633_vm7, %v5664_v15, -1e+30 }
 0x44d   : > { %v5671_v54 = vpop.f32.mrb[38].mxu1 }
 0x44e   : > { %2351 = vmax.xlane.f32.xlu0 %v2350_v34  ;;  %v5674_v62 = vpop.f32.mrb[39].mxu1  ;;  %v2162_v0 = vsel %vm2153_vm6, %v5671_v54, -1e+30  ;;  %v2205_v34 = vsel %vm1134_vm1, %v2161_v6, -inf  ;;  %v2325_v9 = vsel %vm5633_vm7, %v5671_v54, -1e+30 }
 0x44f   : > { %2360 = vmax.xlane.f32.xlu1 %v2359_v60  ;;  %v2208_v60 = vsel %vm1134_vm1, %v2162_v0, -inf  ;;  %v2159_v6 = vsel %vm2153_vm6, %v5669_v29, -1e+30  ;;  %v2160_v0 = vsel %vm2153_vm6, %v5674_v62, -1e+30 }
 0x452   : > { %2191 = vmax.xlane.f32.xlu0 %v2190_v2  ;;  %v2368_v2 = vsel %vm1134_vm1, %v2324_v25, -inf  ;;  %v2322_v25 = vsel %vm5633_vm7, %v5669_v29, -1e+30 }
 0x453   : > { %2354 = vmax.xlane.f32.xlu1 %v2353_v61  ;;  %v2371_v61 = vsel %vm1134_vm1, %v2325_v9, -inf  ;;  %v2323_v9 = vsel %vm5633_vm7, %v5674_v62, -1e+30 }
 0x456   : > { %2206 = vmax.xlane.f32.xlu0 %v2205_v34  ;;  %v2199_v34 = vsel %vm1134_vm1, %v2159_v6, -inf }
 0x457   : > { %2209 = vmax.xlane.f32.xlu1 %v2208_v60  ;;  %v2202_v60 = vsel %vm1134_vm1, %v2160_v0, -inf }
 0x45a   : > { %2369 = vmax.xlane.f32.xlu0 %v2368_v2  ;;  %v2362_v2 = vsel %vm1134_vm1, %v2322_v25, -inf }
 0x45b   : > { %2372 = vmax.xlane.f32.xlu1 %v2371_v61  ;;  %v2365_v61 = vsel %vm1134_vm1, %v2323_v9, -inf }
 0x45e   : > { %2200 = vmax.xlane.f32.xlu0 %v2199_v34 }
 0x45f   : > { %2203 = vmax.xlane.f32.xlu1 %v2202_v60 }
 0x462   : > { %2363 = vmax.xlane.f32.xlu0 %v2362_v2 }
 0x463   : > { %2366 = vmax.xlane.f32.xlu1 %v2365_v61 }
 0x470   : > { %v5717_v50 = vpop.f32.mrb[40].mxu1 }
 0x471   : > { %v5719_v6 = vpop.f32.mrb[41].mxu1  ;;  %v2165_v0 = vsel %vm2153_vm6, %v5717_v50, -1e+30  ;;  %v2328_v9 = vsel %vm5633_vm7, %v5717_v50, -1e+30 }
 0x472   : > { %v5724_v34 = vpop.f32.mrb[42].mxu1  ;;  %v2217_v60 = vsel %vm1134_vm1, %v2165_v0, -inf  ;;  %v2380_v0 = vsel %vm1134_vm1, %v2328_v9, -inf }
 0x473   : > { %2218 = vmax.xlane.f32.xlu0 %v2217_v60  ;;  %v5727_v11 = vpop.f32.mrb[43].mxu1  ;;  %v2166_v25 = vsel %vm2153_vm6, %v5724_v34, -1e+30  ;;  %v2329_v61 = vsel %vm5633_vm7, %v5724_v34, -1e+30 }
 0x474   : > { %v2220_v2 = vsel %vm1134_vm1, %v2166_v25, -inf  ;;  %v2163_v60 = vsel %vm2153_vm6, %v5719_v6, -1e+30  ;;  %v2383_v38 = vsel %vm1134_vm1, %v2329_v61, -inf  ;;  %v2164_v26 = vsel %vm2153_vm6, %v5727_v11, -1e+30 }
 0x475   : > { %2221 = vmax.xlane.f32.xlu1 %v2220_v2  ;;  %v2211_v25 = vsel %vm1134_vm1, %v2163_v60, -inf  ;;  %v2326_v2 = vsel %vm5633_vm7, %v5719_v6, -1e+30  ;;  %v2214_v9 = vsel %vm1134_vm1, %v2164_v26, -inf }
 0x477   : > { %2381 = vmax.xlane.f32.xlu0 %v2380_v0  ;;  %v2327_v0 = vsel %vm5633_vm7, %v5727_v11, -1e+30 }
 0x478   : > { %v2377_v61 = vsel %vm1134_vm1, %v2327_v0, -inf }
 0x479   : > { %2384 = vmax.xlane.f32.xlu1 %v2383_v38  ;;  %v2374_v38 = vsel %vm1134_vm1, %v2326_v2, -inf }
 0x47b   : > { %2212 = vmax.xlane.f32.xlu0 %v2211_v25 }
 0x47d   : > { %2215 = vmax.xlane.f32.xlu1 %v2214_v9 }
 0x47f   : > { %2375 = vmax.xlane.f32.xlu0 %v2374_v38 }
 0x481   : > { %2378 = vmax.xlane.f32.xlu1 %v2377_v61 }
 0x485   : > { %v5757_v3 = vpop.f32.mrb[44].mxu1 }
 0x486   : > { %v5759_v60 = vpop.f32.mrb[45].mxu1  ;;  %v2169_v25 = vsel %vm2153_vm6, %v5757_v3, -1e+30  ;;  %v2332_v0 = vsel %vm5633_vm7, %v5757_v3, -1e+30 }
 0x487   : > { %v5764_v26 = vpop.f32.mrb[46].mxu1  ;;  %v2229_v9 = vsel %vm1134_vm1, %v2169_v25, -inf  ;;  %v2392_v25 = vsel %vm1134_vm1, %v2332_v0, -inf }
 0x488   : > { %2230 = vmax.xlane.f32.xlu0 %v2229_v9  ;;  %v5767_v16 = vpop.f32.mrb[47].mxu1  ;;  %v2170_v2 = vsel %vm2153_vm6, %v5764_v26, -1e+30  ;;  %v2333_v61 = vsel %vm5633_vm7, %v5764_v26, -1e+30 }
 0x489   : > { %v2232_v38 = vsel %vm1134_vm1, %v2170_v2, -inf  ;;  %v2167_v9 = vsel %vm2153_vm6, %v5759_v60, -1e+30  ;;  %v2395_v40 = vsel %vm1134_vm1, %v2333_v61, -inf  ;;  %v2168_v36 = vsel %vm2153_vm6, %v5767_v16, -1e+30 }
 0x48a   : > { %2233 = vmax.xlane.f32.xlu1 %v2232_v38  ;;  %v2223_v2 = vsel %vm1134_vm1, %v2167_v9, -inf  ;;  %v2330_v38 = vsel %vm5633_vm7, %v5759_v60, -1e+30  ;;  %v2226_v0 = vsel %vm1134_vm1, %v2168_v36, -inf }
 0x48c   : > { %2393 = vmax.xlane.f32.xlu0 %v2392_v25  ;;  %v2331_v25 = vsel %vm5633_vm7, %v5767_v16, -1e+30 }
 0x48d   : > { %v2389_v61 = vsel %vm1134_vm1, %v2331_v25, -inf }
 0x48e   : > { %2396 = vmax.xlane.f32.xlu1 %v2395_v40  ;;  %v2386_v40 = vsel %vm1134_vm1, %v2330_v38, -inf }
 0x490   : > { %2224 = vmax.xlane.f32.xlu0 %v2223_v2 }
 0x492   : > { %2227 = vmax.xlane.f32.xlu1 %v2226_v0 }
 0x494   : > { %2387 = vmax.xlane.f32.xlu0 %v2386_v40 }
 0x496   : > { %2390 = vmax.xlane.f32.xlu1 %v2389_v61 }
 0x4aa   : > { %v5797_v24 = vpop.f32.mrb[48].mxu1 }
 0x4ab   : > { %v5799_v9 = vpop.f32.mrb[49].mxu1  ;;  %v2173_v2 = vsel %vm2153_vm6, %v5797_v24, -1e+30  ;;  %v2336_v25 = vsel %vm5633_vm7, %v5797_v24, -1e+30 }
 0x4ac   : > { %v5804_v36 = vpop.f32.mrb[50].mxu1  ;;  %v2241_v0 = vsel %vm1134_vm1, %v2173_v2, -inf  ;;  %v2404_v2 = vsel %vm1134_vm1, %v2336_v25, -inf }
 0x4ad   : > { %2242 = vmax.xlane.f32.xlu0 %v2241_v0  ;;  %v5807_v39 = vpop.f32.mrb[51].mxu1  ;;  %v2174_v38 = vsel %vm2153_vm6, %v5804_v36, -1e+30  ;;  %v2337_v61 = vsel %vm5633_vm7, %v5804_v36, -1e+30 }
 0x4ae   : > { %v2244_v40 = vsel %vm1134_vm1, %v2174_v38, -inf  ;;  %v2171_v0 = vsel %vm2153_vm6, %v5799_v9, -1e+30  ;;  %v2407_v23 = vsel %vm1134_vm1, %v2337_v61, -inf  ;;  %v2172_v45 = vsel %vm2153_vm6, %v5807_v39, -1e+30 }
 0x4af   : > { %2245 = vmax.xlane.f32.xlu1 %v2244_v40  ;;  %v2235_v38 = vsel %vm1134_vm1, %v2171_v0, -inf  ;;  %v2334_v40 = vsel %vm5633_vm7, %v5799_v9, -1e+30  ;;  %v2238_v25 = vsel %vm1134_vm1, %v2172_v45, -inf }
 0x4b1   : > { %2405 = vmax.xlane.f32.xlu0 %v2404_v2  ;;  %v2335_v2 = vsel %vm5633_vm7, %v5807_v39, -1e+30 }
 0x4b2   : > { %v2401_v61 = vsel %vm1134_vm1, %v2335_v2, -inf }
 0x4b3   : > { %2408 = vmax.xlane.f32.xlu1 %v2407_v23  ;;  %v2398_v23 = vsel %vm1134_vm1, %v2334_v40, -inf }
 0x4b5   : > { %2236 = vmax.xlane.f32.xlu0 %v2235_v38 }
 0x4b7   : > { %2239 = vmax.xlane.f32.xlu1 %v2238_v25 }
 0x4b9   : > { %2399 = vmax.xlane.f32.xlu0 %v2398_v23 }
 0x4bb   : > { %2402 = vmax.xlane.f32.xlu1 %v2401_v61 }
 0x4cb   : > { %v5837_v19 = vpop.f32.mrb[52].mxu1 }
 0x4cc   : > { %v5839_v0 = vpop.f32.mrb[53].mxu1  ;;  %v2177_v38 = vsel %vm2153_vm6, %v5837_v19, -1e+30  ;;  %v2340_v2 = vsel %vm5633_vm7, %v5837_v19, -1e+30 }
 0x4cd   : > { %v5844_v45 = vpop.f32.mrb[54].mxu1  ;;  %v2253_v25 = vsel %vm1134_vm1, %v2177_v38, -inf  ;;  %v2416_v38 = vsel %vm1134_vm1, %v2340_v2, -inf }
 0x4ce   : > { %2254 = vmax.xlane.f32.xlu0 %v2253_v25  ;;  %v5847_v52 = vpop.f32.mrb[55].mxu1  ;;  %v2178_v40 = vsel %vm2153_vm6, %v5844_v45, -1e+30  ;;  %v2341_v61 = vsel %vm5633_vm7, %v5844_v45, -1e+30 }
 0x4cf   : > { %v2256_v23 = vsel %vm1134_vm1, %v2178_v40, -inf  ;;  %v2175_v25 = vsel %vm2153_vm6, %v5839_v0, -1e+30  ;;  %v2419_v5 = vsel %vm1134_vm1, %v2341_v61, -inf  ;;  %v2176_v46 = vsel %vm2153_vm6, %v5847_v52, -1e+30 }
 0x4d0   : > { %2257 = vmax.xlane.f32.xlu1 %v2256_v23  ;;  %v2247_v40 = vsel %vm1134_vm1, %v2175_v25, -inf  ;;  %v2338_v23 = vsel %vm5633_vm7, %v5839_v0, -1e+30  ;;  %v2250_v2 = vsel %vm1134_vm1, %v2176_v46, -inf }
 0x4d2   : > { %2417 = vmax.xlane.f32.xlu0 %v2416_v38  ;;  %v2339_v38 = vsel %vm5633_vm7, %v5847_v52, -1e+30 }
 0x4d3   : > { %v2413_v61 = vsel %vm1134_vm1, %v2339_v38, -inf  ;;  %v2195_v10 = vpop.xlane.xlu0 %2194 }
 0x4d4   : > { %2420 = vmax.xlane.f32.xlu1 %v2419_v5  ;;  %v2410_v5 = vsel %vm1134_vm1, %v2338_v23, -inf  ;;  %v2189_v25 = vpop.xlane.xlu1 %2188  ;;  %v2285_v4 = vsel %vm2153_vm6, %v2195_v10, -1e+30 }
 0x4d5   : > { %v2283_v10 = vsel %vm2153_vm6, %v2189_v25, -1e+30 }
 0x4d6   : > { %2248 = vmax.xlane.f32.xlu0 %v2247_v40 }
 0x4d7   : > { %v2358_v40 = vpop.xlane.xlu0 %2357 }
 0x4d8   : > { %2251 = vmax.xlane.f32.xlu1 %v2250_v2  ;;  %v2198_v17 = vpop.xlane.xlu1 %2197 }
 0x4da   : > { %2411 = vmax.xlane.f32.xlu0 %v2410_v5 }
 0x4db   : > { %v2352_v42 = vpop.xlane.xlu0 %2351 }
 0x4dc   : > { %2414 = vmax.xlane.f32.xlu1 %v2413_v61  ;;  %v2361_v37 = vpop.xlane.xlu1 %2360 }
 0x4df   : > { %v2192_v38 = vpop.xlane.xlu0 %2191 }
 0x4e0   : > { %v2355_v44 = vpop.xlane.xlu1 %2354 }
 0x4e3   : > { %v2207_v49 = vpop.xlane.xlu0 %2206 }
 0x4e4   : > { %v2210_v7 = vpop.xlane.xlu1 %2209 }
 0x4e7   : > { %v2370_v47 = vpop.xlane.xlu0 %2369 }
 0x4f0   : > { %v5877_v43 = vpop.f32.mrb[56].mxu1 }
 0x4f1   : > { %v5879_v46 = vpop.f32.mrb[57].mxu1  ;;  %v2181_v2 = vsel %vm2153_vm6, %v5877_v43, -1e+30  ;;  %v2344_v20 = vsel %vm5633_vm7, %v5877_v43, -1e+30 }
 0x4f2   : > { %v5884_v57 = vpop.f32.mrb[58].mxu1  ;;  %v2265_v23 = vsel %vm1134_vm1, %v2181_v2, -inf  ;;  %v2179_v8 = vsel %vm2153_vm6, %v5879_v46, -1e+30 }
 0x4f3   : > { %2266 = vmax.xlane.f32.xlu0 %v2265_v23  ;;  %v5887_v5 = vpop.f32.mrb[59].mxu1  ;;  %v2182_v61 = vsel %vm2153_vm6, %v5884_v57, -1e+30  ;;  %v2345_v2 = vsel %vm5633_vm7, %v5884_v57, -1e+30  ;;  %v2428_v23 = vsel %vm1134_vm1, %v2344_v20, -inf }
 0x4f4   : > { %v2268_v56 = vsel %vm1134_vm1, %v2182_v61, -inf  ;;  %v2431_v63 = vsel %vm1134_vm1, %v2345_v2, -inf  ;;  %v2180_v61 = vsel %vm2153_vm6, %v5887_v5, -1e+30  ;;  %v2342_v20 = vsel %vm5633_vm7, %v5879_v46, -1e+30 }
 0x4f5   : > { %2269 = vmax.xlane.f32.xlu1 %v2268_v56  ;;  %v2259_v56 = vsel %vm1134_vm1, %v2179_v8, -inf  ;;  %v2343_v2 = vsel %vm5633_vm7, %v5887_v5, -1e+30  ;;  %v2373_v8 = vpop.xlane.xlu1 %2372 }
 0x4f6   : > { %v2425_v48 = vsel %vm1134_vm1, %v2343_v2, -inf }
 0x4f7   : > { %2429 = vmax.xlane.f32.xlu0 %v2428_v23  ;;  %v2262_v23 = vsel %vm1134_vm1, %v2180_v61, -inf  ;;  %v2448_v61 = vsel %vm5633_vm7, %v2358_v40, %v2285_v4  ;;  %v2284_v4 = vsel %vm2153_vm6, %v2192_v38, -1e+30 }
 0x4f8   : > { %v2480_v2 = vsub.f32 %v5637_v12, %v2448_v61 }
 0x4f9   : > { %2432 = vmax.xlane.f32.xlu1 %v2431_v63  ;;  %v2422_v63 = vsel %vm1134_vm1, %v2342_v20, -inf  ;;  %v5921_v33 = vpop.xlane.xlu1 %2203 }
 0x4fa   : > { %v2514_v32 = vmul.f32 1.442695, %v2480_v2 }
 0x4fb   : > { %2260 = vmax.xlane.f32.xlu0 %v2259_v56  ;;  %v5917_v56 = vpop.xlane.xlu0 %2200 }
 0x4fc   : > { %4708 = vpow2.f32 %v2514_v32 }
 0x4fd   : > { %2263 = vmax.xlane.f32.xlu1 %v2262_v23  ;;  %v2286_v23 = vsel %vm2153_vm6, %v2198_v17, -1e+30  ;;  %v5933_v1 = vpop.xlane.xlu1 %2366 }
 0x4fe   : > { %v2449_v20 = vsel %vm5633_vm7, %v2361_v37, %v2286_v23  ;;  %v2446_v37 = vsel %vm5633_vm7, %v2352_v42, %v2283_v10 }
 0x4ff   : > { %2423 = vmax.xlane.f32.xlu0 %v2422_v63  ;;  %v5930_v63 = vpop.xlane.xlu0 %2363  ;;  %v2478_v38 = vsub.f32 %v5639_v27, %v2446_v37 }
 0x501   : > { %2426 = vmax.xlane.f32.xlu1 %v2425_v48  ;;  %v2481_v48 = vsub.f32 %v5644_v14, %v2449_v20  ;;  %v2447_v14 = vsel %vm5633_vm7, %v2355_v44, %v2284_v4  ;;  %v2510_v37 = vmul.f32 1.442695, %v2478_v38 }
 0x502   : > { %v5943_v12 = vpop.xlane.xlu1 %2221  ;;  %v2479_v32 = vsub.f32 %v5650_v28, %v2447_v14 }
 0x503   : > { %v5939_v40 = vpop.xlane.xlu0 %2218  ;;  %v2516_v17 = vmul.f32 1.442695, %v2481_v48 }
 0x504   : > { %v2512_v14 = vmul.f32 1.442695, %v2479_v32 }
 0x505   : > { %4710 = vpow2.f32 %v2516_v17 }
 0x506   : > { %4712 = vpow2.f32 %v2510_v37 }
 0x507   : > { %v5967_v10 = vpop.xlane.xlu0 %2381  ;;  %4714 = vpow2.f32 %v2512_v14 }
 0x511   : > { %v5945_v61 = vpop.f32.mrb[60].mxu1 }
 0x512   : > { %v5949_v23 = vpop.f32.mrb[61].mxu1  ;;  %v2185_v25 = vsel %vm2153_vm6, %v5945_v61, -1e+30  ;;  %v2348_v48 = vsel %vm5633_vm7, %v5945_v61, -1e+30 }
 0x513   : > { %v5955_v20 = vpop.f32.mrb[62].mxu1  ;;  %v2277_v42 = vsel %vm1134_vm1, %v2185_v25, -inf  ;;  %v2289_v25 = vsel %vm2153_vm6, %v2207_v49, -1e+30  ;;  %v2440_v30 = vsel %vm1134_vm1, %v2348_v48, -inf }
 0x514   : > { %2278 = vmax.xlane.f32.xlu0 %v2277_v42  ;;  %v5958_v2 = vpop.f32.mrb[63].mxu1  ;;  %v2186_v44 = vsel %vm2153_vm6, %v5955_v20, -1e+30  ;;  %v2349_v4 = vsel %vm5633_vm7, %v5955_v20, -1e+30  ;;  %v5975_v42 = vpop.xlane.xlu1 %2384  ;;  %v2452_v28 = vsel %vm5633_vm7, %v2370_v47, %v2289_v25 }
 0x515   : > { %v2280_v27 = vsel %vm1134_vm1, %v2186_v44, -inf  ;;  %v2183_v17 = vsel %vm2153_vm6, %v5949_v23, -1e+30  ;;  %v2290_v44 = vsel %vm2153_vm6, %v2210_v7, -1e+30  ;;  %v2443_v38 = vsel %vm1134_vm1, %v2349_v4, -inf  ;;  %v5992_v47 = vpop.xlane.xlu0 %2212 }
 0x516   : > { %2281 = vmax.xlane.f32.xlu1 %v2280_v27  ;;  %v2453_v49 = vsel %vm5633_vm7, %v2373_v8, %v2290_v44  ;;  %v2184_v48 = vsel %vm2153_vm6, %v5958_v2, -1e+30  ;;  %v2271_v32 = vsel %vm1134_vm1, %v2183_v17, -inf  ;;  %v2346_v7 = vsel %vm5633_vm7, %v5949_v23, -1e+30  ;;  %v5998_v27 = vpop.eup %4708 }
 0x517   : > { %v2485_v8 = vsub.f32 %v5671_v54, %v2453_v49  ;;  %v2274_v37 = vsel %vm1134_vm1, %v2184_v48, -inf  ;;  %v6007_v25 = vpop.eup %4710  ;;  %v2287_v17 = vsel %vm2153_vm6, %v5917_v56, -1e+30  ;;  %v2434_v14 = vsel %vm1134_vm1, %v2346_v7, -inf }
 0x518   : > { %2441 = vmax.xlane.f32.xlu0 %v2440_v30  ;;  %v2484_v30 = vsub.f32 %v5664_v15, %v2452_v28  ;;  %v6001_v4 = vpop.xlane.xlu1 %2215  ;;  %v2347_v15 = vsel %vm5633_vm7, %v5958_v2, -1e+30  ;;  %v2450_v54 = vsel %vm5633_vm7, %v5930_v63, %v2287_v17  ;;  %v2576_v44 = vsel %vm2153_vm6, %v5998_v27, 0.0 }
 0x519   : > { %v2288_v49 = vsel %vm2153_vm6, %v5921_v33, -1e+30  ;;  %v2376_v48 = vpop.xlane.xlu0 %2375  ;;  %v2577_v63 = vsel %vm2153_vm6, %v6007_v25, 0.0  ;;  %v2768_v33 = vsel %vm5633_vm7, %v5998_v27, 0.0 }
 0x51a   : > { %2444 = vmax.xlane.f32.xlu1 %v2443_v38  ;;  %v2522_v28 = vmul.f32 1.442695, %v2484_v30  ;;  %v2524_v38 = vmul.f32 1.442695, %v2485_v8  ;;  %v2437_v30 = vsel %vm1134_vm1, %v2347_v15, -inf  ;;  %v2451_v56 = vsel %vm5633_vm7, %v5933_v1, %v2288_v49 }
 0x51b   : > { %v2612_v8 = vsel %vm1134_vm1, %v2576_v44, 0.0  ;;  %v2483_v1 = vsub.f32 %v5674_v62, %v2451_v56  ;;  %v2615_v17 = vsel %vm1134_vm1, %v2577_v63, 0.0  ;;  %v2294_v56 = vsel %vm2153_vm6, %v5943_v12, -1e+30 }
 0x51c   : > { %2272 = vmax.xlane.f32.xlu0 %v2271_v32  ;;  %4716 = vpow2.f32 %v2522_v28  ;;  %v2482_v32 = vsub.f32 %v5669_v29, %v2450_v54  ;;  %v2379_v7 = vpop.xlane.xlu1 %2378  ;;  %v2769_v29 = vsel %vm5633_vm7, %v6007_v25, 0.0  ;;  %v2293_v54 = vsel %vm2153_vm6, %v5939_v40, -1e+30 }
 0x51d   : > { %4718 = vpow2.f32 %v2524_v38  ;;  %v2231_v15 = vpop.xlane.xlu0 %2230  ;;  %v2804_v38 = vsel %vm1134_vm1, %v2768_v33, 0.0  ;;  %v2456_v62 = vsel %vm5633_vm7, %v5967_v10, %v2293_v54  ;;  %v2807_v63 = vsel %vm1134_vm1, %v2769_v29, 0.0 }
 0x51e   : > { %2275 = vmax.xlane.f32.xlu1 %v2274_v37  ;;  %v6034_v37 = vpop.eup %4712  ;;  %v2457_v40 = vsel %vm5633_vm7, %v5975_v42, %v2294_v56  ;;  %v2292_v56 = vsel %vm2153_vm6, %v6001_v4, -1e+30 }
 0x51f   : > { %v6041_v28 = vpop.eup %4714  ;;  %v2574_v49 = vsel %vm2153_vm6, %v6034_v37, 0.0  ;;  %v2766_v12 = vsel %vm5633_vm7, %v6034_v37, 0.0  ;;  %v2489_v42 = vsub.f32 %v5724_v34, %v2457_v40 }
 0x520   : > { %2435 = vmax.xlane.f32.xlu0 %v2434_v14  ;;  %v2518_v14 = vmul.f32 1.442695, %v2482_v32  ;;  %v2234_v44 = vpop.xlane.xlu1 %2233  ;;  %v2575_v10 = vsel %vm2153_vm6, %v6041_v28, 0.0  ;;  %v2488_v32 = vsub.f32 %v5717_v50, %v2456_v62  ;;  %v2606_v33 = vsel %vm1134_vm1, %v2574_v49, 0.0 }
 0x521   : > { %v2609_v29 = vsel %vm1134_vm1, %v2575_v10, 0.0  ;;  %v2767_v50 = vsel %vm5633_vm7, %v6041_v28, 0.0  ;;  %v2798_v62 = vsel %vm1134_vm1, %v2766_v12, 0.0 }
 0x522   : > { %2438 = vmax.xlane.f32.xlu1 %v2437_v30  ;;  %v2520_v30 = vmul.f32 1.442695, %v2483_v1  ;;  %4720 = vpow2.f32 %v2518_v14  ;;  %v2530_v54 = vmul.f32 1.442695, %v2488_v32  ;;  %v2801_v40 = vsel %vm1134_vm1, %v2767_v50, 0.0 }
 0x524   : > { %2613 = vadd.xlane.f32.xlu0 %v2612_v8  ;;  %v2394_v8 = vpop.xlane.xlu0 %2393  ;;  %4722 = vpow2.f32 %v2520_v30  ;;  %v2532_v30 = vmul.f32 1.442695, %v2489_v42 }
 0x525   : > { %4724 = vpow2.f32 %v2530_v54  ;;  %v2297_v54 = vsel %vm2153_vm6, %v2231_v15, -1e+30 }
 0x526   : > { %2616 = vadd.xlane.f32.xlu1 %v2615_v17  ;;  %v6068_v1 = vpop.eup %4716  ;;  %v2397_v17 = vpop.xlane.xlu1 %2396  ;;  %4726 = vpow2.f32 %v2532_v30  ;;  %v2298_v30 = vsel %vm2153_vm6, %v2234_v44, -1e+30 }
 0x527   : > { %v6075_v14 = vpop.eup %4718  ;;  %v2580_v49 = vsel %vm2153_vm6, %v6068_v1, 0.0  ;;  %v2772_v4 = vsel %vm5633_vm7, %v6068_v1, 0.0  ;;  %v2461_v15 = vsel %vm5633_vm7, %v2397_v17, %v2298_v30 }
 0x528   : > { %2805 = vadd.xlane.f32.xlu0 %v2804_v38  ;;  %v2291_v38 = vsel %vm2153_vm6, %v5992_v47, -1e+30  ;;  %v2455_v47 = vsel %vm5633_vm7, %v2379_v7, %v2292_v56  ;;  %v2493_v17 = vsub.f32 %v5764_v26, %v2461_v15 }
 0x529   : > { %v2454_v34 = vsel %vm5633_vm7, %v2376_v48, %v2291_v38  ;;  %v2581_v48 = vsel %vm2153_vm6, %v6075_v14, 0.0  ;;  %v2487_v7 = vsub.f32 %v5727_v11, %v2455_v47 }
 0x52a   : > { %2808 = vadd.xlane.f32.xlu1 %v2807_v63  ;;  %v2225_v63 = vpop.xlane.xlu0 %2224  ;;  %v2486_v10 = vsub.f32 %v5719_v6, %v2454_v34  ;;  %v2228_v32 = vpop.xlane.xlu1 %2227  ;;  %v2627_v42 = vsel %vm1134_vm1, %v2581_v48, 0.0  ;;  %v2773_v6 = vsel %vm5633_vm7, %v6075_v14, 0.0  ;;  %v2460_v34 = vsel %vm5633_vm7, %v2394_v8, %v2297_v54 }
 0x52b   : > { %v2492_v47 = vsub.f32 %v5757_v3, %v2460_v34  ;;  %v2540_v34 = vmul.f32 1.442695, %v2493_v17 }
 0x52c   : > { %2607 = vadd.xlane.f32.xlu0 %v2606_v33  ;;  %v2624_v33 = vsel %vm1134_vm1, %v2580_v49, 0.0  ;;  %v6100_v12 = vpop.eup %4720  ;;  %v2526_v50 = vmul.f32 1.442695, %v2486_v10  ;;  %v2528_v49 = vmul.f32 1.442695, %v2487_v7 }
 0x52d   : > { %v2578_v11 = vsel %vm2153_vm6, %v6100_v12, 0.0  ;;  %v2770_v44 = vsel %vm5633_vm7, %v6100_v12, 0.0 }
 0x52e   : > { %2610 = vadd.xlane.f32.xlu1 %v2609_v29  ;;  %v6107_v29 = vpop.eup %4722  ;;  %v2388_v38 = vpop.xlane.xlu0 %2387  ;;  %4728 = vpow2.f32 %v2526_v50  ;;  %v2618_v10 = vsel %vm1134_vm1, %v2578_v11, 0.0  ;;  %v2295_v50 = vsel %vm2153_vm6, %v2225_v63, -1e+30  ;;  %v2810_v54 = vsel %vm1134_vm1, %v2770_v44, 0.0 }
 0x52f   : > { %v2391_v56 = vpop.xlane.xlu1 %2390  ;;  %v2579_v8 = vsel %vm2153_vm6, %v6107_v29, 0.0  ;;  %4730 = vpow2.f32 %v2528_v49  ;;  %v2771_v3 = vsel %vm5633_vm7, %v6107_v29, 0.0  ;;  %v2296_v11 = vsel %vm2153_vm6, %v2228_v32, -1e+30 }
 0x530   : > { %2799 = vadd.xlane.f32.xlu0 %v2798_v62  ;;  %v2816_v62 = vsel %vm1134_vm1, %v2772_v4, 0.0  ;;  %v2621_v7 = vsel %vm1134_vm1, %v2579_v8, 0.0  ;;  %v2813_v30 = vsel %vm1134_vm1, %v2771_v3, 0.0  ;;  %v2459_v63 = vsel %vm5633_vm7, %v2391_v56, %v2296_v11 }
 0x531   : > { %v2491_v56 = vsub.f32 %v5767_v16, %v2459_v63 }
 0x532   : > { %2802 = vadd.xlane.f32.xlu1 %v2801_v40  ;;  %v2819_v40 = vsel %vm1134_vm1, %v2773_v6, 0.0  ;;  %v2538_v6 = vmul.f32 1.442695, %v2492_v47 }
 0x534   : > { %2625 = vadd.xlane.f32.xlu0 %v2624_v33  ;;  %v6130_v33 = vpop.eup %4724  ;;  %4732 = vpow2.f32 %v2538_v6 }
 0x535   : > { %v2584_v26 = vsel %vm2153_vm6, %v6130_v33, 0.0  ;;  %v2776_v32 = vsel %vm5633_vm7, %v6130_v33, 0.0  ;;  %4734 = vpow2.f32 %v2540_v34 }
 0x536   : > { %2628 = vadd.xlane.f32.xlu1 %v2627_v42  ;;  %v6137_v42 = vpop.eup %4726  ;;  %v2636_v8 = vsel %vm1134_vm1, %v2584_v26, 0.0  ;;  %v2828_v6 = vsel %vm1134_vm1, %v2776_v32, 0.0 }
 0x538   : > { %2817 = vadd.xlane.f32.xlu0 %v2816_v62  ;;  %v2458_v62 = vsel %vm5633_vm7, %v2388_v38, %v2295_v50  ;;  %v2585_v38 = vsel %vm2153_vm6, %v6137_v42, 0.0  ;;  %v6160_v47 = vpop.eup %4728 }
 0x539   : > { %v6167_v44 = vpop.eup %4730  ;;  %v2582_v16 = vsel %vm2153_vm6, %v6160_v47, 0.0 }
 0x53a   : > { %2820 = vadd.xlane.f32.xlu1 %v2819_v40  ;;  %v2243_v48 = vpop.xlane.xlu0 %2242  ;;  %v2490_v40 = vsub.f32 %v5759_v60, %v2458_v62  ;;  %v2777_v60 = vsel %vm5633_vm7, %v6137_v42, 0.0  ;;  %v2583_v11 = vsel %vm2153_vm6, %v6167_v44, 0.0 }
 0x53b   : > { %v2831_v34 = vsel %vm1134_vm1, %v2777_v60, 0.0 }
 0x53c   : > { %2619 = vadd.xlane.f32.xlu0 %v2618_v10  ;;  %v2246_v4 = vpop.xlane.xlu1 %2245  ;;  %v2639_v10 = vsel %vm1134_vm1, %v2585_v38, 0.0  ;;  %v2534_v17 = vmul.f32 1.442695, %v2490_v40 }
 0x53d   : > { %v2302_v62 = vsel %vm2153_vm6, %v2246_v4, -1e+30  ;;  %v2774_v4 = vsel %vm5633_vm7, %v6160_v47, 0.0 }
 0x53e   : > { %2622 = vadd.xlane.f32.xlu1 %v2621_v7  ;;  %v2406_v49 = vpop.xlane.xlu0 %2405  ;;  %v2301_v7 = vsel %vm2153_vm6, %v2243_v48, -1e+30  ;;  %4736 = vpow2.f32 %v2534_v17  ;;  %v6190_v63 = vpop.eup %4732  ;;  %v2822_v60 = vsel %vm1134_vm1, %v2774_v4, 0.0 }
 0x53f   : > { %v2464_v50 = vsel %vm5633_vm7, %v2406_v49, %v2301_v7  ;;  %v2588_v17 = vsel %vm2153_vm6, %v6190_v63, 0.0 }
 0x540   : > { %2811 = vadd.xlane.f32.xlu0 %v2810_v54  ;;  %v2409_v15 = vpop.xlane.xlu1 %2408  ;;  %v2536_v54 = vmul.f32 1.442695, %v2491_v56  ;;  %v2496_v49 = vsub.f32 %v5797_v24, %v2464_v50  ;;  %v2775_v24 = vsel %vm5633_vm7, %v6167_v44, 0.0 }
 0x541   : > { %v2465_v48 = vsel %vm5633_vm7, %v2409_v15, %v2302_v62  ;;  %v2633_v15 = vsel %vm1134_vm1, %v2583_v11, 0.0  ;;  %v2825_v50 = vsel %vm1134_vm1, %v2775_v24, 0.0 }
 0x542   : > { %2814 = vadd.xlane.f32.xlu1 %v2813_v30  ;;  %v2237_v3 = vpop.xlane.xlu0 %2236  ;;  %v2630_v30 = vsel %vm1134_vm1, %v2582_v16, 0.0  ;;  %4738 = vpow2.f32 %v2536_v54  ;;  %v2497_v38 = vsub.f32 %v5804_v36, %v2465_v48  ;;  %v2546_v32 = vmul.f32 1.442695, %v2496_v49  ;;  %v3006_v54 = vld [vmem:[%s452_s22] sm:$0xf]  ;;  %s6755_s22 = scalar_lea.vmem %s6852_s11, %s4075_s15 }
 0x543   : > { %v2299_v56 = vsel %vm2153_vm6, %v2237_v3, -1e+30  ;;  %4541 = vmatprep.subr.msk.bf16.mxu0 %vm1183_vm0, %v3006_v54  ;;  %v2780_v48 = vsel %vm5633_vm7, %v6190_v63, 0.0 }
 0x544   : > { %2637 = vadd.xlane.f32.xlu0 %v2636_v8  ;;  %v2240_v26 = vpop.xlane.xlu1 %2239  ;;  %v6197_v8 = vpop.eup %4734  ;;  %v2548_v7 = vmul.f32 1.442695, %v2497_v38  ;;  %4740 = vpow2.f32 %v2546_v32 }
 0x545   : > { %v2589_v16 = vsel %vm2153_vm6, %v6197_v8, 0.0 }
 0x546   : > { %2640 = vadd.xlane.f32.xlu1 %v2639_v10  ;;  %v2400_v40 = vpop.xlane.xlu0 %2399  ;;  %4742 = vpow2.f32 %v2548_v7 }
 0x547   : > { %v2462_v36 = vsel %vm5633_vm7, %v2400_v40, %v2299_v56  ;;  %v2840_v40 = vsel %vm1134_vm1, %v2780_v48, 0.0 }
 0x548   : > { %2829 = vadd.xlane.f32.xlu0 %v2828_v6  ;;  %v2403_v10 = vpop.xlane.xlu1 %2402  ;;  %v2300_v6 = vsel %vm2153_vm6, %v2240_v26, -1e+30  ;;  %v2494_v62 = vsub.f32 %v5799_v9, %v2462_v36  ;;  %v2648_v26 = vsel %vm1134_vm1, %v2588_v17, 0.0  ;;  %v6226_v11 = vpop.eup %4736  ;;  %v2781_v9 = vsel %vm5633_vm7, %v6197_v8, 0.0 }
 0x549   : > { %v2463_v3 = vsel %vm5633_vm7, %v2403_v10, %v2300_v6 }
 0x54a   : > { %2832 = vadd.xlane.f32.xlu1 %v2831_v34  ;;  %v3056_v34 = vsel %vm1183_vm0, %v3006_v54, 0  ;;  %v2495_v49 = vsub.f32 %v5807_v39, %v2463_v3  ;;  %v2542_v38 = vmul.f32 1.442695, %v2494_v62  ;;  %v2843_v39 = vsel %vm1134_vm1, %v2781_v9, 0.0 }
 0x54b   : > { %4466 = vmatpush3.bf16.msra.mxu0 %v3056_v34 }
 0x54c   : > { %2631 = vadd.xlane.f32.xlu0 %v2630_v30  ;;  %v2651_v30 = vsel %vm1134_vm1, %v2589_v16, 0.0  ;;  %v6233_v4 = vpop.eup %4738  ;;  %v2544_v24 = vmul.f32 1.442695, %v2495_v49  ;;  %4744 = vpow2.f32 %v2542_v38 }
 0x54d   : > { %v2587_v32 = vsel %vm2153_vm6, %v6233_v4, 0.0  ;;  %v2779_v6 = vsel %vm5633_vm7, %v6233_v4, 0.0 }
 0x54e   : > { %2634 = vadd.xlane.f32.xlu1 %v2633_v15  ;;  %v2586_v15 = vsel %vm2153_vm6, %v6226_v11, 0.0  ;;  %v6247_v36 = vpop.eup %4740  ;;  %4746 = vpow2.f32 %v2544_v24  ;;  %v2645_v7 = vsel %vm1134_vm1, %v2587_v32, 0.0 }
 0x54f   : > { %v2642_v10 = vsel %vm1134_vm1, %v2586_v15, 0.0 }
 0x550   : > { %2823 = vadd.xlane.f32.xlu0 %v2822_v60  ;;  %v2778_v60 = vsel %vm5633_vm7, %v6226_v11, 0.0 }
 0x551   : > { %v2834_v54 = vsel %vm1134_vm1, %v2778_v60, 0.0 }
 0x552   : > { %2826 = vadd.xlane.f32.xlu1 %v2825_v50  ;;  %v6253_v50 = vpop.eup %4742 }
 0x553   : > { %v2593_v38 = vsel %vm2153_vm6, %v6253_v50, 0.0 }
 0x554   : > { %2649 = vadd.xlane.f32.xlu0 %v2648_v26  ;;  %v2592_v26 = vsel %vm2153_vm6, %v6247_v36, 0.0  ;;  %v2663_v60 = vsel %vm1134_vm1, %v2593_v38, 0.0 }
 0x556   : > { %2652 = vadd.xlane.f32.xlu1 %v2651_v30  ;;  %v2837_v30 = vsel %vm1134_vm1, %v2779_v6, 0.0  ;;  %v6277_v32 = vpop.eup %4744 }
 0x558   : > { %2841 = vadd.xlane.f32.xlu0 %v2840_v40 }
 0x55a   : > { %2844 = vadd.xlane.f32.xlu1 %v2843_v39  ;;  %v2660_v39 = vsel %vm1134_vm1, %v2592_v26, 0.0 }
 0x55b   : > { %v2255_v56 = vpop.xlane.xlu0 %2254 }
 0x55c   : > { %2643 = vadd.xlane.f32.xlu0 %v2642_v10  ;;  %v2305_v3 = vsel %vm2153_vm6, %v2255_v56, -1e+30 }
 0x55d   : > { %v2258_v17 = vpop.xlane.xlu1 %2257 }
 0x55e   : > { %2646 = vadd.xlane.f32.xlu1 %v2645_v7  ;;  %v2306_v34 = vsel %vm2153_vm6, %v2258_v17, -1e+30  ;;  %v6283_v17 = vpop.eup %4746 }
 0x55f   : > { %v2418_v16 = vpop.xlane.xlu0 %2417 }
 0x560   : > { %v2468_v62 = vsel %vm5633_vm7, %v2418_v16, %v2305_v3  ;;  %2835 = vadd.xlane.f32.xlu0 %v2834_v54  ;;  %v2590_v54 = vsel %vm2153_vm6, %v6277_v32, 0.0 }
 0x561   : > { %v2500_v48 = vsub.f32 %v5837_v19, %v2468_v62  ;;  %v2421_v49 = vpop.xlane.xlu1 %2420  ;;  %v2784_v19 = vsel %vm5633_vm7, %v6247_v36, 0.0 }
 0x562   : > { %v2469_v9 = vsel %vm5633_vm7, %v2421_v49, %v2306_v34  ;;  %2838 = vadd.xlane.f32.xlu1 %v2837_v30  ;;  %v2852_v3 = vsel %vm1134_vm1, %v2784_v19, 0.0  ;;  %v2591_v30 = vsel %vm2153_vm6, %v6283_v17, 0.0 }
 0x563   : > { %v2554_v40 = vmul.f32 1.442695, %v2500_v48  ;;  %v2501_v15 = vsub.f32 %v5844_v45, %v2469_v9  ;;  %v2249_v24 = vpop.xlane.xlu0 %2248  ;;  %v2785_v45 = vsel %vm5633_vm7, %v6253_v50, 0.0 }
 0x564   : > { %2661 = vadd.xlane.f32.xlu0 %v2660_v39  ;;  %v2303_v7 = vsel %vm2153_vm6, %v2249_v24, -1e+30  ;;  %v2855_v48 = vsel %vm1134_vm1, %v2785_v45, 0.0  ;;  %v2657_v24 = vsel %vm1134_vm1, %v2591_v30, 0.0  ;;  %v2783_v39 = vsel %vm5633_vm7, %v6283_v17, 0.0 }
 0x565   : > { %4748 = vpow2.f32 %v2554_v40  ;;  %v2556_v56 = vmul.f32 1.442695, %v2501_v15  ;;  %v2252_v10 = vpop.xlane.xlu1 %2251  ;;  %v2654_v40 = vsel %vm1134_vm1, %v2590_v54, 0.0 }
 0x566   : > { %2664 = vadd.xlane.f32.xlu1 %v2663_v60  ;;  %v2304_v62 = vsel %vm2153_vm6, %v2252_v10, -1e+30  ;;  %v2849_v60 = vsel %vm1134_vm1, %v2783_v39, 0.0 }
 0x567   : > { %4750 = vpow2.f32 %v2556_v56  ;;  %v2412_v6 = vpop.xlane.xlu0 %2411 }
 0x568   : > { %v2466_v16 = vsel %vm5633_vm7, %v2412_v6, %v2303_v7  ;;  %2853 = vadd.xlane.f32.xlu0 %v2852_v3 }
 0x569   : > { %v2498_v26 = vsub.f32 %v5839_v0, %v2466_v16  ;;  %v2415_v34 = vpop.xlane.xlu1 %2414  ;;  %v2782_v0 = vsel %vm5633_vm7, %v6277_v32, 0.0 }
 0x56a   : > { %v2467_v49 = vsel %vm5633_vm7, %v2415_v34, %v2304_v62  ;;  %2856 = vadd.xlane.f32.xlu1 %v2855_v48 }
 0x56b   : > { %v2550_v9 = vmul.f32 1.442695, %v2498_v26  ;;  %v2499_v38 = vsub.f32 %v5847_v52, %v2467_v49  ;;  %v2846_v52 = vsel %vm1134_vm1, %v2782_v0, 0.0 }
 0x56c   : > { %2655 = vadd.xlane.f32.xlu0 %v2654_v40 }
 0x56d   : > { %4752 = vpow2.f32 %v2550_v9  ;;  %v2552_v15 = vmul.f32 1.442695, %v2499_v38 }
 0x56e   : > { %2658 = vadd.xlane.f32.xlu1 %v2657_v24 }
 0x56f   : > { %v6311_v19 = vpop.eup %4748  ;;  %4754 = vpow2.f32 %v2552_v15 }
 0x570   : > { %2847 = vadd.xlane.f32.xlu0 %v2846_v52  ;;  %v2596_v56 = vsel %vm2153_vm6, %v6311_v19, 0.0  ;;  %v2788_v6 = vsel %vm5633_vm7, %v6311_v19, 0.0 }
 0x571   : > { %v6317_v10 = vpop.eup %4750  ;;  %v2672_v7 = vsel %vm1134_vm1, %v2596_v56, 0.0  ;;  %v2864_v62 = vsel %vm1134_vm1, %v2788_v6, 0.0 }
 0x572   : > { %2850 = vadd.xlane.f32.xlu1 %v2849_v60  ;;  %v2597_v45 = vsel %vm2153_vm6, %v6317_v10, 0.0  ;;  %v2789_v16 = vsel %vm5633_vm7, %v6317_v10, 0.0 }
 0x573   : > { %v2675_v3 = vsel %vm1134_vm1, %v2597_v45, 0.0  ;;  %v2867_v48 = vsel %vm1134_vm1, %v2789_v16, 0.0 }
 0x574   : > { %2673 = vadd.xlane.f32.xlu0 %v2672_v7 }
 0x576   : > { %2676 = vadd.xlane.f32.xlu1 %v2675_v3 }
 0x577   : > { %v6331_v54 = vpop.eup %4752 }
 0x578   : > { %2865 = vadd.xlane.f32.xlu0 %v2864_v62  ;;  %v2594_v26 = vsel %vm2153_vm6, %v6331_v54, 0.0  ;;  %v2786_v9 = vsel %vm5633_vm7, %v6331_v54, 0.0 }
 0x579   : > { %v6337_v34 = vpop.eup %4754  ;;  %v2666_v30 = vsel %vm1134_vm1, %v2594_v26, 0.0  ;;  %v2858_v0 = vsel %vm1134_vm1, %v2786_v9, 0.0 }
 0x57a   : > { %2868 = vadd.xlane.f32.xlu1 %v2867_v48  ;;  %v2595_v49 = vsel %vm2153_vm6, %v6337_v34, 0.0  ;;  %v2787_v40 = vsel %vm5633_vm7, %v6337_v34, 0.0 }
 0x57b   : > { %v2669_v38 = vsel %vm1134_vm1, %v2595_v49, 0.0  ;;  %v2861_v24 = vsel %vm1134_vm1, %v2787_v40, 0.0 }
 0x57c   : > { %2667 = vadd.xlane.f32.xlu0 %v2666_v30 }
 0x57e   : > { %2670 = vadd.xlane.f32.xlu1 %v2669_v38 }
 0x580   : > { %v2267_v15 = vpop.xlane.xlu0 %2266  ;;  %2859 = vadd.xlane.f32.xlu0 %v2858_v0 }
 0x581   : > { %v2309_v52 = vsel %vm2153_vm6, %v2267_v15, -1e+30 }
 0x582   : > { %v2270_v39 = vpop.xlane.xlu1 %2269  ;;  %2862 = vadd.xlane.f32.xlu1 %v2861_v24 }
 0x583   : > { %v2310_v45 = vsel %vm2153_vm6, %v2270_v39, -1e+30 }
 0x584   : > { %v2430_v56 = vpop.xlane.xlu0 %2429 }
 0x585   : > { %v2472_v60 = vsel %vm5633_vm7, %v2430_v56, %v2309_v52 }
 0x586   : > { %v2504_v7 = vsub.f32 %v5877_v43, %v2472_v60  ;;  %v2433_v6 = vpop.xlane.xlu1 %2432 }
 0x587   : > { %v2473_v3 = vsel %vm5633_vm7, %v2433_v6, %v2310_v45 }
 0x588   : > { %v2562_v16 = vmul.f32 1.442695, %v2504_v7  ;;  %v2505_v62 = vsub.f32 %v5884_v57, %v2473_v3  ;;  %v2261_v26 = vpop.xlane.xlu0 %2260 }
 0x589   : > { %v2307_v30 = vsel %vm2153_vm6, %v2261_v26, -1e+30 }
 0x58a   : > { %4756 = vpow2.f32 %v2562_v16  ;;  %v2564_v48 = vmul.f32 1.442695, %v2505_v62  ;;  %v2264_v49 = vpop.xlane.xlu1 %2263 }
 0x58b   : > { %v2308_v43 = vsel %vm2153_vm6, %v2264_v49, -1e+30 }
 0x58c   : > { %4758 = vpow2.f32 %v2564_v48  ;;  %v2424_v9 = vpop.xlane.xlu0 %2423 }
 0x58d   : > { %v2470_v38 = vsel %vm5633_vm7, %v2424_v9, %v2307_v30 }
 0x58e   : > { %v2502_v40 = vsub.f32 %v5879_v46, %v2470_v38  ;;  %v2427_v0 = vpop.xlane.xlu1 %2426 }
 0x58f   : > { %v2471_v57 = vsel %vm5633_vm7, %v2427_v0, %v2308_v43 }
 0x590   : > { %v2558_v15 = vmul.f32 1.442695, %v2502_v40  ;;  %v2503_v24 = vsub.f32 %v5887_v5, %v2471_v57 }
 0x592   : > { %4760 = vpow2.f32 %v2558_v15  ;;  %v2560_v39 = vmul.f32 1.442695, %v2503_v24 }
 0x594   : > { %v6373_v52 = vpop.eup %4756  ;;  %4762 = vpow2.f32 %v2560_v39 }
 0x595   : > { %v2600_v56 = vsel %vm2153_vm6, %v6373_v52, 0.0  ;;  %v2792_v5 = vsel %vm5633_vm7, %v6373_v52, 0.0 }
 0x596   : > { %v6378_v60 = vpop.eup %4758  ;;  %v2684_v46 = vsel %vm1134_vm1, %v2600_v56, 0.0  ;;  %v2876_v3 = vsel %vm1134_vm1, %v2792_v5, 0.0 }
 0x597   : > { %2685 = vadd.xlane.f32.xlu0 %v2684_v46  ;;  %v2601_v45 = vsel %vm2153_vm6, %v6378_v60, 0.0  ;;  %v2793_v6 = vsel %vm5633_vm7, %v6378_v60, 0.0 }
 0x598   : > { %v2687_v7 = vsel %vm1134_vm1, %v2601_v45, 0.0  ;;  %v2879_v62 = vsel %vm1134_vm1, %v2793_v6, 0.0 }
 0x599   : > { %2688 = vadd.xlane.f32.xlu1 %v2687_v7 }
 0x59b   : > { %2877 = vadd.xlane.f32.xlu0 %v2876_v3 }
 0x59c   : > { %v6392_v16 = vpop.eup %4760 }
 0x59d   : > { %2880 = vadd.xlane.f32.xlu1 %v2879_v62  ;;  %v2598_v26 = vsel %vm2153_vm6, %v6392_v16, 0.0  ;;  %v2790_v9 = vsel %vm5633_vm7, %v6392_v16, 0.0 }
 0x59e   : > { %v6398_v48 = vpop.eup %4762  ;;  %v2678_v49 = vsel %vm1134_vm1, %v2598_v26, 0.0  ;;  %v2870_v0 = vsel %vm1134_vm1, %v2790_v9, 0.0 }
 0x59f   : > { %2679 = vadd.xlane.f32.xlu0 %v2678_v49  ;;  %v2599_v30 = vsel %vm2153_vm6, %v6398_v48, 0.0  ;;  %v2791_v40 = vsel %vm5633_vm7, %v6398_v48, 0.0 }
 0x5a0   : > { %v2681_v38 = vsel %vm1134_vm1, %v2599_v30, 0.0  ;;  %v2873_v15 = vsel %vm1134_vm1, %v2791_v40, 0.0 }
 0x5a1   : > { %v2279_v43 = vpop.xlane.xlu0 %2278  ;;  %2682 = vadd.xlane.f32.xlu1 %v2681_v38 }
 0x5a2   : > { %v2313_v24 = vsel %vm2153_vm6, %v2279_v43, -1e+30 }
 0x5a3   : > { %2871 = vadd.xlane.f32.xlu0 %v2870_v0  ;;  %v2282_v57 = vpop.xlane.xlu1 %2281 }
 0x5a4   : > { %v2314_v46 = vsel %vm2153_vm6, %v2282_v57, -1e+30 }
 0x5a5   : > { %v2442_v39 = vpop.xlane.xlu0 %2441  ;;  %2874 = vadd.xlane.f32.xlu1 %v2873_v15 }
 0x5a6   : > { %v2476_v56 = vsel %vm5633_vm7, %v2442_v39, %v2313_v24 }
 0x5a7   : > { %v2508_v45 = vsub.f32 %v5945_v61, %v2476_v56  ;;  %v2445_v5 = vpop.xlane.xlu1 %2444 }
 0x5a8   : > { %v2477_v7 = vsel %vm5633_vm7, %v2445_v5, %v2314_v46 }
 0x5a9   : > { %v2570_v6 = vmul.f32 1.442695, %v2508_v45  ;;  %v2509_v3 = vsub.f32 %v5955_v20, %v2477_v7  ;;  %v2273_v62 = vpop.xlane.xlu0 %2272 }
 0x5aa   : > { %v2311_v30 = vsel %vm2153_vm6, %v2273_v62, -1e+30 }
 0x5ab   : > { %4764 = vpow2.f32 %v2570_v6  ;;  %v2572_v26 = vmul.f32 1.442695, %v2509_v3  ;;  %v2276_v49 = vpop.xlane.xlu1 %2275 }
 0x5ac   : > { %v2312_v61 = vsel %vm2153_vm6, %v2276_v49, -1e+30 }
 0x5ad   : > { %4766 = vpow2.f32 %v2572_v26  ;;  %v2436_v9 = vpop.xlane.xlu0 %2435 }
 0x5ae   : > { %v2474_v38 = vsel %vm5633_vm7, %v2436_v9, %v2311_v30 }
 0x5af   : > { %v2506_v43 = vsub.f32 %v5949_v23, %v2474_v38  ;;  %v2439_v40 = vpop.xlane.xlu1 %2438 }
 0x5b0   : > { %v2475_v20 = vsel %vm5633_vm7, %v2439_v40, %v2312_v61 }
 0x5b1   : > { %v2566_v0 = vmul.f32 1.442695, %v2506_v43  ;;  %v2507_v57 = vsub.f32 %v5958_v2, %v2475_v20  ;;  %v2614_v15 = vpop.xlane.xlu0 %2613 }
 0x5b3   : > { %4768 = vpow2.f32 %v2566_v0  ;;  %v2568_v24 = vmul.f32 1.442695, %v2507_v57  ;;  %v2617_v39 = vpop.xlane.xlu1 %2616 }
 0x5b5   : > { %v6433_v56 = vpop.eup %4764  ;;  %4770 = vpow2.f32 %v2568_v24  ;;  %v2806_v46 = vpop.xlane.xlu0 %2805 }
 0x5b6   : > { %v2604_v45 = vsel %vm2153_vm6, %v6433_v56, 0.0  ;;  %4772 = vrcp.f32 %v2614_v15 }
 0x5b7   : > { %v6438_v23 = vpop.eup %4766  ;;  %v2809_v5 = vpop.xlane.xlu1 %2808  ;;  %v2696_v7 = vsel %vm1134_vm1, %v2604_v45, 0.0  ;;  %4774 = vrcp.f32 %v2617_v39 }
 0x5b8   : > { %6900 = vst [vmem:[#allocation24_spill] sm:$0xff] %v6438_v23  ;;  %2697 = vadd.xlane.f32.xlu0 %v2696_v7  ;;  %v2605_v2 = vsel %vm2153_vm6, %v6438_v23, 0.0  ;;  %4776 = vrcp.f32 %v2809_v5  ;;  %v2796_v5 = vsel %vm5633_vm7, %v6433_v56, 0.0 }
 0x5b9   : > { %v2608_v6 = vpop.xlane.xlu0 %2607  ;;  %v2699_v3 = vsel %vm1134_vm1, %v2605_v2, 0.0 }
 0x5ba   : > { %2700 = vadd.xlane.f32.xlu1 %v2699_v3  ;;  %4778 = vrcp.f32 %v2608_v6 }
 0x5bb   : > { %v2611_v62 = vpop.xlane.xlu1 %2610  ;;  %4780 = vrcp.f32 %v2806_v46 }
 0x5bc   : > { %4782 = vrcp.f32 %v2611_v62  ;;  %v2797_v62 = vsel %vm5633_vm7, %v6438_v23, 0.0 }
 0x5bd   : > { %v6445_v26 = vpop.eup %4768  ;;  %v2800_v49 = vpop.xlane.xlu0 %2799 }
 0x5be   : > { %4784 = vrcp.f32 %v2800_v49  ;;  %v2602_v30 = vsel %vm2153_vm6, %v6445_v26, 0.0  ;;  %v2794_v40 = vsel %vm5633_vm7, %v6445_v26, 0.0 }
 0x5bf   : > { %v6450_v9 = vpop.eup %4770  ;;  %v2803_v38 = vpop.xlane.xlu1 %2802  ;;  %v2690_v61 = vsel %vm1134_vm1, %v2602_v30, 0.0  ;;  %v2882_v46 = vsel %vm1134_vm1, %v2794_v40, 0.0 }
 0x5c0   : > { %4786 = vrcp.f32 %v2803_v38  ;;  %2691 = vadd.xlane.f32.xlu0 %v2690_v61  ;;  %v2603_v43 = vsel %vm2153_vm6, %v6450_v9, 0.0  ;;  %v4773_v57 = vpop.eup %4772  ;;  %v2795_v15 = vsel %vm5633_vm7, %v6450_v9, 0.0  ;;  %v2888_v61 = vsel %vm1134_vm1, %v2796_v5, 0.0 }
 0x5c1   : > { %v2626_v20 = vpop.xlane.xlu0 %2625  ;;  %v2693_v0 = vsel %vm1134_vm1, %v2603_v43, 0.0  ;;  %v4775_v24 = vpop.eup %4774  ;;  %v2885_v6 = vsel %vm1134_vm1, %v2795_v15, 0.0  ;;  %v2736_v15 = vsel %vm2153_vm6, %v4773_v57, 0.0 }
 0x5c2   : > { %2694 = vadd.xlane.f32.xlu1 %v2693_v0  ;;  %v4777_v45 = vpop.eup %4776  ;;  %v2737_v30 = vsel %vm2153_vm6, %v4775_v24, 0.0  ;;  %4788 = vrcp.f32 %v2626_v20 }
 0x5c3   : > { %v2629_v39 = vpop.xlane.xlu1 %2628  ;;  %v2929_v0 = vsel %vm5633_vm7, %v4777_v45, %v2737_v30 }
 0x5c4   : > { %2883 = vadd.xlane.f32.xlu0 %v2882_v46  ;;  %v4779_v7 = vpop.eup %4778  ;;  %4790 = vrcp.f32 %v2629_v39  ;;  %v2961_v39 = vmul.f32 %v6007_v25, %v2929_v0 }
 0x5c5   : > { %v2818_v2 = vpop.xlane.xlu0 %2817  ;;  %v4781_v3 = vpop.eup %4780  ;;  %v2734_v40 = vsel %vm2153_vm6, %v4779_v7, 0.0 }
 0x5c6   : > { %2886 = vadd.xlane.f32.xlu1 %v2885_v6  ;;  %v4783_v49 = vpop.eup %4782  ;;  %v2891_v6 = vsel %vm1134_vm1, %v2797_v62, 0.0  ;;  %v2928_v20 = vsel %vm5633_vm7, %v4781_v3, %v2736_v15 }
 0x5c7   : > { %v2821_v38 = vpop.xlane.xlu1 %2820  ;;  %v2735_v23 = vsel %vm2153_vm6, %v4783_v49, 0.0  ;;  %v2960_v49 = vmul.f32 %v5998_v27, %v2928_v20 }
 0x5c8   : > { %v4785_v43 = vpop.eup %4784  ;;  %2889 = vadd.xlane.f32.xlu0 %v2888_v61  ;;  %4792 = vrcp.f32 %v2821_v38 }
 0x5c9   : > { %v2620_v46 = vpop.xlane.xlu0 %2619  ;;  %v2926_v24 = vsel %vm5633_vm7, %v4785_v43, %v2734_v40  ;;  %v2991_v3 = vpack.c.bf16 %v2961_v39, %v2960_v49 }
 0x5ca   : > { %v4787_v5 = vpop.eup %4786  ;;  %2892 = vadd.xlane.f32.xlu1 %v2891_v6  ;;  %4794 = vrcp.f32 %v2620_v46  ;;  %v2958_v7 = vmul.f32 %v6034_v37, %v2926_v24 }
 0x5cb   : > { %v2623_v45 = vpop.xlane.xlu1 %2622  ;;  %v2927_v57 = vsel %vm5633_vm7, %v4787_v5, %v2735_v23  ;;  %4796 = vrcp.f32 %v2818_v2 }
 0x5cc   : > { %v2959_v62 = vmul.f32 %v6041_v28, %v2927_v57  ;;  %4798 = vrcp.f32 %v2623_v45  ;;  %v4789_v25 = vpop.eup %4788 }
 0x5cd   : > { %v2812_v30 = vpop.xlane.xlu0 %2811  ;;  %v2740_v20 = vsel %vm2153_vm6, %v4789_v25, 0.0 }
 0x5ce   : > { %4800 = vrcp.f32 %v2812_v30  ;;  %v2990_v38 = vpack.c.bf16 %v2959_v62, %v2958_v7  ;;  %v4791_v23 = vpop.eup %4790  ;;  %v6901_v30 = vpack.i.bf16 %v5398_v41, %v5395_v13  ;;  %v6902_v13 = vpack.i.bf16 %v5404_v18, %v5401_v51 }
 0x5cf   : > { %v2815_v61 = vpop.xlane.xlu1 %2814  ;;  %v2741_v27 = vsel %vm2153_vm6, %v4791_v23, 0.0  ;;  %v6904_v51 = vpack.i.bf16 %v5420_v22, %v5417_v21  ;;  %v6909_v22 = vld [vmem:[#allocation7_spill] sm:$0xff] }
 0x5d0   : > { %4802 = vrcp.f32 %v2815_v61  ;;  %4467 = vmatprep.mubr.msk.bf16.mxu0 %vm1134_vm1, %v2990_v38 }
 0x5d1   : > { %v2638_v43 = vpop.xlane.xlu0 %2637  ;;  %4468 = vmatmul.mubr.msk.bf16.vlgmr.msra.gmra.mrb[64].mxu0 %vm1134_vm1, %v2991_v3 }
 0x5d2   : > { %v4793_v37 = vpop.eup %4792  ;;  %4804 = vrcp.f32 %v2638_v43 }
 0x5d3   : > { %v2641_v2 = vpop.xlane.xlu1 %2640  ;;  %v2933_v5 = vsel %vm5633_vm7, %v4793_v37, %v2741_v27  ;;  %v6907_v27 = vld [vmem:[#allocation2_spill] sm:$0xff] }
 0x5d4   : > { %v4795_v40 = vpop.eup %4794  ;;  %4806 = vrcp.f32 %v2641_v2  ;;  %v2965_v61 = vmul.f32 %v6075_v14, %v2933_v5  ;;  %v6903_v14 = vpack.i.bf16 %v5426_v55, %v5423_v35  ;;  %v6905_v35 = vpack.i.bf16 %v5448_v58, %v5445_v53 }
 0x5d5   : > { %v2830_v28 = vpop.xlane.xlu0 %2829  ;;  %v4797_v0 = vpop.eup %4796  ;;  %v2738_v24 = vsel %vm2153_vm6, %v4795_v40, 0.0 }
 0x5d6   : > { %v4799_v15 = vpop.eup %4798  ;;  %v2932_v62 = vsel %vm5633_vm7, %v4797_v0, %v2740_v20 }
 0x5d7   : > { %v2833_v46 = vpop.xlane.xlu1 %2832  ;;  %v2739_v7 = vsel %vm2153_vm6, %v4799_v15, 0.0  ;;  %v2964_v23 = vmul.f32 %v6068_v1, %v2932_v62  ;;  %v6906_v15 = vld [vmem:[#allocation3_spill] sm:$0xff] }
 0x5d8   : > { %v4801_v6 = vpop.eup %4800  ;;  %4808 = vrcp.f32 %v2833_v46  ;;  %v6908_v46 = vpack.i.bf16 %v6906_v15, %v6907_v27  ;;  %v6925_v15 = vld [vmem:[#allocation12_spill] sm:$0xff] }
 0x5d9   : > { %v2632_v45 = vpop.xlane.xlu0 %2631  ;;  %v2930_v57 = vsel %vm5633_vm7, %v4801_v6, %v2738_v24  ;;  %v6910_v24 = vld [vmem:[#allocation6_spill] sm:$0xff] }
 0x5da   : > { %v4803_v39 = vpop.eup %4802  ;;  %4810 = vrcp.f32 %v2632_v45  ;;  %v2962_v3 = vmul.f32 %v6100_v12, %v2930_v57  ;;  %v2993_v12 = vpack.c.bf16 %v2965_v61, %v2964_v23  ;;  %v6911_v5 = vpack.i.bf16 %v6909_v22, %v6910_v24 }
 0x5db   : > { %4620 = vrot.lane.b32.xlu1 %v6901_v30, %s4927_s23  ;;  %v2635_v49 = vpop.xlane.xlu1 %2634  ;;  %v2931_v38 = vsel %vm5633_vm7, %v4803_v39, %v2739_v7  ;;  %4812 = vrcp.f32 %v2830_v28 }
 0x5dc   : > { %v2963_v43 = vmul.f32 %v6107_v29, %v2931_v38  ;;  %4814 = vrcp.f32 %v2635_v49  ;;  %v4805_v1 = vpop.eup %4804  ;;  %v6912_v49 = vld [vmem:[#allocation5_spill] sm:$0xff]  ;;  %v6913_v38 = vld [vmem:[#allocation4_spill] sm:$0xff] }
 0x5dd   : > { %v2824_v25 = vpop.xlane.xlu0 %2823  ;;  %v2744_v57 = vsel %vm2153_vm6, %v4805_v1, 0.0  ;;  %v6914_v61 = vpack.i.bf16 %v6912_v49, %v6913_v38  ;;  %v6934_v49 = vld [vmem:[#allocation22_spill] sm:$0xff] }
 0x5de   : > { %4816 = vrcp.f32 %v2824_v25  ;;  %4615 = vrot.lane.b32.xlu0 %v6902_v13, %s4927_s23  ;;  %v2992_v41 = vpack.c.bf16 %v2963_v43, %v2962_v3  ;;  %v4807_v18 = vpop.eup %4806  ;;  %v6915_v43 = vld [vmem:[#allocation11_spill] sm:$0xff]  ;;  %v6916_v25 = vld [vmem:[#allocation10_spill] sm:$0xff] }
 0x5df   : > { %4625 = vrot.lane.b32.xlu1 %v6903_v14, %s4927_s23  ;;  %v2827_v2 = vpop.xlane.xlu1 %2826  ;;  %v2745_v21 = vsel %vm2153_vm6, %v4807_v18, 0.0  ;;  %v6917_v23 = vpack.i.bf16 %v6915_v43, %v6916_v25  ;;  %v6919_v18 = vld [vmem:[#allocation8_spill] sm:$0xff] }
 0x5e0   : > { %4818 = vrcp.f32 %v2827_v2  ;;  %4471 = vmatprep.mubr.msk.bf16.mxu0 %vm1134_vm1, %v2992_v41 }
 0x5e1   : > { %v2650_v29 = vpop.xlane.xlu0 %2649  ;;  %4472 = vmatmul.mubr.msk.bf16.gmra.mrb[68].mxu0 %vm1134_vm1, %v2993_v12 }
 0x5e2   : > { %4630 = vrot.lane.b32.xlu0 %v6904_v51, %s4927_s23  ;;  %v4809_v37 = vpop.eup %4808  ;;  %4820 = vrcp.f32 %v2650_v29  ;;  %v6918_v51 = vld [vmem:[#allocation9_spill] sm:$0xff] }
 0x5e3   : > { %4635 = vrot.lane.b32.xlu1 %v6905_v35, %s4927_s23  ;;  %v2653_v55 = vpop.xlane.xlu1 %2652  ;;  %v2937_v45 = vsel %vm5633_vm7, %v4809_v37, %v2745_v21  ;;  %v6920_v35 = vpack.i.bf16 %v6918_v51, %v6919_v18  ;;  %v6921_v37 = vld [vmem:[#allocation15_spill] sm:$0xff]  ;;  %v6928_v21 = vld [vmem:[#allocation18_spill] sm:$0xff]  ;;  %v6937_v51 = vld [vmem:[#allocation20_spill] sm:$0xff] }
 0x5e4   : > { %v4811_v40 = vpop.eup %4810  ;;  %4822 = vrcp.f32 %v2653_v55  ;;  %v2969_v14 = vmul.f32 %v6137_v42, %v2937_v45  ;;  %v6930_v45 = vld [vmem:[#allocation17_spill] sm:$0xff] }
 0x5e5   : > { %v2842_v28 = vpop.xlane.xlu0 %2841  ;;  %v4813_v0 = vpop.eup %4812  ;;  %v2742_v20 = vsel %vm2153_vm6, %v4811_v40, 0.0  ;;  %v6922_v40 = vld [vmem:[#allocation14_spill] sm:$0xff] }
 0x5e6   : > { %4640 = vrot.lane.b32.xlu0 %v6908_v46, %s4927_s23  ;;  %v4815_v6 = vpop.eup %4814  ;;  %v2936_v3 = vsel %vm5633_vm7, %v4813_v0, %v2744_v57  ;;  %v6923_v42 = vpack.i.bf16 %v6921_v37, %v6922_v40  ;;  %v6924_v0 = vld [vmem:[#allocation13_spill] sm:$0xff]  ;;  %v6931_v57 = vld [vmem:[#allocation16_spill] sm:$0xff] }
 0x5e7   : > { %4645 = vrot.lane.b32.xlu1 %v6911_v5, %s4927_s23  ;;  %v2845_v53 = vpop.xlane.xlu1 %2844  ;;  %v2743_v30 = vsel %vm2153_vm6, %v4815_v6, 0.0  ;;  %v2968_v1 = vmul.f32 %v6130_v33, %v2936_v3  ;;  %v6926_v27 = vpack.i.bf16 %v6924_v0, %v6925_v15  ;;  %v6927_v6 = vld [vmem:[#allocation19_spill] sm:$0xff] }
 0x5e8   : > { %v4817_v58 = vpop.eup %4816  ;;  %4824 = vrcp.f32 %v2845_v53  ;;  %v6929_v22 = vpack.i.bf16 %v6927_v6, %v6928_v21 }
 0x5e9   : > { %v2644_v39 = vpop.xlane.xlu0 %2643  ;;  %v2934_v7 = vsel %vm5633_vm7, %v4817_v58, %v2742_v20 }
 0x5ea   : > { %v4819_v62 = vpop.eup %4818  ;;  %4650 = vrot.lane.b32.xlu0 %v6914_v61, %s4927_s23  ;;  %4826 = vrcp.f32 %v2644_v39  ;;  %v2966_v2 = vmul.f32 %v6160_v47, %v2934_v7  ;;  %v2995_v47 = vpack.c.bf16 %v2969_v14, %v2968_v1  ;;  %v6932_v39 = vpack.i.bf16 %v6930_v45, %v6931_v57  ;;  %v6936_v1 = vld [vmem:[#allocation21_spill] sm:$0xff] }
 0x5eb   : > { %4655 = vrot.lane.b32.xlu1 %v6917_v23, %s4927_s23  ;;  %v2647_v13 = vpop.xlane.xlu1 %2646  ;;  %v2935_v41 = vsel %vm5633_vm7, %v4819_v62, %v2743_v30  ;;  %4828 = vrcp.f32 %v2842_v28  ;;  %v6933_v30 = vld [vmem:[#allocation23_spill] sm:$0xff]  ;;  %v4704_v23 = vld [vmem:[%s6850_s9] sm:$0xff]   ;;  %v6938_v18 = vpack.i.bf16 %v6936_v1, %v6937_v51 }
 0x5ec   : > { %v2967_v12 = vmul.f32 %v6167_v44, %v2935_v41  ;;  %4830 = vrcp.f32 %v2647_v13  ;;  %v4821_v33 = vpop.eup %4820  ;;  %v6935_v38 = vpack.i.bf16 %v6933_v30, %v6934_v49  ;;  %v4705_v13 = vld [vmem:[%s6850_s9 + $0x8] sm:$0xff]   ;;  %4499 = vmatprep.subr.bf16.mxu1 %v4704_v23 }
 0x5ed   : > { %v2836_v29 = vpop.xlane.xlu0 %2835  ;;  %v2748_v41 = vsel %vm2153_vm6, %v4821_v33, 0.0  ;;  %4500 = vmatpush3.bf16.msra.mxu1 %v4704_v23 }
 0x5ee   : > { %4832 = vrcp.f32 %v2836_v29  ;;  %4660 = vrot.lane.b32.xlu0 %v6920_v35, %s4927_s23  ;;  %v2994_v55 = vpack.c.bf16 %v2967_v12, %v2966_v2  ;;  %v4823_v46 = vpop.eup %4822  ;;  %4501 = vmatprep.subr.bf16.mxu1 %v4705_v13 }
 0x5ef   : > { %4665 = vrot.lane.b32.xlu1 %v6923_v42, %s4927_s23  ;;  %v2839_v28 = vpop.xlane.xlu1 %2838  ;;  %v2749_v62 = vsel %vm2153_vm6, %v4823_v46, 0.0 }
 0x5f0   : > { %4834 = vrcp.f32 %v2839_v28  ;;  %4475 = vmatprep.mubr.msk.bf16.mxu0 %vm1134_vm1, %v2994_v55 }
 0x5f1   : > { %v2662_v44 = vpop.xlane.xlu0 %2661  ;;  %4476 = vmatmul.mubr.msk.bf16.gmra.mrb[72].mxu0 %vm1134_vm1, %v2995_v47  ;;  %v4706_v47 = vld [vmem:[%s6850_s9 + $0x10] sm:$0xff]   ;;  %4502 = vmatpush3.bf16.msra.mxu1 %v4705_v13 }
 0x5f2   : > { %4670 = vrot.lane.b32.xlu0 %v6926_v27, %s4927_s23  ;;  %v4825_v5 = vpop.eup %4824  ;;  %4836 = vrcp.f32 %v2662_v44  ;;  %4503 = vmatprep.subr.bf16.mxu1 %v4706_v47 }
 0x5f3   : > { %4675 = vrot.lane.b32.xlu1 %v6929_v22, %s4927_s23  ;;  %v2665_v24 = vpop.xlane.xlu1 %2664  ;;  %v2941_v25 = vsel %vm5633_vm7, %v4825_v5, %v2749_v62 }
 0x5f4   : > { %v4827_v53 = vpop.eup %4826  ;;  %4838 = vrcp.f32 %v2665_v24  ;;  %v2973_v40 = vmul.f32 %v6197_v8, %v2941_v25 }
 0x5f5   : > { %v2854_v58 = vpop.xlane.xlu0 %2853  ;;  %v4829_v20 = vpop.eup %4828  ;;  %v2746_v43 = vsel %vm2153_vm6, %v4827_v53, 0.0  ;;  %4504 = vmatpush3.bf16.msra.mxu1 %v4706_v47 }
 0x5f6   : > { %4680 = vrot.lane.b32.xlu0 %v6932_v39, %s4927_s23  ;;  %v4831_v7 = vpop.eup %4830  ;;  %v2940_v35 = vsel %vm5633_vm7, %v4829_v20, %v2748_v41 }
 0x5f7   : > { %4685 = vrot.lane.b32.xlu1 %v6935_v38, %s4927_s23  ;;  %v2857_v61 = vpop.xlane.xlu1 %2856  ;;  %v2747_v29 = vsel %vm2153_vm6, %v4831_v7, 0.0  ;;  %v2972_v33 = vmul.f32 %v6190_v63, %v2940_v35 }
 0x5f8   : > { %v4833_v3 = vpop.eup %4832  ;;  %4840 = vrcp.f32 %v2857_v61 }
 0x5f9   : > { %v2656_v14 = vpop.xlane.xlu0 %2655  ;;  %v2938_v2 = vsel %vm5633_vm7, %v4833_v3, %v2746_v43  ;;  %v2997_v27 = vpack.c.bf16 %v2973_v40, %v2972_v33 }
 0x5fa   : > { %v4835_v12 = vpop.eup %4834  ;;  %4690 = vrot.lane.b32.xlu0 %v6938_v18, %s4927_s23  ;;  %4842 = vrcp.f32 %v2656_v14  ;;  %v2970_v42 = vmul.f32 %v6226_v11, %v2938_v2 }
 0x5fb   : > { %v2659_v55 = vpop.xlane.xlu1 %2658  ;;  %v2939_v37 = vsel %vm5633_vm7, %v4835_v12, %v2747_v29  ;;  %4844 = vrcp.f32 %v2854_v58 }
 0x5fc   : > { %v2971_v28 = vmul.f32 %v6233_v4, %v2939_v37  ;;  %4846 = vrcp.f32 %v2659_v55  ;;  %v4837_v11 = vpop.eup %4836 }
 0x5fd   : > { %v2848_v44 = vpop.xlane.xlu0 %2847  ;;  %v2752_v57 = vsel %vm2153_vm6, %v4837_v11, 0.0 }
 0x5fe   : > { %4848 = vrcp.f32 %v2848_v44  ;;  %v2996_v0 = vpack.c.bf16 %v2971_v28, %v2970_v42  ;;  %v4839_v4 = vpop.eup %4838 }
 0x5ff   : > { %v2851_v15 = vpop.xlane.xlu1 %2850  ;;  %v2753_v5 = vsel %vm2153_vm6, %v4839_v4, 0.0 }
 0x600   : > { %4850 = vrcp.f32 %v2851_v15  ;;  %4479 = vmatprep.mubr.msk.bf16.mxu0 %vm1134_vm1, %v2996_v0 }
 0x601   : > { %v2674_v8 = vpop.xlane.xlu0 %2673  ;;  %4480 = vmatmul.mubr.msk.bf16.gmra.mrb[76].mxu0 %vm1134_vm1, %v2997_v27 }
 0x602   : > { %v4841_v6 = vpop.eup %4840  ;;  %4852 = vrcp.f32 %v2674_v8 }
 0x603   : > { %v2677_v46 = vpop.xlane.xlu1 %2676  ;;  %v2945_v45 = vsel %vm5633_vm7, %v4841_v6, %v2753_v5  ;;  %v4707_v6 = vld [vmem:[%s6850_s9 + $0x18] sm:$0xff]  }
 0x604   : > { %v4843_v21 = vpop.eup %4842  ;;  %4854 = vrcp.f32 %v2677_v46  ;;  %v2977_v3 = vmul.f32 %v6253_v50, %v2945_v45  ;;  %4505 = vmatprep.subr.bf16.mxu1 %v4707_v6 }
 0x605   : > { %v2866_v22 = vpop.xlane.xlu0 %2865  ;;  %v4845_v63 = vpop.eup %4844  ;;  %v2750_v20 = vsel %vm2153_vm6, %v4843_v21, 0.0  ;;  %4506 = vmatpush3.bf16.msra.mxu1 %v4707_v6 }
 0x606   : > { %v4847_v24 = vpop.eup %4846  ;;  %v2944_v49 = vsel %vm5633_vm7, %v4845_v63, %v2752_v57 }
 0x607   : > { %v2869_v53 = vpop.xlane.xlu1 %2868  ;;  %v2751_v30 = vsel %vm2153_vm6, %v4847_v24, 0.0  ;;  %v2976_v13 = vmul.f32 %v6247_v36, %v2944_v49 }
 0x608   : > { %v4849_v58 = vpop.eup %4848  ;;  %4856 = vrcp.f32 %v2869_v53 }
 0x609   : > { %v2668_v39 = vpop.xlane.xlu0 %2667  ;;  %v2942_v7 = vsel %vm5633_vm7, %v4849_v58, %v2750_v20  ;;  %v2999_v2 = vpack.c.bf16 %v2977_v3, %v2976_v13 }
 0x60a   : > { %v4851_v62 = vpop.eup %4850  ;;  %4858 = vrcp.f32 %v2668_v39  ;;  %v2974_v43 = vmul.f32 %v6277_v32, %v2942_v7 }
 0x60b   : > { %v2671_v38 = vpop.xlane.xlu1 %2670  ;;  %v2943_v61 = vsel %vm5633_vm7, %v4851_v62, %v2751_v30  ;;  %4860 = vrcp.f32 %v2866_v22 }
 0x60c   : > { %v2975_v25 = vmul.f32 %v6283_v17, %v2943_v61  ;;  %4862 = vrcp.f32 %v2671_v38  ;;  %v4853_v12 = vpop.eup %4852 }
 0x60d   : > { %v2860_v23 = vpop.xlane.xlu0 %2859  ;;  %v2756_v55 = vsel %vm2153_vm6, %v4853_v12, 0.0 }
 0x60e   : > { %4864 = vrcp.f32 %v2860_v23  ;;  %v2998_v41 = vpack.c.bf16 %v2975_v25, %v2974_v43  ;;  %v4855_v50 = vpop.eup %4854 }
 0x60f   : > { %v2863_v14 = vpop.xlane.xlu1 %2862  ;;  %v2757_v17 = vsel %vm2153_vm6, %v4855_v50, 0.0 }
 0x610   : > { %4866 = vrcp.f32 %v2863_v14  ;;  %4483 = vmatprep.mubr.msk.bf16.mxu0 %vm1134_vm1, %v2998_v41 }
 0x611   : > { %4484 = vmatmul.mubr.msk.bf16.gmra.mrb[80].mxu0 %vm1134_vm1, %v2999_v2 }
 0x612   : > { %v4857_v29 = vpop.eup %4856 }
 0x613   : > { %v2949_v35 = vsel %vm5633_vm7, %v4857_v29, %v2757_v17 }
 0x614   : > { %v4859_v1 = vpop.eup %4858  ;;  %v2981_v44 = vmul.f32 %v6317_v10, %v2949_v35 }
 0x615   : > { %v4861_v32 = vpop.eup %4860  ;;  %v2754_v36 = vsel %vm2153_vm6, %v4859_v1, 0.0 }
 0x616   : > { %v4863_v51 = vpop.eup %4862  ;;  %v2948_v28 = vsel %vm5633_vm7, %v4861_v32, %v2756_v55 }
 0x617   : > { %v2755_v42 = vsel %vm2153_vm6, %v4863_v51, 0.0  ;;  %v2980_v15 = vmul.f32 %v6311_v19, %v2948_v28 }
 0x618   : > { %v4865_v18 = vpop.eup %4864 }
 0x619   : > { %v2946_v37 = vsel %vm5633_vm7, %v4865_v18, %v2754_v36  ;;  %v3001_v8 = vpack.c.bf16 %v2981_v44, %v2980_v15 }
 0x61a   : > { %v4867_v40 = vpop.eup %4866  ;;  %v2978_v33 = vmul.f32 %v6331_v54, %v2946_v37 }
 0x61b   : > { %v2947_v47 = vsel %vm5633_vm7, %v4867_v40, %v2755_v42 }
 0x61c   : > { %v2979_v0 = vmul.f32 %v6337_v34, %v2947_v47 }
 0x61e   : > { %v3000_v27 = vpack.c.bf16 %v2979_v0, %v2978_v33 }
 0x620   : > { %4487 = vmatprep.mubr.msk.bf16.mxu0 %vm1134_vm1, %v3000_v27 }
 0x621   : > { %4488 = vmatmul.mubr.msk.bf16.gmra.mrb[84].mxu0 %vm1134_vm1, %v3001_v8 }
 0x624   : > { %v2686_v11 = vpop.xlane.xlu0 %2685 }
 0x625   : > { %4868 = vrcp.f32 %v2686_v11  ;;  %v6939_v11 = vld [vmem:[#allocation24_spill] sm:$0xff] }
 0x626   : > { %v2689_v4 = vpop.xlane.xlu1 %2688 }
 0x627   : > { %4870 = vrcp.f32 %v2689_v4 }
 0x628   : > { %v2878_v46 = vpop.xlane.xlu0 %2877 }
 0x62a   : > { %v2881_v10 = vpop.xlane.xlu1 %2880 }
 0x62b   : > { %4872 = vrcp.f32 %v2881_v10 }
 0x62c   : > { %v2680_v54 = vpop.xlane.xlu0 %2679 }
 0x62d   : > { %4874 = vrcp.f32 %v2680_v54 }
 0x62e   : > { %v2683_v19 = vpop.xlane.xlu1 %2682  ;;  %4876 = vrcp.f32 %v2878_v46 }
 0x62f   : > { %4878 = vrcp.f32 %v2683_v19  ;;  %v4869_v22 = vpop.eup %4868 }
 0x630   : > { %v2872_v34 = vpop.xlane.xlu0 %2871  ;;  %v2760_v7 = vsel %vm2153_vm6, %v4869_v22, 0.0 }
 0x631   : > { %4880 = vrcp.f32 %v2872_v34  ;;  %v4871_v63 = vpop.eup %4870 }
 0x632   : > { %v2875_v21 = vpop.xlane.xlu1 %2874  ;;  %v2761_v20 = vsel %vm2153_vm6, %v4871_v63, 0.0 }
 0x633   : > { %4882 = vrcp.f32 %v2875_v21 }
 0x635   : > { %v4873_v24 = vpop.eup %4872 }
 0x636   : > { %v2953_v39 = vsel %vm5633_vm7, %v4873_v24, %v2761_v20 }
 0x637   : > { %v4875_v5 = vpop.eup %4874  ;;  %v2985_v3 = vmul.f32 %v6378_v60, %v2953_v39 }
 0x638   : > { %v4877_v53 = vpop.eup %4876  ;;  %v2758_v57 = vsel %vm2153_vm6, %v4875_v5, 0.0 }
 0x639   : > { %v4879_v58 = vpop.eup %4878  ;;  %v2952_v38 = vsel %vm5633_vm7, %v4877_v53, %v2760_v7 }
 0x63a   : > { %v2759_v49 = vsel %vm2153_vm6, %v4879_v58, 0.0  ;;  %v2984_v23 = vmul.f32 %v6373_v52, %v2952_v38 }
 0x63b   : > { %v4881_v45 = vpop.eup %4880 }
 0x63c   : > { %v2950_v62 = vsel %vm5633_vm7, %v4881_v45, %v2758_v57  ;;  %v3003_v41 = vpack.c.bf16 %v2985_v3, %v2984_v23 }
 0x63d   : > { %v4883_v30 = vpop.eup %4882  ;;  %v2982_v43 = vmul.f32 %v6392_v16, %v2950_v62 }
 0x63e   : > { %v2951_v61 = vsel %vm5633_vm7, %v4883_v30, %v2759_v49 }
 0x63f   : > { %v2983_v25 = vmul.f32 %v6398_v48, %v2951_v61 }
 0x641   : > { %v3002_v13 = vpack.c.bf16 %v2983_v25, %v2982_v43 }
 0x643   : > { %4491 = vmatprep.mubr.msk.bf16.mxu0 %vm1134_vm1, %v3002_v13 }
 0x644   : > { %4492 = vmatmul.mubr.msk.bf16.gmra.mrb[88].mxu0 %vm1134_vm1, %v3003_v41 }
 0x645   : > { %v2698_v14 = vpop.xlane.xlu0 %2697 }
 0x647   : > { %v2701_v2 = vpop.xlane.xlu1 %2700 }
 0x64d   : > { %v2692_v12 = vpop.xlane.xlu0 %2691 }
 0x64e   : > { %4884 = vrcp.f32 %v2692_v12 }
 0x64f   : > { %v2695_v50 = vpop.xlane.xlu1 %2694 }
 0x650   : > { %4886 = vrcp.f32 %v2695_v50 }
 0x651   : > { %v2884_v29 = vpop.xlane.xlu0 %2883 }
 0x652   : > { %4888 = vrcp.f32 %v2884_v29 }
 0x653   : > { %4890 = vrcp.f32 %v2698_v14  ;;  %v2887_v60 = vpop.xlane.xlu1 %2886 }
 0x654   : > { %4892 = vrcp.f32 %v2887_v60 }
 0x655   : > { %4894 = vrcp.f32 %v2701_v2  ;;  %v2890_v16 = vpop.xlane.xlu0 %2889 }
 0x656   : > { %4896 = vrcp.f32 %v2890_v16 }
 0x657   : > { %v2893_v52 = vpop.xlane.xlu1 %2892 }
 0x658   : > { %4898 = vrcp.f32 %v2893_v52  ;;  %v4885_v48 = vpop.eup %4884 }
 0x659   : > { %v2762_v51 = vsel %vm2153_vm6, %v4885_v48, 0.0 }
 0x65a   : > { %v4887_v1 = vpop.eup %4886 }
 0x65b   : > { %v2763_v35 = vsel %vm2153_vm6, %v4887_v1, 0.0 }
 0x65c   : > { %v4889_v32 = vpop.eup %4888 }
 0x65d   : > { %v4891_v17 = vpop.eup %4890  ;;  %v2954_v18 = vsel %vm5633_vm7, %v4889_v32, %v2762_v51 }
 0x65e   : > { %v4893_v36 = vpop.eup %4892  ;;  %v2764_v42 = vsel %vm2153_vm6, %v4891_v17, 0.0  ;;  %v2986_v28 = vmul.f32 %v6445_v26, %v2954_v18 }
 0x65f   : > { %v4895_v55 = vpop.eup %4894  ;;  %v2955_v37 = vsel %vm5633_vm7, %v4893_v36, %v2763_v35  ;;  %v6744_v35 = vld [vmem:[%s6851_s10] ss:$0 sm:$0xff] }
 0x660   : > { %v4897_v40 = vpop.eup %4896  ;;  %v2987_v47 = vmul.f32 %v6450_v9, %v2955_v37  ;;  %v2765_v0 = vsel %vm2153_vm6, %v4895_v55, 0.0  ;;  %v4621_v55 = vpop.permute.xlu1 %4620 }
 0x661   : > { %v2956_v44 = vsel %vm5633_vm7, %v4897_v40, %v2764_v42  ;;  %v4616_v40 = vpop.permute.xlu0 %4615 }
 0x662   : > { %v4899_v33 = vpop.eup %4898  ;;  %v3004_v15 = vpack.c.bf16 %v2987_v47, %v2986_v28  ;;  %v2988_v8 = vmul.f32 %v6433_v56, %v2956_v44 }
 0x663   : > { %v2957_v27 = vsel %vm5633_vm7, %v4899_v33, %v2765_v0  ;;  %v4623_v33 = vunpack.i.h.bf16 %v4621_v55  ;;  %v4622_v0 = vunpack.i.l.bf16 %v4621_v55 }
 0x664   : > { %4495 = vmatprep.mubr.msk.bf16.mxu0 %vm1134_vm1, %v3004_v15  ;;  %v2989_v4 = vmul.f32 %v6939_v11, %v2957_v27  ;;  %v4617_v11 = vunpack.i.l.bf16 %v4616_v40 }
 0x666   : > { %v3005_v26 = vpack.c.bf16 %v2989_v4, %v2988_v8  ;;  %v4618_v8 = vunpack.i.h.bf16 %v4616_v40 }
 0x668   : > { %4496 = vmatmul.mubr.msk.bf16.gmra.mrb[92].mxu0 %vm1134_vm1, %v3005_v26 }
 0x6a4   : > { %v4469_v9 = vpop.f32.mrb[64].mxu0 }
 0x6a5   : > { %v3092_v46 = vpop.f32.mrb[65].mxu0 }
 0x6a6   : > { %v4470_v6 = vpop.f32.mrb[66].mxu0 }
 0x6a7   : > { %v3220_v10 = vpack.c.bf16 %v4470_v6, %v4469_v9  ;;  %v3095_v54 = vpop.f32.mrb[67].mxu0 }
 0x6a8   : > { %v3219_v59 = vpack.c.bf16 %v3095_v54, %v3092_v46 }
 0x6aa   : > { %4507 = vmatprep.mubr.msk.bf16.mxu1 %vm1683_vm3, %v3219_v59  ;;  %v4631_v59 = vpop.permute.xlu0 %4630 }
 0x6ab   : > { %4508 = vmatmul.mubr.msk.bf16.vlgmr.msra.gmra.mrb[64].mxu1 %vm1683_vm3, %v3220_v10 }
 0x6b4   : > { %v4473_v31 = vpop.f32.mrb[68].mxu0 }
 0x6b5   : > { %v3108_v19 = vpop.f32.mrb[69].mxu0 }
 0x6b6   : > { %v4474_v34 = vpop.f32.mrb[70].mxu0 }
 0x6b7   : > { %v3222_v21 = vpack.c.bf16 %v4474_v34, %v4473_v31  ;;  %v3111_v56 = vpop.f32.mrb[71].mxu0 }
 0x6b8   : > { %v3221_v22 = vpack.c.bf16 %v3111_v56, %v3108_v19  ;;  %v4626_v19 = vpop.permute.xlu1 %4625 }
 0x6ba   : > { %4511 = vmatprep.mubr.msk.bf16.mxu1 %vm1683_vm3, %v3221_v22 }
 0x6bb   : > { %4512 = vmatmul.mubr.msk.bf16.gmra.mrb[68].mxu1 %vm1683_vm3, %v3222_v21 }
 0x6c4   : > { %v4477_v63 = vpop.f32.mrb[72].mxu0 }
 0x6c5   : > { %v3124_v24 = vpop.f32.mrb[73].mxu0 }
 0x6c6   : > { %v4478_v5 = vpop.f32.mrb[74].mxu0 }
 0x6c7   : > { %v3224_v53 = vpack.c.bf16 %v4478_v5, %v4477_v63  ;;  %v3127_v58 = vpop.f32.mrb[75].mxu0  ;;  %v4633_v63 = vunpack.i.h.bf16 %v4631_v59 }
 0x6c8   : > { %v3223_v20 = vpack.c.bf16 %v3127_v58, %v3124_v24  ;;  %v4632_v24 = vunpack.i.l.bf16 %v4631_v59  ;;  %v4628_v58 = vunpack.i.h.bf16 %v4626_v19 }
 0x6ca   : > { %4515 = vmatprep.mubr.msk.bf16.mxu1 %vm1683_vm3, %v3223_v20  ;;  %v4627_v20 = vunpack.i.l.bf16 %v4626_v19 }
 0x6cb   : > { %4516 = vmatmul.mubr.msk.bf16.gmra.mrb[72].mxu1 %vm1683_vm3, %v3224_v53 }
 0x6d4   : > { %v4481_v45 = vpop.f32.mrb[76].mxu0 }
 0x6d5   : > { %v3140_v57 = vpop.f32.mrb[77].mxu0 }
 0x6d6   : > { %v4482_v39 = vpop.f32.mrb[78].mxu0 }
 0x6d7   : > { %v3226_v7 = vpack.c.bf16 %v4482_v39, %v4481_v45  ;;  %v3143_v62 = vpop.f32.mrb[79].mxu0 }
 0x6d8   : > { %v3225_v30 = vpack.c.bf16 %v3143_v62, %v3140_v57 }
 0x6da   : > { %4519 = vmatprep.mubr.msk.bf16.mxu1 %vm1683_vm3, %v3225_v30 }
 0x6db   : > { %4520 = vmatmul.mubr.msk.bf16.gmra.mrb[76].mxu1 %vm1683_vm3, %v3226_v7 }
 0x6e4   : > { %v4485_v49 = vpop.f32.mrb[80].mxu0 }
 0x6e5   : > { %v3156_v38 = vpop.f32.mrb[81].mxu0 }
 0x6e6   : > { %v4486_v61 = vpop.f32.mrb[82].mxu0 }
 0x6e7   : > { %v3228_v3 = vpack.c.bf16 %v4486_v61, %v4485_v49  ;;  %v3159_v43 = vpop.f32.mrb[83].mxu0 }
 0x6e8   : > { %v3227_v25 = vpack.c.bf16 %v3159_v43, %v3156_v38  ;;  %v4641_v38 = vpop.permute.xlu0 %4640 }
 0x6ea   : > { %4523 = vmatprep.mubr.msk.bf16.mxu1 %vm1683_vm3, %v3227_v25 }
 0x6eb   : > { %4524 = vmatmul.mubr.msk.bf16.gmra.mrb[80].mxu1 %vm1683_vm3, %v3228_v3  ;;  %v4636_v3 = vpop.permute.xlu1 %4635 }
 0x6f4   : > { %v4489_v23 = vpop.f32.mrb[84].mxu0 }
 0x6f5   : > { %v3172_v13 = vpop.f32.mrb[85].mxu0 }
 0x6f6   : > { %v4490_v41 = vpop.f32.mrb[86].mxu0 }
 0x6f7   : > { %v3230_v14 = vpack.c.bf16 %v4490_v41, %v4489_v23  ;;  %v3175_v2 = vpop.f32.mrb[87].mxu0  ;;  %v4643_v41 = vunpack.i.h.bf16 %v4641_v38 }
 0x6f8   : > { %v3229_v12 = vpack.c.bf16 %v3175_v2, %v3172_v13 }
 0x6fa   : > { %4527 = vmatprep.mubr.msk.bf16.mxu1 %vm1683_vm3, %v3229_v12 }
 0x6fb   : > { %4528 = vmatmul.mubr.msk.bf16.gmra.mrb[84].mxu1 %vm1683_vm3, %v3230_v14  ;;  %v4642_v14 = vunpack.i.l.bf16 %v4641_v38 }
 0x717   : > { %v4493_v50 = vpop.f32.mrb[88].mxu0 }
 0x718   : > { %v3188_v29 = vpop.f32.mrb[89].mxu0 }
 0x719   : > { %v4494_v60 = vpop.f32.mrb[90].mxu0 }
 0x71a   : > { %v3232_v16 = vpack.c.bf16 %v4494_v60, %v4493_v50  ;;  %v3191_v52 = vpop.f32.mrb[91].mxu0  ;;  %v4638_v50 = vunpack.i.h.bf16 %v4636_v3 }
 0x71b   : > { %v3231_v48 = vpack.c.bf16 %v3191_v52, %v3188_v29  ;;  %v4637_v29 = vunpack.i.l.bf16 %v4636_v3 }
 0x71d   : > { %4531 = vmatprep.mubr.msk.bf16.mxu1 %vm1683_vm3, %v3231_v48 }
 0x71e   : > { %4532 = vmatmul.mubr.msk.bf16.gmra.mrb[88].mxu1 %vm1683_vm3, %v3232_v16 }
 0x73b   : > { %v4497_v1 = vpop.f32.mrb[92].mxu0 }
 0x73c   : > { %v3204_v32 = vpop.f32.mrb[93].mxu0 }
 0x73d   : > { %v4498_v51 = vpop.f32.mrb[94].mxu0 }
 0x73e   : > { %v3234_v17 = vpack.c.bf16 %v4498_v51, %v4497_v1  ;;  %v3207_v18 = vpop.f32.mrb[95].mxu0 }
 0x73f   : > { %v3233_v36 = vpack.c.bf16 %v3207_v18, %v3204_v32 }
 0x741   : > { %4535 = vmatprep.mubr.msk.bf16.mxu1 %vm1683_vm3, %v3233_v36  ;;  %v4646_v36 = vpop.permute.xlu1 %4645 }
 0x742   : > { %4536 = vmatmul.mubr.msk.bf16.gmra.mrb[92].mxu1 %vm1683_vm3, %v3234_v17  ;;  %v4651_v17 = vpop.permute.xlu0 %4650 }
 0x77e   : > { %v4509_v37 = vpop.f32.mrb[64].mxu1 }
 0x77f   : > { %v3365_v42 = vadd.f32 %v4509_v37, %v6744_v35  ;;  %v3356_v28 = vpop.f32.mrb[65].mxu1 }
 0x780   : > { %v3357_v47 = vadd.f32 %v6744_v35, %v3356_v28  ;;  %v4510_v44 = vpop.f32.mrb[66].mxu1  ;;  %v4653_v28 = vunpack.i.h.bf16 %v4651_v17 }
 0x781   : > { %v3368_v15 = vadd.f32 %v4510_v44, %v6744_v35  ;;  %v3359_v27 = vpop.f32.mrb[67].mxu1  ;;  %v3613_v26 = vsel %vm1683_vm3, %v3365_v42, %v4622_v0  ;;  %v4648_v0 = vunpack.i.h.bf16 %v4646_v36 }
 0x782   : > { %v3360_v4 = vadd.f32 %v6744_v35, %v3359_v27  ;;  %v3611_v46 = vsel %vm1683_vm3, %v3357_v47, %v4617_v11  ;;  %v4652_v47 = vunpack.i.l.bf16 %v4651_v17 }
 0x783   : > { %v3614_v9 = vsel %vm1683_vm3, %v3368_v15, %v4623_v33  ;;  %v4647_v15 = vunpack.i.l.bf16 %v4646_v36 }
 0x784   : > { %v4116_v6 = vpack.c.bf16 %v3614_v9, %v3613_v26  ;;  %v3612_v10 = vsel %vm1683_vm3, %v3360_v4, %v4618_v8 }
 0x785   : > { %v4111_v54 = vpack.c.bf16 %v3612_v10, %v3611_v46 }
 0x786   : > { %4188 = vst [vmem:[%s6755_s22 + $0x8] sm:$0xff] %v4116_v6   ;;  %v4661_v6 = vpop.permute.xlu0 %4660 }
 0x787   : > { %4112 = vst [vmem:[%s6755_s22] sm:$0xff] %v4111_v54   ;;  %v4656_v54 = vpop.permute.xlu1 %4655 }
 0x78e   : > { %v4513_v31 = vpop.f32.mrb[68].mxu1 }
 0x78f   : > { %v3381_v34 = vadd.f32 %v4513_v31, %v6744_v35  ;;  %v3372_v21 = vpop.f32.mrb[69].mxu1 }
 0x790   : > { %v3373_v56 = vadd.f32 %v6744_v35, %v3372_v21  ;;  %v4514_v22 = vpop.f32.mrb[70].mxu1  ;;  %v4663_v21 = vunpack.i.h.bf16 %v4661_v6 }
 0x791   : > { %v3384_v5 = vadd.f32 %v4514_v22, %v6744_v35  ;;  %v3375_v53 = vpop.f32.mrb[71].mxu1  ;;  %v3617_v57 = vsel %vm1683_vm3, %v3381_v34, %v4632_v24  ;;  %v4658_v24 = vunpack.i.h.bf16 %v4656_v54 }
 0x792   : > { %v3376_v45 = vadd.f32 %v6744_v35, %v3375_v53  ;;  %v3615_v7 = vsel %vm1683_vm3, %v3373_v56, %v4627_v20  ;;  %v4662_v56 = vunpack.i.l.bf16 %v4661_v6 }
 0x793   : > { %v3618_v39 = vsel %vm1683_vm3, %v3384_v5, %v4633_v63  ;;  %v4657_v5 = vunpack.i.l.bf16 %v4656_v54 }
 0x794   : > { %v4126_v62 = vpack.c.bf16 %v3618_v39, %v3617_v57  ;;  %v3616_v30 = vsel %vm1683_vm3, %v3376_v45, %v4628_v58 }
 0x795   : > { %v4121_v49 = vpack.c.bf16 %v3616_v30, %v3615_v7 }
 0x796   : > { %4190 = vst [vmem:[%s6755_s22 + $0x18] sm:$0xff] %v4126_v62   ;;  %v4671_v62 = vpop.permute.xlu0 %4670 }
 0x797   : > { %4189 = vst [vmem:[%s6755_s22 + $0x10] sm:$0xff] %v4121_v49   ;;  %v4666_v49 = vpop.permute.xlu1 %4665 }
 0x79e   : > { %v4517_v61 = vpop.f32.mrb[72].mxu1 }
 0x79f   : > { %v3397_v43 = vadd.f32 %v4517_v61, %v6744_v35  ;;  %v3388_v25 = vpop.f32.mrb[73].mxu1 }
 0x7a0   : > { %v3389_v23 = vadd.f32 %v6744_v35, %v3388_v25  ;;  %v4518_v13 = vpop.f32.mrb[74].mxu1  ;;  %v4673_v25 = vunpack.i.h.bf16 %v4671_v62 }
 0x7a1   : > { %v3400_v2 = vadd.f32 %v4518_v13, %v6744_v35  ;;  %v3391_v12 = vpop.f32.mrb[75].mxu1  ;;  %v3621_v16 = vsel %vm1683_vm3, %v3397_v43, %v4642_v14  ;;  %v4668_v14 = vunpack.i.h.bf16 %v4666_v49 }
 0x7a2   : > { %v3392_v60 = vadd.f32 %v6744_v35, %v3391_v12  ;;  %v3619_v48 = vsel %vm1683_vm3, %v3389_v23, %v4637_v29  ;;  %v4672_v23 = vunpack.i.l.bf16 %v4671_v62 }
 0x7a3   : > { %v3622_v52 = vsel %vm1683_vm3, %v3400_v2, %v4643_v41  ;;  %v4667_v2 = vunpack.i.l.bf16 %v4666_v49 }
 0x7a4   : > { %v4136_v1 = vpack.c.bf16 %v3622_v52, %v3621_v16  ;;  %v3620_v32 = vsel %vm1683_vm3, %v3392_v60, %v4638_v50 }
 0x7a5   : > { %v4131_v51 = vpack.c.bf16 %v3620_v32, %v3619_v48 }
 0x7a6   : > { %4192 = vst [vmem:[%s6755_s22 + $0x28] sm:$0xff] %v4136_v1   ;;  %v4681_v1 = vpop.permute.xlu0 %4680 }
 0x7a7   : > { %4191 = vst [vmem:[%s6755_s22 + $0x20] sm:$0xff] %v4131_v51   ;;  %v4676_v51 = vpop.permute.xlu1 %4675 }
 0x7ae   : > { %v4521_v18 = vpop.f32.mrb[76].mxu1 }
 0x7af   : > { %v3413_v55 = vadd.f32 %v4521_v18, %v6744_v35  ;;  %v3404_v37 = vpop.f32.mrb[77].mxu1 }
 0x7b0   : > { %v3405_v40 = vadd.f32 %v6744_v35, %v3404_v37  ;;  %v4522_v42 = vpop.f32.mrb[78].mxu1  ;;  %v4683_v37 = vunpack.i.h.bf16 %v4681_v1 }
 0x7b1   : > { %v3416_v44 = vadd.f32 %v4522_v42, %v6744_v35  ;;  %v3407_v33 = vpop.f32.mrb[79].mxu1  ;;  %v3625_v8 = vsel %vm1683_vm3, %v3413_v55, %v4652_v47  ;;  %v4678_v47 = vunpack.i.h.bf16 %v4676_v51 }
 0x7b2   : > { %v3408_v27 = vadd.f32 %v6744_v35, %v3407_v33  ;;  %v3623_v4 = vsel %vm1683_vm3, %v3405_v40, %v4647_v15  ;;  %v4682_v40 = vunpack.i.l.bf16 %v4681_v1 }
 0x7b3   : > { %v3626_v11 = vsel %vm1683_vm3, %v3416_v44, %v4653_v28  ;;  %v4677_v44 = vunpack.i.l.bf16 %v4676_v51 }
 0x7b4   : > { %v4146_v26 = vpack.c.bf16 %v3626_v11, %v3625_v8  ;;  %v3624_v9 = vsel %vm1683_vm3, %v3408_v27, %v4648_v0 }
 0x7b5   : > { %v4141_v46 = vpack.c.bf16 %v3624_v9, %v3623_v4 }
 0x7b6   : > { %4194 = vst [vmem:[%s6755_s22 + $0x38] sm:$0xff] %v4146_v26   ;;  %v4691_v26 = vpop.permute.xlu0 %4690 }
 0x7b7   : > { %4193 = vst [vmem:[%s6755_s22 + $0x30] sm:$0xff] %v4141_v46   ;;  %v4686_v46 = vpop.permute.xlu1 %4685 }
 0x7be   : > { %v4525_v10 = vpop.f32.mrb[80].mxu1 }
 0x7bf   : > { %v3429_v59 = vadd.f32 %v4525_v10, %v6744_v35  ;;  %v3420_v31 = vpop.f32.mrb[81].mxu1 }
 0x7c0   : > { %v3421_v19 = vadd.f32 %v6744_v35, %v3420_v31  ;;  %v4526_v34 = vpop.f32.mrb[82].mxu1  ;;  %v4693_v31 = vunpack.i.h.bf16 %v4691_v26 }
 0x7c1   : > { %v3432_v22 = vadd.f32 %v4526_v34, %v6744_v35  ;;  %v3423_v63 = vpop.f32.mrb[83].mxu1  ;;  %v3629_v58 = vsel %vm1683_vm3, %v3429_v59, %v4662_v56  ;;  %v4688_v56 = vunpack.i.h.bf16 %v4686_v46 }
 0x7c2   : > { %v3424_v53 = vadd.f32 %v6744_v35, %v3423_v63  ;;  %v3627_v45 = vsel %vm1683_vm3, %v3421_v19, %v4657_v5  ;;  %v4692_v19 = vunpack.i.l.bf16 %v4691_v26 }
 0x7c3   : > { %v3630_v20 = vsel %vm1683_vm3, %v3432_v22, %v4663_v21  ;;  %v4687_v22 = vunpack.i.l.bf16 %v4686_v46 }
 0x7c4   : > { %v4156_v57 = vpack.c.bf16 %v3630_v20, %v3629_v58  ;;  %v3628_v39 = vsel %vm1683_vm3, %v3424_v53, %v4658_v24 }
 0x7c5   : > { %v4151_v7 = vpack.c.bf16 %v3628_v39, %v3627_v45 }
 0x7c6   : > { %4196 = vst [vmem:[%s6755_s22 + $0x48] sm:$0xff] %v4156_v57  }
 0x7c7   : > { %4195 = vst [vmem:[%s6755_s22 + $0x40] sm:$0xff] %v4151_v7  }
 0x7ce   : > { %v4529_v30 = vpop.f32.mrb[84].mxu1 }
 0x7cf   : > { %v3445_v38 = vadd.f32 %v4529_v30, %v6744_v35  ;;  %v3436_v61 = vpop.f32.mrb[85].mxu1 }
 0x7d0   : > { %v3437_v3 = vadd.f32 %v6744_v35, %v3436_v61  ;;  %v4530_v43 = vpop.f32.mrb[86].mxu1 }
 0x7d1   : > { %v3448_v13 = vadd.f32 %v4530_v43, %v6744_v35  ;;  %v3439_v41 = vpop.f32.mrb[87].mxu1  ;;  %v3633_v50 = vsel %vm1683_vm3, %v3445_v38, %v4672_v23 }
 0x7d2   : > { %v3440_v12 = vadd.f32 %v6744_v35, %v3439_v41  ;;  %v3631_v60 = vsel %vm1683_vm3, %v3437_v3, %v4667_v2 }
 0x7d3   : > { %v3634_v29 = vsel %vm1683_vm3, %v3448_v13, %v4673_v25 }
 0x7d4   : > { %v4166_v16 = vpack.c.bf16 %v3634_v29, %v3633_v50  ;;  %v3632_v52 = vsel %vm1683_vm3, %v3440_v12, %v4668_v14 }
 0x7d5   : > { %v4161_v48 = vpack.c.bf16 %v3632_v52, %v3631_v60 }
 0x7d6   : > { %4198 = vst [vmem:[%s6755_s22 + $0x58] sm:$0xff] %v4166_v16  }
 0x7d7   : > { %4197 = vst [vmem:[%s6755_s22 + $0x50] sm:$0xff] %v4161_v48  }
 0x7f1   : > { %v4533_v32 = vpop.f32.mrb[88].mxu1 }
 0x7f2   : > { %v3461_v17 = vadd.f32 %v4533_v32, %v6744_v35  ;;  %v3452_v18 = vpop.f32.mrb[89].mxu1 }
 0x7f3   : > { %v3453_v36 = vadd.f32 %v6744_v35, %v3452_v18  ;;  %v4534_v55 = vpop.f32.mrb[90].mxu1 }
 0x7f4   : > { %v3464_v42 = vadd.f32 %v4534_v55, %v6744_v35  ;;  %v3455_v28 = vpop.f32.mrb[91].mxu1  ;;  %v3637_v0 = vsel %vm1683_vm3, %v3461_v17, %v4682_v40 }
 0x7f5   : > { %v3456_v33 = vadd.f32 %v6744_v35, %v3455_v28  ;;  %v3635_v27 = vsel %vm1683_vm3, %v3453_v36, %v4677_v44 }
 0x7f6   : > { %v3638_v15 = vsel %vm1683_vm3, %v3464_v42, %v4683_v37 }
 0x7f7   : > { %v4176_v8 = vpack.c.bf16 %v3638_v15, %v3637_v0  ;;  %v3636_v11 = vsel %vm1683_vm3, %v3456_v33, %v4678_v47 }
 0x7f8   : > { %v4171_v4 = vpack.c.bf16 %v3636_v11, %v3635_v27 }
 0x7f9   : > { %4200 = vst [vmem:[%s6755_s22 + $0x68] sm:$0xff] %v4176_v8  }
 0x7fa   : > { %4199 = vst [vmem:[%s6755_s22 + $0x60] sm:$0xff] %v4171_v4  }
 0x815   : > { %v4537_v9 = vpop.f32.mrb[92].mxu1 }
 0x816   : > { %v3477_v6 = vadd.f32 %v4537_v9, %v6744_v35  ;;  %v3468_v10 = vpop.f32.mrb[93].mxu1 }
 0x817   : > { %v3469_v54 = vadd.f32 %v6744_v35, %v3468_v10  ;;  %v4538_v59 = vpop.f32.mrb[94].mxu1 }
 0x818   : > { %v3480_v34 = vadd.f32 %v4538_v59, %v6744_v35  ;;  %v3471_v21 = vpop.f32.mrb[95].mxu1  ;;  %v3641_v24 = vsel %vm1683_vm3, %v3477_v6, %v4692_v19 }
 0x819   : > { %v3472_v63 = vadd.f32 %v6744_v35, %v3471_v21  ;;  %v3639_v53 = vsel %vm1683_vm3, %v3469_v54, %v4687_v22 }
 0x81a   : > { %v3642_v5 = vsel %vm1683_vm3, %v3480_v34, %v4693_v31 }
 0x81b   : > { %v4186_v58 = vpack.c.bf16 %v3642_v5, %v3641_v24  ;;  %v3640_v20 = vsel %vm1683_vm3, %v3472_v63, %v4688_v56 }
 0x81c   : > { %v4181_v45 = vpack.c.bf16 %v3640_v20, %v3639_v53 }
 0x81d   : > { %4202 = vst [vmem:[%s6755_s22 + $0x78] sm:$0xff] %v4186_v58  }
 0x81e   : > { %4201 = vst [vmem:[%s6755_s22 + $0x70] sm:$0xff] %v4181_v45  }
 0x81f PF: > { %s21_s19 = sadd.s32 1, %s4922_s19   ;;  %s6940_s17 = smov %s4918_s18 }
 0x820   : > { %p18_p5 = scmp.ge.s32.totalorder %s21_s19, 4   ;;  %s6941_s18 = smov %s6943_s20 }
 0x822   :  { %20 = sbr.rel (!%p18_p5) target bundleno = 2 (0x2), region = 100 }

// kernel: fursformer_forward.7
= control target key start
LH: loop header
LB: loop body
LE: loop exit
PB: predicated region body
PF: predicated region fallthrough
CT: control target
= control target key end

     0   :  { %s2132_s17 = smov 0   ;;  %s2134_s18 = smov 0   ;;  %s2572_s0 = inlined_call_operand.vmem [shape: f32[2,64,3], index: 0, kind: input, shape index: {}]   ;;  %s2573_s1 = inlined_call_operand.vmem [shape: bf16[2,64,8], index: 1, kind: input, shape index: {}]   ;;  %s2574_s2 = inlined_call_operand.vmem [shape: bf16[2,8,64], index: 2, kind: input, shape index: {}]   ;;  %s2575_s3 = inlined_call_operand.vmem [shape: f32[3,16], index: 3, kind: input, shape index: {}]   ;;  %s2576_s4 = inlined_call_operand.vmem [shape: bf16[16,48], index: 4, kind: input, shape index: {}]   ;;  %s2577_s5 = inlined_call_operand.vmem [shape: bf16[48,64], index: 5, kind: input, shape index: {}]   ;;  %s2578_s6 = inlined_call_operand.vmem [shape: f32[1,64], index: 6, kind: input, shape index: {}]   ;;  %s2579_s7 = inlined_call_operand.vmem [shape: bf16[64,64], index: 7, kind: input, shape index: {}]   ;;  %s2580_s8 = inlined_call_operand.vmem [shape: f32[1,64], index: 8, kind: input, shape index: {}]   ;;  %s2581_s9 = inlined_call_operand.vmem [shape: bf16[64,64], index: 9, kind: input, shape index: {}]   ;;  %s2582_s10 = inlined_call_operand.vmem [shape: f32[1,64], index: 10, kind: input, shape index: {}]   ;;  %s2583_s11 = inlined_call_operand.vmem [shape: bf16[2,64,128], index: 11, kind: output, shape index: {}]  }
   0x1   :  { %s2136_s19 = smov 0  }
   0x2 LB: > { %s33_s20 = sadd.s32 1, %s2062_s18  ;;  %p1700_p0 = scmp.ge.s32.totalorder %s2066_s19, 1  ;;  %s2066_s19 = sphi %s2136_s19, %s21_s19   ;;  %s2062_s18 = sphi %s2134_s18, %s2587_s18   ;;  %s2058_s17 = sphi %s2132_s17, %s2586_s17  }
   0x3   : > { %p35_p1 = scmp.ge.s32.totalorder %s33_s20, 2  ;;  %p377_p2 = scmp.lt.s32.totalorder %s2066_s19, 3 }
   0x5   : > { %s2589_s20 = smov (%p35_p1, %s33_s20), 0  ;;  %p378_p3 = pnand %p1700_p0, %p377_p2 }
   0x6   : > { %p435_p4 = scmp.lt.s32.totalorder (!%p378_p3), %s2058_s17, 1  ;;  %v2068_v0 = vmov (!%p378_p3), 2   ;;  %v2069_v1 = vmov (!%p378_p3), 1   ;;  %v2070_v4 = vmov (!%p378_p3), 0   ;;  %v1980_v10 = vld [vmem:[%s2576_s4] sm:$0xff] (!%p378_p3)   ;;  %v513_v13 = vlaneseq (!%p378_p3)  ;;  %s2071_s25 = smov (!%p378_p3), 64  }
   0x7   : > { %381 = sbr.rel (%p378_p3) target bundleno = 1871 (0x74f), region = 64  ;;  %1951 = vset.pattern.permute.xlu0 (!%p378_p3), %v2068_v0  ;;  %1947 = vset.pattern.permute.xlu1 (!%p378_p3), %v2069_v1  ;;  %v1981_v12 = vld [vmem:[%s2577_s5] sm:$0xff] (!%p378_p3)   ;;  %vm649_vm0 = vcmask (!%p378_p3), 130048   ;;  %vm770_vm1 = vcmask (!%p378_p3), 392192   ;;  %vm891_vm2 = vcmask (!%p378_p3), 523264   ;;  %vm1095_vm6 = vcmask (!%p378_p3), 64512  }
   0x8   : > { %1836 = vmatprep.subr.bf16.mxu0 (!%p378_p3), %v1980_v10  ;;  %1846 = vmatprep.subr.bf16.mxu1 (!%p378_p3), %v1981_v12  ;;  %v514_v16 = vshrl.u32 (!%p378_p3), %v513_v13, 7  ;;  %v472_v22 = vld [vmem:[%s2575_s3] sm:$0x7] (!%p378_p3)  ;;  %vm1316_vm8 = vcmask (!%p378_p3), 1043456  }
   0x9   : > { %1837 = vmatpush3.bf16.msra.mxu0 (!%p378_p3), %v1980_v10  ;;  %1847 = vmatpush3.bf16.msra.mxu1 (!%p378_p3), %v1981_v12 }
   0xa   : > { %v515_v19 = vsub.s32 (!%p378_p3), 0, %v514_v16  ;;  %v559_v20 = vsub.s32 (!%p378_p3), 1, %v514_v16  ;;  %v611_v21 = vsub.s32 (!%p378_p3), 2, %v514_v16 }
   0xc   : > { %v516_v25 = vrot.slane (!%p378_p3), %v472_v22, %v515_v19  ;;  %v560_v26 = vrot.slane (!%p378_p3), %v472_v22, %v559_v20  ;;  %v2176_v27 = vrot.slane (!%p378_p3), %v472_v22, %v611_v21 }
   0xe   : > { %s2591_s17 = smov (!%p435_p4, %s2058_s17), 1 }
   0xf   : > { %s1761_s21 = sshll.u32 %s2591_s17, 6  ;;  %s1762_s28 = sshll.u32 %s2591_s17, 5 }
  0x10   : > { %s2156_s24 = scalar_lea.vmem %s2572_s0, %s1761_s21  ;;  %s2214_s12 = scalar_lea.vmem %s2573_s1, %s1762_s28 }
  0x11   : > { %v465_v2 = vld [vmem:[%s2156_s24 + $0x8] sm:$0xff]  ;;  %v464_v3 = vld [vmem:[%s2156_s24] sm:$0xff]  ;;  %v467_v5 = vld [vmem:[%s2156_s24 + $0x18] sm:$0xff]  ;;  %s1705_s21 = sshll.u32 %s2591_s17, 2 }
  0x12   : > { %582 = vperm.xlu0 %1951, %v465_v2   ;;  %526 = vperm.xlu1 %1947, %v464_v3   ;;  %v466_v6 = vld [vmem:[%s2156_s24 + $0x10] sm:$0xff]  ;;  %v468_v7 = vld [vmem:[%s2156_s24 + $0x20] sm:$0xff]  ;;  %v469_v8 = vld [vmem:[%s2156_s24 + $0x28] sm:$0xff] }
  0x13   : > { %v470_v9 = vld [vmem:[%s2156_s24 + $0x30] sm:$0xff]  ;;  %v471_v11 = vld [vmem:[%s2156_s24 + $0x38] sm:$0xff]  ;;  %s452_s24 = scalar_lea.vmem %s2574_s2, %s1705_s21 }
  0x16   : > { %1952 = vset.pattern.permute.xlu0 %v2070_v4  ;;  %530 = vperm.xlu1 %1947, %v465_v2  }
  0x17   : > { %475 = vperm.xlu0 %1952, %v464_v3  }
  0x1a   : > { %1948 = vset.pattern.permute.xlu1 %v2070_v4 }
  0x1b   : > { %480 = vperm.xlu0 %1952, %v465_v2   ;;  %490 = vperm.xlu1 %1948, %v467_v5  }
  0x1f   : > { %485 = vperm.xlu0 %1952, %v466_v6   ;;  %1949 = vset.pattern.permute.xlu1 %v2069_v1 }
  0x20   : > { %538 = vperm.xlu1 %1949, %v467_v5  }
  0x23   : > { %495 = vperm.xlu0 %1952, %v468_v7  }
  0x24   : > { %1950 = vset.pattern.permute.xlu1 %v2068_v0 }
  0x25   : > { %578 = vperm.xlu1 %1950, %v464_v3  }
  0x27   : > { %1953 = vset.pattern.permute.xlu0 %v2069_v1 }
  0x28   : > { %534 = vperm.xlu0 %1953, %v466_v6  }
  0x29   : > { %586 = vperm.xlu1 %1950, %v466_v6  }
  0x2c   : > { %546 = vperm.xlu0 %1953, %v469_v8  }
  0x2d   : > { %590 = vperm.xlu1 %1950, %v467_v5  }
  0x30   : > { %550 = vperm.xlu0 %1953, %v470_v9  }
  0x31   : > { %1954 = vset.pattern.permute.xlu1 %v2070_v4 }
  0x32   : > { %500 = vperm.xlu1 %1954, %v469_v8  }
  0x34   : > { %1958 = vset.pattern.permute.xlu0 %v2068_v0 }
  0x35   : > { %594 = vperm.xlu0 %1958, %v468_v7  }
  0x36   : > { %1955 = vset.pattern.permute.xlu1 %v2069_v1 }
  0x37   : > { %542 = vperm.xlu1 %1955, %v468_v7  }
  0x39   : > { %606 = vperm.xlu0 %1958, %v471_v11  }
  0x3b   : > { %1956 = vset.pattern.permute.xlu1 %v2070_v4 }
  0x3c   : > { %505 = vperm.xlu1 %1956, %v470_v9  }
  0x40   : > { %510 = vperm.xlu1 %1956, %v471_v11  }
  0x44   : > { %1957 = vset.pattern.permute.xlu1 %v2069_v1 }
  0x45   : > { %554 = vperm.xlu1 %1957, %v471_v11  }
  0x49   : > { %1959 = vset.pattern.permute.xlu1 %v2068_v0 }
  0x4a   : > { %598 = vperm.xlu1 %1959, %v469_v8  }
  0x4e   : > { %602 = vperm.xlu1 %1959, %v470_v9  }
  0x91   : > { %v527_v14 = vpop.permute.xlu1 %526  ;;  %v583_v15 = vpop.permute.xlu0 %582 }
  0x92   : > { %v614_v32 = vmul.f32 %v2176_v27, %v583_v15  ;;  %v561_v36 = vmul.f32 %v560_v26, %v527_v14 }
  0x95   : > { %v531_v17 = vpop.permute.xlu1 %530 }
  0x96   : > { %v476_v18 = vpop.permute.xlu0 %475  ;;  %v562_v30 = vmul.f32 %v560_v26, %v531_v17 }
  0x97   : > { %v517_v33 = vmul.f32 %v516_v25, %v476_v18 }
  0x99   : > { %v569_v38 = vadd.f32 %v561_v36, %v517_v33  ;;  %v1982_v36 = vld [vmem:[%s2577_s5 + $0x8] sm:$0xff]  }
  0x9a   : > { %v481_v23 = vpop.permute.xlu0 %480  ;;  %v491_v24 = vpop.permute.xlu1 %490  ;;  %1848 = vmatprep.subr.bf16.mxu1 %v1982_v36 }
  0x9b   : > { %v518_v28 = vmul.f32 %v516_v25, %v481_v23  ;;  %v520_v51 = vmul.f32 %v516_v25, %v491_v24  ;;  %1849 = vmatpush3.bf16.msra.mxu1 %v1982_v36 }
  0x9d   : > { %v570_v34 = vadd.f32 %v562_v30, %v518_v28 }
  0x9e   : > { %v486_v29 = vpop.permute.xlu0 %485 }
  0x9f   : > { %v539_v31 = vpop.permute.xlu1 %538  ;;  %v622_v40 = vadd.f32 %v614_v32, %v570_v34  ;;  %v519_v41 = vmul.f32 %v516_v25, %v486_v29 }
  0xa0   : > { %v564_v46 = vmul.f32 %v560_v26, %v539_v31 }
  0xa1   : > { %v630_v49 = vmax.f32 %v622_v40, 0.0 }
  0xa2   : > { %v496_v35 = vpop.permute.xlu0 %495  ;;  %v572_v54 = vadd.f32 %v564_v46, %v520_v51 }
  0xa3   : > { %v521_v5 = vmul.f32 %v516_v25, %v496_v35 }
  0xa4   : > { %v579_v37 = vpop.permute.xlu1 %578 }
  0xa5   : > { %v613_v39 = vmul.f32 %v2176_v27, %v579_v37  ;;  %v1983_v37 = vld [vmem:[%s2577_s5 + $0x10] sm:$0xff]  }
  0xa6   : > { %1850 = vmatprep.subr.bf16.mxu1 %v1983_v37 }
  0xa7   : > { %v621_v42 = vadd.f32 %v613_v39, %v569_v38  ;;  %v535_v43 = vpop.permute.xlu0 %534  ;;  %1851 = vmatpush3.bf16.msra.mxu1 %v1983_v37  ;;  %v1985_v38 = vld [vmem:[%s2579_s7 + $0x8] sm:$0xff]  }
  0xa8   : > { %v563_v44 = vmul.f32 %v560_v26, %v535_v43  ;;  %v587_v45 = vpop.permute.xlu1 %586 }
  0xa9   : > { %v629_v47 = vmax.f32 %v621_v42, 0.0  ;;  %v615_v48 = vmul.f32 %v2176_v27, %v587_v45 }
  0xaa   : > { %v571_v50 = vadd.f32 %v563_v44, %v519_v41 }
  0xab   : > { %v637_v52 = vpack.c.bf16 %v630_v49, %v629_v47  ;;  %v547_v62 = vpop.permute.xlu0 %546 }
  0xac   : > { %v591_v53 = vpop.permute.xlu1 %590  ;;  %v623_v55 = vadd.f32 %v615_v48, %v571_v50  ;;  %v566_v7 = vmul.f32 %v560_v26, %v547_v62  ;;  %v1989_v62 = vld [vmem:[%s2214_s12 + $0x8] sm:$0xff]  }
  0xad   : > { %v616_v56 = vmul.f32 %v2176_v27, %v591_v53  ;;  %1838 = vmatprep.mubr.msk.bf16.mxu0 %vm649_vm0, %v637_v52 }
  0xae   : > { %v631_v58 = vmax.f32 %v623_v55, 0.0 }
  0xaf   : > { %v624_v57 = vadd.f32 %v616_v56, %v572_v54  ;;  %v551_v1 = vpop.permute.xlu0 %550 }
  0xb0   : > { %v567_v16 = vmul.f32 %v560_v26, %v551_v1 }
  0xb1   : > { %v632_v59 = vmax.f32 %v624_v57, 0.0  ;;  %v501_v60 = vpop.permute.xlu1 %500 }
  0xb2   : > { %v522_v8 = vmul.f32 %v516_v25, %v501_v60  ;;  %v1987_v60 = vld [vmem:[%s2579_s7 + $0x18] sm:$0xff]  }
  0xb3   : > { %v638_v61 = vpack.c.bf16 %v632_v59, %v631_v58  ;;  %v1986_v59 = vld [vmem:[%s2579_s7 + $0x10] sm:$0xff]  }
  0xb4   : > { %v595_v4 = vpop.permute.xlu0 %594  ;;  %v574_v15 = vadd.f32 %v566_v7, %v522_v8 }
  0xb5   : > { %1839 = vmatmul.mubr.msk.bf16.vlgmr.msra.gmra.mrb[0].mxu0 %vm649_vm0, %v638_v61  ;;  %v617_v10 = vmul.f32 %v2176_v27, %v595_v4  ;;  %v1988_v61 = vld [vmem:[%s2214_s12] sm:$0xff]  }
  0xb6   : > { %v543_v63 = vpop.permute.xlu1 %542  ;;  %1876 = vmatprep.subr.bf16.mxu1 %v1988_v61 }
  0xb7   : > { %v565_v3 = vmul.f32 %v560_v26, %v543_v63 }
  0xb8   : > { %v607_v12 = vpop.permute.xlu0 %606 }
  0xb9   : > { %v573_v9 = vadd.f32 %v565_v3, %v521_v5  ;;  %v620_v21 = vmul.f32 %v2176_v27, %v607_v12 }
  0xbb   : > { %v506_v0 = vpop.permute.xlu1 %505  ;;  %v625_v17 = vadd.f32 %v617_v10, %v573_v9 }
  0xbc   : > { %v523_v19 = vmul.f32 %v516_v25, %v506_v0  ;;  %v1713_v0 = vld [vmem:[%s2578_s6] ss:$0 sm:$0xff] }
  0xbd   : > { %v633_v24 = vmax.f32 %v625_v17, 0.0 }
  0xbe   : > { %v575_v29 = vadd.f32 %v567_v16, %v523_v19 }
  0xbf   : > { %v511_v2 = vpop.permute.xlu1 %510 }
  0xc0   : > { %v524_v14 = vmul.f32 %v516_v25, %v511_v2 }
  0xc4   : > { %v555_v6 = vpop.permute.xlu1 %554 }
  0xc5   : > { %v568_v11 = vmul.f32 %v560_v26, %v555_v6 }
  0xc7   : > { %v576_v20 = vadd.f32 %v568_v11, %v524_v14 }
  0xc9   : > { %v599_v18 = vpop.permute.xlu1 %598  ;;  %v628_v30 = vadd.f32 %v620_v21, %v576_v20 }
  0xca   : > { %v618_v22 = vmul.f32 %v2176_v27, %v599_v18 }
  0xcb   : > { %v636_v35 = vmax.f32 %v628_v30, 0.0 }
  0xcc   : > { %v626_v23 = vadd.f32 %v618_v22, %v574_v15 }
  0xcd   : > { %v603_v28 = vpop.permute.xlu1 %602 }
  0xce   : > { %v634_v31 = vmax.f32 %v626_v23, 0.0  ;;  %v619_v32 = vmul.f32 %v2176_v27, %v603_v28  ;;  %v1984_v27 = vld [vmem:[%s2579_s7] sm:$0xff]   ;;  %v1990_v28 = vld [vmem:[%s2214_s12 + $0x10] sm:$0xff]  }
  0xcf   : > { %1860 = vmatprep.subr.bf16.mxu0 %v1984_v27 }
  0xd0   : > { %v639_v33 = vpack.c.bf16 %v634_v31, %v633_v24  ;;  %v627_v34 = vadd.f32 %v619_v32, %v575_v29  ;;  %1861 = vmatpush3.bf16.msra.mxu0 %v1984_v27  ;;  %v1991_v29 = vld [vmem:[%s2214_s12 + $0x18] sm:$0xff]   ;;  %v1721_v31 = vld [vmem:[%s2580_s8] ss:$0 sm:$0xff] }
  0xd1   : > { %1862 = vmatprep.subr.bf16.mxu0 %v1985_v38 }
  0xd2   : > { %v635_v26 = vmax.f32 %v627_v34, 0.0  ;;  %1842 = vmatprep.mubr.msk.bf16.mxu0 %vm649_vm0, %v639_v33 }
  0xd4   : > { %v640_v25 = vpack.c.bf16 %v636_v35, %v635_v26  ;;  %1863 = vmatpush3.bf16.msra.mxu0 %v1985_v38 }
  0xd5   : > { %1864 = vmatprep.subr.bf16.mxu0 %v1986_v59 }
  0xd6   : > { %1843 = vmatmul.mubr.msk.bf16.gmra.mrb[4].mxu0 %vm649_vm0, %v640_v25 }
  0xd8   : > { %1865 = vmatpush3.bf16.msra.mxu0 %v1986_v59 }
  0xd9   : > { %1866 = vmatprep.subr.bf16.mxu0 %v1987_v60 }
  0xdc   : > { %1867 = vmatpush3.bf16.msra.mxu0 %v1987_v60 }
 0x188   : > { %v1840_v39 = vpop.f32.mrb[0].mxu0 }
 0x189   : > { %v696_v40 = vpop.f32.mrb[1].mxu0  ;;  %v729_v42 = vmax.f32 %v1840_v39, 0.0 }
 0x18a   : > { %v1841_v41 = vpop.f32.mrb[2].mxu0  ;;  %v727_v45 = vmax.f32 %v696_v40, 0.0 }
 0x18b   : > { %v730_v43 = vmax.f32 %v1841_v41, 0.0  ;;  %v699_v44 = vpop.f32.mrb[3].mxu0 }
 0x18c   : > { %v728_v46 = vmax.f32 %v699_v44, 0.0 }
 0x18d   : > { %v736_v47 = vpack.c.bf16 %v730_v43, %v729_v42 }
 0x18e   : > { %v735_v48 = vpack.c.bf16 %v728_v46, %v727_v45 }
 0x190   : > { %1852 = vmatprep.mubr.msk.bf16.mxu1 %vm770_vm1, %v735_v48  ;;  %v2267_v48 = vand.u32 127, %v513_v13 }
 0x191   : > { %1853 = vmatmul.mubr.msk.bf16.vlgmr.msra.gmra.mrb[0].mxu1 %vm770_vm1, %v736_v47 }
 0x192   : > { %1877 = vmatpush3.bf16.msra.mxu1 %v1988_v61  ;;  %vm1128_vm3 = vcmp.ge.s32.totalorder %v2267_v48, 4  ;;  %vm1129_vm4 = vcmp.lt.s32.totalorder %v2267_v48, 8  ;;  %vm1085_vm5 = vcmp.lt.s32.totalorder %v2267_v48, 4 }
 0x193   : > { %1878 = vmatprep.subr.bf16.mxu1 %v1989_v62  ;;  %vm2272_vm7 = vmand %vm1128_vm3, %vm1129_vm4 }
 0x196   : > { %1879 = vmatpush3.bf16.msra.mxu1 %v1989_v62 }
 0x197   : > { %1880 = vmatprep.subr.bf16.mxu1 %v1990_v28 }
 0x19a   : > { %1881 = vmatpush3.bf16.msra.mxu1 %v1990_v28 }
 0x19b   : > { %1882 = vmatprep.subr.bf16.mxu1 %v1991_v29 }
 0x19e   : > { %1883 = vmatpush3.bf16.msra.mxu1 %v1991_v29 }
 0x1a9   : > { %v1844_v49 = vpop.f32.mrb[4].mxu0 }
 0x1aa   : > { %v712_v50 = vpop.f32.mrb[5].mxu0  ;;  %v733_v52 = vmax.f32 %v1844_v49, 0.0 }
 0x1ab   : > { %v1845_v51 = vpop.f32.mrb[6].mxu0  ;;  %v731_v55 = vmax.f32 %v712_v50, 0.0 }
 0x1ac   : > { %v734_v53 = vmax.f32 %v1845_v51, 0.0  ;;  %v715_v54 = vpop.f32.mrb[7].mxu0 }
 0x1ad   : > { %v732_v56 = vmax.f32 %v715_v54, 0.0 }
 0x1ae   : > { %v738_v57 = vpack.c.bf16 %v734_v53, %v733_v52 }
 0x1af   : > { %v737_v58 = vpack.c.bf16 %v732_v56, %v731_v55 }
 0x1b1   : > { %1856 = vmatprep.mubr.msk.bf16.mxu1 %vm770_vm1, %v737_v58 }
 0x1b2   : > { %1857 = vmatmul.mubr.msk.bf16.gmra.mrb[4].mxu1 %vm770_vm1, %v738_v57 }
 0x264   : > { %v1854_v63 = vpop.f32.mrb[0].mxu1 }
 0x265   : > { %v817_v1 = vpop.f32.mrb[1].mxu1  ;;  %v2221_v3 = vadd.f32 %v1854_v63, %v1713_v0 }
 0x266   : > { %v1855_v2 = vpop.f32.mrb[2].mxu1  ;;  %v2225_v6 = vadd.f32 %v1713_v0, %v817_v1 }
 0x267   : > { %v2223_v4 = vadd.f32 %v1855_v2, %v1713_v0  ;;  %v820_v5 = vpop.f32.mrb[3].mxu1 }
 0x268   : > { %v2227_v7 = vadd.f32 %v1713_v0, %v820_v5 }
 0x269   : > { %v1965_v8 = vpack.i.bf16 %v2223_v4, %v2221_v3  ;;  %v849_v9 = vpack.c.bf16 %v2223_v4, %v2221_v3  ;;  %v1993_v3 = vld [vmem:[%s2581_s9 + $0x8] sm:$0xff]   ;;  %v1994_v4 = vld [vmem:[%s2581_s9 + $0x10] sm:$0xff]  }
 0x26a   : > { %v1960_v10 = vpack.i.bf16 %v2227_v7, %v2225_v6  ;;  %v848_v11 = vpack.c.bf16 %v2227_v7, %v2225_v6 }
 0x26c   : > { %1868 = vmatprep.mubr.msk.bf16.mxu0 %vm891_vm2, %v848_v11 }
 0x26d   : > { %1869 = vmatmul.mubr.msk.bf16.vlgmr.msra.gmra.mrb[8].mxu0 %vm891_vm2, %v849_v9 }
 0x285   : > { %v1858_v12 = vpop.f32.mrb[4].mxu1 }
 0x286   : > { %v833_v14 = vpop.f32.mrb[5].mxu1  ;;  %v2239_v16 = vadd.f32 %v1858_v12, %v1713_v0 }
 0x287   : > { %v1859_v15 = vpop.f32.mrb[6].mxu1  ;;  %v2243_v19 = vadd.f32 %v1713_v0, %v833_v14 }
 0x288   : > { %v2241_v17 = vadd.f32 %v1859_v15, %v1713_v0  ;;  %v836_v18 = vpop.f32.mrb[7].mxu1 }
 0x289   : > { %v2245_v20 = vadd.f32 %v1713_v0, %v836_v18 }
 0x28a   : > { %v1975_v21 = vpack.i.bf16 %v2241_v17, %v2239_v16  ;;  %v851_v22 = vpack.c.bf16 %v2241_v17, %v2239_v16 }
 0x28b   : > { %v1970_v23 = vpack.i.bf16 %v2245_v20, %v2243_v19  ;;  %v850_v24 = vpack.c.bf16 %v2245_v20, %v2243_v19 }
 0x28d   : > { %1872 = vmatprep.mubr.msk.bf16.mxu0 %vm891_vm2, %v850_v24 }
 0x28e   : > { %1873 = vmatmul.mubr.msk.bf16.gmra.mrb[12].mxu0 %vm891_vm2, %v851_v22 }
 0x340   : > { %v1870_v30 = vpop.f32.mrb[8].mxu0 }
 0x341   : > { %v938_v32 = vpop.f32.mrb[9].mxu0  ;;  %v947_v34 = vadd.f32 %v1870_v30, %v1721_v31 }
 0x342   : > { %v1871_v33 = vpop.f32.mrb[10].mxu0  ;;  %v939_v25 = vadd.f32 %v1721_v31, %v938_v32 }
 0x343   : > { %v950_v35 = vadd.f32 %v1871_v33, %v1721_v31  ;;  %v941_v26 = vpop.f32.mrb[11].mxu0 }
 0x344   : > { %v942_v36 = vadd.f32 %v1721_v31, %v941_v26 }
 0x345   : > { %v970_v37 = vpack.c.bf16 %v950_v35, %v947_v34 }
 0x346   : > { %v969_v27 = vpack.c.bf16 %v942_v36, %v939_v25 }
 0x348   : > { %1884 = vmatprep.mubr.msk.bf16.mxu1 %vm891_vm2, %v969_v27 }
 0x349   : > { %1885 = vmatmul.mubr.msk.bf16.vlgmr.msra.gmra.mrb[8].mxu1 %vm891_vm2, %v970_v37 }
 0x361   : > { %v1874_v38 = vpop.f32.mrb[12].mxu0 }
 0x362   : > { %v954_v39 = vpop.f32.mrb[13].mxu0  ;;  %v963_v41 = vadd.f32 %v1874_v38, %v1721_v31 }
 0x363   : > { %v1875_v40 = vpop.f32.mrb[14].mxu0  ;;  %v955_v44 = vadd.f32 %v1721_v31, %v954_v39 }
 0x364   : > { %v966_v42 = vadd.f32 %v1875_v40, %v1721_v31  ;;  %v957_v43 = vpop.f32.mrb[15].mxu0 }
 0x365   : > { %v958_v45 = vadd.f32 %v1721_v31, %v957_v43 }
 0x366   : > { %v972_v46 = vpack.c.bf16 %v966_v42, %v963_v41 }
 0x367   : > { %v971_v47 = vpack.c.bf16 %v958_v45, %v955_v44 }
 0x369   : > { %1888 = vmatprep.mubr.msk.bf16.mxu1 %vm891_vm2, %v971_v47 }
 0x36a   : > { %1889 = vmatmul.mubr.msk.bf16.gmra.mrb[12].mxu1 %vm891_vm2, %v972_v46 }
 0x41c   : > { %v1886_v50 = vpop.f32.mrb[8].mxu1 }
 0x41d   : > { %v2276_v51 = vpop.f32.mrb[9].mxu1  ;;  %v1089_v52 = vsel %vm1085_vm5, %v1886_v50, -1e+30  ;;  %v1133_v57 = vsel %vm2272_vm7, %v1886_v50, -1e+30 }
 0x41e   : > { %v2280_v53 = vpop.f32.mrb[10].mxu1  ;;  %v1102_v13 = vsel %vm1095_vm6, %v1089_v52, -inf  ;;  %v1087_v54 = vsel %vm1085_vm5, %v2276_v51, -1e+30  ;;  %v1145_v59 = vsel %vm1095_vm6, %v1133_v57, -inf }
 0x41f   : > { %1103 = vmax.xlane.f32.xlu0 %v1102_v13  ;;  %v2286_v55 = vpop.f32.mrb[11].mxu1  ;;  %v1096_v56 = vsel %vm1095_vm6, %v1087_v54, -inf  ;;  %v1090_v58 = vsel %vm1085_vm5, %v2280_v53, -1e+30  ;;  %v1131_v61 = vsel %vm2272_vm7, %v2276_v51, -1e+30 }
 0x420   : > { %1097 = vmax.xlane.f32.xlu1 %v1096_v56  ;;  %v1105_v60 = vsel %vm1095_vm6, %v1090_v58, -inf  ;;  %v1134_v62 = vsel %vm2272_vm7, %v2280_v53, -1e+30  ;;  %v1139_v63 = vsel %vm1095_vm6, %v1131_v61, -inf  ;;  %v1088_v1 = vsel %vm1085_vm5, %v2286_v55, -1e+30 }
 0x421   : > { %v1148_v0 = vsel %vm1095_vm6, %v1134_v62, -inf  ;;  %v1132_v2 = vsel %vm2272_vm7, %v2286_v55, -1e+30  ;;  %v1099_v5 = vsel %vm1095_vm6, %v1088_v1, -inf }
 0x422   : > { %v1142_v9 = vsel %vm1095_vm6, %v1132_v2, -inf }
 0x423   : > { %1146 = vmax.xlane.f32.xlu0 %v1145_v59 }
 0x424   : > { %1106 = vmax.xlane.f32.xlu1 %v1105_v60 }
 0x427   : > { %1140 = vmax.xlane.f32.xlu0 %v1139_v63 }
 0x428   : > { %1149 = vmax.xlane.f32.xlu1 %v1148_v0 }
 0x42b   : > { %1100 = vmax.xlane.f32.xlu0 %v1099_v5 }
 0x42c   : > { %1143 = vmax.xlane.f32.xlu1 %v1142_v9 }
 0x43d   : > { %v2312_v11 = vpop.f32.mrb[12].mxu1 }
 0x43e   : > { %v2314_v12 = vpop.f32.mrb[13].mxu1  ;;  %v1093_v14 = vsel %vm1085_vm5, %v2312_v11, -1e+30  ;;  %v1137_v26 = vsel %vm2272_vm7, %v2312_v11, -1e+30 }
 0x43f   : > { %v2319_v15 = vpop.f32.mrb[14].mxu1  ;;  %v1114_v18 = vsel %vm1095_vm6, %v1093_v14, -inf  ;;  %v1091_v28 = vsel %vm1085_vm5, %v2314_v12, -1e+30  ;;  %v1135_v32 = vsel %vm2272_vm7, %v2314_v12, -1e+30 }
 0x440   : > { %1115 = vmax.xlane.f32.xlu0 %v1114_v18  ;;  %v2322_v22 = vpop.f32.mrb[15].mxu1  ;;  %v1094_v24 = vsel %vm1085_vm5, %v2319_v15, -1e+30  ;;  %v1108_v31 = vsel %vm1095_vm6, %v1091_v28, -inf  ;;  %v1151_v35 = vsel %vm1095_vm6, %v1135_v32, -inf  ;;  %v1157_v37 = vsel %vm1095_vm6, %v1137_v26, -inf }
 0x441   : > { %v1117_v29 = vsel %vm1095_vm6, %v1094_v24, -inf  ;;  %v1092_v30 = vsel %vm1085_vm5, %v2322_v22, -1e+30  ;;  %v1136_v34 = vsel %vm2272_vm7, %v2322_v22, -1e+30 }
 0x442   : > { %1118 = vmax.xlane.f32.xlu1 %v1117_v29  ;;  %v1111_v33 = vsel %vm1095_vm6, %v1092_v30, -inf  ;;  %v1154_v25 = vsel %vm1095_vm6, %v1136_v34, -inf  ;;  %v1138_v36 = vsel %vm2272_vm7, %v2319_v15, -1e+30 }
 0x443   : > { %v1160_v27 = vsel %vm1095_vm6, %v1138_v36, -inf }
 0x444   : > { %1109 = vmax.xlane.f32.xlu0 %v1108_v31 }
 0x446   : > { %1112 = vmax.xlane.f32.xlu1 %v1111_v33 }
 0x448   : > { %1152 = vmax.xlane.f32.xlu0 %v1151_v35 }
 0x44a   : > { %1155 = vmax.xlane.f32.xlu1 %v1154_v25 }
 0x44c   : > { %1158 = vmax.xlane.f32.xlu0 %v1157_v37 }
 0x44e   : > { %1161 = vmax.xlane.f32.xlu1 %v1160_v27 }
 0x4ac   : > { %v1104_v38 = vpop.xlane.xlu0 %1103 }
 0x4ad   : > { %v1098_v39 = vpop.xlane.xlu1 %1097  ;;  %v1122_v40 = vsel %vm1085_vm5, %v1104_v38, -1e+30 }
 0x4ae   : > { %v1120_v45 = vsel %vm1085_vm5, %v1098_v39, -1e+30 }
 0x4b0   : > { %v1147_v41 = vpop.xlane.xlu0 %1146 }
 0x4b1   : > { %v1165_v42 = vsel %vm2272_vm7, %v1147_v41, %v1122_v40  ;;  %v1107_v43 = vpop.xlane.xlu1 %1106 }
 0x4b2   : > { %v1173_v44 = vsub.f32 %v1886_v50, %v1165_v42  ;;  %v1123_v52 = vsel %vm1085_vm5, %v1107_v43, -1e+30 }
 0x4b4   : > { %v1183_v46 = vmul.f32 1.442695, %v1173_v44  ;;  %v1141_v47 = vpop.xlane.xlu0 %1140 }
 0x4b5   : > { %v1163_v13 = vsel %vm2272_vm7, %v1141_v47, %v1120_v45  ;;  %v1150_v54 = vpop.xlane.xlu1 %1149 }
 0x4b6   : > { %1996 = vpow2.f32 %v1183_v46  ;;  %v1171_v56 = vsub.f32 %v2276_v51, %v1163_v13  ;;  %v1166_v57 = vsel %vm2272_vm7, %v1150_v54, %v1123_v52 }
 0x4b7   : > { %v1174_v50 = vsub.f32 %v2280_v53, %v1166_v57 }
 0x4b8   : > { %v1179_v58 = vmul.f32 1.442695, %v1171_v56  ;;  %v1101_v59 = vpop.xlane.xlu0 %1100 }
 0x4b9   : > { %v1185_v60 = vmul.f32 1.442695, %v1174_v50  ;;  %v1121_v61 = vsel %vm1085_vm5, %v1101_v59, -1e+30  ;;  %v1144_v62 = vpop.xlane.xlu1 %1143 }
 0x4ba   : > { %1998 = vpow2.f32 %v1179_v58  ;;  %v1164_v63 = vsel %vm2272_vm7, %v1144_v62, %v1121_v61 }
 0x4bb   : > { %2000 = vpow2.f32 %v1185_v60  ;;  %v1172_v0 = vsub.f32 %v2286_v55, %v1164_v63 }
 0x4bd   : > { %v1181_v51 = vmul.f32 1.442695, %v1172_v0 }
 0x4bf   : > { %2002 = vpow2.f32 %v1181_v51 }
 0x4c0   : > { %v2371_v1 = vpop.eup %1996 }
 0x4c1   : > { %v1197_v53 = vsel %vm1085_vm5, %v2371_v1, 0.0  ;;  %v1245_v5 = vsel %vm2272_vm7, %v2371_v1, 0.0 }
 0x4c2   : > { %v1209_v2 = vsel %vm1095_vm6, %v1197_v53, 0.0  ;;  %v1257_v55 = vsel %vm1095_vm6, %v1245_v5, 0.0  ;;  %v1303_v53 = vld [vmem:[%s452_s24] sm:$0xf]  ;;  %s461_s24 = scalar_lea.vmem %s2583_s11, %s1762_s28 }
 0x4c3   : > { %1210 = vadd.xlane.f32.xlu0 %v1209_v2  ;;  %1918 = vmatprep.subr.msk.bf16.mxu0 %vm1316_vm8, %v1303_v53 }
 0x4c4   : > { %v2380_v9 = vpop.eup %1998 }
 0x4c5   : > { %v2382_v14 = vpop.eup %2000  ;;  %v1195_v28 = vsel %vm1085_vm5, %v2380_v9, 0.0  ;;  %v1243_v33 = vsel %vm2272_vm7, %v2380_v9, 0.0 }
 0x4c6   : > { %v1198_v18 = vsel %vm1085_vm5, %v2382_v14, 0.0  ;;  %v1246_v29 = vsel %vm2272_vm7, %v2382_v14, 0.0  ;;  %v1203_v31 = vsel %vm1095_vm6, %v1195_v28, 0.0  ;;  %v1251_v26 = vsel %vm1095_vm6, %v1243_v33, 0.0 }
 0x4c7   : > { %1258 = vadd.xlane.f32.xlu0 %v1257_v55  ;;  %v1212_v24 = vsel %vm1095_vm6, %v1198_v18, 0.0  ;;  %v1260_v32 = vsel %vm1095_vm6, %v1246_v29, 0.0  ;;  %v1318_v55 = vsel %vm1316_vm8, %v1303_v53, 0 }
 0x4c8   : > { %1213 = vadd.xlane.f32.xlu1 %v1212_v24  ;;  %1893 = vmatpush3.bf16.msra.mxu0 %v1318_v55 }
 0x4c9   : > { %v2395_v30 = vpop.eup %2002 }
 0x4ca   : > { %v1196_v34 = vsel %vm1085_vm5, %v2395_v30, 0.0  ;;  %v1244_v37 = vsel %vm2272_vm7, %v2395_v30, 0.0 }
 0x4cb   : > { %1204 = vadd.xlane.f32.xlu0 %v1203_v31  ;;  %v1206_v36 = vsel %vm1095_vm6, %v1196_v34, 0.0  ;;  %v1254_v39 = vsel %vm1095_vm6, %v1244_v37, 0.0  ;;  %v1992_v37 = vld [vmem:[%s2581_s9] sm:$0xff]  }
 0x4cc   : > { %1261 = vadd.xlane.f32.xlu1 %v1260_v32  ;;  %1902 = vmatprep.subr.bf16.mxu1 %v1992_v37 }
 0x4cd   : > { %v1116_v35 = vpop.xlane.xlu0 %1115  ;;  %1903 = vmatpush3.bf16.msra.mxu1 %v1992_v37 }
 0x4ce   : > { %v1126_v47 = vsel %vm1085_vm5, %v1116_v35, -1e+30  ;;  %1904 = vmatprep.subr.bf16.mxu1 %v1993_v3 }
 0x4cf   : > { %1252 = vadd.xlane.f32.xlu0 %v1251_v26  ;;  %v1119_v25 = vpop.xlane.xlu1 %1118 }
 0x4d0   : > { %1207 = vadd.xlane.f32.xlu1 %v1206_v36  ;;  %v1127_v57 = vsel %vm1085_vm5, %v1119_v25, -1e+30 }
 0x4d1   : > { %v1110_v27 = vpop.xlane.xlu0 %1109  ;;  %1905 = vmatpush3.bf16.msra.mxu1 %v1993_v3 }
 0x4d2   : > { %v1124_v40 = vsel %vm1085_vm5, %v1110_v27, -1e+30  ;;  %1906 = vmatprep.subr.bf16.mxu1 %v1994_v4 }
 0x4d3   : > { %v1113_v38 = vpop.xlane.xlu1 %1112 }
 0x4d4   : > { %1255 = vadd.xlane.f32.xlu1 %v1254_v39  ;;  %v1125_v43 = vsel %vm1085_vm5, %v1113_v38, -1e+30 }
 0x4d5   : > { %v1153_v41 = vpop.xlane.xlu0 %1152  ;;  %1907 = vmatpush3.bf16.msra.mxu1 %v1994_v4 }
 0x4d6   : > { %v1167_v42 = vsel %vm2272_vm7, %v1153_v41, %v1124_v40 }
 0x4d7   : > { %v1175_v44 = vsub.f32 %v2314_v12, %v1167_v42  ;;  %v1156_v45 = vpop.xlane.xlu1 %1155 }
 0x4d8   : > { %v1168_v46 = vsel %vm2272_vm7, %v1156_v45, %v1125_v43 }
 0x4d9   : > { %v1176_v52 = vsub.f32 %v2322_v22, %v1168_v46  ;;  %v1159_v13 = vpop.xlane.xlu0 %1158  ;;  %v1187_v54 = vmul.f32 1.442695, %v1175_v44 }
 0x4da   : > { %v1169_v56 = vsel %vm2272_vm7, %v1159_v13, %v1126_v47 }
 0x4db   : > { %v1177_v12 = vsub.f32 %v2312_v11, %v1169_v56  ;;  %v1162_v50 = vpop.xlane.xlu1 %1161  ;;  %v1189_v58 = vmul.f32 1.442695, %v1176_v52  ;;  %2004 = vpow2.f32 %v1187_v54 }
 0x4dc   : > { %v1170_v59 = vsel %vm2272_vm7, %v1162_v50, %v1127_v57 }
 0x4dd   : > { %v1191_v60 = vmul.f32 1.442695, %v1177_v12  ;;  %v1178_v61 = vsub.f32 %v2319_v15, %v1170_v59 }
 0x4df   : > { %2006 = vpow2.f32 %v1191_v60  ;;  %v1193_v22 = vmul.f32 1.442695, %v1178_v61 }
 0x4e0   : > { %2008 = vpow2.f32 %v1189_v58 }
 0x4e1   : > { %2010 = vpow2.f32 %v1193_v22 }
 0x4e5   : > { %v2431_v62 = vpop.eup %2004 }
 0x4e6   : > { %v1199_v5 = vsel %vm1085_vm5, %v2431_v62, 0.0  ;;  %v1247_v29 = vsel %vm2272_vm7, %v2431_v62, 0.0 }
 0x4e7   : > { %v1215_v28 = vsel %vm1095_vm6, %v1199_v5, 0.0  ;;  %v1263_v33 = vsel %vm1095_vm6, %v1247_v29, 0.0 }
 0x4e9   : > { %v2433_v63 = vpop.eup %2006 }
 0x4ea   : > { %v2436_v11 = vpop.eup %2008  ;;  %v1201_v0 = vsel %vm1085_vm5, %v2433_v63, 0.0  ;;  %v1249_v34 = vsel %vm2272_vm7, %v2433_v63, 0.0 }
 0x4eb   : > { %v2444_v15 = vpop.eup %2010  ;;  %v1221_v51 = vsel %vm1095_vm6, %v1201_v0, 0.0  ;;  %v1200_v24 = vsel %vm1085_vm5, %v2436_v11, 0.0  ;;  %v1248_v32 = vsel %vm2272_vm7, %v2436_v11, 0.0  ;;  %v1269_v25 = vsel %vm1095_vm6, %v1249_v34, 0.0 }
 0x4ec   : > { %1222 = vadd.xlane.f32.xlu0 %v1221_v51  ;;  %v1202_v2 = vsel %vm1085_vm5, %v2444_v15, 0.0  ;;  %v1218_v31 = vsel %vm1095_vm6, %v1200_v24, 0.0  ;;  %v1266_v35 = vsel %vm1095_vm6, %v1248_v32, 0.0  ;;  %v1250_v26 = vsel %vm2272_vm7, %v2444_v15, 0.0 }
 0x4ed   : > { %v1224_v18 = vsel %vm1095_vm6, %v1202_v2, 0.0  ;;  %v1272_v36 = vsel %vm1095_vm6, %v1250_v26, 0.0 }
 0x4ee   : > { %1225 = vadd.xlane.f32.xlu1 %v1224_v18 }
 0x4f0   : > { %1216 = vadd.xlane.f32.xlu0 %v1215_v28 }
 0x4f2   : > { %1219 = vadd.xlane.f32.xlu1 %v1218_v31 }
 0x4f4   : > { %1264 = vadd.xlane.f32.xlu0 %v1263_v33 }
 0x4f6   : > { %1267 = vadd.xlane.f32.xlu1 %v1266_v35 }
 0x4f8   : > { %1270 = vadd.xlane.f32.xlu0 %v1269_v25 }
 0x4fa   : > { %1273 = vadd.xlane.f32.xlu1 %v1272_v36 }
 0x50b   : > { %1966 = vrot.lane.b32.xlu1 %v1965_v8, %s2071_s25 }
 0x50e   : > { %1961 = vrot.lane.b32.xlu0 %v1960_v10, %s2071_s25 }
 0x50f   : > { %1971 = vrot.lane.b32.xlu1 %v1970_v23, %s2071_s25 }
 0x512   : > { %1976 = vrot.lane.b32.xlu0 %v1975_v21, %s2071_s25 }
 0x550   : > { %v1211_v6 = vpop.xlane.xlu0 %1210 }
 0x551   : > { %2012 = vrcp.f32 %v1211_v6 }
 0x554   : > { %v1259_v7 = vpop.xlane.xlu0 %1258 }
 0x555   : > { %v1214_v8 = vpop.xlane.xlu1 %1213  ;;  %2014 = vrcp.f32 %v1259_v7 }
 0x556   : > { %2016 = vrcp.f32 %v1214_v8 }
 0x558   : > { %v1205_v10 = vpop.xlane.xlu0 %1204 }
 0x559   : > { %v1262_v16 = vpop.xlane.xlu1 %1261  ;;  %2018 = vrcp.f32 %v1205_v10 }
 0x55a   : > { %2020 = vrcp.f32 %v1262_v16 }
 0x55b   : > { %v2013_v21 = vpop.eup %2012 }
 0x55c   : > { %v1253_v17 = vpop.xlane.xlu0 %1252  ;;  %v1237_v45 = vsel %vm1085_vm5, %v2013_v21, 0.0 }
 0x55d   : > { %v1208_v19 = vpop.xlane.xlu1 %1207  ;;  %2022 = vrcp.f32 %v1253_v17 }
 0x55e   : > { %2024 = vrcp.f32 %v1208_v19 }
 0x55f   : > { %v2015_v23 = vpop.eup %2014 }
 0x560   : > { %v2017_v27 = vpop.eup %2016  ;;  %v1285_v13 = vsel %vm2272_vm7, %v2015_v23, %v1237_v45  ;;  %v1742_v23 = vld [vmem:[%s2582_s10] ss:$0 sm:$0xff] }
 0x561   : > { %v1256_v20 = vpop.xlane.xlu1 %1255  ;;  %v1238_v42 = vsel %vm1085_vm5, %v2017_v27, 0.0  ;;  %v1293_v50 = vmul.f32 %v2371_v1, %v1285_v13 }
 0x562   : > { %2026 = vrcp.f32 %v1256_v20 }
 0x563   : > { %v2019_v38 = vpop.eup %2018 }
 0x564   : > { %v2021_v39 = vpop.eup %2020  ;;  %v1235_v43 = vsel %vm1085_vm5, %v2019_v38, 0.0 }
 0x565   : > { %v1286_v44 = vsel %vm2272_vm7, %v2021_v39, %v1238_v42 }
 0x566   : > { %v1294_v56 = vmul.f32 %v2382_v14, %v1286_v44 }
 0x567   : > { %v2023_v40 = vpop.eup %2022 }
 0x568   : > { %v2025_v41 = vpop.eup %2024  ;;  %v1283_v46 = vsel %vm2272_vm7, %v2023_v40, %v1235_v43  ;;  %v1300_v59 = vpack.c.bf16 %v1294_v56, %v1293_v50 }
 0x569   : > { %v1236_v52 = vsel %vm1085_vm5, %v2025_v41, 0.0  ;;  %v1291_v57 = vmul.f32 %v2380_v9, %v1283_v46 }
 0x56c   : > { %v2027_v47 = vpop.eup %2026 }
 0x56d   : > { %v1284_v54 = vsel %vm2272_vm7, %v2027_v47, %v1236_v52 }
 0x56e   : > { %v1292_v12 = vmul.f32 %v2395_v30, %v1284_v54 }
 0x570   : > { %v1299_v58 = vpack.c.bf16 %v1292_v12, %v1291_v57 }
 0x572   : > { %1894 = vmatprep.mubr.msk.bf16.mxu0 %vm1095_vm6, %v1299_v58 }
 0x573   : > { %1895 = vmatmul.mubr.msk.bf16.vlgmr.msra.gmra.mrb[16].mxu0 %vm1095_vm6, %v1300_v59 }
 0x579   : > { %v1223_v60 = vpop.xlane.xlu0 %1222 }
 0x57b   : > { %v1226_v61 = vpop.xlane.xlu1 %1225 }
 0x57d   : > { %v1217_v22 = vpop.xlane.xlu0 %1216 }
 0x57e   : > { %2028 = vrcp.f32 %v1217_v22 }
 0x57f   : > { %v1220_v0 = vpop.xlane.xlu1 %1219 }
 0x580   : > { %2030 = vrcp.f32 %v1220_v0 }
 0x581   : > { %v1265_v51 = vpop.xlane.xlu0 %1264 }
 0x582   : > { %2032 = vrcp.f32 %v1265_v51 }
 0x583   : > { %2034 = vrcp.f32 %v1223_v60  ;;  %v1268_v9 = vpop.xlane.xlu1 %1267 }
 0x584   : > { %2036 = vrcp.f32 %v1268_v9 }
 0x585   : > { %2038 = vrcp.f32 %v1226_v61  ;;  %v1271_v14 = vpop.xlane.xlu0 %1270 }
 0x586   : > { %2040 = vrcp.f32 %v1271_v14 }
 0x587   : > { %v1274_v1 = vpop.xlane.xlu1 %1273 }
 0x588   : > { %2042 = vrcp.f32 %v1274_v1  ;;  %v2029_v30 = vpop.eup %2028 }
 0x589   : > { %v1239_v5 = vsel %vm1085_vm5, %v2029_v30, 0.0  ;;  %v1962_v39 = vpop.permute.xlu0 %1961 }
 0x58a   : > { %v2031_v53 = vpop.eup %2030  ;;  %v1964_v52 = vunpack.i.h.bf16 %v1962_v39  ;;  %v1963_v13 = vunpack.i.l.bf16 %v1962_v39 }
 0x58b   : > { %v1240_v28 = vsel %vm1085_vm5, %v2031_v53, 0.0  ;;  %v1967_v27 = vpop.permute.xlu1 %1966 }
 0x58c   : > { %v2033_v2 = vpop.eup %2032  ;;  %v1969_v44 = vunpack.i.h.bf16 %v1967_v27  ;;  %v1968_v45 = vunpack.i.l.bf16 %v1967_v27 }
 0x58d   : > { %v2035_v55 = vpop.eup %2034  ;;  %v1287_v18 = vsel %vm2272_vm7, %v2033_v2, %v1239_v5  ;;  %v1977_v60 = vpop.permute.xlu0 %1976 }
 0x58e   : > { %v2037_v24 = vpop.eup %2036  ;;  %v1241_v33 = vsel %vm1085_vm5, %v2035_v55, 0.0  ;;  %v1295_v34 = vmul.f32 %v2431_v62, %v1287_v18  ;;  %v1979_v1 = vunpack.i.h.bf16 %v1977_v60  ;;  %v1978_v30 = vunpack.i.l.bf16 %v1977_v60 }
 0x58f   : > { %v2039_v29 = vpop.eup %2038  ;;  %v1288_v31 = vsel %vm2272_vm7, %v2037_v24, %v1240_v28  ;;  %v1972_v22 = vpop.permute.xlu1 %1971 }
 0x590   : > { %v2041_v32 = vpop.eup %2040  ;;  %v1296_v35 = vmul.f32 %v2436_v11, %v1288_v31  ;;  %v1242_v36 = vsel %vm1085_vm5, %v2039_v29, 0.0  ;;  %v1995_v11 = vld [vmem:[%s2581_s9 + $0x18] sm:$0xff]   ;;  %v1974_v5 = vunpack.i.h.bf16 %v1972_v22  ;;  %v1973_v55 = vunpack.i.l.bf16 %v1972_v22 }
 0x591   : > { %v1289_v26 = vsel %vm2272_vm7, %v2041_v32, %v1241_v33  ;;  %1908 = vmatprep.subr.bf16.mxu1 %v1995_v11 }
 0x592   : > { %v2043_v25 = vpop.eup %2042  ;;  %v1301_v37 = vpack.c.bf16 %v1296_v35, %v1295_v34  ;;  %v1297_v4 = vmul.f32 %v2433_v63, %v1289_v26  ;;  %1909 = vmatpush3.bf16.msra.mxu1 %v1995_v11 }
 0x593   : > { %v1290_v3 = vsel %vm2272_vm7, %v2043_v25, %v1242_v36 }
 0x594   : > { %1898 = vmatprep.mubr.msk.bf16.mxu0 %vm1095_vm6, %v1301_v37  ;;  %v1298_v6 = vmul.f32 %v2444_v15, %v1290_v3 }
 0x596   : > { %v1302_v62 = vpack.c.bf16 %v1298_v6, %v1297_v4 }
 0x598   : > { %1899 = vmatmul.mubr.msk.bf16.gmra.mrb[20].mxu0 %vm1095_vm6, %v1302_v62 }
 0x646   : > { %v1896_v48 = vpop.f32.mrb[16].mxu0 }
 0x647   : > { %v1354_v7 = vpop.f32.mrb[17].mxu0 }
 0x648   : > { %v1897_v8 = vpop.f32.mrb[18].mxu0 }
 0x649   : > { %v1386_v49 = vpack.c.bf16 %v1897_v8, %v1896_v48  ;;  %v1357_v10 = vpop.f32.mrb[19].mxu0 }
 0x64a   : > { %v1385_v16 = vpack.c.bf16 %v1357_v10, %v1354_v7 }
 0x64c   : > { %1910 = vmatprep.mubr.msk.bf16.mxu1 %vm891_vm2, %v1385_v16 }
 0x64d   : > { %1911 = vmatmul.mubr.msk.bf16.vlgmr.msra.gmra.mrb[16].mxu1 %vm891_vm2, %v1386_v49 }
 0x66b   : > { %v1900_v63 = vpop.f32.mrb[20].mxu0 }
 0x66c   : > { %v1370_v15 = vpop.f32.mrb[21].mxu0 }
 0x66d   : > { %v1901_v17 = vpop.f32.mrb[22].mxu0 }
 0x66e   : > { %v1388_v19 = vpack.c.bf16 %v1901_v17, %v1900_v63  ;;  %v1373_v20 = vpop.f32.mrb[23].mxu0 }
 0x66f   : > { %v1387_v21 = vpack.c.bf16 %v1373_v20, %v1370_v15 }
 0x671   : > { %1914 = vmatprep.mubr.msk.bf16.mxu1 %vm891_vm2, %v1387_v21 }
 0x672   : > { %1915 = vmatmul.mubr.msk.bf16.gmra.mrb[20].mxu1 %vm891_vm2, %v1388_v19 }
 0x720   : > { %v1912_v38 = vpop.f32.mrb[16].mxu1 }
 0x721   : > { %v1483_v40 = vadd.f32 %v1912_v38, %v1742_v23  ;;  %v1474_v41 = vpop.f32.mrb[17].mxu1 }
 0x722   : > { %v1475_v42 = vadd.f32 %v1742_v23, %v1474_v41  ;;  %v1913_v43 = vpop.f32.mrb[18].mxu1 }
 0x723   : > { %v1486_v46 = vadd.f32 %v1913_v43, %v1742_v23  ;;  %v1477_v47 = vpop.f32.mrb[19].mxu1  ;;  %v1539_v56 = vsel %vm891_vm2, %v1483_v40, %v1968_v45 }
 0x724   : > { %v1478_v54 = vadd.f32 %v1742_v23, %v1477_v47  ;;  %v1537_v12 = vsel %vm891_vm2, %v1475_v42, %v1963_v13 }
 0x725   : > { %v1540_v57 = vsel %vm891_vm2, %v1486_v46, %v1969_v44 }
 0x726   : > { %v1780_v50 = vpack.c.bf16 %v1540_v57, %v1539_v56  ;;  %v1538_v58 = vsel %vm891_vm2, %v1478_v54, %v1964_v52 }
 0x727   : > { %v1775_v59 = vpack.c.bf16 %v1538_v58, %v1537_v12 }
 0x728   : > { %1792 = vst [vmem:[%s461_s24 + $0x8] sm:$0xff] %v1780_v50  }
 0x729   : > { %1776 = vst [vmem:[%s461_s24] sm:$0xff] %v1775_v59  }
 0x745   : > { %v1916_v61 = vpop.f32.mrb[20].mxu1 }
 0x746   : > { %v1499_v0 = vadd.f32 %v1916_v61, %v1742_v23  ;;  %v1490_v51 = vpop.f32.mrb[21].mxu1 }
 0x747   : > { %v1491_v9 = vadd.f32 %v1742_v23, %v1490_v51  ;;  %v1917_v14 = vpop.f32.mrb[22].mxu1 }
 0x748   : > { %v1502_v53 = vadd.f32 %v1917_v14, %v1742_v23  ;;  %v1493_v2 = vpop.f32.mrb[23].mxu1  ;;  %v1543_v24 = vsel %vm891_vm2, %v1499_v0, %v1978_v30 }
 0x749   : > { %v1494_v18 = vadd.f32 %v1742_v23, %v1493_v2  ;;  %v1541_v29 = vsel %vm891_vm2, %v1491_v9, %v1973_v55 }
 0x74a   : > { %v1544_v28 = vsel %vm891_vm2, %v1502_v53, %v1979_v1 }
 0x74b   : > { %v1790_v31 = vpack.c.bf16 %v1544_v28, %v1543_v24  ;;  %v1542_v32 = vsel %vm891_vm2, %v1494_v18, %v1974_v5 }
 0x74c   : > { %v1785_v33 = vpack.c.bf16 %v1542_v32, %v1541_v29 }
 0x74d   : > { %1794 = vst [vmem:[%s461_s24 + $0x18] sm:$0xff] %v1790_v31  }
 0x74e   : > { %1793 = vst [vmem:[%s461_s24 + $0x10] sm:$0xff] %v1785_v33  }
 0x74f PF: > { %s21_s19 = sadd.s32 1, %s2066_s19   ;;  %s2586_s17 = smov %s2062_s18 }
 0x750   : > { %p18_p5 = scmp.ge.s32.totalorder %s21_s19, 4   ;;  %s2587_s18 = smov %s2589_s20 }
 0x752   :  { %20 = sbr.rel (!%p18_p5) target bundleno = 2 (0x2), region = 100 }

// kernel: fursformer_forward.8
= control target key start
LH: loop header
LB: loop body
LE: loop exit
PB: predicated region body
PF: predicated region fallthrough
CT: control target
= control target key end

     0   :  { %s1479_s17 = smov 0   ;;  %s1481_s18 = smov 0   ;;  %s1691_s0 = inlined_call_operand.vmem [shape: f32[2,16,3], index: 0, kind: input, shape index: {}]   ;;  %s1692_s1 = inlined_call_operand.vmem [shape: bf16[2,64,8], index: 1, kind: input, shape index: {}]   ;;  %s1693_s2 = inlined_call_operand.vmem [shape: bf16[2,8,64], index: 2, kind: input, shape index: {}]   ;;  %s1694_s3 = inlined_call_operand.vmem [shape: f32[3,32], index: 3, kind: input, shape index: {}]   ;;  %s1695_s4 = inlined_call_operand.vmem [shape: bf16[32,96], index: 4, kind: input, shape index: {}]   ;;  %s1696_s5 = inlined_call_operand.vmem [shape: bf16[96,64], index: 5, kind: input, shape index: {}]   ;;  %s1697_s6 = inlined_call_operand.vmem [shape: f32[1,64], index: 6, kind: input, shape index: {}]   ;;  %s1698_s7 = inlined_call_operand.vmem [shape: bf16[64,64], index: 7, kind: input, shape index: {}]   ;;  %s1699_s8 = inlined_call_operand.vmem [shape: f32[1,64], index: 8, kind: input, shape index: {}]   ;;  %s1700_s9 = inlined_call_operand.vmem [shape: bf16[64,64], index: 9, kind: input, shape index: {}]   ;;  %s1701_s10 = inlined_call_operand.vmem [shape: f32[1,64], index: 10, kind: input, shape index: {}]   ;;  %s1702_s11 = inlined_call_operand.vmem [shape: bf16[2,16,128], index: 11, kind: output, shape index: {}]  }
   0x1   :  { %s1483_s19 = smov 0  }
   0x2 LB: > { %s33_s20 = sadd.s32 1, %s1407_s18  ;;  %p1174_p0 = scmp.ge.s32.totalorder %s1411_s19, 1  ;;  %s1411_s19 = sphi %s1483_s19, %s21_s19   ;;  %s1407_s18 = sphi %s1481_s18, %s1706_s18   ;;  %s1403_s17 = sphi %s1479_s17, %s1705_s17  }
   0x3   : > { %p35_p1 = scmp.ge.s32.totalorder %s33_s20, 2  ;;  %p377_p2 = scmp.lt.s32.totalorder %s1411_s19, 3 }
   0x5   : > { %s1708_s20 = smov (%p35_p1, %s33_s20), 0  ;;  %p378_p3 = pnand %p1174_p0, %p377_p2 }
   0x6   : > { %p435_p4 = scmp.lt.s32.totalorder (!%p378_p3), %s1403_s17, 1  ;;  %v1413_v0 = vmov (!%p378_p3), 1   ;;  %v1414_v1 = vmov (!%p378_p3), 0   ;;  %v1415_v4 = vmov (!%p378_p3), 2   ;;  %v1357_v5 = vld [vmem:[%s1695_s4] sm:$0xff] (!%p378_p3)   ;;  %v1416_v6 = vmov (!%p378_p3), 0.0  }
   0x7   : > { %381 = sbr.rel (%p378_p3) target bundleno = 1795 (0x703), region = 64  ;;  %1349 = vset.pattern.permute.xlu1 (!%p378_p3), %v1413_v0  ;;  %1348 = vset.pattern.permute.xlu0 (!%p378_p3), %v1414_v1  ;;  %v1358_v7 = vld [vmem:[%s1695_s4 + $0x8] sm:$0xff] (!%p378_p3)   ;;  %vm1417_vm0 = vmmov (!%p378_p3), 0   ;;  %v1359_v8 = vld [vmem:[%s1696_s5] sm:$0xff] (!%p378_p3)   ;;  %v1361_v10 = vld [vmem:[%s1696_s5 + $0x10] sm:$0xff] (!%p378_p3)   ;;  %v477_v12 = vlaneseq (!%p378_p3)  ;;  %vm534_vm1 = vcmask (!%p378_p3), 261120  }
   0x8   : > { %1252 = vmatprep.subr.bf16.mxu0 (!%p378_p3), %v1416_v6  ;;  %1260 = vmatprep.subr.bf16.mxu1 (!%p378_p3), %v1416_v6  ;;  %v1360_v9 = vld [vmem:[%s1696_s5 + $0x8] sm:$0xff] (!%p378_p3)   ;;  %v1362_v11 = vld [vmem:[%s1696_s5 + $0x18] sm:$0xff] (!%p378_p3)   ;;  %v466_v16 = vld [vmem:[%s1694_s3] sm:$0x7] (!%p378_p3)  ;;  %vm637_vm2 = vcmask (!%p378_p3), 785408   ;;  %vm722_vm3 = vcmask (!%p378_p3), 523264  }
   0x9   : > { %1253 = vmatpush3.bf16.msra.mxu0 (!%p378_p3), %v1357_v5  ;;  %1256 = vmatprep.mubr.msk.bf16.mxu0 (!%p378_p3), %vm1417_vm0, %v1416_v6  ;;  %v478_v13 = vshrl.u32 (!%p378_p3), %v477_v12, 7  ;;  %v1363_v40 = vld [vmem:[%s1696_s5 + $0x20] sm:$0xff] (!%p378_p3)   ;;  %v1364_v41 = vld [vmem:[%s1696_s5 + $0x28] sm:$0xff] (!%p378_p3)   ;;  %v1367_v51 = vld [vmem:[%s1698_s7 + $0x10] sm:$0xff] (!%p378_p3)   ;;  %vm851_vm7 = vcmask (!%p378_p3), 64512   ;;  %vm910_vm9 = vcmask (!%p378_p3), 1043456  }
   0xa   : > { %1254 = vmatprep.subr.bf16.mxu0 (!%p378_p3), %v1416_v6  ;;  %1272 = vmatprep.mubr.msk.bf16.mxu1 (!%p378_p3), %vm1417_vm0, %v1416_v6  ;;  %v1365_v42 = vld [vmem:[%s1698_s7] sm:$0xff] (!%p378_p3)   ;;  %v1366_v43 = vld [vmem:[%s1698_s7 + $0x8] sm:$0xff] (!%p378_p3)   ;;  %v1368_v52 = vld [vmem:[%s1698_s7 + $0x18] sm:$0xff] (!%p378_p3)   ;;  %s1418_s12 = smov (!%p378_p3), 64  }
   0xb   : > { %1261 = vmatpush3.bf16.msra.mxu1 (!%p378_p3), %v1359_v8  ;;  %v493_v14 = vsub.s32 (!%p378_p3), 1, %v478_v13  ;;  %v479_v15 = vsub.s32 (!%p378_p3), 0, %v478_v13  ;;  %v509_v19 = vsub.s32 (!%p378_p3), 2, %v478_v13  ;;  %v1185_v53 = vld [vmem:[%s1697_s6] ss:$0 sm:$0xff] (!%p378_p3) }
   0xc   : > { %1262 = vmatprep.subr.bf16.mxu1 (!%p378_p3), %v1416_v6 }
   0xd   : > { %1255 = vmatpush3.bf16.msra.mxu0 (!%p378_p3), %v1358_v7  ;;  %v494_v20 = vrot.slane (!%p378_p3), %v466_v16, %v493_v14  ;;  %v480_v21 = vrot.slane (!%p378_p3), %v466_v16, %v479_v15  ;;  %v510_v24 = vrot.slane (!%p378_p3), %v466_v16, %v509_v19 }
   0xe   : > { %s1710_s17 = smov (!%p435_p4, %s1403_s17), 1  ;;  %1276 = vmatprep.subr.bf16.mxu0 %v1416_v6 }
   0xf   : > { %s1215_s21 = sshll.u32 %s1710_s17, 4  ;;  %s1216_s25 = sshll.u32 %s1710_s17, 5  ;;  %1263 = vmatpush3.bf16.msra.mxu1 %v1360_v9 }
  0x10   : > { %s442_s24 = scalar_lea.vmem %s1691_s0, %s1215_s21  ;;  %s1507_s28 = scalar_lea.vmem %s1692_s1, %s1216_s25  ;;  %1264 = vmatprep.subr.bf16.mxu1 %v1416_v6 }
  0x11   : > { %v464_v2 = vld [vmem:[%s442_s24] sm:$0xff]  ;;  %v465_v3 = vld [vmem:[%s442_s24 + $0x8] sm:$0xff]  ;;  %v1371_v0 = vld [vmem:[%s1507_s28 + $0x10] sm:$0xff]  }
  0x12   : > { %484 = vperm.xlu1 %1349, %v464_v2   ;;  %469 = vperm.xlu0 %1348, %v464_v2   ;;  %v1369_v60 = vld [vmem:[%s1507_s28] sm:$0xff]   ;;  %v1370_v63 = vld [vmem:[%s1507_s28 + $0x8] sm:$0xff]   ;;  %v1372_v1 = vld [vmem:[%s1507_s28 + $0x18] sm:$0xff]   ;;  %s1179_s28 = sshll.u32 %s1710_s17, 2 }
  0x13   : > { %1265 = vmatpush3.bf16.msra.mxu1 %v1361_v10  ;;  %s452_s15 = scalar_lea.vmem %s1693_s2, %s1179_s28  ;;  %s1217_s28 = sshll.u32 %s1710_s17, 3 }
  0x14   : > { %1266 = vmatprep.subr.bf16.mxu1 %v1416_v6  ;;  %s461_s14 = scalar_lea.vmem %s1702_s11, %s1217_s28 }
  0x16   : > { %488 = vperm.xlu1 %1349, %v465_v3   ;;  %474 = vperm.xlu0 %1348, %v465_v3  }
  0x17   : > { %1267 = vmatpush3.bf16.msra.mxu1 %v1362_v11  ;;  %v1597_v11 = vand.u32 127, %v477_v12 }
  0x18   : > { %1268 = vmatprep.subr.bf16.mxu1 %v1416_v6 }
  0x19   : > { %vm847_vm4 = vcmp.lt.s32.totalorder %v1597_v11, 4  ;;  %vm860_vm5 = vcmp.ge.s32.totalorder %v1597_v11, 4  ;;  %vm861_vm6 = vcmp.lt.s32.totalorder %v1597_v11, 8 }
  0x1a   : > { %1351 = vset.pattern.permute.xlu1 %v1415_v4  ;;  %1350 = vset.pattern.permute.xlu0 %v1415_v4  ;;  %vm1605_vm8 = vmand %vm860_vm5, %vm861_vm6 }
  0x1b   : > { %504 = vperm.xlu1 %1351, %v465_v3   ;;  %500 = vperm.xlu0 %1350, %v464_v2   ;;  %v1193_v2 = vld [vmem:[%s1699_s8] ss:$0 sm:$0xff] }
  0x1c   : > { %1269 = vmatpush3.bf16.msra.mxu1 %v1363_v40 }
  0x1d   : > { %1270 = vmatprep.subr.bf16.mxu1 %v1416_v6 }
  0x20   : > { %1271 = vmatpush3.bf16.msra.mxu1 %v1364_v41 }
  0x21   : > { %1300 = vmatprep.subr.bf16.mxu1 %v1416_v6 }
  0x91   : > { %v485_v17 = vpop.permute.xlu1 %484  ;;  %v470_v18 = vpop.permute.xlu0 %469 }
  0x92   : > { %v495_v25 = vmul.f32 %v494_v20, %v485_v17  ;;  %v481_v26 = vmul.f32 %v480_v21, %v470_v18 }
  0x94   : > { %v497_v31 = vadd.f32 %v495_v25, %v481_v26 }
  0x95   : > { %v489_v22 = vpop.permute.xlu1 %488  ;;  %v475_v23 = vpop.permute.xlu0 %474 }
  0x96   : > { %v496_v27 = vmul.f32 %v494_v20, %v489_v22  ;;  %v482_v28 = vmul.f32 %v480_v21, %v475_v23 }
  0x98   : > { %v498_v32 = vadd.f32 %v496_v27, %v482_v28 }
  0x9a   : > { %v505_v29 = vpop.permute.xlu1 %504  ;;  %v501_v30 = vpop.permute.xlu0 %500 }
  0x9b   : > { %v512_v33 = vmul.f32 %v510_v24, %v505_v29  ;;  %v511_v34 = vmul.f32 %v510_v24, %v501_v30 }
  0x9d   : > { %v514_v35 = vadd.f32 %v512_v33, %v498_v32  ;;  %v513_v36 = vadd.f32 %v511_v34, %v497_v31 }
  0x9f   : > { %v516_v37 = vmax.f32 %v514_v35, 0.0  ;;  %v515_v38 = vmax.f32 %v513_v36, 0.0 }
  0xa1   : > { %v517_v39 = vpack.c.bf16 %v516_v37, %v515_v38 }
  0xa3   : > { %1257 = vmatmul.mubr.msk.bf16.vlgmr.msra.gmra.mrb[0].mxu0 %vm534_vm1, %v517_v39 }
  0xa4   : > { %1284 = vmatprep.mubr.msk.bf16.mxu0 %vm1417_vm0, %v1416_v6  ;;  %1277 = vmatpush3.bf16.msra.mxu0 %v1365_v42 }
  0xa5   : > { %1278 = vmatprep.subr.bf16.mxu0 %v1416_v6 }
  0xa8   : > { %1279 = vmatpush3.bf16.msra.mxu0 %v1366_v43 }
  0xa9   : > { %1280 = vmatprep.subr.bf16.mxu0 %v1416_v6 }
  0xac   : > { %1281 = vmatpush3.bf16.msra.mxu0 %v1367_v51 }
  0xad   : > { %1282 = vmatprep.subr.bf16.mxu0 %v1416_v6 }
  0xb0   : > { %1283 = vmatpush3.bf16.msra.mxu0 %v1368_v52 }
  0xb1   : > { %1288 = vmatprep.subr.bf16.mxu0 %v1416_v6 }
 0x176   : > { %v572_v44 = vpop.f32.mrb[0].mxu0 }
 0x177   : > { %v1258_v45 = vpop.f32.mrb[1].mxu0  ;;  %v579_v47 = vmax.f32 %v572_v44, 0.0 }
 0x178   : > { %v575_v46 = vpop.f32.mrb[2].mxu0 }
 0x179   : > { %v580_v48 = vmax.f32 %v575_v46, 0.0  ;;  %v1259_v49 = vpop.f32.mrb[3].mxu0 }
 0x17b   : > { %v581_v50 = vpack.c.bf16 %v580_v48, %v579_v47  ;;  %v906_v47 = vld [vmem:[%s452_s15] sm:$0xf] }
 0x17c   : > { %v912_v48 = vsel %vm910_vm9, %v906_v47, 0 }
 0x17d   : > { %1273 = vmatmul.mubr.msk.bf16.vlgmr.msra.gmra.mrb[0].mxu1 %vm637_vm2, %v581_v50 }
 0x17e   : > { %1302 = vmatprep.mubr.msk.bf16.mxu1 %vm1417_vm0, %v1416_v6  ;;  %1301 = vmatpush3.bf16.msra.mxu1 %v912_v48 }
 0x17f   : > { %1306 = vmatprep.subr.bf16.mxu1 %v1416_v6 }
 0x250   : > { %v675_v54 = vpop.f32.mrb[0].mxu1 }
 0x251   : > { %v1274_v55 = vpop.f32.mrb[1].mxu1  ;;  %v1574_v57 = vadd.f32 %v1185_v53, %v675_v54 }
 0x252   : > { %v678_v56 = vpop.f32.mrb[2].mxu1 }
 0x253   : > { %v1576_v58 = vadd.f32 %v1185_v53, %v678_v56  ;;  %v1275_v59 = vpop.f32.mrb[3].mxu1 }
 0x255   : > { %v1352_v61 = vpack.i.bf16 %v1576_v58, %v1574_v57  ;;  %v682_v62 = vpack.c.bf16 %v1576_v58, %v1574_v57 }
 0x257   : > { %1285 = vmatmul.mubr.msk.bf16.vlgmr.msra.gmra.mrb[4].mxu0 %vm722_vm3, %v682_v62 }
 0x258   : > { %1289 = vmatpush3.bf16.msra.mxu0 %v1369_v60  ;;  %1296 = vmatprep.mubr.msk.bf16.mxu0 %vm1417_vm0, %v1416_v6 }
 0x259   : > { %1290 = vmatprep.subr.bf16.mxu0 %v1416_v6 }
 0x25c   : > { %1291 = vmatpush3.bf16.msra.mxu0 %v1370_v63  ;;  %v1373_v63 = vld [vmem:[%s1700_s9] sm:$0xff]  }
 0x25d   : > { %1292 = vmatprep.subr.bf16.mxu0 %v1416_v6 }
 0x260   : > { %1293 = vmatpush3.bf16.msra.mxu0 %v1371_v0 }
 0x261   : > { %1294 = vmatprep.subr.bf16.mxu0 %v1416_v6 }
 0x264   : > { %1295 = vmatpush3.bf16.msra.mxu0 %v1372_v1  ;;  %v1374_v1 = vld [vmem:[%s1700_s9 + $0x8] sm:$0xff]  }
 0x32a   : > { %v760_v3 = vpop.f32.mrb[4].mxu0 }
 0x32b   : > { %v1286_v4 = vpop.f32.mrb[5].mxu0  ;;  %v761_v7 = vadd.f32 %v1193_v2, %v760_v3  ;;  %v1376_v3 = vld [vmem:[%s1700_s9 + $0x18] sm:$0xff]  }
 0x32c   : > { %v763_v5 = vpop.f32.mrb[6].mxu0 }
 0x32d   : > { %v764_v8 = vadd.f32 %v1193_v2, %v763_v5  ;;  %v1287_v9 = vpop.f32.mrb[7].mxu0  ;;  %v1375_v2 = vld [vmem:[%s1700_s9 + $0x10] sm:$0xff]  }
 0x32f   : > { %v767_v10 = vpack.c.bf16 %v764_v8, %v761_v7 }
 0x331   : > { %1297 = vmatmul.mubr.msk.bf16.vlgmr.msra.gmra.mrb[8].mxu0 %vm722_vm3, %v767_v10  ;;  %v1205_v10 = vld [vmem:[%s1701_s10] ss:$0 sm:$0xff] }
 0x404   : > { %v837_v13 = vpop.f32.mrb[8].mxu0 }
 0x405   : > { %v1298_v14 = vpop.f32.mrb[9].mxu0  ;;  %v849_v15 = vsel %vm847_vm4, %v837_v13, -1e+30  ;;  %v863_v22 = vsel %vm1605_vm8, %v837_v13, -1e+30 }
 0x406   : > { %v840_v16 = vpop.f32.mrb[10].mxu0  ;;  %v852_v17 = vsel %vm851_vm7, %v849_v15, -inf  ;;  %v865_v24 = vsel %vm851_vm7, %v863_v22, -inf }
 0x407   : > { %853 = vmax.xlane.f32.xlu1 %v852_v17  ;;  %v1299_v12 = vpop.f32.mrb[11].mxu0  ;;  %v850_v19 = vsel %vm847_vm4, %v840_v16, -1e+30  ;;  %v864_v20 = vsel %vm1605_vm8, %v840_v16, -1e+30 }
 0x408   : > { %v855_v21 = vsel %vm851_vm7, %v850_v19, -inf  ;;  %v868_v23 = vsel %vm851_vm7, %v864_v20, -inf }
 0x409   : > { %856 = vmax.xlane.f32.xlu0 %v855_v21 }
 0x40b   : > { %869 = vmax.xlane.f32.xlu1 %v868_v23 }
 0x40d   : > { %866 = vmax.xlane.f32.xlu0 %v865_v24 }
 0x494   : > { %v854_v25 = vpop.xlane.xlu1 %853 }
 0x495   : > { %v858_v30 = vsel %vm847_vm4, %v854_v25, -1e+30 }
 0x496   : > { %v857_v26 = vpop.xlane.xlu0 %856 }
 0x497   : > { %v859_v27 = vsel %vm847_vm4, %v857_v26, -1e+30 }
 0x498   : > { %v870_v28 = vpop.xlane.xlu1 %869 }
 0x499   : > { %v872_v29 = vsel %vm1605_vm8, %v870_v28, %v859_v27 }
 0x49a   : > { %v874_v31 = vsub.f32 %v840_v16, %v872_v29  ;;  %v867_v32 = vpop.xlane.xlu0 %866 }
 0x49b   : > { %v871_v33 = vsel %vm1605_vm8, %v867_v32, %v858_v30 }
 0x49c   : > { %v877_v34 = vmul.f32 1.442695, %v874_v31  ;;  %v873_v35 = vsub.f32 %v837_v13, %v871_v33 }
 0x49e   : > { %1377 = vpow2.f32 %v877_v34  ;;  %v875_v36 = vmul.f32 1.442695, %v873_v35 }
 0x4a0   : > { %1379 = vpow2.f32 %v875_v36 }
 0x4a8   : > { %v1378_v37 = vpop.eup %1377 }
 0x4a9   : > { %v880_v38 = vsel %vm847_vm4, %v1378_v37, 0.0  ;;  %v892_v42 = vsel %vm1605_vm8, %v1378_v37, 0.0 }
 0x4aa   : > { %v1380_v39 = vpop.eup %1379  ;;  %v884_v40 = vsel %vm851_vm7, %v880_v38, 0.0  ;;  %v896_v45 = vsel %vm851_vm7, %v892_v42, 0.0 }
 0x4ab   : > { %885 = vadd.xlane.f32.xlu1 %v884_v40  ;;  %v879_v41 = vsel %vm847_vm4, %v1380_v39, 0.0  ;;  %v891_v44 = vsel %vm1605_vm8, %v1380_v39, 0.0 }
 0x4ac   : > { %v881_v43 = vsel %vm851_vm7, %v879_v41, 0.0  ;;  %v893_v46 = vsel %vm851_vm7, %v891_v44, 0.0 }
 0x4ad   : > { %882 = vadd.xlane.f32.xlu0 %v881_v43 }
 0x4af   : > { %897 = vadd.xlane.f32.xlu1 %v896_v45 }
 0x4b1   : > { %894 = vadd.xlane.f32.xlu0 %v893_v46 }
 0x4c7   : > { %1353 = vrot.lane.b32.xlu0 %v1352_v61, %s1418_s12 }
 0x538   : > { %v886_v49 = vpop.xlane.xlu1 %885 }
 0x539   : > { %1381 = vrcp.f32 %v886_v49 }
 0x53a   : > { %v883_v50 = vpop.xlane.xlu0 %882 }
 0x53b   : > { %1383 = vrcp.f32 %v883_v50 }
 0x53c   : > { %v898_v51 = vpop.xlane.xlu1 %897 }
 0x53d   : > { %1385 = vrcp.f32 %v898_v51 }
 0x53e   : > { %v895_v52 = vpop.xlane.xlu0 %894 }
 0x53f   : > { %1387 = vrcp.f32 %v895_v52 }
 0x542   : > { %v1354_v11 = vpop.permute.xlu0 %1353 }
 0x543   : > { %v1382_v53 = vpop.eup %1381  ;;  %v1356_v16 = vunpack.i.h.bf16 %v1354_v11  ;;  %v1355_v17 = vunpack.i.l.bf16 %v1354_v11 }
 0x544   : > { %v890_v56 = vsel %vm847_vm4, %v1382_v53, 0.0 }
 0x545   : > { %v1384_v54 = vpop.eup %1383 }
 0x546   : > { %v889_v59 = vsel %vm847_vm4, %v1384_v54, 0.0 }
 0x547   : > { %v1386_v55 = vpop.eup %1385 }
 0x548   : > { %v902_v57 = vsel %vm1605_vm8, %v1386_v55, %v890_v56 }
 0x549   : > { %v1388_v58 = vpop.eup %1387  ;;  %v904_v62 = vmul.f32 %v1378_v37, %v902_v57 }
 0x54a   : > { %v901_v60 = vsel %vm1605_vm8, %v1388_v58, %v889_v59 }
 0x54b   : > { %v903_v61 = vmul.f32 %v1380_v39, %v901_v60 }
 0x54d   : > { %v905_v0 = vpack.c.bf16 %v904_v62, %v903_v61 }
 0x54f   : > { %1303 = vmatmul.mubr.msk.bf16.vlgmr.msra.gmra.mrb[4].mxu1 %vm851_vm7, %v905_v0 }
 0x550   : > { %1307 = vmatpush3.bf16.msra.mxu1 %v1373_v63  ;;  %1314 = vmatprep.mubr.msk.bf16.mxu1 %vm1417_vm0, %v1416_v6 }
 0x551   : > { %1308 = vmatprep.subr.bf16.mxu1 %v1416_v6 }
 0x554   : > { %1309 = vmatpush3.bf16.msra.mxu1 %v1374_v1 }
 0x555   : > { %1310 = vmatprep.subr.bf16.mxu1 %v1416_v6 }
 0x558   : > { %1311 = vmatpush3.bf16.msra.mxu1 %v1375_v2 }
 0x559   : > { %1312 = vmatprep.subr.bf16.mxu1 %v1416_v6 }
 0x55c   : > { %1313 = vmatpush3.bf16.msra.mxu1 %v1376_v3 }
 0x622   : > { %v948_v4 = vpop.f32.mrb[4].mxu1 }
 0x623   : > { %v1304_v5 = vpop.f32.mrb[5].mxu1 }
 0x624   : > { %v951_v7 = vpop.f32.mrb[6].mxu1 }
 0x625   : > { %v955_v8 = vpack.c.bf16 %v951_v7, %v948_v4  ;;  %v1305_v9 = vpop.f32.mrb[7].mxu1 }
 0x627   : > { %1315 = vmatmul.mubr.msk.bf16.vlgmr.msra.gmra.mrb[8].mxu1 %vm722_vm3, %v955_v8 }
 0x6fa   : > { %v1032_v13 = vpop.f32.mrb[8].mxu1 }
 0x6fb   : > { %v1033_v14 = vadd.f32 %v1205_v10, %v1032_v13  ;;  %v1316_v6 = vpop.f32.mrb[9].mxu1 }
 0x6fc   : > { %v1035_v15 = vpop.f32.mrb[10].mxu1 }
 0x6fd   : > { %v1036_v18 = vadd.f32 %v1205_v10, %v1035_v15  ;;  %v1317_v12 = vpop.f32.mrb[11].mxu1  ;;  %v1047_v19 = vsel %vm722_vm3, %v1033_v14, %v1355_v17 }
 0x6ff   : > { %v1048_v20 = vsel %vm722_vm3, %v1036_v18, %v1356_v16 }
 0x700   : > { %v1223_v21 = vpack.c.bf16 %v1048_v20, %v1047_v19 }
 0x702   : > { %1224 = vst [vmem:[%s461_s14] sm:$0xff] %v1223_v21  }
 0x703 PF: > { %s21_s19 = sadd.s32 1, %s1411_s19   ;;  %s1705_s17 = smov %s1407_s18 }
 0x704   : > { %p18_p5 = scmp.ge.s32.totalorder %s21_s19, 4   ;;  %s1706_s18 = smov %s1708_s20 }
 0x706   :  { %20 = sbr.rel (!%p18_p5) target bundleno = 2 (0x2), region = 100 }

// kernel: fursformer_forward.9
= control target key start
LH: loop header
LB: loop body
LE: loop exit
PB: predicated region body
PF: predicated region fallthrough
CT: control target
= control target key end

     0   :  { %v3256_v0 = vmov 0   ;;  %vm1153_vm0 = vcmask 523264   ;;  %s4434_s4 = inlined_call_operand.vmem [shape: bf16[448,64], index: 4, kind: input, shape index: {}]   ;;  %s4435_s3 = inlined_call_operand.vmem [shape: bf16[512,64], index: 3, kind: input, shape index: {}]   ;;  %s4436_s2 = inlined_call_operand.vmem [shape: bf16[512,128], index: 2, kind: input, shape index: {}]   ;;  %s4437_s1 = inlined_call_operand.vmem [shape: bf16[512,128], index: 1, kind: input, shape index: {}]   ;;  %s4438_s0 = inlined_call_operand.vmem [shape: bf16[512,128], index: 0, kind: input, shape index: {}]   ;;  %s4439_s7 = inlined_call_operand.vmem [shape: bf16[64,128], index: 7, kind: input, shape index: {}]   ;;  %s4440_s5 = inlined_call_operand.vmem [shape: f32[1,64], index: 5, kind: input, shape index: {}]   ;;  %s4441_s6 = inlined_call_operand.vmem [shape: f32[1,64], index: 6, kind: input, shape index: {}]   ;;  %s4442_s8 = inlined_call_operand.vmem [shape: f32[1,128], index: 8, kind: input, shape index: {}]   ;;  %s4443_s9 = inlined_call_operand.vmem [shape: f32[512,128], index: 9, kind: output, shape index: {}]  }
   0x1   :  { %1250 = vmatprep.subr.bf16.mxu0 %v3256_v0  ;;  %v3094_v1 = vld [vmem:[%s4434_s4 + $0x80] sm:$0xff]   ;;  %2989 = vmatprep.subr.bf16.mxu1 %v3256_v0  ;;  %v3095_v2 = vld [vmem:[%s4434_s4 + $0x88] sm:$0xff]   ;;  %v3096_v3 = vld [vmem:[%s4434_s4 + $0x90] sm:$0xff]  }
   0x2   :  { %1251 = vmatpush1.bf16.msra.mxu0 %v3094_v1  ;;  %3001 = vmatpush1.bf16.msra.mxu1 %v3094_v1  ;;  %v3097_v4 = vld [vmem:[%s4434_s4 + $0x98] sm:$0xff]   ;;  %v3106_v5 = vld [vmem:[%s4435_s3] sm:$0xff]   ;;  %v3099_v7 = vld [vmem:[%s4434_s4 + $0xa8] sm:$0xff]  }
   0x3   :  { %1252 = vmatprep.subr.bf16.mxu0 %v3256_v0  ;;  %2990 = vmatprep.subr.bf16.mxu1 %v3256_v0  ;;  %v3098_v6 = vld [vmem:[%s4434_s4 + $0xa0] sm:$0xff]   ;;  %v3100_v8 = vld [vmem:[%s4434_s4 + $0xb0] sm:$0xff]   ;;  %v3101_v9 = vld [vmem:[%s4434_s4 + $0xb8] sm:$0xff]  }
   0x4   :  { %2794 = vmatprep.mubr.msk.bf16.mxu0 %vm1153_vm0, %v3106_v5  ;;  %v3102_v10 = vld [vmem:[%s4434_s4 + $0xc0] sm:$0xff]   ;;  %v3103_v11 = vld [vmem:[%s4434_s4 + $0xc8] sm:$0xff]   ;;  %v3104_v12 = vld [vmem:[%s4434_s4 + $0xd0] sm:$0xff]  }
   0x5   :  { %v3105_v13 = vld [vmem:[%s4434_s4 + $0xd8] sm:$0xff]   ;;  %v3107_v14 = vld [vmem:[%s4436_s2] sm:$0xff]   ;;  %v3110_v16 = vld [vmem:[%s4435_s3 + $0x8] sm:$0xff]  }
   0x6   :  { %1253 = vmatpush1.bf16.msra.mxu0 %v3095_v2  ;;  %3002 = vmatpush1.bf16.msra.mxu1 %v3095_v2  ;;  %v3108_v15 = vld [vmem:[%s4434_s4] sm:$0xff]   ;;  %v3109_v17 = vld [vmem:[%s4434_s4 + $0x8] sm:$0xff]   ;;  %v3112_v19 = vld [vmem:[%s4434_s4 + $0x10] sm:$0xff]  }
   0x7   :  { %1254 = vmatprep.subr.bf16.mxu0 %v3256_v0  ;;  %2991 = vmatprep.subr.bf16.mxu1 %v3256_v0  ;;  %v3111_v18 = vld [vmem:[%s4436_s2 + $0x8] sm:$0xff]   ;;  %v3114_v20 = vld [vmem:[%s4435_s3 + $0x10] sm:$0xff]   ;;  %v3148_v21 = vld [vmem:[%s4435_s3 + $0x40] sm:$0xff]  }
   0x8   :  { %v3149_v22 = vld [vmem:[%s4436_s2 + $0x40] sm:$0xff]   ;;  %2802 = vmatprep.mubr.msk.bf16.mxu1 %vm1153_vm0, %v3148_v21  ;;  %v3113_v23 = vld [vmem:[%s4434_s4 + $0x18] sm:$0xff]   ;;  %v3152_v24 = vld [vmem:[%s4435_s3 + $0x48] sm:$0xff]  }
   0x9   :  { %v3115_v25 = vld [vmem:[%s4436_s2 + $0x10] sm:$0xff]   ;;  %v3116_v26 = vld [vmem:[%s4434_s4 + $0x20] sm:$0xff]   ;;  %v3153_v27 = vld [vmem:[%s4436_s2 + $0x48] sm:$0xff]  }
   0xa   :  { %1255 = vmatpush1.bf16.msra.mxu0 %v3096_v3  ;;  %3003 = vmatpush1.bf16.msra.mxu1 %v3096_v3  ;;  %v3118_v28 = vld [vmem:[%s4435_s3 + $0x18] sm:$0xff]   ;;  %v3156_v29 = vld [vmem:[%s4435_s3 + $0x50] sm:$0xff]   ;;  %v3117_v30 = vld [vmem:[%s4434_s4 + $0x28] sm:$0xff]  }
   0xb   :  { %1256 = vmatprep.subr.bf16.mxu0 %v3256_v0  ;;  %2992 = vmatprep.subr.bf16.mxu1 %v3256_v0  ;;  %v3119_v31 = vld [vmem:[%s4436_s2 + $0x18] sm:$0xff]   ;;  %v3120_v32 = vld [vmem:[%s4434_s4 + $0x30] sm:$0xff]   ;;  %v3122_v34 = vld [vmem:[%s4435_s3 + $0x20] sm:$0xff]  }
   0xc   :  { %v3157_v33 = vld [vmem:[%s4436_s2 + $0x50] sm:$0xff]   ;;  %v3160_v35 = vld [vmem:[%s4435_s3 + $0x58] sm:$0xff]   ;;  %v3123_v37 = vld [vmem:[%s4436_s2 + $0x20] sm:$0xff]  }
   0xd   :  { %v3121_v36 = vld [vmem:[%s4434_s4 + $0x38] sm:$0xff]   ;;  %v3124_v38 = vld [vmem:[%s4434_s4 + $0x40] sm:$0xff]   ;;  %v3126_v40 = vld [vmem:[%s4435_s3 + $0x28] sm:$0xff]  }
   0xe   :  { %1257 = vmatpush1.bf16.msra.mxu0 %v3097_v4  ;;  %3004 = vmatpush1.bf16.msra.mxu1 %v3097_v4  ;;  %v3161_v39 = vld [vmem:[%s4436_s2 + $0x58] sm:$0xff]   ;;  %v3164_v41 = vld [vmem:[%s4435_s3 + $0x60] sm:$0xff]   ;;  %v3125_v42 = vld [vmem:[%s4434_s4 + $0x48] sm:$0xff]  }
   0xf   :  { %1258 = vmatprep.subr.bf16.mxu0 %v3256_v0  ;;  %2993 = vmatprep.subr.bf16.mxu1 %v3256_v0  ;;  %v3127_v43 = vld [vmem:[%s4436_s2 + $0x28] sm:$0xff]   ;;  %v3128_v44 = vld [vmem:[%s4434_s4 + $0x50] sm:$0xff]   ;;  %v3165_v45 = vld [vmem:[%s4436_s2 + $0x60] sm:$0xff]  }
  0x10   :  { %v3130_v46 = vld [vmem:[%s4435_s3 + $0x30] sm:$0xff]   ;;  %v3168_v47 = vld [vmem:[%s4435_s3 + $0x68] sm:$0xff]   ;;  %v3129_v48 = vld [vmem:[%s4434_s4 + $0x58] sm:$0xff]  }
  0x11   :  { %v3131_v49 = vld [vmem:[%s4436_s2 + $0x30] sm:$0xff]   ;;  %v3132_v50 = vld [vmem:[%s4434_s4 + $0x60] sm:$0xff]   ;;  %v3134_v51 = vld [vmem:[%s4435_s3 + $0x38] sm:$0xff]  }
  0x12   :  { %1259 = vmatpush1.bf16.msra.mxu0 %v3098_v6  ;;  %3005 = vmatpush1.bf16.msra.mxu1 %v3098_v6  ;;  %v3169_v52 = vld [vmem:[%s4436_s2 + $0x68] sm:$0xff]   ;;  %v3172_v53 = vld [vmem:[%s4435_s3 + $0x70] sm:$0xff]   ;;  %v3135_v55 = vld [vmem:[%s4436_s2 + $0x38] sm:$0xff]  }
  0x13   :  { %1260 = vmatprep.subr.bf16.mxu0 %v3256_v0  ;;  %2994 = vmatprep.subr.bf16.mxu1 %v3256_v0  ;;  %v3133_v54 = vld [vmem:[%s4434_s4 + $0x68] sm:$0xff]   ;;  %v3173_v56 = vld [vmem:[%s4436_s2 + $0x70] sm:$0xff]   ;;  %v3138_v58 = vld [vmem:[%s4437_s1] sm:$0xff]  }
  0x14   :  { %v3136_v57 = vld [vmem:[%s4434_s4 + $0x70] sm:$0xff]   ;;  %v3176_v59 = vld [vmem:[%s4435_s3 + $0x78] sm:$0xff]   ;;  %v3139_v61 = vld [vmem:[%s4438_s0] sm:$0xff]  }
  0x15   :  { %v3137_v60 = vld [vmem:[%s4434_s4 + $0x78] sm:$0xff]   ;;  %v3140_v63 = vld [vmem:[%s4437_s1 + $0x8] sm:$0xff]   ;;  %v3180_v1 = vld [vmem:[%s4435_s3 + $0x80] sm:$0xff]  }
  0x16   :  { %1261 = vmatpush1.bf16.msra.mxu0 %v3099_v7  ;;  %3006 = vmatpush1.bf16.msra.mxu1 %v3099_v7  ;;  %v3177_v62 = vld [vmem:[%s4436_s2 + $0x78] sm:$0xff]   ;;  %v3181_v2 = vld [vmem:[%s4436_s2 + $0x80] sm:$0xff]   ;;  %v3142_v3 = vld [vmem:[%s4437_s1 + $0x10] sm:$0xff]  }
  0x17   :  { %1262 = vmatprep.subr.bf16.mxu0 %v3256_v0  ;;  %2995 = vmatprep.subr.bf16.mxu1 %v3256_v0  ;;  %v3184_v4 = vld [vmem:[%s4435_s3 + $0x88] sm:$0xff]   ;;  %v3143_v5 = vld [vmem:[%s4438_s0 + $0x10] sm:$0xff]   ;;  %v3144_v7 = vld [vmem:[%s4437_s1 + $0x18] sm:$0xff]  }
  0x18   :  { %v3185_v6 = vld [vmem:[%s4436_s2 + $0x88] sm:$0xff]  }
  0x19   :  { %v3200_v21 = vld [vmem:[%s4435_s3 + $0xa8] sm:$0xff]  }
  0x1a   :  { %1263 = vmatpush1.bf16.msra.mxu0 %v3100_v8  ;;  %3007 = vmatpush1.bf16.msra.mxu1 %v3100_v8  ;;  %v3188_v8 = vld [vmem:[%s4435_s3 + $0x90] sm:$0xff]  }
  0x1b   :  { %1264 = vmatprep.subr.bf16.mxu0 %v3256_v0  ;;  %2996 = vmatprep.subr.bf16.mxu1 %v3256_v0 }
  0x1e   :  { %1265 = vmatpush1.bf16.msra.mxu0 %v3101_v9  ;;  %3008 = vmatpush1.bf16.msra.mxu1 %v3101_v9  ;;  %v3145_v9 = vld [vmem:[%s4438_s0 + $0x18] sm:$0xff]  }
  0x1f   :  { %1266 = vmatprep.subr.bf16.mxu0 %v3256_v0  ;;  %2997 = vmatprep.subr.bf16.mxu1 %v3256_v0 }
  0x22   :  { %1267 = vmatpush1.bf16.msra.mxu0 %v3102_v10  ;;  %3009 = vmatpush1.bf16.msra.mxu1 %v3102_v10  ;;  %v3189_v10 = vld [vmem:[%s4436_s2 + $0x90] sm:$0xff]  }
  0x23   :  { %1268 = vmatprep.subr.bf16.mxu0 %v3256_v0  ;;  %2998 = vmatprep.subr.bf16.mxu1 %v3256_v0 }
  0x26   :  { %1269 = vmatpush1.bf16.msra.mxu0 %v3103_v11  ;;  %3010 = vmatpush1.bf16.msra.mxu1 %v3103_v11  ;;  %v3146_v11 = vld [vmem:[%s4437_s1 + $0x20] sm:$0xff]  }
  0x27   :  { %1270 = vmatprep.subr.bf16.mxu0 %v3256_v0  ;;  %2999 = vmatprep.subr.bf16.mxu1 %v3256_v0 }
  0x2a   :  { %1271 = vmatpush1.bf16.msra.mxu0 %v3104_v12  ;;  %3011 = vmatpush1.bf16.msra.mxu1 %v3104_v12  ;;  %v3192_v12 = vld [vmem:[%s4435_s3 + $0x98] sm:$0xff]  }
  0x2b   :  { %1272 = vmatprep.subr.bf16.mxu0 %v3256_v0  ;;  %3000 = vmatprep.subr.bf16.mxu1 %v3256_v0 }
  0x2e   :  { %1273 = vmatpush1.bf16.msra.mxu0 %v3105_v13  ;;  %3012 = vmatpush1.bf16.msra.mxu1 %v3105_v13  ;;  %v3147_v13 = vld [vmem:[%s4438_s0 + $0x20] sm:$0xff]  }
  0x2f   :  { %1635 = vmatprep.subr.bf16.mxu0 %v3256_v0 }
  0x31   :  { %1283 = vmatmul.mubr.bf16.vlgmr.msra.gmra.mrb[0].mxu0 %v3107_v14  ;;  %1347 = vmatmul.mubr.bf16.vlgmr.msra.gmra.mrb[0].mxu1 %v3149_v22  ;;  %v3193_v14 = vld [vmem:[%s4436_s2 + $0x98] sm:$0xff]   ;;  %v3155_v22 = vld [vmem:[%s4438_s0 + $0x30] sm:$0xff]  }
  0x32   :  { %1636 = vmatpush1.bf16.msra.mxu0 %v3108_v15  ;;  %2795 = vmatprep.mubr.msk.bf16.mxu0 %vm1153_vm0, %v3110_v16  ;;  %v3150_v15 = vld [vmem:[%s4437_s1 + $0x28] sm:$0xff]   ;;  %v3196_v16 = vld [vmem:[%s4435_s3 + $0xa0] sm:$0xff]  }
  0x33   :  { %1637 = vmatprep.subr.bf16.mxu0 %v3256_v0  ;;  %2803 = vmatprep.mubr.msk.bf16.mxu1 %vm1153_vm0, %v3152_v24  ;;  %v3158_v24 = vld [vmem:[%s4437_s1 + $0x38] sm:$0xff]  }
  0x36   :  { %1638 = vmatpush1.bf16.msra.mxu0 %v3109_v17  ;;  %v3212_v17 = vld [vmem:[%s4439_s7] sm:$0xff]  }
  0x37   :  { %1639 = vmatprep.subr.bf16.mxu0 %v3256_v0  ;;  %2917 = vmatprep.subr.bf16.mxu1 %v3212_v17 }
  0x38   :  { %2918 = vmatpush3.bf16.msra.mxu1 %v3212_v17  ;;  %v3216_v17 = vld [vmem:[%s4438_s0 + $0xa8] sm:$0xff]  }
  0x39   :  { %1291 = vmatmul.mubr.bf16.gmra.mrb[4].mxu0 %v3111_v18  ;;  %1355 = vmatmul.mubr.bf16.gmra.mrb[4].mxu1 %v3153_v27  ;;  %v3151_v18 = vld [vmem:[%s4438_s0 + $0x28] sm:$0xff]   ;;  %v3205_v27 = vld [vmem:[%s4436_s2 + $0xb0] sm:$0xff]  }
  0x3a   :  { %1640 = vmatpush1.bf16.msra.mxu0 %v3112_v19  ;;  %2796 = vmatprep.mubr.msk.bf16.mxu0 %vm1153_vm0, %v3114_v20  ;;  %v3197_v19 = vld [vmem:[%s4436_s2 + $0xa0] sm:$0xff]   ;;  %v3154_v20 = vld [vmem:[%s4437_s1 + $0x30] sm:$0xff]  }
  0x3b   :  { %1641 = vmatprep.subr.bf16.mxu0 %v3256_v0  ;;  %2804 = vmatprep.mubr.msk.bf16.mxu1 %vm1153_vm0, %v3156_v29  ;;  %v3208_v29 = vld [vmem:[%s4435_s3 + $0xb8] sm:$0xff]  }
  0x3e   :  { %1642 = vmatpush1.bf16.msra.mxu0 %v3113_v23  ;;  %v3201_v23 = vld [vmem:[%s4436_s2 + $0xa8] sm:$0xff]  }
  0x3f   :  { %1643 = vmatprep.subr.bf16.mxu0 %v3256_v0 }
  0x41   :  { %1299 = vmatmul.mubr.bf16.gmra.mrb[8].mxu0 %v3115_v25  ;;  %1363 = vmatmul.mubr.bf16.gmra.mrb[8].mxu1 %v3157_v33  ;;  %v3204_v25 = vld [vmem:[%s4435_s3 + $0xb0] sm:$0xff]   ;;  %v3213_v33 = vld [vmem:[%s4435_s3 + $0xc0] sm:$0xff]  }
  0x42   :  { %1644 = vmatpush1.bf16.msra.mxu0 %v3116_v26  ;;  %2797 = vmatprep.mubr.msk.bf16.mxu0 %vm1153_vm0, %v3118_v28  ;;  %v3159_v26 = vld [vmem:[%s4438_s0 + $0x38] sm:$0xff]   ;;  %v3162_v28 = vld [vmem:[%s4437_s1 + $0x40] sm:$0xff]  }
  0x43   :  { %1645 = vmatprep.subr.bf16.mxu0 %v3256_v0  ;;  %2805 = vmatprep.mubr.msk.bf16.mxu1 %vm1153_vm0, %v3160_v35  ;;  %v3214_v35 = vld [vmem:[%s4436_s2 + $0xc0] sm:$0xff]  }
  0x46   :  { %1646 = vmatpush1.bf16.msra.mxu0 %v3117_v30  ;;  %v3163_v30 = vld [vmem:[%s4438_s0 + $0x40] sm:$0xff]  }
  0x47   :  { %1647 = vmatprep.subr.bf16.mxu0 %v3256_v0 }
  0x49   :  { %1307 = vmatmul.mubr.bf16.gmra.mrb[12].mxu0 %v3119_v31  ;;  %1371 = vmatmul.mubr.bf16.gmra.mrb[12].mxu1 %v3161_v39  ;;  %v3209_v31 = vld [vmem:[%s4436_s2 + $0xb8] sm:$0xff]   ;;  %v3218_v39 = vld [vmem:[%s4436_s2 + $0xc8] sm:$0xff]  }
  0x4a   :  { %1648 = vmatpush1.bf16.msra.mxu0 %v3120_v32  ;;  %2798 = vmatprep.mubr.msk.bf16.mxu0 %vm1153_vm0, %v3122_v34  ;;  %v3166_v32 = vld [vmem:[%s4437_s1 + $0x48] sm:$0xff]  }
  0x4b   :  { %1649 = vmatprep.subr.bf16.mxu0 %v3256_v0  ;;  %2806 = vmatprep.mubr.msk.bf16.mxu1 %vm1153_vm0, %v3164_v41  ;;  %v3167_v34 = vld [vmem:[%s4438_s0 + $0x48] sm:$0xff]   ;;  %v3221_v41 = vld [vmem:[%s4435_s3 + $0xd0] sm:$0xff]  }
  0x4e   :  { %1650 = vmatpush1.bf16.msra.mxu0 %v3121_v36  ;;  %v3170_v36 = vld [vmem:[%s4437_s1 + $0x50] sm:$0xff]  }
  0x4f   :  { %1651 = vmatprep.subr.bf16.mxu0 %v3256_v0 }
  0x51   :  { %1315 = vmatmul.mubr.bf16.gmra.mrb[16].mxu0 %v3123_v37  ;;  %1379 = vmatmul.mubr.bf16.gmra.mrb[16].mxu1 %v3165_v45  ;;  %v3217_v37 = vld [vmem:[%s4435_s3 + $0xc8] sm:$0xff]   ;;  %v3178_v45 = vld [vmem:[%s4437_s1 + $0x60] sm:$0xff]  }
  0x52   :  { %1652 = vmatpush1.bf16.msra.mxu0 %v3124_v38  ;;  %2799 = vmatprep.mubr.msk.bf16.mxu0 %vm1153_vm0, %v3126_v40  ;;  %v3171_v38 = vld [vmem:[%s4438_s0 + $0x50] sm:$0xff]   ;;  %v3174_v40 = vld [vmem:[%s4437_s1 + $0x58] sm:$0xff]  }
  0x53   :  { %1653 = vmatprep.subr.bf16.mxu0 %v3256_v0  ;;  %2807 = vmatprep.mubr.msk.bf16.mxu1 %vm1153_vm0, %v3168_v47  ;;  %v3179_v47 = vld [vmem:[%s4438_s0 + $0x60] sm:$0xff]  }
  0x56   :  { %1654 = vmatpush1.bf16.msra.mxu0 %v3125_v42  ;;  %v3237_v42 = vld [vmem:[%s4439_s7 + $0x8] sm:$0xff]  }
  0x57   :  { %1655 = vmatprep.subr.bf16.mxu0 %v3256_v0  ;;  %2919 = vmatprep.subr.bf16.mxu1 %v3237_v42 }
  0x58   :  { %2920 = vmatpush3.bf16.msra.mxu1 %v3237_v42 }
  0x59   :  { %1323 = vmatmul.mubr.bf16.gmra.mrb[20].mxu0 %v3127_v43  ;;  %1387 = vmatmul.mubr.bf16.gmra.mrb[20].mxu1 %v3169_v52  ;;  %v3175_v43 = vld [vmem:[%s4438_s0 + $0x58] sm:$0xff]  }
  0x5a   :  { %1656 = vmatpush1.bf16.msra.mxu0 %v3128_v44  ;;  %2800 = vmatprep.mubr.msk.bf16.mxu0 %vm1153_vm0, %v3130_v46  ;;  %v3222_v44 = vld [vmem:[%s4436_s2 + $0xd0] sm:$0xff]   ;;  %v3225_v46 = vld [vmem:[%s4435_s3 + $0xd8] sm:$0xff]  }
  0x5b   :  { %1657 = vmatprep.subr.bf16.mxu0 %v3256_v0  ;;  %2808 = vmatprep.mubr.msk.bf16.mxu1 %vm1153_vm0, %v3172_v53  ;;  %v3247_v52 = vld [vmem:[%s4439_s7 + $0x18] sm:$0xff]   ;;  %v3183_v53 = vld [vmem:[%s4438_s0 + $0x68] sm:$0xff]  }
  0x5e   :  { %1658 = vmatpush1.bf16.msra.mxu0 %v3129_v48  ;;  %v3226_v48 = vld [vmem:[%s4436_s2 + $0xd8] sm:$0xff]  }
  0x5f   :  { %1659 = vmatprep.subr.bf16.mxu0 %v3256_v0 }
  0x61   :  { %1331 = vmatmul.mubr.bf16.gmra.mrb[24].mxu0 %v3131_v49  ;;  %1395 = vmatmul.mubr.bf16.gmra.mrb[24].mxu1 %v3173_v56  ;;  %v3244_v49 = vld [vmem:[%s4439_s7 + $0x10] sm:$0xff]   ;;  %v3233_v56 = vld [vmem:[%s4435_s3 + $0xe8] sm:$0xff]  }
  0x62   :  { %1660 = vmatpush1.bf16.msra.mxu0 %v3132_v50  ;;  %2801 = vmatprep.mubr.msk.bf16.mxu0 %vm1153_vm0, %v3134_v51  ;;  %v3182_v50 = vld [vmem:[%s4437_s1 + $0x68] sm:$0xff]   ;;  %v3229_v51 = vld [vmem:[%s4435_s3 + $0xe0] sm:$0xff]  }
  0x63   :  { %1661 = vmatprep.subr.bf16.mxu0 %v3256_v0  ;;  %2809 = vmatprep.mubr.msk.bf16.mxu1 %vm1153_vm0, %v3176_v59  ;;  %v3190_v59 = vld [vmem:[%s4437_s1 + $0x78] sm:$0xff]  }
  0x64   :  { %2921 = vmatprep.subr.bf16.mxu1 %v3244_v49 }
  0x65   :  { %2922 = vmatpush3.bf16.msra.mxu1 %v3244_v49  ;;  %v3240_v49 = vld [vmem:[%s4437_s1 + $0xd8] sm:$0xff]  }
  0x66   :  { %1662 = vmatpush1.bf16.msra.mxu0 %v3133_v54  ;;  %2923 = vmatprep.subr.bf16.mxu1 %v3247_v52  ;;  %v3230_v54 = vld [vmem:[%s4436_s2 + $0xe0] sm:$0xff]  }
  0x67   :  { %1663 = vmatprep.subr.bf16.mxu0 %v3256_v0 }
  0x69   :  { %1339 = vmatmul.mubr.bf16.gmra.mrb[28].mxu0 %v3135_v55  ;;  %1403 = vmatmul.mubr.bf16.gmra.mrb[28].mxu1 %v3177_v62  ;;  %v3186_v55 = vld [vmem:[%s4437_s1 + $0x70] sm:$0xff]  }
  0x6a   :  { %1664 = vmatpush1.bf16.msra.mxu0 %v3136_v57  ;;  %1667 = vmatprep.mubr.bf16.mxu0 %v3138_v58  ;;  %v3187_v57 = vld [vmem:[%s4438_s0 + $0x70] sm:$0xff]   ;;  %v3234_v58 = vld [vmem:[%s4436_s2 + $0xe8] sm:$0xff]  }
  0x6b   :  { %1665 = vmatprep.subr.bf16.mxu0 %v3256_v0  ;;  %2810 = vmatprep.mubr.msk.bf16.mxu1 %vm1153_vm0, %v3180_v1  ;;  %v3141_v0 = vld [vmem:[%s4438_s0 + $0x8] sm:$0xff]   ;;  %v3239_v62 = vld [vmem:[%s4436_s2 + $0xf0] sm:$0xff]   ;;  %v3242_v1 = vld [vmem:[%s4435_s3 + $0xf8] sm:$0xff]  }
  0x6c   :  { %2924 = vmatpush3.bf16.msra.mxu1 %v3247_v52  ;;  %v3863_v52 = vld [vmem:[%s4440_s5] ss:$0 sm:$0xff] }
  0x6e   :  { %1666 = vmatpush1.bf16.msra.mxu0 %v3137_v60  ;;  %v3238_v60 = vld [vmem:[%s4435_s3 + $0xf0] sm:$0xff]  }
  0x71   :  { %1668 = vmatmul.mubr.bf16.vlgmr.msra.gmra.mrb[0].mxu0 %v3139_v61  ;;  %1411 = vmatmul.mubr.bf16.gmra.mrb[32].mxu1 %v3181_v2  ;;  %v3191_v61 = vld [vmem:[%s4438_s0 + $0x78] sm:$0xff]  }
  0x72   :  { %1675 = vmatprep.mubr.bf16.mxu0 %v3140_v63  ;;  %2811 = vmatprep.mubr.msk.bf16.mxu1 %vm1153_vm0, %v3184_v4  ;;  %v3194_v63 = vld [vmem:[%s4437_s1 + $0x80] sm:$0xff]   ;;  %v3243_v2 = vld [vmem:[%s4436_s2 + $0xf8] sm:$0xff]   ;;  %v3199_v4 = vld [vmem:[%s4438_s0 + $0x88] sm:$0xff]  }
  0x79   :  { %1676 = vmatmul.mubr.bf16.gmra.mrb[4].mxu0 %v3141_v0  ;;  %1419 = vmatmul.mubr.bf16.gmra.mrb[36].mxu1 %v3185_v6  ;;  %v3195_v0 = vld [vmem:[%s4438_s0 + $0x80] sm:$0xff]   ;;  %v3203_v6 = vld [vmem:[%s4438_s0 + $0x90] sm:$0xff]  }
  0x7a   :  { %1683 = vmatprep.mubr.bf16.mxu0 %v3142_v3  ;;  %2812 = vmatprep.mubr.msk.bf16.mxu1 %vm1153_vm0, %v3188_v8  ;;  %v3198_v3 = vld [vmem:[%s4437_s1 + $0x88] sm:$0xff]   ;;  %v3207_v8 = vld [vmem:[%s4438_s0 + $0x98] sm:$0xff]  }
  0x81   :  { %1684 = vmatmul.mubr.bf16.gmra.mrb[8].mxu0 %v3143_v5  ;;  %1427 = vmatmul.mubr.bf16.gmra.mrb[40].mxu1 %v3189_v10  ;;  %v3202_v5 = vld [vmem:[%s4437_s1 + $0x90] sm:$0xff]  }
  0x82   :  { %1691 = vmatprep.mubr.bf16.mxu0 %v3144_v7  ;;  %2813 = vmatprep.mubr.msk.bf16.mxu1 %vm1153_vm0, %v3192_v12  ;;  %v3206_v7 = vld [vmem:[%s4437_s1 + $0x98] sm:$0xff]  }
  0x89   :  { %1692 = vmatmul.mubr.bf16.gmra.mrb[12].mxu0 %v3145_v9  ;;  %1435 = vmatmul.mubr.bf16.gmra.mrb[44].mxu1 %v3193_v14  ;;  %v3210_v9 = vld [vmem:[%s4437_s1 + $0xa0] sm:$0xff]  }
  0x8a   :  { %1699 = vmatprep.mubr.bf16.mxu0 %v3146_v11  ;;  %2814 = vmatprep.mubr.msk.bf16.mxu1 %vm1153_vm0, %v3196_v16  ;;  %v3211_v11 = vld [vmem:[%s4438_s0 + $0xa0] sm:$0xff]  }
  0x91   :  { %1700 = vmatmul.mubr.bf16.gmra.mrb[16].mxu0 %v3147_v13  ;;  %1443 = vmatmul.mubr.bf16.gmra.mrb[48].mxu1 %v3197_v19  ;;  %v3215_v13 = vld [vmem:[%s4437_s1 + $0xa8] sm:$0xff]   ;;  %v3219_v19 = vld [vmem:[%s4437_s1 + $0xb0] sm:$0xff]  }
  0x92   :  { %1707 = vmatprep.mubr.bf16.mxu0 %v3150_v15  ;;  %2815 = vmatprep.mubr.msk.bf16.mxu1 %vm1153_vm0, %v3200_v21 }
  0x99   :  { %1708 = vmatmul.mubr.bf16.gmra.mrb[20].mxu0 %v3151_v18  ;;  %1451 = vmatmul.mubr.bf16.gmra.mrb[52].mxu1 %v3201_v23  ;;  %v3220_v23 = vld [vmem:[%s4438_s0 + $0xb0] sm:$0xff]  }
  0x9a   :  { %1715 = vmatprep.mubr.bf16.mxu0 %v3154_v20  ;;  %2816 = vmatprep.mubr.msk.bf16.mxu1 %vm1153_vm0, %v3204_v25  ;;  %v3223_v25 = vld [vmem:[%s4437_s1 + $0xb8] sm:$0xff]  }
  0xa1   :  { %1716 = vmatmul.mubr.bf16.gmra.mrb[24].mxu0 %v3155_v22  ;;  %1459 = vmatmul.mubr.bf16.gmra.mrb[56].mxu1 %v3205_v27 }
  0xa2   :  { %1723 = vmatprep.mubr.bf16.mxu0 %v3158_v24  ;;  %2817 = vmatprep.mubr.msk.bf16.mxu1 %vm1153_vm0, %v3208_v29  ;;  %v3224_v29 = vld [vmem:[%s4438_s0 + $0xb8] sm:$0xff]  }
  0xa9   :  { %1724 = vmatmul.mubr.bf16.gmra.mrb[28].mxu0 %v3159_v26  ;;  %1467 = vmatmul.mubr.bf16.gmra.mrb[60].mxu1 %v3209_v31  ;;  %v3227_v31 = vld [vmem:[%s4437_s1 + $0xc0] sm:$0xff]  }
  0xaa   :  { %1731 = vmatprep.mubr.bf16.mxu0 %v3162_v28  ;;  %2818 = vmatprep.mubr.msk.bf16.mxu1 %vm1153_vm0, %v3213_v33 }
  0xb1   :  { %1732 = vmatmul.mubr.bf16.gmra.mrb[32].mxu0 %v3163_v30  ;;  %1475 = vmatmul.mubr.bf16.gmra.mrb[64].mxu1 %v3214_v35  ;;  %v3228_v35 = vld [vmem:[%s4438_s0 + $0xc0] sm:$0xff]  }
  0xb2   :  { %1739 = vmatprep.mubr.bf16.mxu0 %v3166_v32  ;;  %2819 = vmatprep.mubr.msk.bf16.mxu1 %vm1153_vm0, %v3217_v37  ;;  %v3231_v37 = vld [vmem:[%s4437_s1 + $0xc8] sm:$0xff]  }
  0xb9   :  { %1740 = vmatmul.mubr.bf16.gmra.mrb[36].mxu0 %v3167_v34  ;;  %1483 = vmatmul.mubr.bf16.gmra.mrb[68].mxu1 %v3218_v39 }
  0xba   :  { %1747 = vmatprep.mubr.bf16.mxu0 %v3170_v36  ;;  %2820 = vmatprep.mubr.msk.bf16.mxu1 %vm1153_vm0, %v3221_v41  ;;  %v3232_v41 = vld [vmem:[%s4438_s0 + $0xc8] sm:$0xff]  }
  0xc1   :  { %1748 = vmatmul.mubr.bf16.gmra.mrb[40].mxu0 %v3171_v38  ;;  %1491 = vmatmul.mubr.bf16.gmra.mrb[72].mxu1 %v3222_v44 }
  0xc2   :  { %1755 = vmatprep.mubr.bf16.mxu0 %v3174_v40  ;;  %2821 = vmatprep.mubr.msk.bf16.mxu1 %vm1153_vm0, %v3225_v46 }
  0xc9   :  { %1756 = vmatmul.mubr.bf16.gmra.mrb[44].mxu0 %v3175_v43  ;;  %1499 = vmatmul.mubr.bf16.gmra.mrb[76].mxu1 %v3226_v48  ;;  %v3235_v43 = vld [vmem:[%s4437_s1 + $0xd0] sm:$0xff]  }
  0xca   :  { %1763 = vmatprep.mubr.bf16.mxu0 %v3178_v45  ;;  %2822 = vmatprep.mubr.msk.bf16.mxu1 %vm1153_vm0, %v3229_v51 }
  0xd1   :  { %1764 = vmatmul.mubr.bf16.gmra.mrb[48].mxu0 %v3179_v47  ;;  %1507 = vmatmul.mubr.bf16.gmra.mrb[80].mxu1 %v3230_v54  ;;  %v3236_v47 = vld [vmem:[%s4438_s0 + $0xd0] sm:$0xff]   ;;  %v3868_v54 = vld [vmem:[%s4441_s6] ss:$0 sm:$0xff] }
  0xd2   :  { %1771 = vmatprep.mubr.bf16.mxu0 %v3182_v50  ;;  %2823 = vmatprep.mubr.msk.bf16.mxu1 %vm1153_vm0, %v3233_v56 }
  0xd9   :  { %1772 = vmatmul.mubr.bf16.gmra.mrb[52].mxu0 %v3183_v53  ;;  %1515 = vmatmul.mubr.bf16.gmra.mrb[84].mxu1 %v3234_v58  ;;  %v3241_v58 = vld [vmem:[%s4438_s0 + $0xd8] sm:$0xff]  }
  0xda   :  { %1779 = vmatprep.mubr.bf16.mxu0 %v3186_v55  ;;  %2824 = vmatprep.mubr.msk.bf16.mxu1 %vm1153_vm0, %v3238_v60 }
  0xe1   :  { %1780 = vmatmul.mubr.bf16.gmra.mrb[56].mxu0 %v3187_v57  ;;  %1523 = vmatmul.mubr.bf16.gmra.mrb[88].mxu1 %v3239_v62 }
  0xe2   :  { %1787 = vmatprep.mubr.bf16.mxu0 %v3190_v59  ;;  %2825 = vmatprep.mubr.msk.bf16.mxu1 %vm1153_vm0, %v3242_v1 }
  0xe9   :  { %1788 = vmatmul.mubr.bf16.gmra.mrb[60].mxu0 %v3191_v61  ;;  %1531 = vmatmul.mubr.bf16.gmra.mrb[92].mxu1 %v3243_v2  ;;  %v3245_v61 = vld [vmem:[%s4437_s1 + $0xe0] sm:$0xff]  }
  0xea   :  { %1795 = vmatprep.mubr.bf16.mxu0 %v3194_v63 }
  0xf1   :  { %1796 = vmatmul.mubr.bf16.gmra.mrb[64].mxu0 %v3195_v0 }
  0xf2   :  { %1803 = vmatprep.mubr.bf16.mxu0 %v3198_v3 }
  0xf9   :  { %1804 = vmatmul.mubr.bf16.gmra.mrb[68].mxu0 %v3199_v4 }
  0xfa   :  { %1811 = vmatprep.mubr.bf16.mxu0 %v3202_v5 }
 0x101   :  { %1812 = vmatmul.mubr.bf16.gmra.mrb[72].mxu0 %v3203_v6 }
 0x102   :  { %1819 = vmatprep.mubr.bf16.mxu0 %v3206_v7 }
 0x104   :  { %v3790_v10 = vpop.f32.mrb[0].mxu1 }
 0x105   :  { %v1350_v12 = vpop.f32.mrb[1].mxu1 }
 0x106   :  { %v3798_v14 = vpop.f32.mrb[2].mxu1  ;;  %v3246_v12 = vld [vmem:[%s4438_s0 + $0xe0] sm:$0xff]  }
 0x107   :  { %v1353_v15 = vpop.f32.mrb[3].mxu1 }
 0x109   :  { %1820 = vmatmul.mubr.bf16.gmra.mrb[76].mxu0 %v3207_v8 }
 0x10a   :  { %1827 = vmatprep.mubr.bf16.mxu0 %v3210_v9 }
 0x10c   :  { %v3800_v16 = vpop.f32.mrb[4].mxu1 }
 0x10d   :  { %v1358_v18 = vpop.f32.mrb[5].mxu1 }
 0x10e   :  { %v3808_v20 = vpop.f32.mrb[6].mxu1 }
 0x10f   :  { %v1361_v21 = vpop.f32.mrb[7].mxu1 }
 0x111   :  { %1828 = vmatmul.mubr.bf16.gmra.mrb[80].mxu0 %v3211_v11 }
 0x112   :  { %1835 = vmatprep.mubr.bf16.mxu0 %v3215_v13 }
 0x114   :  { %v3810_v22 = vpop.f32.mrb[8].mxu1 }
 0x115   :  { %v1366_v24 = vpop.f32.mrb[9].mxu1 }
 0x116   :  { %v3818_v26 = vpop.f32.mrb[10].mxu1 }
 0x117   :  { %v1369_v27 = vpop.f32.mrb[11].mxu1 }
 0x119   :  { %1836 = vmatmul.mubr.bf16.gmra.mrb[84].mxu0 %v3216_v17  ;;  %v3248_v17 = vld [vmem:[%s4437_s1 + $0xe8] sm:$0xff]  }
 0x11a   :  { %1843 = vmatprep.mubr.bf16.mxu0 %v3219_v19 }
 0x11c   :  { %v3820_v28 = vpop.f32.mrb[12].mxu1 }
 0x11d   :  { %v1374_v30 = vpop.f32.mrb[13].mxu1 }
 0x11e   :  { %v3828_v32 = vpop.f32.mrb[14].mxu1 }
 0x11f   :  { %v1377_v33 = vpop.f32.mrb[15].mxu1 }
 0x121   :  { %1844 = vmatmul.mubr.bf16.gmra.mrb[88].mxu0 %v3220_v23 }
 0x122   :  { %1851 = vmatprep.mubr.bf16.mxu0 %v3223_v25 }
 0x124   :  { %v3830_v34 = vpop.f32.mrb[16].mxu1 }
 0x125   :  { %v1382_v36 = vpop.f32.mrb[17].mxu1 }
 0x126   :  { %v3838_v38 = vpop.f32.mrb[18].mxu1 }
 0x127   :  { %v1385_v39 = vpop.f32.mrb[19].mxu1 }
 0x129   :  { %1852 = vmatmul.mubr.bf16.gmra.mrb[92].mxu0 %v3224_v29 }
 0x12a   :  { %1859 = vmatprep.mubr.bf16.mxu0 %v3227_v31 }
 0x12c   :  { %v3840_v40 = vpop.f32.mrb[20].mxu1 }
 0x12d   :  { %v1390_v42 = vpop.f32.mrb[21].mxu1 }
 0x12e   :  { %v3848_v44 = vpop.f32.mrb[22].mxu1  ;;  %v3250_v42 = vld [vmem:[%s4437_s1 + $0xf0] sm:$0xff]  }
 0x12f   :  { %v1393_v45 = vpop.f32.mrb[23].mxu1 }
 0x131   :  { %1860 = vmatmul.mubr.bf16.gmra.mrb[96].mxu0 %v3228_v35 }
 0x132   :  { %1867 = vmatprep.mubr.bf16.mxu0 %v3231_v37  ;;  %v3249_v37 = vld [vmem:[%s4438_s0 + $0xe8] sm:$0xff]  }
 0x134   :  { %v3850_v46 = vpop.f32.mrb[24].mxu1 }
 0x135   :  { %v1398_v48 = vpop.f32.mrb[25].mxu1 }
 0x136   :  { %v3858_v50 = vpop.f32.mrb[26].mxu1 }
 0x137   :  { %v1401_v51 = vpop.f32.mrb[27].mxu1 }
 0x139   :  { %1868 = vmatmul.mubr.bf16.gmra.mrb[100].mxu0 %v3232_v41 }
 0x13a   :  { %1875 = vmatprep.mubr.bf16.mxu0 %v3235_v43 }
 0x13c   :  { %v3870_v55 = vpop.f32.mrb[28].mxu1 }
 0x13d   :  { %v1406_v59 = vpop.f32.mrb[29].mxu1 }
 0x13e   :  { %v3879_v62 = vpop.f32.mrb[30].mxu1 }
 0x13f   :  { %v1409_v2 = vpop.f32.mrb[31].mxu1 }
 0x140   :  { %v3252_v2 = vld [vmem:[%s4437_s1 + $0xf8] sm:$0xff]  }
 0x141   :  { %1876 = vmatmul.mubr.bf16.gmra.mrb[104].mxu0 %v3236_v47 }
 0x142   :  { %1883 = vmatprep.mubr.bf16.mxu0 %v3240_v49 }
 0x144   :  { %v1669_v53 = vpop.f32.mrb[0].mxu0  ;;  %v3884_v7 = vpop.f32.mrb[32].mxu1 }
 0x145   :  { %v1931_v56 = vmul.f32 %v3863_v52, %v1669_v53  ;;  %v1671_v57 = vpop.f32.mrb[1].mxu0  ;;  %v1414_v13 = vpop.f32.mrb[33].mxu1 }
 0x146   :  { %v1672_v60 = vpop.f32.mrb[2].mxu0  ;;  %v3893_v18 = vpop.f32.mrb[34].mxu1 }
 0x147   :  { %v2002_v63 = vadd.f32 %v3868_v54, %v1931_v56  ;;  %v1932_v1 = vmul.f32 %v3863_v52, %v1672_v60  ;;  %v1674_v0 = vpop.f32.mrb[3].mxu0  ;;  %v1417_v24 = vpop.f32.mrb[35].mxu1 }
 0x149   :  { %v2003_v3 = vadd.f32 %v3868_v54, %v1932_v1  ;;  %1884 = vmatmul.mubr.bf16.gmra.mrb[108].mxu0 %v3241_v58  ;;  %v2066_v4 = vmax.f32 %v2002_v63, 0.0  ;;  %v3251_v63 = vld [vmem:[%s4438_s0 + $0xf0] sm:$0xff]  }
 0x14a   :  { %1891 = vmatprep.mubr.bf16.mxu0 %v3245_v61 }
 0x14b   :  { %v2067_v5 = vmax.f32 %v2003_v3, 0.0 }
 0x14c   :  { %v1677_v6 = vpop.f32.mrb[4].mxu0  ;;  %v3899_v31 = vpop.f32.mrb[36].mxu1 }
 0x14d   :  { %v2130_v8 = vpack.c.bf16 %v2067_v5, %v2066_v4  ;;  %v1933_v9 = vmul.f32 %v3863_v52, %v1677_v6  ;;  %v1679_v11 = vpop.f32.mrb[5].mxu0  ;;  %v1422_v39 = vpop.f32.mrb[37].mxu1 }
 0x14e   :  { %v1680_v15 = vpop.f32.mrb[6].mxu0  ;;  %v3908_v43 = vpop.f32.mrb[38].mxu1 }
 0x14f   :  { %v2004_v19 = vadd.f32 %v3868_v54, %v1933_v9  ;;  %v1934_v21 = vmul.f32 %v3863_v52, %v1680_v15  ;;  %v1682_v23 = vpop.f32.mrb[7].mxu0  ;;  %2925 = vmatprep.mubr.msk.bf16.mxu1 %vm1153_vm0, %v2130_v8  ;;  %v1425_v49 = vpop.f32.mrb[39].mxu1 }
 0x150   :  { %v3253_v23 = vld [vmem:[%s4438_s0 + $0xf8] sm:$0xff]  }
 0x151   :  { %v2005_v25 = vadd.f32 %v3868_v54, %v1934_v21  ;;  %1892 = vmatmul.mubr.bf16.gmra.mrb[112].mxu0 %v3246_v12  ;;  %v2068_v27 = vmax.f32 %v2004_v19, 0.0 }
 0x152   :  { %1899 = vmatprep.mubr.bf16.mxu0 %v3248_v17 }
 0x153   :  { %v2069_v29 = vmax.f32 %v2005_v25, 0.0 }
 0x154   :  { %v1685_v30 = vpop.f32.mrb[8].mxu0  ;;  %v3914_v58 = vpop.f32.mrb[40].mxu1 }
 0x155   :  { %v2131_v33 = vpack.c.bf16 %v2069_v29, %v2068_v27  ;;  %v1935_v35 = vmul.f32 %v3863_v52, %v1685_v30  ;;  %v1687_v36 = vpop.f32.mrb[9].mxu0  ;;  %v1430_v1 = vpop.f32.mrb[41].mxu1 }
 0x156   :  { %v1688_v41 = vpop.f32.mrb[10].mxu0  ;;  %v3923_v3 = vpop.f32.mrb[42].mxu1 }
 0x157   :  { %v2006_v45 = vadd.f32 %v3868_v54, %v1935_v35  ;;  %v1936_v47 = vmul.f32 %v3863_v52, %v1688_v41  ;;  %v1690_v48 = vpop.f32.mrb[11].mxu0  ;;  %2926 = vmatmul.mubr.msk.bf16.vlgmr.msra.gmra.mrb[96].mxu1 %vm1153_vm0, %v2131_v33  ;;  %v1433_v8 = vpop.f32.mrb[43].mxu1 }
 0x159   :  { %v2007_v51 = vadd.f32 %v3868_v54, %v1936_v47  ;;  %1900 = vmatmul.mubr.bf16.gmra.mrb[116].mxu0 %v3249_v37  ;;  %v2070_v53 = vmax.f32 %v2006_v45, 0.0 }
 0x15a   :  { %1907 = vmatprep.mubr.bf16.mxu0 %v3250_v42 }
 0x15b   :  { %v2071_v56 = vmax.f32 %v2007_v51, 0.0 }
 0x15c   :  { %v1693_v57 = vpop.f32.mrb[12].mxu0  ;;  %v3929_v15 = vpop.f32.mrb[44].mxu1 }
 0x15d   :  { %v2132_v59 = vpack.c.bf16 %v2071_v56, %v2070_v53  ;;  %v1937_v60 = vmul.f32 %v3863_v52, %v1693_v57  ;;  %v1695_v61 = vpop.f32.mrb[13].mxu0  ;;  %v1438_v24 = vpop.f32.mrb[45].mxu1 }
 0x15e   :  { %v1696_v0 = vpop.f32.mrb[14].mxu0  ;;  %v3935_v27 = vpop.f32.mrb[46].mxu1 }
 0x15f   :  { %v2008_v4 = vadd.f32 %v3868_v54, %v1937_v60  ;;  %v1938_v5 = vmul.f32 %v3863_v52, %v1696_v0  ;;  %v1698_v6 = vpop.f32.mrb[15].mxu0  ;;  %2929 = vmatprep.mubr.msk.bf16.mxu1 %vm1153_vm0, %v2132_v59  ;;  %v1441_v35 = vpop.f32.mrb[47].mxu1 }
 0x161   :  { %v2009_v9 = vadd.f32 %v3868_v54, %v1938_v5  ;;  %1908 = vmatmul.mubr.bf16.gmra.mrb[120].mxu0 %v3251_v63  ;;  %v2072_v11 = vmax.f32 %v2008_v4, 0.0 }
 0x162   :  { %1915 = vmatprep.mubr.bf16.mxu0 %v3252_v2 }
 0x163   :  { %v2073_v12 = vmax.f32 %v2009_v9, 0.0 }
 0x164   :  { %v1701_v13 = vpop.f32.mrb[16].mxu0  ;;  %v3941_v42 = vpop.f32.mrb[48].mxu1 }
 0x165   :  { %v2133_v17 = vpack.c.bf16 %v2073_v12, %v2072_v11  ;;  %v1939_v19 = vmul.f32 %v3863_v52, %v1701_v13  ;;  %v1703_v21 = vpop.f32.mrb[17].mxu0  ;;  %v1446_v49 = vpop.f32.mrb[49].mxu1 }
 0x166   :  { %v1704_v25 = vpop.f32.mrb[18].mxu0  ;;  %v3944_v53 = vpop.f32.mrb[50].mxu1 }
 0x167   :  { %v2010_v29 = vadd.f32 %v3868_v54, %v1939_v19  ;;  %v1940_v30 = vmul.f32 %v3863_v52, %v1704_v25  ;;  %v1706_v33 = vpop.f32.mrb[19].mxu0  ;;  %2930 = vmatmul.mubr.msk.bf16.gmra.mrb[100].mxu1 %vm1153_vm0, %v2133_v17  ;;  %v1449_v60 = vpop.f32.mrb[51].mxu1 }
 0x169   :  { %v2011_v36 = vadd.f32 %v3868_v54, %v1940_v30  ;;  %1916 = vmatmul.mubr.bf16.gmra.mrb[124].mxu0 %v3253_v23  ;;  %v2074_v37 = vmax.f32 %v2010_v29, 0.0 }
 0x16b   :  { %v2075_v39 = vmax.f32 %v2011_v36, 0.0 }
 0x16c   :  { %v1709_v41 = vpop.f32.mrb[20].mxu0  ;;  %v3950_v2 = vpop.f32.mrb[52].mxu1 }
 0x16d   :  { %v2134_v45 = vpack.c.bf16 %v2075_v39, %v2074_v37  ;;  %v1941_v47 = vmul.f32 %v3863_v52, %v1709_v41  ;;  %v1711_v48 = vpop.f32.mrb[21].mxu0  ;;  %v1454_v8 = vpop.f32.mrb[53].mxu1 }
 0x16e   :  { %v1712_v51 = vpop.f32.mrb[22].mxu0  ;;  %v3953_v11 = vpop.f32.mrb[54].mxu1 }
 0x16f   :  { %v2012_v56 = vadd.f32 %v3868_v54, %v1941_v47  ;;  %v1942_v57 = vmul.f32 %v3863_v52, %v1712_v51  ;;  %v1714_v59 = vpop.f32.mrb[23].mxu0  ;;  %2933 = vmatprep.mubr.msk.bf16.mxu1 %vm1153_vm0, %v2134_v45  ;;  %v1457_v19 = vpop.f32.mrb[55].mxu1 }
 0x171   :  { %v2013_v61 = vadd.f32 %v3868_v54, %v1942_v57  ;;  %v2076_v63 = vmax.f32 %v2012_v56, 0.0 }
 0x173   :  { %v2077_v1 = vmax.f32 %v2013_v61, 0.0 }
 0x174   :  { %v1717_v0 = vpop.f32.mrb[24].mxu0  ;;  %v3959_v29 = vpop.f32.mrb[56].mxu1 }
 0x175   :  { %v2135_v4 = vpack.c.bf16 %v2077_v1, %v2076_v63  ;;  %v1943_v5 = vmul.f32 %v3863_v52, %v1717_v0  ;;  %v1719_v6 = vpop.f32.mrb[25].mxu0  ;;  %v1462_v36 = vpop.f32.mrb[57].mxu1 }
 0x176   :  { %v1720_v9 = vpop.f32.mrb[26].mxu0  ;;  %v3962_v39 = vpop.f32.mrb[58].mxu1 }
 0x177   :  { %v2014_v12 = vadd.f32 %v3868_v54, %v1943_v5  ;;  %v1944_v13 = vmul.f32 %v3863_v52, %v1720_v9  ;;  %v1722_v17 = vpop.f32.mrb[27].mxu0  ;;  %2934 = vmatmul.mubr.msk.bf16.gmra.mrb[104].mxu1 %vm1153_vm0, %v2135_v4  ;;  %v1465_v48 = vpop.f32.mrb[59].mxu1 }
 0x179   :  { %v2015_v21 = vadd.f32 %v3868_v54, %v1944_v13  ;;  %v2078_v23 = vmax.f32 %v2014_v12, 0.0 }
 0x17b   :  { %v2079_v24 = vmax.f32 %v2015_v21, 0.0 }
 0x17c   :  { %v1725_v25 = vpop.f32.mrb[28].mxu0  ;;  %v3968_v59 = vpop.f32.mrb[60].mxu1 }
 0x17d   :  { %v2136_v30 = vpack.c.bf16 %v2079_v24, %v2078_v23  ;;  %v1945_v33 = vmul.f32 %v3863_v52, %v1725_v25  ;;  %v1727_v35 = vpop.f32.mrb[29].mxu0  ;;  %v1470_v1 = vpop.f32.mrb[61].mxu1 }
 0x17e   :  { %v1728_v37 = vpop.f32.mrb[30].mxu0  ;;  %v3971_v4 = vpop.f32.mrb[62].mxu1 }
 0x17f   :  { %v2016_v41 = vadd.f32 %v3868_v54, %v1945_v33  ;;  %v1946_v45 = vmul.f32 %v3863_v52, %v1728_v37  ;;  %v1730_v47 = vpop.f32.mrb[31].mxu0  ;;  %2937 = vmatprep.mubr.msk.bf16.mxu1 %vm1153_vm0, %v2136_v30  ;;  %v1473_v9 = vpop.f32.mrb[63].mxu1 }
 0x181   :  { %v2017_v49 = vadd.f32 %v3868_v54, %v1946_v45  ;;  %v2080_v51 = vmax.f32 %v2016_v41, 0.0 }
 0x183   :  { %v2081_v56 = vmax.f32 %v2017_v49, 0.0 }
 0x184   :  { %v1733_v57 = vpop.f32.mrb[32].mxu0  ;;  %v3979_v19 = vpop.f32.mrb[64].mxu1 }
 0x185   :  { %v2137_v60 = vpack.c.bf16 %v2081_v56, %v2080_v51  ;;  %v1734_v61 = vadd.f32 %v1733_v57, %v3790_v10  ;;  %v1735_v63 = vpop.f32.mrb[33].mxu0  ;;  %v1478_v30 = vpop.f32.mrb[65].mxu1 }
 0x186   :  { %v1736_v0 = vpop.f32.mrb[34].mxu0  ;;  %v3982_v33 = vpop.f32.mrb[66].mxu1 }
 0x187   :  { %v1947_v5 = vmul.f32 %v3863_v52, %v1734_v61  ;;  %v1737_v6 = vadd.f32 %v1736_v0, %v3798_v14  ;;  %v1738_v8 = vpop.f32.mrb[35].mxu0  ;;  %2938 = vmatmul.mubr.msk.bf16.gmra.mrb[108].mxu1 %vm1153_vm0, %v2137_v60  ;;  %v1481_v45 = vpop.f32.mrb[67].mxu1 }
 0x189   :  { %v2018_v12 = vadd.f32 %v3868_v54, %v1947_v5  ;;  %v1948_v13 = vmul.f32 %v3863_v52, %v1737_v6 }
 0x18b   :  { %v2019_v17 = vadd.f32 %v3868_v54, %v1948_v13  ;;  %v2082_v21 = vmax.f32 %v2018_v12, 0.0 }
 0x18c   :  { %v1741_v10 = vpop.f32.mrb[36].mxu0  ;;  %v3990_v51 = vpop.f32.mrb[68].mxu1 }
 0x18d   :  { %v2083_v23 = vmax.f32 %v2019_v17, 0.0  ;;  %v1742_v24 = vadd.f32 %v1741_v10, %v3800_v16  ;;  %v1743_v25 = vpop.f32.mrb[37].mxu0  ;;  %v1486_v63 = vpop.f32.mrb[69].mxu1 }
 0x18e   :  { %v1744_v14 = vpop.f32.mrb[38].mxu0  ;;  %v3993_v1 = vpop.f32.mrb[70].mxu1 }
 0x18f   :  { %v2138_v35 = vpack.c.bf16 %v2083_v23, %v2082_v21  ;;  %v1949_v36 = vmul.f32 %v3863_v52, %v1742_v24  ;;  %v1745_v37 = vadd.f32 %v1744_v14, %v3808_v20  ;;  %v1746_v41 = vpop.f32.mrb[39].mxu0  ;;  %v1489_v9 = vpop.f32.mrb[71].mxu1 }
 0x191   :  { %v2020_v47 = vadd.f32 %v3868_v54, %v1949_v36  ;;  %v1950_v48 = vmul.f32 %v3863_v52, %v1745_v37  ;;  %2941 = vmatprep.mubr.msk.bf16.mxu1 %vm1153_vm0, %v2138_v35 }
 0x193   :  { %v2021_v16 = vadd.f32 %v3868_v54, %v1950_v48  ;;  %v2084_v56 = vmax.f32 %v2020_v47, 0.0 }
 0x194   :  { %v1749_v49 = vpop.f32.mrb[40].mxu0  ;;  %v4001_v10 = vpop.f32.mrb[72].mxu1 }
 0x195   :  { %v2085_v57 = vmax.f32 %v2021_v16, 0.0  ;;  %v1750_v60 = vadd.f32 %v1749_v49, %v3810_v22  ;;  %v1751_v61 = vpop.f32.mrb[41].mxu0  ;;  %v1494_v30 = vpop.f32.mrb[73].mxu1 }
 0x196   :  { %v1752_v20 = vpop.f32.mrb[42].mxu0  ;;  %v4004_v14 = vpop.f32.mrb[74].mxu1 }
 0x197   :  { %v2139_v0 = vpack.c.bf16 %v2085_v57, %v2084_v56  ;;  %v1951_v5 = vmul.f32 %v3863_v52, %v1750_v60  ;;  %v1753_v6 = vadd.f32 %v1752_v20, %v3818_v26  ;;  %v1754_v8 = vpop.f32.mrb[43].mxu0  ;;  %v1497_v45 = vpop.f32.mrb[75].mxu1 }
 0x199   :  { %v2022_v12 = vadd.f32 %v3868_v54, %v1951_v5  ;;  %v1952_v13 = vmul.f32 %v3863_v52, %v1753_v6  ;;  %2942 = vmatmul.mubr.msk.bf16.gmra.mrb[112].mxu1 %vm1153_vm0, %v2139_v0 }
 0x19b   :  { %v2023_v22 = vadd.f32 %v3868_v54, %v1952_v13  ;;  %v2086_v21 = vmax.f32 %v2022_v12, 0.0 }
 0x19c   :  { %v1757_v17 = vpop.f32.mrb[44].mxu0  ;;  %v4012_v49 = vpop.f32.mrb[76].mxu1 }
 0x19d   :  { %v2087_v23 = vmax.f32 %v2023_v22, 0.0  ;;  %v1758_v24 = vadd.f32 %v1757_v17, %v3820_v28  ;;  %v1759_v25 = vpop.f32.mrb[45].mxu0  ;;  %v1502_v63 = vpop.f32.mrb[77].mxu1 }
 0x19e   :  { %v1760_v26 = vpop.f32.mrb[46].mxu0  ;;  %v4015_v20 = vpop.f32.mrb[78].mxu1 }
 0x19f   :  { %v2140_v35 = vpack.c.bf16 %v2087_v23, %v2086_v21  ;;  %v1953_v36 = vmul.f32 %v3863_v52, %v1758_v24  ;;  %v1761_v37 = vadd.f32 %v1760_v26, %v3828_v32  ;;  %v1762_v41 = vpop.f32.mrb[47].mxu0  ;;  %v1505_v9 = vpop.f32.mrb[79].mxu1 }
 0x1a1   :  { %v2024_v47 = vadd.f32 %v3868_v54, %v1953_v36  ;;  %v1954_v48 = vmul.f32 %v3863_v52, %v1761_v37  ;;  %2945 = vmatprep.mubr.msk.bf16.mxu1 %vm1153_vm0, %v2140_v35 }
 0x1a3   :  { %v2025_v28 = vadd.f32 %v3868_v54, %v1954_v48  ;;  %v2088_v56 = vmax.f32 %v2024_v47, 0.0 }
 0x1a4   :  { %v1765_v16 = vpop.f32.mrb[48].mxu0  ;;  %v4023_v17 = vpop.f32.mrb[80].mxu1 }
 0x1a5   :  { %v2089_v57 = vmax.f32 %v2025_v28, 0.0  ;;  %v1766_v60 = vadd.f32 %v1765_v16, %v3830_v34  ;;  %v1767_v61 = vpop.f32.mrb[49].mxu0  ;;  %v1510_v30 = vpop.f32.mrb[81].mxu1 }
 0x1a6   :  { %v1768_v32 = vpop.f32.mrb[50].mxu0  ;;  %v4026_v26 = vpop.f32.mrb[82].mxu1 }
 0x1a7   :  { %v2141_v0 = vpack.c.bf16 %v2089_v57, %v2088_v56  ;;  %v1955_v5 = vmul.f32 %v3863_v52, %v1766_v60  ;;  %v1769_v6 = vadd.f32 %v1768_v32, %v3838_v38  ;;  %v1770_v8 = vpop.f32.mrb[51].mxu0  ;;  %v1513_v45 = vpop.f32.mrb[83].mxu1 }
 0x1a9   :  { %v2026_v12 = vadd.f32 %v3868_v54, %v1955_v5  ;;  %v1956_v13 = vmul.f32 %v3863_v52, %v1769_v6  ;;  %2946 = vmatmul.mubr.msk.bf16.gmra.mrb[116].mxu1 %vm1153_vm0, %v2141_v0 }
 0x1ab   :  { %v2027_v34 = vadd.f32 %v3868_v54, %v1956_v13  ;;  %v2090_v21 = vmax.f32 %v2026_v12, 0.0 }
 0x1ac   :  { %v1773_v22 = vpop.f32.mrb[52].mxu0  ;;  %v4034_v16 = vpop.f32.mrb[84].mxu1 }
 0x1ad   :  { %v2091_v23 = vmax.f32 %v2027_v34, 0.0  ;;  %v1774_v24 = vadd.f32 %v1773_v22, %v3840_v40  ;;  %v1775_v25 = vpop.f32.mrb[53].mxu0  ;;  %v1518_v63 = vpop.f32.mrb[85].mxu1 }
 0x1ae   :  { %v1776_v38 = vpop.f32.mrb[54].mxu0  ;;  %v4037_v32 = vpop.f32.mrb[86].mxu1 }
 0x1af   :  { %v2142_v35 = vpack.c.bf16 %v2091_v23, %v2090_v21  ;;  %v1957_v36 = vmul.f32 %v3863_v52, %v1774_v24  ;;  %v1777_v37 = vadd.f32 %v1776_v38, %v3848_v44  ;;  %v1778_v41 = vpop.f32.mrb[55].mxu0  ;;  %v1521_v9 = vpop.f32.mrb[87].mxu1 }
 0x1b1   :  { %v2028_v47 = vadd.f32 %v3868_v54, %v1957_v36  ;;  %v1958_v48 = vmul.f32 %v3863_v52, %v1777_v37  ;;  %2949 = vmatprep.mubr.msk.bf16.mxu1 %vm1153_vm0, %v2142_v35 }
 0x1b3   :  { %v2029_v40 = vadd.f32 %v3868_v54, %v1958_v48  ;;  %v2092_v56 = vmax.f32 %v2028_v47, 0.0 }
 0x1b4   :  { %v1781_v28 = vpop.f32.mrb[56].mxu0  ;;  %v4045_v22 = vpop.f32.mrb[88].mxu1 }
 0x1b5   :  { %v2093_v57 = vmax.f32 %v2029_v40, 0.0  ;;  %v1782_v60 = vadd.f32 %v1781_v28, %v3850_v46  ;;  %v1783_v61 = vpop.f32.mrb[57].mxu0  ;;  %v1526_v30 = vpop.f32.mrb[89].mxu1 }
 0x1b6   :  { %v1784_v44 = vpop.f32.mrb[58].mxu0  ;;  %v4048_v38 = vpop.f32.mrb[90].mxu1 }
 0x1b7   :  { %v2143_v0 = vpack.c.bf16 %v2093_v57, %v2092_v56  ;;  %v1959_v5 = vmul.f32 %v3863_v52, %v1782_v60  ;;  %v1785_v6 = vadd.f32 %v1784_v44, %v3858_v50  ;;  %v1786_v8 = vpop.f32.mrb[59].mxu0  ;;  %v1529_v45 = vpop.f32.mrb[91].mxu1 }
 0x1b9   :  { %v2030_v12 = vadd.f32 %v3868_v54, %v1959_v5  ;;  %v1960_v13 = vmul.f32 %v3863_v52, %v1785_v6  ;;  %2950 = vmatmul.mubr.msk.bf16.gmra.mrb[120].mxu1 %vm1153_vm0, %v2143_v0 }
 0x1bb   :  { %v2031_v46 = vadd.f32 %v3868_v54, %v1960_v13  ;;  %v2094_v21 = vmax.f32 %v2030_v12, 0.0 }
 0x1bc   :  { %v1789_v34 = vpop.f32.mrb[60].mxu0  ;;  %v4056_v28 = vpop.f32.mrb[92].mxu1 }
 0x1bd   :  { %v2095_v23 = vmax.f32 %v2031_v46, 0.0  ;;  %v1790_v24 = vadd.f32 %v1789_v34, %v3870_v55  ;;  %v1791_v25 = vpop.f32.mrb[61].mxu0  ;;  %v1534_v63 = vpop.f32.mrb[93].mxu1 }
 0x1be   :  { %v1792_v50 = vpop.f32.mrb[62].mxu0  ;;  %v4059_v44 = vpop.f32.mrb[94].mxu1 }
 0x1bf   :  { %v2144_v35 = vpack.c.bf16 %v2095_v23, %v2094_v21  ;;  %v1961_v36 = vmul.f32 %v3863_v52, %v1790_v24  ;;  %v1793_v37 = vadd.f32 %v1792_v50, %v3879_v62  ;;  %v1794_v41 = vpop.f32.mrb[63].mxu0  ;;  %v1537_v9 = vpop.f32.mrb[95].mxu1 }
 0x1c1   :  { %v2032_v47 = vadd.f32 %v3868_v54, %v1961_v36  ;;  %v1962_v48 = vmul.f32 %v3863_v52, %v1793_v37  ;;  %2953 = vmatprep.mubr.msk.bf16.mxu1 %vm1153_vm0, %v2144_v35 }
 0x1c3   :  { %v2033_v55 = vadd.f32 %v3868_v54, %v1962_v48  ;;  %v2096_v56 = vmax.f32 %v2032_v47, 0.0 }
 0x1c4   :  { %v1797_v40 = vpop.f32.mrb[64].mxu0 }
 0x1c5   :  { %v2097_v57 = vmax.f32 %v2033_v55, 0.0  ;;  %v1798_v60 = vadd.f32 %v1797_v40, %v3884_v7  ;;  %v1799_v61 = vpop.f32.mrb[65].mxu0 }
 0x1c6   :  { %v1800_v62 = vpop.f32.mrb[66].mxu0 }
 0x1c7   :  { %v2145_v0 = vpack.c.bf16 %v2097_v57, %v2096_v56  ;;  %v1963_v5 = vmul.f32 %v3863_v52, %v1798_v60  ;;  %v1801_v6 = vadd.f32 %v1800_v62, %v3893_v18  ;;  %v1802_v8 = vpop.f32.mrb[67].mxu0 }
 0x1c9   :  { %v2034_v12 = vadd.f32 %v3868_v54, %v1963_v5  ;;  %v1964_v13 = vmul.f32 %v3863_v52, %v1801_v6  ;;  %2954 = vmatmul.mubr.msk.bf16.gmra.mrb[124].mxu1 %vm1153_vm0, %v2145_v0 }
 0x1cb   :  { %v2035_v7 = vadd.f32 %v3868_v54, %v1964_v13  ;;  %v2098_v34 = vmax.f32 %v2034_v12, 0.0 }
 0x1cc   :  { %v1805_v46 = vpop.f32.mrb[68].mxu0 }
 0x1cd   :  { %v2099_v21 = vmax.f32 %v2035_v7, 0.0  ;;  %v1806_v23 = vadd.f32 %v1805_v46, %v3899_v31  ;;  %v1807_v24 = vpop.f32.mrb[69].mxu0 }
 0x1ce   :  { %v1808_v25 = vpop.f32.mrb[70].mxu0 }
 0x1cf   :  { %v2146_v30 = vpack.c.bf16 %v2099_v21, %v2098_v34  ;;  %v1965_v18 = vmul.f32 %v3863_v52, %v1806_v23  ;;  %v1809_v50 = vadd.f32 %v1808_v25, %v3908_v43  ;;  %v1810_v35 = vpop.f32.mrb[71].mxu0 }
 0x1d1   :  { %v2036_v36 = vadd.f32 %v3868_v54, %v1965_v18  ;;  %v1966_v37 = vmul.f32 %v3863_v52, %v1809_v50  ;;  %2957 = vmatprep.mubr.msk.bf16.mxu1 %vm1153_vm0, %v2146_v30 }
 0x1d3   :  { %v2037_v41 = vadd.f32 %v3868_v54, %v1966_v37  ;;  %v2100_v47 = vmax.f32 %v2036_v36, 0.0 }
 0x1d4   :  { %v1813_v45 = vpop.f32.mrb[72].mxu0 }
 0x1d5   :  { %v2101_v48 = vmax.f32 %v2037_v41, 0.0  ;;  %v1814_v31 = vadd.f32 %v1813_v45, %v3914_v58  ;;  %v1815_v55 = vpop.f32.mrb[73].mxu0 }
 0x1d6   :  { %v1816_v40 = vpop.f32.mrb[74].mxu0 }
 0x1d7   :  { %v2147_v56 = vpack.c.bf16 %v2101_v48, %v2100_v47  ;;  %v1967_v57 = vmul.f32 %v3863_v52, %v1814_v31  ;;  %v1817_v43 = vadd.f32 %v1816_v40, %v3923_v3  ;;  %v1818_v60 = vpop.f32.mrb[75].mxu0 }
 0x1d9   :  { %v2038_v61 = vadd.f32 %v3868_v54, %v1967_v57  ;;  %v1968_v63 = vmul.f32 %v3863_v52, %v1817_v43  ;;  %2958 = vmatmul.mubr.msk.bf16.gmra.mrb[128].mxu1 %vm1153_vm0, %v2147_v56 }
 0x1db   :  { %v2039_v62 = vadd.f32 %v3868_v54, %v1968_v63  ;;  %v2102_v5 = vmax.f32 %v2038_v61, 0.0 }
 0x1dc   :  { %v1821_v0 = vpop.f32.mrb[76].mxu0 }
 0x1dd   :  { %v2103_v6 = vmax.f32 %v2039_v62, 0.0  ;;  %v1822_v58 = vadd.f32 %v1821_v0, %v3929_v15  ;;  %v1823_v8 = vpop.f32.mrb[77].mxu0 }
 0x1de   :  { %v1824_v9 = vpop.f32.mrb[78].mxu0 }
 0x1df   :  { %v2148_v12 = vpack.c.bf16 %v2103_v6, %v2102_v5  ;;  %v1969_v13 = vmul.f32 %v3863_v52, %v1822_v58  ;;  %v1825_v3 = vadd.f32 %v1824_v9, %v3935_v27  ;;  %v1826_v7 = vpop.f32.mrb[79].mxu0 }
 0x1e1   :  { %v2040_v46 = vadd.f32 %v3868_v54, %v1969_v13  ;;  %v1970_v34 = vmul.f32 %v3863_v52, %v1825_v3  ;;  %2961 = vmatprep.mubr.msk.bf16.mxu1 %vm1153_vm0, %v2148_v12 }
 0x1e3   :  { %v2041_v21 = vadd.f32 %v3868_v54, %v1970_v34  ;;  %v2104_v24 = vmax.f32 %v2040_v46, 0.0 }
 0x1e4   :  { %v1829_v23 = vpop.f32.mrb[80].mxu0 }
 0x1e5   :  { %v2105_v25 = vmax.f32 %v2041_v21, 0.0  ;;  %v1830_v15 = vadd.f32 %v1829_v23, %v3941_v42  ;;  %v1831_v30 = vpop.f32.mrb[81].mxu0 }
 0x1e6   :  { %v1832_v18 = vpop.f32.mrb[82].mxu0 }
 0x1e7   :  { %v2149_v50 = vpack.c.bf16 %v2105_v25, %v2104_v24  ;;  %v1971_v35 = vmul.f32 %v3863_v52, %v1830_v15  ;;  %v1833_v27 = vadd.f32 %v1832_v18, %v3944_v53  ;;  %v1834_v36 = vpop.f32.mrb[83].mxu0 }
 0x1e9   :  { %v2042_v37 = vadd.f32 %v3868_v54, %v1971_v35  ;;  %v1972_v41 = vmul.f32 %v3863_v52, %v1833_v27  ;;  %2962 = vmatmul.mubr.msk.bf16.gmra.mrb[132].mxu1 %vm1153_vm0, %v2149_v50 }
 0x1eb   :  { %v2043_v45 = vadd.f32 %v3868_v54, %v1972_v41  ;;  %v2106_v48 = vmax.f32 %v2042_v37, 0.0 }
 0x1ec   :  { %v1837_v47 = vpop.f32.mrb[84].mxu0 }
 0x1ed   :  { %v2107_v31 = vmax.f32 %v2043_v45, 0.0  ;;  %v1838_v42 = vadd.f32 %v1837_v47, %v3950_v2  ;;  %v1839_v55 = vpop.f32.mrb[85].mxu0 }
 0x1ee   :  { %v1840_v40 = vpop.f32.mrb[86].mxu0 }
 0x1ef   :  { %v2150_v56 = vpack.c.bf16 %v2107_v31, %v2106_v48  ;;  %v1973_v57 = vmul.f32 %v3863_v52, %v1838_v42  ;;  %v1841_v53 = vadd.f32 %v1840_v40, %v3953_v11  ;;  %v1842_v43 = vpop.f32.mrb[87].mxu0 }
 0x1f1   :  { %v2044_v60 = vadd.f32 %v3868_v54, %v1973_v57  ;;  %v1974_v61 = vmul.f32 %v3863_v52, %v1841_v53  ;;  %2965 = vmatprep.mubr.msk.bf16.mxu1 %vm1153_vm0, %v2150_v56 }
 0x1f3   :  { %v2045_v63 = vadd.f32 %v3868_v54, %v1974_v61  ;;  %v2108_v0 = vmax.f32 %v2044_v60, 0.0 }
 0x1f4   :  { %v1845_v62 = vpop.f32.mrb[88].mxu0 }
 0x1f5   :  { %v2109_v5 = vmax.f32 %v2045_v63, 0.0  ;;  %v1846_v2 = vadd.f32 %v1845_v62, %v3959_v29  ;;  %v1847_v6 = vpop.f32.mrb[89].mxu0 }
 0x1f6   :  { %v1848_v58 = vpop.f32.mrb[90].mxu0 }
 0x1f7   :  { %v2151_v8 = vpack.c.bf16 %v2109_v5, %v2108_v0  ;;  %v1975_v9 = vmul.f32 %v3863_v52, %v1846_v2  ;;  %v1849_v11 = vadd.f32 %v1848_v58, %v3962_v39  ;;  %v1850_v12 = vpop.f32.mrb[91].mxu0 }
 0x1f9   :  { %v2046_v13 = vadd.f32 %v3868_v54, %v1975_v9  ;;  %v1976_v3 = vmul.f32 %v3863_v52, %v1849_v11  ;;  %2966 = vmatmul.mubr.msk.bf16.gmra.mrb[136].mxu1 %vm1153_vm0, %v2151_v8 }
 0x1fb   :  { %v2047_v7 = vadd.f32 %v3868_v54, %v1976_v3  ;;  %v2110_v34 = vmax.f32 %v2046_v13, 0.0 }
 0x1fc   :  { %v1853_v46 = vpop.f32.mrb[92].mxu0 }
 0x1fd   :  { %v2111_v21 = vmax.f32 %v2047_v7, 0.0  ;;  %v1854_v29 = vadd.f32 %v1853_v46, %v3968_v59  ;;  %v1855_v23 = vpop.f32.mrb[93].mxu0 }
 0x1fe   :  { %v1856_v24 = vpop.f32.mrb[94].mxu0 }
 0x1ff   :  { %v2152_v25 = vpack.c.bf16 %v2111_v21, %v2110_v34  ;;  %v1977_v15 = vmul.f32 %v3863_v52, %v1854_v29  ;;  %v1857_v39 = vadd.f32 %v1856_v24, %v3971_v4  ;;  %v1858_v30 = vpop.f32.mrb[95].mxu0 }
 0x201   :  { %v2048_v18 = vadd.f32 %v3868_v54, %v1977_v15  ;;  %v1978_v50 = vmul.f32 %v3863_v52, %v1857_v39  ;;  %2969 = vmatprep.mubr.msk.bf16.mxu1 %vm1153_vm0, %v2152_v25 }
 0x203   :  { %v2049_v35 = vadd.f32 %v3868_v54, %v1978_v50  ;;  %v2112_v36 = vmax.f32 %v2048_v18, 0.0 }
 0x204   :  { %v1861_v27 = vpop.f32.mrb[96].mxu0 }
 0x205   :  { %v2113_v37 = vmax.f32 %v2049_v35, 0.0  ;;  %v1862_v59 = vadd.f32 %v1861_v27, %v3979_v19  ;;  %v1863_v41 = vpop.f32.mrb[97].mxu0 }
 0x206   :  { %v1864_v45 = vpop.f32.mrb[98].mxu0 }
 0x207   :  { %v2153_v47 = vpack.c.bf16 %v2113_v37, %v2112_v36  ;;  %v1979_v48 = vmul.f32 %v3863_v52, %v1862_v59  ;;  %v1865_v4 = vadd.f32 %v1864_v45, %v3982_v33  ;;  %v1866_v31 = vpop.f32.mrb[99].mxu0 }
 0x209   :  { %v2050_v42 = vadd.f32 %v3868_v54, %v1979_v48  ;;  %v1980_v55 = vmul.f32 %v3863_v52, %v1865_v4  ;;  %2970 = vmatmul.mubr.msk.bf16.gmra.mrb[140].mxu1 %vm1153_vm0, %v2153_v47  ;;  %v4150_v4 = vld [vmem:[%s4442_s8] ss:$0 sm:$0xff] }
 0x20b   :  { %v2051_v40 = vadd.f32 %v3868_v54, %v1980_v55  ;;  %v2114_v57 = vmax.f32 %v2050_v42, 0.0 }
 0x20c   :  { %v1869_v56 = vpop.f32.mrb[100].mxu0 }
 0x20d   :  { %v2115_v53 = vmax.f32 %v2051_v40, 0.0  ;;  %v1870_v19 = vadd.f32 %v1869_v56, %v3990_v51  ;;  %v1871_v43 = vpop.f32.mrb[101].mxu0 }
 0x20e   :  { %v1872_v60 = vpop.f32.mrb[102].mxu0 }
 0x20f   :  { %v2154_v61 = vpack.c.bf16 %v2115_v53, %v2114_v57  ;;  %v1981_v63 = vmul.f32 %v3863_v52, %v1870_v19  ;;  %v1873_v33 = vadd.f32 %v1872_v60, %v3993_v1  ;;  %v1874_v62 = vpop.f32.mrb[103].mxu0 }
 0x211   :  { %v2052_v0 = vadd.f32 %v3868_v54, %v1981_v63  ;;  %v1982_v5 = vmul.f32 %v3863_v52, %v1873_v33  ;;  %2973 = vmatprep.mubr.msk.bf16.mxu1 %vm1153_vm0, %v2154_v61 }
 0x213   :  { %v2053_v2 = vadd.f32 %v3868_v54, %v1982_v5  ;;  %v2116_v58 = vmax.f32 %v2052_v0, 0.0 }
 0x214   :  { %v1877_v6 = vpop.f32.mrb[104].mxu0 }
 0x215   :  { %v2117_v8 = vmax.f32 %v2053_v2, 0.0  ;;  %v1878_v51 = vadd.f32 %v1877_v6, %v4001_v10  ;;  %v1879_v9 = vpop.f32.mrb[105].mxu0 }
 0x216   :  { %v1880_v11 = vpop.f32.mrb[106].mxu0 }
 0x217   :  { %v2155_v12 = vpack.c.bf16 %v2117_v8, %v2116_v58  ;;  %v1983_v13 = vmul.f32 %v3863_v52, %v1878_v51  ;;  %v1881_v1 = vadd.f32 %v1880_v11, %v4004_v14  ;;  %v1882_v3 = vpop.f32.mrb[107].mxu0 }
 0x219   :  { %v2054_v7 = vadd.f32 %v3868_v54, %v1983_v13  ;;  %v1984_v46 = vmul.f32 %v3863_v52, %v1881_v1  ;;  %2974 = vmatmul.mubr.msk.bf16.gmra.mrb[144].mxu1 %vm1153_vm0, %v2155_v12 }
 0x21b   :  { %v2055_v34 = vadd.f32 %v3868_v54, %v1984_v46  ;;  %v2118_v29 = vmax.f32 %v2054_v7, 0.0 }
 0x21c   :  { %v1885_v21 = vpop.f32.mrb[108].mxu0 }
 0x21d   :  { %v2119_v23 = vmax.f32 %v2055_v34, 0.0  ;;  %v1886_v10 = vadd.f32 %v1885_v21, %v4012_v49  ;;  %v1887_v24 = vpop.f32.mrb[109].mxu0 }
 0x21e   :  { %v1888_v25 = vpop.f32.mrb[110].mxu0 }
 0x21f   :  { %v2156_v15 = vpack.c.bf16 %v2119_v23, %v2118_v29  ;;  %v1985_v39 = vmul.f32 %v3863_v52, %v1886_v10  ;;  %v1889_v14 = vadd.f32 %v1888_v25, %v4015_v20  ;;  %v1890_v30 = vpop.f32.mrb[111].mxu0  ;;  %v3254_v29 = vld [vmem:[%s4440_s5] ss:$0 sm:$0xff] }
 0x221   :  { %v2056_v18 = vadd.f32 %v3868_v54, %v1985_v39  ;;  %v1986_v50 = vmul.f32 %v3863_v52, %v1889_v14  ;;  %2977 = vmatprep.mubr.msk.bf16.mxu1 %vm1153_vm0, %v2156_v15 }
 0x223   :  { %v2057_v35 = vadd.f32 %v3868_v54, %v1986_v50  ;;  %v2120_v36 = vmax.f32 %v2056_v18, 0.0 }
 0x224   :  { %v1893_v27 = vpop.f32.mrb[112].mxu0 }
 0x225   :  { %v2121_v37 = vmax.f32 %v2057_v35, 0.0  ;;  %v1894_v49 = vadd.f32 %v1893_v27, %v4023_v17  ;;  %v1895_v59 = vpop.f32.mrb[113].mxu0 }
 0x226   :  { %v1896_v41 = vpop.f32.mrb[114].mxu0 }
 0x227   :  { %v2157_v45 = vpack.c.bf16 %v2121_v37, %v2120_v36  ;;  %v1987_v47 = vmul.f32 %v3863_v52, %v1894_v49  ;;  %v1897_v20 = vadd.f32 %v1896_v41, %v4026_v26  ;;  %v1898_v48 = vpop.f32.mrb[115].mxu0 }
 0x229   :  { %v2058_v31 = vadd.f32 %v3868_v54, %v1987_v47  ;;  %v1988_v42 = vmul.f32 %v3863_v52, %v1897_v20  ;;  %2978 = vmatmul.mubr.msk.bf16.gmra.mrb[148].mxu1 %vm1153_vm0, %v2157_v45 }
 0x22a   :  { %v2927_v17 = vpop.f32.mrb[96].mxu1 }
 0x22b   :  { %v2059_v55 = vadd.f32 %v3868_v54, %v1988_v42  ;;  %v2340_v40 = vadd.f32 %v2927_v17, %v4150_v4  ;;  %v2331_v56 = vpop.f32.mrb[97].mxu1  ;;  %v2122_v19 = vmax.f32 %v2058_v31, 0.0 }
 0x22c   :  { %v2332_v26 = vadd.f32 %v4150_v4, %v2331_v56  ;;  %v1901_v57 = vpop.f32.mrb[116].mxu0  ;;  %v2928_v53 = vpop.f32.mrb[98].mxu1 }
 0x22d   :  { %v2123_v43 = vmax.f32 %v2059_v55, 0.0  ;;  %2588 = vst [vmem:[%s4443_s9 + $0x10] sm:$0xff] %v2340_v40  ;;  %v1902_v60 = vadd.f32 %v1901_v57, %v4034_v16  ;;  %v2343_v61 = vadd.f32 %v2928_v53, %v4150_v4  ;;  %v1903_v63 = vpop.f32.mrb[117].mxu0  ;;  %v2334_v33 = vpop.f32.mrb[99].mxu1 }
 0x22e   :  { %2586 = vst [vmem:[%s4443_s9] sm:$0xff] %v2332_v26  ;;  %v2335_v62 = vadd.f32 %v4150_v4, %v2334_v33  ;;  %v1904_v0 = vpop.f32.mrb[118].mxu0 }
 0x22f   :  { %v2158_v5 = vpack.c.bf16 %v2123_v43, %v2122_v19  ;;  %v1989_v2 = vmul.f32 %v3863_v52, %v1902_v60  ;;  %2589 = vst [vmem:[%s4443_s9 + $0x18] sm:$0xff] %v2343_v61  ;;  %v1905_v16 = vadd.f32 %v1904_v0, %v4037_v32  ;;  %v1906_v6 = vpop.f32.mrb[119].mxu0 }
 0x230   :  { %2587 = vst [vmem:[%s4443_s9 + $0x8] sm:$0xff] %v2335_v62 }
 0x231   :  { %v2060_v58 = vadd.f32 %v3868_v54, %v1989_v2  ;;  %v1990_v8 = vmul.f32 %v3863_v52, %v1905_v16  ;;  %2981 = vmatprep.mubr.msk.bf16.mxu1 %vm1153_vm0, %v2158_v5 }
 0x233   :  { %v2061_v51 = vadd.f32 %v3868_v54, %v1990_v8  ;;  %v2124_v11 = vmax.f32 %v2060_v58, 0.0 }
 0x234   :  { %v1909_v9 = vpop.f32.mrb[120].mxu0 }
 0x235   :  { %v2125_v12 = vmax.f32 %v2061_v51, 0.0  ;;  %v1910_v13 = vadd.f32 %v1909_v9, %v4045_v22  ;;  %v1911_v1 = vpop.f32.mrb[121].mxu0  ;;  %v3255_v22 = vld [vmem:[%s4441_s6] ss:$0 sm:$0xff] }
 0x236   :  { %v1912_v32 = vpop.f32.mrb[122].mxu0 }
 0x237   :  { %v2159_v3 = vpack.c.bf16 %v2125_v12, %v2124_v11  ;;  %v1991_v7 = vmul.f32 %v3863_v52, %v1910_v13  ;;  %v1913_v46 = vadd.f32 %v1912_v32, %v4048_v38  ;;  %v1914_v34 = vpop.f32.mrb[123].mxu0 }
 0x239   :  { %v2062_v21 = vadd.f32 %v3868_v54, %v1991_v7  ;;  %v1992_v23 = vmul.f32 %v3254_v29, %v1913_v46  ;;  %2982 = vmatmul.mubr.msk.bf16.gmra.mrb[152].mxu1 %vm1153_vm0, %v2159_v3 }
 0x23a   :  { %v2931_v10 = vpop.f32.mrb[100].mxu1 }
 0x23b   :  { %v2063_v24 = vadd.f32 %v3255_v22, %v1992_v23  ;;  %v2356_v52 = vadd.f32 %v2931_v10, %v4150_v4  ;;  %v2347_v25 = vpop.f32.mrb[101].mxu1  ;;  %v2126_v39 = vmax.f32 %v2062_v21, 0.0 }
 0x23c   :  { %v2348_v38 = vadd.f32 %v4150_v4, %v2347_v25  ;;  %v1917_v15 = vpop.f32.mrb[124].mxu0  ;;  %v2932_v54 = vpop.f32.mrb[102].mxu1 }
 0x23d   :  { %v2127_v14 = vmax.f32 %v2063_v24, 0.0  ;;  %2592 = vst [vmem:[%s4443_s9 + $0x30] sm:$0xff] %v2356_v52  ;;  %v1918_v30 = vadd.f32 %v1917_v15, %v4056_v28  ;;  %v2359_v18 = vadd.f32 %v2932_v54, %v4150_v4  ;;  %v1919_v50 = vpop.f32.mrb[125].mxu0  ;;  %v2350_v35 = vpop.f32.mrb[103].mxu1 }
 0x23e   :  { %2590 = vst [vmem:[%s4443_s9 + $0x20] sm:$0xff] %v2348_v38  ;;  %v2351_v27 = vadd.f32 %v4150_v4, %v2350_v35  ;;  %v1920_v36 = vpop.f32.mrb[126].mxu0 }
 0x23f   :  { %v2160_v37 = vpack.c.bf16 %v2127_v14, %v2126_v39  ;;  %v1993_v49 = vmul.f32 %v3254_v29, %v1918_v30  ;;  %2593 = vst [vmem:[%s4443_s9 + $0x38] sm:$0xff] %v2359_v18  ;;  %v1921_v59 = vadd.f32 %v1920_v36, %v4059_v44  ;;  %v1922_v28 = vpop.f32.mrb[127].mxu0 }
 0x240   :  { %2591 = vst [vmem:[%s4443_s9 + $0x28] sm:$0xff] %v2351_v27 }
 0x241   :  { %v2064_v41 = vadd.f32 %v3255_v22, %v1993_v49  ;;  %v1994_v45 = vmul.f32 %v3254_v29, %v1921_v59  ;;  %2985 = vmatprep.mubr.msk.bf16.mxu1 %vm1153_vm0, %v2160_v37 }
 0x243   :  { %v2065_v47 = vadd.f32 %v3255_v22, %v1994_v45  ;;  %v2128_v20 = vmax.f32 %v2064_v41, 0.0 }
 0x245   :  { %v2129_v48 = vmax.f32 %v2065_v47, 0.0 }
 0x247   :  { %v2161_v31 = vpack.c.bf16 %v2129_v48, %v2128_v20 }
 0x249   :  { %2986 = vmatmul.mubr.msk.bf16.gmra.mrb[156].mxu1 %vm1153_vm0, %v2161_v31 }
 0x24a   :  { %v2935_v42 = vpop.f32.mrb[104].mxu1 }
 0x24b   :  { %v2372_v17 = vadd.f32 %v2935_v42, %v4150_v4  ;;  %v2363_v55 = vpop.f32.mrb[105].mxu1 }
 0x24c   :  { %v2364_v44 = vadd.f32 %v4150_v4, %v2363_v55  ;;  %v2936_v40 = vpop.f32.mrb[106].mxu1 }
 0x24d   :  { %2596 = vst [vmem:[%s4443_s9 + $0x50] sm:$0xff] %v2372_v17  ;;  %v2375_v56 = vadd.f32 %v2936_v40, %v4150_v4  ;;  %v2366_v26 = vpop.f32.mrb[107].mxu1 }
 0x24e   :  { %2594 = vst [vmem:[%s4443_s9 + $0x40] sm:$0xff] %v2364_v44  ;;  %v2367_v57 = vadd.f32 %v4150_v4, %v2366_v26 }
 0x24f   :  { %2597 = vst [vmem:[%s4443_s9 + $0x58] sm:$0xff] %v2375_v56 }
 0x250   :  { %2595 = vst [vmem:[%s4443_s9 + $0x48] sm:$0xff] %v2367_v57 }
 0x25a   :  { %v2939_v53 = vpop.f32.mrb[108].mxu1 }
 0x25b   :  { %v2388_v19 = vadd.f32 %v2939_v53, %v4150_v4  ;;  %v2379_v43 = vpop.f32.mrb[109].mxu1 }
 0x25c   :  { %v2380_v60 = vadd.f32 %v4150_v4, %v2379_v43  ;;  %v2940_v61 = vpop.f32.mrb[110].mxu1 }
 0x25d   :  { %2600 = vst [vmem:[%s4443_s9 + $0x70] sm:$0xff] %v2388_v19  ;;  %v2391_v63 = vadd.f32 %v2940_v61, %v4150_v4  ;;  %v2382_v33 = vpop.f32.mrb[111].mxu1 }
 0x25e   :  { %2598 = vst [vmem:[%s4443_s9 + $0x60] sm:$0xff] %v2380_v60  ;;  %v2383_v62 = vadd.f32 %v4150_v4, %v2382_v33 }
 0x25f   :  { %2601 = vst [vmem:[%s4443_s9 + $0x78] sm:$0xff] %v2391_v63 }
 0x260   :  { %2599 = vst [vmem:[%s4443_s9 + $0x68] sm:$0xff] %v2383_v62 }
 0x26c   :  { %v2943_v0 = vpop.f32.mrb[112].mxu1 }
 0x26d   :  { %v2404_v5 = vadd.f32 %v2943_v0, %v4150_v4  ;;  %v2395_v2 = vpop.f32.mrb[113].mxu1 }
 0x26e   :  { %v2396_v16 = vadd.f32 %v4150_v4, %v2395_v2  ;;  %v2944_v6 = vpop.f32.mrb[114].mxu1 }
 0x26f   :  { %2604 = vst [vmem:[%s4443_s9 + $0x90] sm:$0xff] %v2404_v5  ;;  %v2407_v58 = vadd.f32 %v2944_v6, %v4150_v4  ;;  %v2398_v8 = vpop.f32.mrb[115].mxu1 }
 0x270   :  { %2602 = vst [vmem:[%s4443_s9 + $0x80] sm:$0xff] %v2396_v16  ;;  %v2399_v51 = vadd.f32 %v4150_v4, %v2398_v8 }
 0x271   :  { %2605 = vst [vmem:[%s4443_s9 + $0x98] sm:$0xff] %v2407_v58 }
 0x272   :  { %2603 = vst [vmem:[%s4443_s9 + $0x88] sm:$0xff] %v2399_v51 }
 0x27c   :  { %v2947_v9 = vpop.f32.mrb[116].mxu1 }
 0x27d   :  { %v2420_v11 = vadd.f32 %v2947_v9, %v4150_v4  ;;  %v2411_v12 = vpop.f32.mrb[117].mxu1 }
 0x27e   :  { %v2412_v13 = vadd.f32 %v4150_v4, %v2411_v12  ;;  %v2948_v1 = vpop.f32.mrb[118].mxu1 }
 0x27f   :  { %2608 = vst [vmem:[%s4443_s9 + $0xb0] sm:$0xff] %v2420_v11  ;;  %v2423_v32 = vadd.f32 %v2948_v1, %v4150_v4  ;;  %v2414_v3 = vpop.f32.mrb[119].mxu1 }
 0x280   :  { %2606 = vst [vmem:[%s4443_s9 + $0xa0] sm:$0xff] %v2412_v13  ;;  %v2415_v7 = vadd.f32 %v4150_v4, %v2414_v3 }
 0x281   :  { %2609 = vst [vmem:[%s4443_s9 + $0xb8] sm:$0xff] %v2423_v32 }
 0x282   :  { %2607 = vst [vmem:[%s4443_s9 + $0xa8] sm:$0xff] %v2415_v7 }
 0x28c   :  { %v2951_v46 = vpop.f32.mrb[120].mxu1 }
 0x28d   :  { %v2436_v34 = vadd.f32 %v2951_v46, %v4150_v4  ;;  %v2427_v21 = vpop.f32.mrb[121].mxu1 }
 0x28e   :  { %v2428_v29 = vadd.f32 %v4150_v4, %v2427_v21  ;;  %v2952_v23 = vpop.f32.mrb[122].mxu1 }
 0x28f   :  { %2612 = vst [vmem:[%s4443_s9 + $0xd0] sm:$0xff] %v2436_v34  ;;  %v2439_v10 = vadd.f32 %v2952_v23, %v4150_v4  ;;  %v2430_v22 = vpop.f32.mrb[123].mxu1 }
 0x290   :  { %2610 = vst [vmem:[%s4443_s9 + $0xc0] sm:$0xff] %v2428_v29  ;;  %v2431_v24 = vadd.f32 %v4150_v4, %v2430_v22 }
 0x291   :  { %2613 = vst [vmem:[%s4443_s9 + $0xd8] sm:$0xff] %v2439_v10 }
 0x292   :  { %2611 = vst [vmem:[%s4443_s9 + $0xc8] sm:$0xff] %v2431_v24 }
 0x29c   :  { %v2955_v52 = vpop.f32.mrb[124].mxu1 }
 0x29d   :  { %v2452_v25 = vadd.f32 %v2955_v52, %v4150_v4  ;;  %v2443_v38 = vpop.f32.mrb[125].mxu1 }
 0x29e   :  { %v2444_v15 = vadd.f32 %v4150_v4, %v2443_v38  ;;  %v2956_v54 = vpop.f32.mrb[126].mxu1 }
 0x29f   :  { %2616 = vst [vmem:[%s4443_s9 + $0xf0] sm:$0xff] %v2452_v25  ;;  %v2455_v39 = vadd.f32 %v2956_v54, %v4150_v4  ;;  %v2446_v14 = vpop.f32.mrb[127].mxu1 }
 0x2a0   :  { %2614 = vst [vmem:[%s4443_s9 + $0xe0] sm:$0xff] %v2444_v15  ;;  %v2447_v30 = vadd.f32 %v4150_v4, %v2446_v14 }
 0x2a1   :  { %2617 = vst [vmem:[%s4443_s9 + $0xf8] sm:$0xff] %v2455_v39 }
 0x2a2   :  { %2615 = vst [vmem:[%s4443_s9 + $0xe8] sm:$0xff] %v2447_v30 }
 0x2ac   :  { %v2959_v18 = vpop.f32.mrb[128].mxu1 }
 0x2ad   :  { %v2468_v50 = vadd.f32 %v2959_v18, %v4150_v4  ;;  %v2459_v35 = vpop.f32.mrb[129].mxu1 }
 0x2ae   :  { %v2460_v27 = vadd.f32 %v4150_v4, %v2459_v35  ;;  %v2960_v36 = vpop.f32.mrb[130].mxu1 }
 0x2af   :  { %2620 = vst [vmem:[%s4443_s9 + $0x110] sm:$0xff] %v2468_v50  ;;  %v2471_v37 = vadd.f32 %v2960_v36, %v4150_v4  ;;  %v2462_v49 = vpop.f32.mrb[131].mxu1 }
 0x2b0   :  { %2618 = vst [vmem:[%s4443_s9 + $0x100] sm:$0xff] %v2460_v27  ;;  %v2463_v59 = vadd.f32 %v4150_v4, %v2462_v49 }
 0x2b1   :  { %2621 = vst [vmem:[%s4443_s9 + $0x118] sm:$0xff] %v2471_v37 }
 0x2b2   :  { %2619 = vst [vmem:[%s4443_s9 + $0x108] sm:$0xff] %v2463_v59 }
 0x2bc   :  { %v2963_v28 = vpop.f32.mrb[132].mxu1 }
 0x2bd   :  { %v2484_v41 = vadd.f32 %v2963_v28, %v4150_v4  ;;  %v2475_v45 = vpop.f32.mrb[133].mxu1 }
 0x2be   :  { %v2476_v47 = vadd.f32 %v4150_v4, %v2475_v45  ;;  %v2964_v20 = vpop.f32.mrb[134].mxu1 }
 0x2bf   :  { %2624 = vst [vmem:[%s4443_s9 + $0x130] sm:$0xff] %v2484_v41  ;;  %v2487_v48 = vadd.f32 %v2964_v20, %v4150_v4  ;;  %v2478_v31 = vpop.f32.mrb[135].mxu1 }
 0x2c0   :  { %2622 = vst [vmem:[%s4443_s9 + $0x120] sm:$0xff] %v2476_v47  ;;  %v2479_v42 = vadd.f32 %v4150_v4, %v2478_v31 }
 0x2c1   :  { %2625 = vst [vmem:[%s4443_s9 + $0x138] sm:$0xff] %v2487_v48 }
 0x2c2   :  { %2623 = vst [vmem:[%s4443_s9 + $0x128] sm:$0xff] %v2479_v42 }
 0x2cc   :  { %v2967_v17 = vpop.f32.mrb[136].mxu1 }
 0x2cd   :  { %v2500_v55 = vadd.f32 %v2967_v17, %v4150_v4  ;;  %v2491_v44 = vpop.f32.mrb[137].mxu1 }
 0x2ce   :  { %v2492_v40 = vadd.f32 %v4150_v4, %v2491_v44  ;;  %v2968_v56 = vpop.f32.mrb[138].mxu1 }
 0x2cf   :  { %2628 = vst [vmem:[%s4443_s9 + $0x150] sm:$0xff] %v2500_v55  ;;  %v2503_v26 = vadd.f32 %v2968_v56, %v4150_v4  ;;  %v2494_v57 = vpop.f32.mrb[139].mxu1 }
 0x2d0   :  { %2626 = vst [vmem:[%s4443_s9 + $0x140] sm:$0xff] %v2492_v40  ;;  %v2495_v53 = vadd.f32 %v4150_v4, %v2494_v57 }
 0x2d1   :  { %2629 = vst [vmem:[%s4443_s9 + $0x158] sm:$0xff] %v2503_v26 }
 0x2d2   :  { %2627 = vst [vmem:[%s4443_s9 + $0x148] sm:$0xff] %v2495_v53 }
 0x2dc   :  { %v2971_v19 = vpop.f32.mrb[140].mxu1 }
 0x2dd   :  { %v2516_v43 = vadd.f32 %v2971_v19, %v4150_v4  ;;  %v2507_v60 = vpop.f32.mrb[141].mxu1 }
 0x2de   :  { %v2508_v61 = vadd.f32 %v4150_v4, %v2507_v60  ;;  %v2972_v63 = vpop.f32.mrb[142].mxu1 }
 0x2df   :  { %2632 = vst [vmem:[%s4443_s9 + $0x170] sm:$0xff] %v2516_v43  ;;  %v2519_v33 = vadd.f32 %v2972_v63, %v4150_v4  ;;  %v2510_v62 = vpop.f32.mrb[143].mxu1 }
 0x2e0   :  { %2630 = vst [vmem:[%s4443_s9 + $0x160] sm:$0xff] %v2508_v61  ;;  %v2511_v0 = vadd.f32 %v4150_v4, %v2510_v62 }
 0x2e1   :  { %2633 = vst [vmem:[%s4443_s9 + $0x178] sm:$0xff] %v2519_v33 }
 0x2e2   :  { %2631 = vst [vmem:[%s4443_s9 + $0x168] sm:$0xff] %v2511_v0 }
 0x2ec   :  { %v2975_v5 = vpop.f32.mrb[144].mxu1 }
 0x2ed   :  { %v2532_v2 = vadd.f32 %v2975_v5, %v4150_v4  ;;  %v2523_v16 = vpop.f32.mrb[145].mxu1 }
 0x2ee   :  { %v2524_v6 = vadd.f32 %v4150_v4, %v2523_v16  ;;  %v2976_v58 = vpop.f32.mrb[146].mxu1 }
 0x2ef   :  { %2636 = vst [vmem:[%s4443_s9 + $0x190] sm:$0xff] %v2532_v2  ;;  %v2535_v8 = vadd.f32 %v2976_v58, %v4150_v4  ;;  %v2526_v51 = vpop.f32.mrb[147].mxu1 }
 0x2f0   :  { %2634 = vst [vmem:[%s4443_s9 + $0x180] sm:$0xff] %v2524_v6  ;;  %v2527_v9 = vadd.f32 %v4150_v4, %v2526_v51 }
 0x2f1   :  { %2637 = vst [vmem:[%s4443_s9 + $0x198] sm:$0xff] %v2535_v8 }
 0x2f2   :  { %2635 = vst [vmem:[%s4443_s9 + $0x188] sm:$0xff] %v2527_v9 }
 0x2fc   :  { %v2979_v11 = vpop.f32.mrb[148].mxu1 }
 0x2fd   :  { %v2548_v12 = vadd.f32 %v2979_v11, %v4150_v4  ;;  %v2539_v13 = vpop.f32.mrb[149].mxu1 }
 0x2fe   :  { %v2540_v1 = vadd.f32 %v4150_v4, %v2539_v13  ;;  %v2980_v32 = vpop.f32.mrb[150].mxu1 }
 0x2ff   :  { %2640 = vst [vmem:[%s4443_s9 + $0x1b0] sm:$0xff] %v2548_v12  ;;  %v2551_v3 = vadd.f32 %v2980_v32, %v4150_v4  ;;  %v2542_v7 = vpop.f32.mrb[151].mxu1 }
 0x300   :  { %2638 = vst [vmem:[%s4443_s9 + $0x1a0] sm:$0xff] %v2540_v1  ;;  %v2543_v46 = vadd.f32 %v4150_v4, %v2542_v7 }
 0x301   :  { %2641 = vst [vmem:[%s4443_s9 + $0x1b8] sm:$0xff] %v2551_v3 }
 0x302   :  { %2639 = vst [vmem:[%s4443_s9 + $0x1a8] sm:$0xff] %v2543_v46 }
 0x30c   :  { %v2983_v34 = vpop.f32.mrb[152].mxu1 }
 0x30d   :  { %v2564_v21 = vadd.f32 %v2983_v34, %v4150_v4  ;;  %v2555_v29 = vpop.f32.mrb[153].mxu1 }
 0x30e   :  { %v2556_v23 = vadd.f32 %v4150_v4, %v2555_v29  ;;  %v2984_v10 = vpop.f32.mrb[154].mxu1 }
 0x30f   :  { %2644 = vst [vmem:[%s4443_s9 + $0x1d0] sm:$0xff] %v2564_v21  ;;  %v2567_v22 = vadd.f32 %v2984_v10, %v4150_v4  ;;  %v2558_v24 = vpop.f32.mrb[155].mxu1 }
 0x310   :  { %2642 = vst [vmem:[%s4443_s9 + $0x1c0] sm:$0xff] %v2556_v23  ;;  %v2559_v52 = vadd.f32 %v4150_v4, %v2558_v24 }
 0x311   :  { %2645 = vst [vmem:[%s4443_s9 + $0x1d8] sm:$0xff] %v2567_v22 }
 0x312   :  { %2643 = vst [vmem:[%s4443_s9 + $0x1c8] sm:$0xff] %v2559_v52 }
 0x31c   :  { %v2987_v25 = vpop.f32.mrb[156].mxu1 }
 0x31d   :  { %v2580_v38 = vadd.f32 %v2987_v25, %v4150_v4  ;;  %v2571_v15 = vpop.f32.mrb[157].mxu1 }
 0x31e   :  { %v2572_v54 = vadd.f32 %v4150_v4, %v2571_v15  ;;  %v2988_v39 = vpop.f32.mrb[158].mxu1 }
 0x31f   :  { %2648 = vst [vmem:[%s4443_s9 + $0x1f0] sm:$0xff] %v2580_v38  ;;  %v2583_v14 = vadd.f32 %v2988_v39, %v4150_v4  ;;  %v2574_v30 = vpop.f32.mrb[159].mxu1 }
 0x320   :  { %2646 = vst [vmem:[%s4443_s9 + $0x1e0] sm:$0xff] %v2572_v54  ;;  %v2575_v18 = vadd.f32 %v4150_v4, %v2574_v30 }
 0x321   :  { %2649 = vst [vmem:[%s4443_s9 + $0x1f8] sm:$0xff] %v2583_v14 }
 0x322   :  { %2647 = vst [vmem:[%s4443_s9 + $0x1e8] sm:$0xff] %v2575_v18 }

</bundles_post_ra>
